<compile_context>
chip_gen: v6e
topology: v6e:2x2x1
jax: 0.10.0
libtpu: 0.0.40
codegen_flags: <defaults>
</compile_context>

<pallas_src>
import functools
from collections import OrderedDict

import jax
import jax.numpy as jnp
import numpy as np
from jax import lax
from jax.experimental import pallas as pl
from jax.experimental.pallas import tpu as pltpu

_LANES = 128
_H_HALO = 1    # one zero row above/below (conv pad=1)
_W_LPAD = 2    # two-col left pad: col 0 unused, col 1 is the zero halo; keeps the
               # interior W store offset aligned to bf16 packed sublane pairs.
_W_RPAD = 1    # one zero col on the right (conv pad=1)


def _round_up(c, m=_LANES):
    return ((c + m - 1) // m) * m


# ---------------------------------------------------------------------------
# Fused Pallas kernel: a chain of 3x3 convs (stride 1, pad 1) + bias + ReLU,
# one batch element per grid step, all intermediates resident in VMEM.
# ---------------------------------------------------------------------------
def _fused_backbone_kernel(*refs, layer_dims, return_mask, apply_relu, hh, ww):
    """refs layout (positional, as handed over by pallas_call):

      refs[0]                     x_ref   (1, hh, ww, cin0_p)       bf16
      refs[1+2l], refs[2+2l]      w_ref_l (3, 3*cin_p_l, cout_p_l)  bf16 (resident)
                                  b_ref_l (1, cout_p_l)             f32  (resident)
      next sum(return_mask) refs  o_ref   (1, hh, ww, cout_p_l)     bf16
      scratch:                    buf_ref (2, hh+2, ww+3, cmax_p)   bf16 halo ping-pong
                                  acc_ref (hh*ww, cmax_p)           f32  MXU accumulator
    """
    num_layers = len(layer_dims)
    num_out = sum(return_mask)
    x_ref = refs[0]
    w_refs = [refs[1 + 2 * l] for l in range(num_layers)]
    b_refs = [refs[2 + 2 * l] for l in range(num_layers)]
    out_refs = list(refs[1 + 2 * num_layers: 1 + 2 * num_layers + num_out])
    buf_ref, acc_ref = refs[1 + 2 * num_layers + num_out:]

    # Zero both halo buffers every grid step: the borders must be zero (conv pad),
    # the interiors are fully overwritten below.  Unconditional so it stays correct
    # if the "parallel" batch axis is sharded across cores (scratch is per-core).
    buf_ref[...] = jnp.zeros_like(buf_ref)

    # Layer-0 input into the interior of buffer 0 (aligned W offset _W_LPAD).
    cin0_p = layer_dims[0][0]
    buf_ref[0, _H_HALO:_H_HALO + hh, _W_LPAD:_W_LPAD + ww, :cin0_p] = x_ref[0]

    slot = 0
    out_i = 0
    for l, (cin_p, cout_p) in enumerate(layer_dims):        # static unroll over layers
        w_ref, b_ref = w_refs[l], b_refs[l]
        # Load the halo-padded activation once per layer; all window slicing below is
        # value-level and stays bf16 (no f32 round trip before the MXU).
        cur = buf_ref[slot, :, :, :cin_p]                    # (hh+2, ww+3, cin_p) bf16

        # 3 accumulating MXU dots: taps grouped along K (K = 3*cin_p per dot).
        for dy in range(3):
            rows = cur[dy:dy + hh]                           # (hh, ww+3, cin_p)
            lhs = jnp.concatenate(
                [rows[:, _W_LPAD - 1 + dx:_W_LPAD - 1 + dx + ww] for dx in range(3)],
                axis=-1).reshape(hh * ww, 3 * cin_p)         # (hh*ww, 3*cin_p) bf16
            part = jnp.dot(lhs, w_ref[dy], preferred_element_type=jnp.float32)
            if dy == 0:
                acc_ref[:, :cout_p] = part                   # init, no extra zero pass
            else:
                acc_ref[:, :cout_p] += part                  # f32 accumulate in VMEM

        y = acc_ref[:, :cout_p] + b_ref[...]                 # bias in f32
        if apply_relu[l]:
            y = jnp.maximum(y, 0.0)
        y = y.reshape(hh, ww, cout_p).astype(jnp.bfloat16)

        if l + 1 < num_layers:                               # feed next layer (halo layout,
            buf_ref[1 - slot, _H_HALO:_H_HALO + hh,          #  pack-aligned interior store)
                    _W_LPAD:_W_LPAD + ww, :cout_p] = y
        if return_mask[l]:                                   # lane-dense HBM store
            out_refs[out_i][...] = y.reshape(1, hh, ww, cout_p)
            out_i += 1
        slot = 1 - slot


def fused_conv3x3_backbone(x_nhwc_p, layers, return_mask):
    """Run a chain of ConvReLU layers in ONE pallas_call.

    x_nhwc_p   : (N, H, W, Cin0_p) bf16, channels zero-padded to a 128 multiple.
    layers     : list[ConvReLU] (weights already packed/padded at construction).
    return_mask: list[bool] — which layers' activations to emit to HBM.
    returns    : tuple of (N, H, W, Cout_p) bf16 arrays, one per True in return_mask.
    """
    assert layers and sum(return_mask) > 0
    n, h, w, cin_avail = x_nhwc_p.shape
    layer_dims = tuple((m.cin_p, m.cout_p) for m in layers)
    cin0_p = layer_dims[0][0]
    if cin_avail < cin0_p:      # defensive channel re-pad (padded weight rows are zero)
        x_nhwc_p = jnp.pad(x_nhwc_p, ((0, 0), (0, 0), (0, 0), (0, cin0_p - cin_avail)))
    elif cin_avail > cin0_p:
        x_nhwc_p = x_nhwc_p[..., :cin0_p]
    cmax_p = max(max(d) for d in layer_dims)

    in_specs = [pl.BlockSpec((1, h, w, cin0_p), lambda i: (i, 0, 0, 0))]
    operands = [x_nhwc_p]
    for m in layers:
        # Resident weights/bias: constant index_map -> fetched once, reused every step.
        # TODO(synk): pipeline_mode=pl.Buffered(1) would drop the redundant second
        # buffer for these never-refetched operands once channel counts grow.
        in_specs.append(pl.BlockSpec(m.w_packed.shape, lambda i: (0, 0, 0)))
        in_specs.append(pl.BlockSpec(m.b_packed.shape, lambda i: (0, 0)))
        operands.extend([m.w_packed, m.b_packed])

    out_shapes, out_specs = [], []
    for m, flag in zip(layers, return_mask):
        if flag:
            out_shapes.append(jax.ShapeDtypeStruct((n, h, w, m.cout_p), jnp.bfloat16))
            out_specs.append(pl.BlockSpec((1, h, w, m.cout_p), lambda i: (i, 0, 0, 0)))

    kernel = functools.partial(
        _fused_backbone_kernel,
        layer_dims=layer_dims,
        return_mask=tuple(bool(f) for f in return_mask),
        apply_relu=tuple(m.apply_relu for m in layers),
        hh=h, ww=w)

    # Advisory cost hint using REAL (unpadded) channel counts.
    flops = sum(2 * n * h * w * 9 * m.cin * m.cout for m in layers)
    bytes_accessed = int(
        x_nhwc_p.size * x_nhwc_p.dtype.itemsize
        + sum(m.w_packed.size * 2 + m.b_packed.size * 4 for m in layers)
        + sum(n * h * w * m.cout_p * 2 for m, f in zip(layers, return_mask) if f))

    # TODO(synk): for large feature maps (e.g. 224x224 under v7x's 64 MiB VMEM) this
    # whole-sample-per-step plan must switch to H row tiles with a 2-row halo and a
    # second 'parallel' grid axis; not needed at these shapes.
    outs = pl.pallas_call(
        kernel,
        out_shape=out_shapes,
        grid=(n,),
        in_specs=in_specs,
        out_specs=out_specs,
        scratch_shapes=[
            pltpu.VMEM((2, h + 2 * _H_HALO, w + _W_LPAD + _W_RPAD, cmax_p), jnp.bfloat16),
            pltpu.VMEM((h * w, cmax_p), jnp.float32),
        ],
        compiler_params=pltpu.CompilerParams(
            dimension_semantics=("parallel",)),          # >= 2 tiles -> both v7x TCs
        cost_estimate=pl.CostEstimate(
            flops=flops, transcendentals=0, bytes_accessed=bytes_accessed),
    )(*operands)
    if not isinstance(outs, (list, tuple)):
        outs = (outs,)
    return tuple(outs)


# ---------------------------------------------------------------------------
# "nn.Module"-like building blocks (parameters held as plain JAX arrays).
# ---------------------------------------------------------------------------
class ConvReLU:
    """Equivalent of nn.Sequential(nn.Conv2d(cin, cout, 3, padding=1), nn.ReLU()).

    Weights are packed ONCE at construction for the K-grouped kernel:
      (3, 3, Cin, Cout) f32 HWIO -> (3, 3*Cin_p, Cout_p) bf16
    (first axis = dy; second axis = [dx=0 | dx=1 | dx=2] blocks of Cin_p channels,
    zero-padded up to a 128-lane multiple).  Bias -> (1, Cout_p) f32.
    """

    def __init__(self, w_hwio, b, apply_relu=True):
        kh, kw, cin, cout = w_hwio.shape
        assert (kh, kw) == (3, 3)
        self.cin, self.cout = cin, cout
        self.cin_p, self.cout_p = _round_up(cin), _round_up(cout)
        w_np = np.asarray(w_hwio, np.float32)
        wp = np.zeros((3, 3 * self.cin_p, self.cout_p), np.float32)
        for dx in range(3):
            wp[:, dx * self.cin_p:dx * self.cin_p + cin, :cout] = w_np[:, dx]
        self.w_packed = jnp.asarray(wp, jnp.bfloat16)
        bp = np.zeros((1, self.cout_p), np.float32)
        bp[0, :cout] = np.asarray(b, np.float32)
        self.b_packed = jnp.asarray(bp)
        self.apply_relu = apply_relu

    def __call__(self, x_nhwc_p):
        return fused_conv3x3_backbone(x_nhwc_p, [self], [True])[0]


class IntermediateLayerGetter:
    """Faithful port of torchvision's IntermediateLayerGetter forward semantics.

    Children are kept in registration order and truncated after the last requested
    layer (same as the PyTorch __init__).  When every retained child is a ConvReLU,
    the whole retained backbone is fused into a single pallas_call and only the
    activations named in return_layers are written to HBM.
    """

    def __init__(self, named_children, return_layers):
        names = [name for name, _ in named_children.items()]
        if not set(return_layers).issubset(names):
            raise ValueError('return_layers are not present in model')
        orig_return_layers = dict(return_layers)
        pending = dict(return_layers)
        layers = OrderedDict()
        for name, module in named_children.items():
            layers[name] = module
            if name in pending:
                del pending[name]
            if not pending:
                break                                     # truncate trailing layers
        self.layers = layers
        self.return_layers = orig_return_layers

    # TODO(synk): _load_from_state_dict key remapping is checkpoint IO; no kernel equivalent.
    def __call__(self, x):
        out = OrderedDict()
        items = list(self.layers.items())
        if items and all(isinstance(m, ConvReLU) for _, m in items):
            return_mask = [name in self.return_layers for name, _ in items]
            feats = fused_conv3x3_backbone(x, [m for _, m in items], return_mask)
            fi = 0
            for name, _ in items:
                if name in self.return_layers:
                    out[self.return_layers[name]] = feats[fi]
                    fi += 1
            return out
        # Generic fallback (one kernel per child), faithful to the original loop.
        for name, module in items:
            x = module(x)
            if name in self.return_layers:
                out[self.return_layers[name]] = x
        return out


# ---------------------------------------------------------------------------
# One-time layout adapters (NCHW f32 <-> NHWC bf16 channel-padded): run once per
# model call / once per returned feature, not once per layer.
# ---------------------------------------------------------------------------
def to_backbone_layout(x_nchw):
    # TODO(synk): for real backbones use a space-to-depth repack for the tiny-Cin stem
    # instead of zero-padding Cin=3/4 -> 128.
    x = jnp.transpose(x_nchw, (0, 2, 3, 1)).astype(jnp.bfloat16)
    c = x.shape[-1]
    return jnp.pad(x, ((0, 0), (0, 0), (0, 0), (0, _round_up(c) - c)))


def from_backbone_layout(x_nhwc_p, c_real):
    return jnp.transpose(x_nhwc_p[..., :c_real].astype(jnp.float32), (0, 3, 1, 2))


if __name__ == "__main__":
    key = jax.random.PRNGKey(0)
    k_in, k1, k2, k3, k4, kb1, kb2, kb3, kb4 = jax.random.split(key, 9)

    N, Cin, H, W = 2, 4, 16, 16
    x = jax.random.normal(k_in, (N, Cin, H, W), dtype=jnp.float32)   # NCHW input

    def mk_w(k, cin, cout):
        return 0.1 * jax.random.normal(k, (3, 3, cin, cout), dtype=jnp.float32)

    def mk_b(k, cout):
        return 0.05 * jax.random.normal(k, (cout,), dtype=jnp.float32)

    params = OrderedDict([
        ("conv1",  (mk_w(k1, 4, 8),   mk_b(kb1, 8))),
        ("layer1", (mk_w(k2, 8, 16),  mk_b(kb2, 16))),
        ("layer2", (mk_w(k3, 16, 32), mk_b(kb3, 32))),
        ("head",   (mk_w(k4, 32, 32), mk_b(kb4, 32))),   # after last return layer -> never run
    ])

    named_children = OrderedDict(
        (name, ConvReLU(w, b)) for name, (w, b) in params.items())
    return_layers = {"layer1": "feat1", "layer2": "feat2"}
    getter = IntermediateLayerGetter(named_children, return_layers)
    out_channels = {new: named_children[old].cout
                    for old, new in return_layers.items()}

    @jax.jit
    def forward(x_nchw):
        xh = to_backbone_layout(x_nchw)          # single NCHW->NHWC transpose + channel pad
        feats = getter(xh)                       # fused backbone: one pallas_call, NHWC bf16
        return OrderedDict(
            (name, from_backbone_layout(v, out_channels[name]))
            for name, v in feats.items())        # single transpose per returned feature

    out = forward(x)
    out = {k: jax.block_until_ready(v) for k, v in out.items()}

    # ------------------------------------------------------------------
    # Pure-JAX reference of the same truncated backbone, mirroring the kernel's
    # numerics (bf16 operands, f32 accumulation, bf16 activation storage).
    # ------------------------------------------------------------------
    def conv3x3_ref(x_nhwc_bf16, w_hwio, b, apply_relu=True):
        y = lax.conv_general_dilated(
            x_nhwc_bf16, w_hwio.astype(jnp.bfloat16),
            window_strides=(1, 1), padding=((1, 1), (1, 1)),
            dimension_numbers=("NHWC", "HWIO", "NHWC"),
            preferred_element_type=jnp.float32)
        y = y + b
        if apply_relu:
            y = jnp.maximum(y, 0.0)
        return y.astype(jnp.bfloat16)            # mirror bf16 activation storage

    y = jnp.transpose(x, (0, 2, 3, 1)).astype(jnp.bfloat16)
    ref = OrderedDict()
    for name in ["conv1", "layer1", "layer2"]:
        w_l, b_l = params[name]
        y = conv3x3_ref(y, w_l, b_l)
        if name in return_layers:
            ref[return_layers[name]] = jnp.transpose(y.astype(jnp.float32),
                                                     (0, 3, 1, 2))

    assert set(out.keys()) == {"feat1", "feat2"}
    assert out["feat1"].shape == (N, 16, H, W)
    assert out["feat2"].shape == (N, 32, H, W)
    # bf16 operands / bf16 activation storage -> compare at bf16-level tolerance.
    for kname in ref:
        np.testing.assert_allclose(np.asarray(out[kname]), np.asarray(ref[kname]),
                                   rtol=2e-2, atol=2e-2)

    print("KERNEL_OK")
</pallas_src>

<mosaic_0001>
module attributes {stable_mosaic.version = 11 : i64} {
  func.func @_fused_backbone_kernel(%arg0: i32, %arg1: memref<1x16x16x128xbf16, #tpu.memory_space<vmem>>, %arg2: memref<3x384x128xbf16, #tpu.memory_space<vmem>>, %arg3: memref<1x128xf32, #tpu.memory_space<vmem>>, %arg4: memref<3x384x128xbf16, #tpu.memory_space<vmem>>, %arg5: memref<1x128xf32, #tpu.memory_space<vmem>>, %arg6: memref<3x384x128xbf16, #tpu.memory_space<vmem>>, %arg7: memref<1x128xf32, #tpu.memory_space<vmem>>, %arg8: memref<1x16x16x128xbf16, #tpu.memory_space<vmem>>, %arg9: memref<1x16x16x128xbf16, #tpu.memory_space<vmem>>, %arg10: memref<2x18x19x128xbf16, #tpu.memory_space<vmem>>, %arg11: memref<256x128xf32, #tpu.memory_space<vmem>>) attributes {dimension_semantics = [#tpu.dimension_semantics<parallel>], iteration_bounds = array<i64: 2>, scalar_prefetch = 0 : i64, scratch_operands = 2 : i64, tpu.core_type = #tpu.core_type<tc>, window_params = [{transform_indices = @transform_0, window_bounds = array<i64: 1, 16, 16, 128>}, {pipeline_mode = #tpu.pipeline_mode<synchronous>, transform_indices = @transform_1, window_bounds = array<i64: 3, 384, 128>}, {pipeline_mode = #tpu.pipeline_mode<synchronous>, transform_indices = @transform_2, window_bounds = array<i64: 1, 128>}, {pipeline_mode = #tpu.pipeline_mode<synchronous>, transform_indices = @transform_3, window_bounds = array<i64: 3, 384, 128>}, {pipeline_mode = #tpu.pipeline_mode<synchronous>, transform_indices = @transform_4, window_bounds = array<i64: 1, 128>}, {pipeline_mode = #tpu.pipeline_mode<synchronous>, transform_indices = @transform_5, window_bounds = array<i64: 3, 384, 128>}, {pipeline_mode = #tpu.pipeline_mode<synchronous>, transform_indices = @transform_6, window_bounds = array<i64: 1, 128>}, {transform_indices = @transform_7, window_bounds = array<i64: 1, 16, 16, 128>}, {transform_indices = @transform_8, window_bounds = array<i64: 1, 16, 16, 128>}]} {
    %cst = arith.constant 0.000000e+00 : bf16
    %0 = vector.broadcast %cst : bf16 to vector<2x18x19x128xbf16>
    %c0 = arith.constant 0 : index
    %c0_0 = arith.constant 0 : index
    %c0_1 = arith.constant 0 : index
    %c0_2 = arith.constant 0 : index
    %1 = vector.load %arg10[%c0, %c0_0, %c0_1, %c0_2] : memref<2x18x19x128xbf16, #tpu.memory_space<vmem>>, vector<2x18x19x128xbf16>
    tpu.vector_store %arg10[%c0, %c0_0, %c0_1, %c0_2], %0 {strides = array<i32>} : memref<2x18x19x128xbf16, #tpu.memory_space<vmem>>, vector<2x18x19x128xbf16>,
    %c0_3 = arith.constant 0 : index
    %c0_4 = arith.constant 0 : index
    %c0_5 = arith.constant 0 : index
    %c0_6 = arith.constant 0 : index
    %2 = vector.load %arg1[%c0_3, %c0_4, %c0_5, %c0_6] : memref<1x16x16x128xbf16, #tpu.memory_space<vmem>>, vector<1x16x16x128xbf16>
    %3 = vector.shape_cast %2 : vector<1x16x16x128xbf16> to vector<16x16x128xbf16>
    %c0_7 = arith.constant 0 : index
    %c1 = arith.constant 1 : index
    %c2 = arith.constant 2 : index
    %c0_8 = arith.constant 0 : index
    %4 = vector.load %arg10[%c0_7, %c1, %c2, %c0_8] : memref<2x18x19x128xbf16, #tpu.memory_space<vmem>>, vector<1x16x16x128xbf16>
    %5 = vector.shape_cast %4 : vector<1x16x16x128xbf16> to vector<16x16x128xbf16>
    %6 = vector.shape_cast %3 : vector<16x16x128xbf16> to vector<1x16x16x128xbf16>
    tpu.vector_store %arg10[%c0_7, %c1, %c2, %c0_8], %6 {strides = array<i32>} : memref<2x18x19x128xbf16, #tpu.memory_space<vmem>>, vector<1x16x16x128xbf16>,
    %c0_9 = arith.constant 0 : index
    %c0_10 = arith.constant 0 : index
    %c0_11 = arith.constant 0 : index
    %c0_12 = arith.constant 0 : index
    %7 = vector.load %arg10[%c0_9, %c0_10, %c0_11, %c0_12] : memref<2x18x19x128xbf16, #tpu.memory_space<vmem>>, vector<1x18x19x128xbf16>
    %8 = vector.shape_cast %7 : vector<1x18x19x128xbf16> to vector<18x19x128xbf16>
    %9 = vector.extract_strided_slice %8 {offsets = [0, 0, 0], sizes = [16, 19, 128], strides = [1, 1, 1]} : vector<18x19x128xbf16> to vector<16x19x128xbf16>
    %10 = vector.extract_strided_slice %9 {offsets = [0, 1, 0], sizes = [16, 16, 128], strides = [1, 1, 1]} : vector<16x19x128xbf16> to vector<16x16x128xbf16>
    %11 = vector.extract_strided_slice %9 {offsets = [0, 2, 0], sizes = [16, 16, 128], strides = [1, 1, 1]} : vector<16x19x128xbf16> to vector<16x16x128xbf16>
    %12 = vector.extract_strided_slice %9 {offsets = [0, 3, 0], sizes = [16, 16, 128], strides = [1, 1, 1]} : vector<16x19x128xbf16> to vector<16x16x128xbf16>
    %13 = tpu.concatenate %10, %11, %12 in 2 : vector<16x16x128xbf16>, vector<16x16x128xbf16>, vector<16x16x128xbf16> -> vector<16x16x384xbf16>
    %14 = vector.shape_cast %13 : vector<16x16x384xbf16> to vector<256x384xbf16>
    %c0_13 = arith.constant 0 : index
    %c0_14 = arith.constant 0 : index
    %c0_15 = arith.constant 0 : index
    %15 = vector.load %arg2[%c0_13, %c0_14, %c0_15] : memref<3x384x128xbf16, #tpu.memory_space<vmem>>, vector<1x384x128xbf16>
    %16 = vector.shape_cast %15 : vector<1x384x128xbf16> to vector<384x128xbf16>
    %cst_16 = arith.constant dense<0.000000e+00> : vector<256x128xf32>
    %17 = tpu.matmul %14, %16, %cst_16 {dimension_numbers = #tpu.dot_dimension_numbers<[1], [0], [0], [1], [0, 0, 1, 1], [], []>} : vector<256x384xbf16>, vector<384x128xbf16>, vector<256x128xf32> -> vector<256x128xf32>
    %c0_17 = arith.constant 0 : index
    %c0_18 = arith.constant 0 : index
    %18 = vector.load %arg11[%c0_17, %c0_18] : memref<256x128xf32, #tpu.memory_space<vmem>>, vector<256x128xf32>
    tpu.vector_store %arg11[%c0_17, %c0_18], %17 {strides = array<i32>} : memref<256x128xf32, #tpu.memory_space<vmem>>, vector<256x128xf32>,
    %19 = vector.extract_strided_slice %8 {offsets = [1, 0, 0], sizes = [16, 19, 128], strides = [1, 1, 1]} : vector<18x19x128xbf16> to vector<16x19x128xbf16>
    %20 = vector.extract_strided_slice %19 {offsets = [0, 1, 0], sizes = [16, 16, 128], strides = [1, 1, 1]} : vector<16x19x128xbf16> to vector<16x16x128xbf16>
    %21 = vector.extract_strided_slice %19 {offsets = [0, 2, 0], sizes = [16, 16, 128], strides = [1, 1, 1]} : vector<16x19x128xbf16> to vector<16x16x128xbf16>
    %22 = vector.extract_strided_slice %19 {offsets = [0, 3, 0], sizes = [16, 16, 128], strides = [1, 1, 1]} : vector<16x19x128xbf16> to vector<16x16x128xbf16>
    %23 = tpu.concatenate %20, %21, %22 in 2 : vector<16x16x128xbf16>, vector<16x16x128xbf16>, vector<16x16x128xbf16> -> vector<16x16x384xbf16>
    %24 = vector.shape_cast %23 : vector<16x16x384xbf16> to vector<256x384xbf16>
    %c1_19 = arith.constant 1 : index
    %c0_20 = arith.constant 0 : index
    %c0_21 = arith.constant 0 : index
    %25 = vector.load %arg2[%c1_19, %c0_20, %c0_21] : memref<3x384x128xbf16, #tpu.memory_space<vmem>>, vector<1x384x128xbf16>
    %26 = vector.shape_cast %25 : vector<1x384x128xbf16> to vector<384x128xbf16>
    %cst_22 = arith.constant dense<0.000000e+00> : vector<256x128xf32>
    %27 = tpu.matmul %24, %26, %cst_22 {dimension_numbers = #tpu.dot_dimension_numbers<[1], [0], [0], [1], [0, 0, 1, 1], [], []>} : vector<256x384xbf16>, vector<384x128xbf16>, vector<256x128xf32> -> vector<256x128xf32>
    %c0_23 = arith.constant 0 : index
    %c0_24 = arith.constant 0 : index
    %28 = vector.load %arg11[%c0_23, %c0_24] : memref<256x128xf32, #tpu.memory_space<vmem>>, vector<256x128xf32>
    %29 = arith.addf %28, %27 : vector<256x128xf32>
    %c0_25 = arith.constant 0 : index
    %c0_26 = arith.constant 0 : index
    %30 = vector.load %arg11[%c0_25, %c0_26] : memref<256x128xf32, #tpu.memory_space<vmem>>, vector<256x128xf32>
    tpu.vector_store %arg11[%c0_25, %c0_26], %29 {strides = array<i32>} : memref<256x128xf32, #tpu.memory_space<vmem>>, vector<256x128xf32>,
    %31 = vector.extract_strided_slice %8 {offsets = [2, 0, 0], sizes = [16, 19, 128], strides = [1, 1, 1]} : vector<18x19x128xbf16> to vector<16x19x128xbf16>
    %32 = vector.extract_strided_slice %31 {offsets = [0, 1, 0], sizes = [16, 16, 128], strides = [1, 1, 1]} : vector<16x19x128xbf16> to vector<16x16x128xbf16>
    %33 = vector.extract_strided_slice %31 {offsets = [0, 2, 0], sizes = [16, 16, 128], strides = [1, 1, 1]} : vector<16x19x128xbf16> to vector<16x16x128xbf16>
    %34 = vector.extract_strided_slice %31 {offsets = [0, 3, 0], sizes = [16, 16, 128], strides = [1, 1, 1]} : vector<16x19x128xbf16> to vector<16x16x128xbf16>
    %35 = tpu.concatenate %32, %33, %34 in 2 : vector<16x16x128xbf16>, vector<16x16x128xbf16>, vector<16x16x128xbf16> -> vector<16x16x384xbf16>
    %36 = vector.shape_cast %35 : vector<16x16x384xbf16> to vector<256x384xbf16>
    %c2_27 = arith.constant 2 : index
    %c0_28 = arith.constant 0 : index
    %c0_29 = arith.constant 0 : index
    %37 = vector.load %arg2[%c2_27, %c0_28, %c0_29] : memref<3x384x128xbf16, #tpu.memory_space<vmem>>, vector<1x384x128xbf16>
    %38 = vector.shape_cast %37 : vector<1x384x128xbf16> to vector<384x128xbf16>
    %cst_30 = arith.constant dense<0.000000e+00> : vector<256x128xf32>
    %39 = tpu.matmul %36, %38, %cst_30 {dimension_numbers = #tpu.dot_dimension_numbers<[1], [0], [0], [1], [0, 0, 1, 1], [], []>} : vector<256x384xbf16>, vector<384x128xbf16>, vector<256x128xf32> -> vector<256x128xf32>
    %c0_31 = arith.constant 0 : index
    %c0_32 = arith.constant 0 : index
    %40 = vector.load %arg11[%c0_31, %c0_32] : memref<256x128xf32, #tpu.memory_space<vmem>>, vector<256x128xf32>
    %41 = arith.addf %40, %39 : vector<256x128xf32>
    %c0_33 = arith.constant 0 : index
    %c0_34 = arith.constant 0 : index
    %42 = vector.load %arg11[%c0_33, %c0_34] : memref<256x128xf32, #tpu.memory_space<vmem>>, vector<256x128xf32>
    tpu.vector_store %arg11[%c0_33, %c0_34], %41 {strides = array<i32>} : memref<256x128xf32, #tpu.memory_space<vmem>>, vector<256x128xf32>,
    %c0_35 = arith.constant 0 : index
    %c0_36 = arith.constant 0 : index
    %43 = vector.load %arg11[%c0_35, %c0_36] : memref<256x128xf32, #tpu.memory_space<vmem>>, vector<256x128xf32>
    %c0_37 = arith.constant 0 : index
    %c0_38 = arith.constant 0 : index
    %44 = vector.load %arg3[%c0_37, %c0_38] : memref<1x128xf32, #tpu.memory_space<vmem>>, vector<1x128xf32>
    %45 = vector.broadcast %44 : vector<1x128xf32> to vector<256x128xf32>
    %46 = arith.addf %43, %45 : vector<256x128xf32>
    %cst_39 = arith.constant 0.000000e+00 : f32
    %47 = vector.broadcast %cst_39 : f32 to vector<256x128xf32>
    %48 = arith.maximumf %46, %47 : vector<256x128xf32>
    %49 = vector.shape_cast %48 : vector<256x128xf32> to vector<16x16x128xf32>
    %50 = arith.truncf %49 : vector<16x16x128xf32> to vector<16x16x128xbf16>
    %c1_40 = arith.constant 1 : index
    %c1_41 = arith.constant 1 : index
    %c2_42 = arith.constant 2 : index
    %c0_43 = arith.constant 0 : index
    %51 = vector.load %arg10[%c1_40, %c1_41, %c2_42, %c0_43] : memref<2x18x19x128xbf16, #tpu.memory_space<vmem>>, vector<1x16x16x128xbf16>
    %52 = vector.shape_cast %51 : vector<1x16x16x128xbf16> to vector<16x16x128xbf16>
    %53 = vector.shape_cast %50 : vector<16x16x128xbf16> to vector<1x16x16x128xbf16>
    tpu.vector_store %arg10[%c1_40, %c1_41, %c2_42, %c0_43], %53 {strides = array<i32>} : memref<2x18x19x128xbf16, #tpu.memory_space<vmem>>, vector<1x16x16x128xbf16>,
    %c1_44 = arith.constant 1 : index
    %c0_45 = arith.constant 0 : index
    %c0_46 = arith.constant 0 : index
    %c0_47 = arith.constant 0 : index
    %54 = vector.load %arg10[%c1_44, %c0_45, %c0_46, %c0_47] : memref<2x18x19x128xbf16, #tpu.memory_space<vmem>>, vector<1x18x19x128xbf16>
    %55 = vector.shape_cast %54 : vector<1x18x19x128xbf16> to vector<18x19x128xbf16>
    %56 = vector.extract_strided_slice %55 {offsets = [0, 0, 0], sizes = [16, 19, 128], strides = [1, 1, 1]} : vector<18x19x128xbf16> to vector<16x19x128xbf16>
    %57 = vector.extract_strided_slice %56 {offsets = [0, 1, 0], sizes = [16, 16, 128], strides = [1, 1, 1]} : vector<16x19x128xbf16> to vector<16x16x128xbf16>
    %58 = vector.extract_strided_slice %56 {offsets = [0, 2, 0], sizes = [16, 16, 128], strides = [1, 1, 1]} : vector<16x19x128xbf16> to vector<16x16x128xbf16>
    %59 = vector.extract_strided_slice %56 {offsets = [0, 3, 0], sizes = [16, 16, 128], strides = [1, 1, 1]} : vector<16x19x128xbf16> to vector<16x16x128xbf16>
    %60 = tpu.concatenate %57, %58, %59 in 2 : vector<16x16x128xbf16>, vector<16x16x128xbf16>, vector<16x16x128xbf16> -> vector<16x16x384xbf16>
    %61 = vector.shape_cast %60 : vector<16x16x384xbf16> to vector<256x384xbf16>
    %c0_48 = arith.constant 0 : index
    %c0_49 = arith.constant 0 : index
    %c0_50 = arith.constant 0 : index
    %62 = vector.load %arg4[%c0_48, %c0_49, %c0_50] : memref<3x384x128xbf16, #tpu.memory_space<vmem>>, vector<1x384x128xbf16>
    %63 = vector.shape_cast %62 : vector<1x384x128xbf16> to vector<384x128xbf16>
    %cst_51 = arith.constant dense<0.000000e+00> : vector<256x128xf32>
    %64 = tpu.matmul %61, %63, %cst_51 {dimension_numbers = #tpu.dot_dimension_numbers<[1], [0], [0], [1], [0, 0, 1, 1], [], []>} : vector<256x384xbf16>, vector<384x128xbf16>, vector<256x128xf32> -> vector<256x128xf32>
    %c0_52 = arith.constant 0 : index
    %c0_53 = arith.constant 0 : index
    %65 = vector.load %arg11[%c0_52, %c0_53] : memref<256x128xf32, #tpu.memory_space<vmem>>, vector<256x128xf32>
    tpu.vector_store %arg11[%c0_52, %c0_53], %64 {strides = array<i32>} : memref<256x128xf32, #tpu.memory_space<vmem>>, vector<256x128xf32>,
    %66 = vector.extract_strided_slice %55 {offsets = [1, 0, 0], sizes = [16, 19, 128], strides = [1, 1, 1]} : vector<18x19x128xbf16> to vector<16x19x128xbf16>
    %67 = vector.extract_strided_slice %66 {offsets = [0, 1, 0], sizes = [16, 16, 128], strides = [1, 1, 1]} : vector<16x19x128xbf16> to vector<16x16x128xbf16>
    %68 = vector.extract_strided_slice %66 {offsets = [0, 2, 0], sizes = [16, 16, 128], strides = [1, 1, 1]} : vector<16x19x128xbf16> to vector<16x16x128xbf16>
    %69 = vector.extract_strided_slice %66 {offsets = [0, 3, 0], sizes = [16, 16, 128], strides = [1, 1, 1]} : vector<16x19x128xbf16> to vector<16x16x128xbf16>
    %70 = tpu.concatenate %67, %68, %69 in 2 : vector<16x16x128xbf16>, vector<16x16x128xbf16>, vector<16x16x128xbf16> -> vector<16x16x384xbf16>
    %71 = vector.shape_cast %70 : vector<16x16x384xbf16> to vector<256x384xbf16>
    %c1_54 = arith.constant 1 : index
    %c0_55 = arith.constant 0 : index
    %c0_56 = arith.constant 0 : index
    %72 = vector.load %arg4[%c1_54, %c0_55, %c0_56] : memref<3x384x128xbf16, #tpu.memory_space<vmem>>, vector<1x384x128xbf16>
    %73 = vector.shape_cast %72 : vector<1x384x128xbf16> to vector<384x128xbf16>
    %cst_57 = arith.constant dense<0.000000e+00> : vector<256x128xf32>
    %74 = tpu.matmul %71, %73, %cst_57 {dimension_numbers = #tpu.dot_dimension_numbers<[1], [0], [0], [1], [0, 0, 1, 1], [], []>} : vector<256x384xbf16>, vector<384x128xbf16>, vector<256x128xf32> -> vector<256x128xf32>
    %c0_58 = arith.constant 0 : index
    %c0_59 = arith.constant 0 : index
    %75 = vector.load %arg11[%c0_58, %c0_59] : memref<256x128xf32, #tpu.memory_space<vmem>>, vector<256x128xf32>
    %76 = arith.addf %75, %74 : vector<256x128xf32>
    %c0_60 = arith.constant 0 : index
    %c0_61 = arith.constant 0 : index
    %77 = vector.load %arg11[%c0_60, %c0_61] : memref<256x128xf32, #tpu.memory_space<vmem>>, vector<256x128xf32>
    tpu.vector_store %arg11[%c0_60, %c0_61], %76 {strides = array<i32>} : memref<256x128xf32, #tpu.memory_space<vmem>>, vector<256x128xf32>,
    %78 = vector.extract_strided_slice %55 {offsets = [2, 0, 0], sizes = [16, 19, 128], strides = [1, 1, 1]} : vector<18x19x128xbf16> to vector<16x19x128xbf16>
    %79 = vector.extract_strided_slice %78 {offsets = [0, 1, 0], sizes = [16, 16, 128], strides = [1, 1, 1]} : vector<16x19x128xbf16> to vector<16x16x128xbf16>
    %80 = vector.extract_strided_slice %78 {offsets = [0, 2, 0], sizes = [16, 16, 128], strides = [1, 1, 1]} : vector<16x19x128xbf16> to vector<16x16x128xbf16>
    %81 = vector.extract_strided_slice %78 {offsets = [0, 3, 0], sizes = [16, 16, 128], strides = [1, 1, 1]} : vector<16x19x128xbf16> to vector<16x16x128xbf16>
    %82 = tpu.concatenate %79, %80, %81 in 2 : vector<16x16x128xbf16>, vector<16x16x128xbf16>, vector<16x16x128xbf16> -> vector<16x16x384xbf16>
    %83 = vector.shape_cast %82 : vector<16x16x384xbf16> to vector<256x384xbf16>
    %c2_62 = arith.constant 2 : index
    %c0_63 = arith.constant 0 : index
    %c0_64 = arith.constant 0 : index
    %84 = vector.load %arg4[%c2_62, %c0_63, %c0_64] : memref<3x384x128xbf16, #tpu.memory_space<vmem>>, vector<1x384x128xbf16>
    %85 = vector.shape_cast %84 : vector<1x384x128xbf16> to vector<384x128xbf16>
    %cst_65 = arith.constant dense<0.000000e+00> : vector<256x128xf32>
    %86 = tpu.matmul %83, %85, %cst_65 {dimension_numbers = #tpu.dot_dimension_numbers<[1], [0], [0], [1], [0, 0, 1, 1], [], []>} : vector<256x384xbf16>, vector<384x128xbf16>, vector<256x128xf32> -> vector<256x128xf32>
    %c0_66 = arith.constant 0 : index
    %c0_67 = arith.constant 0 : index
    %87 = vector.load %arg11[%c0_66, %c0_67] : memref<256x128xf32, #tpu.memory_space<vmem>>, vector<256x128xf32>
    %88 = arith.addf %87, %86 : vector<256x128xf32>
    %c0_68 = arith.constant 0 : index
    %c0_69 = arith.constant 0 : index
    %89 = vector.load %arg11[%c0_68, %c0_69] : memref<256x128xf32, #tpu.memory_space<vmem>>, vector<256x128xf32>
    tpu.vector_store %arg11[%c0_68, %c0_69], %88 {strides = array<i32>} : memref<256x128xf32, #tpu.memory_space<vmem>>, vector<256x128xf32>,
    %c0_70 = arith.constant 0 : index
    %c0_71 = arith.constant 0 : index
    %90 = vector.load %arg11[%c0_70, %c0_71] : memref<256x128xf32, #tpu.memory_space<vmem>>, vector<256x128xf32>
    %c0_72 = arith.constant 0 : index
    %c0_73 = arith.constant 0 : index
    %91 = vector.load %arg5[%c0_72, %c0_73] : memref<1x128xf32, #tpu.memory_space<vmem>>, vector<1x128xf32>
    %92 = vector.broadcast %91 : vector<1x128xf32> to vector<256x128xf32>
    %93 = arith.addf %90, %92 : vector<256x128xf32>
    %cst_74 = arith.constant 0.000000e+00 : f32
    %94 = vector.broadcast %cst_74 : f32 to vector<256x128xf32>
    %95 = arith.maximumf %93, %94 : vector<256x128xf32>
    %96 = vector.shape_cast %95 : vector<256x128xf32> to vector<16x16x128xf32>
    %97 = arith.truncf %96 : vector<16x16x128xf32> to vector<16x16x128xbf16>
    %c0_75 = arith.constant 0 : index
    %c1_76 = arith.constant 1 : index
    %c2_77 = arith.constant 2 : index
    %c0_78 = arith.constant 0 : index
    %98 = vector.load %arg10[%c0_75, %c1_76, %c2_77, %c0_78] : memref<2x18x19x128xbf16, #tpu.memory_space<vmem>>, vector<1x16x16x128xbf16>
    %99 = vector.shape_cast %98 : vector<1x16x16x128xbf16> to vector<16x16x128xbf16>
    %100 = vector.shape_cast %97 : vector<16x16x128xbf16> to vector<1x16x16x128xbf16>
    tpu.vector_store %arg10[%c0_75, %c1_76, %c2_77, %c0_78], %100 {strides = array<i32>} : memref<2x18x19x128xbf16, #tpu.memory_space<vmem>>, vector<1x16x16x128xbf16>,
    %101 = vector.shape_cast %97 : vector<16x16x128xbf16> to vector<1x16x16x128xbf16>
    %c0_79 = arith.constant 0 : index
    %c0_80 = arith.constant 0 : index
    %c0_81 = arith.constant 0 : index
    %c0_82 = arith.constant 0 : index
    %102 = vector.load %arg8[%c0_79, %c0_80, %c0_81, %c0_82] : memref<1x16x16x128xbf16, #tpu.memory_space<vmem>>, vector<1x16x16x128xbf16>
    tpu.vector_store %arg8[%c0_79, %c0_80, %c0_81, %c0_82], %101 {strides = array<i32>} : memref<1x16x16x128xbf16, #tpu.memory_space<vmem>>, vector<1x16x16x128xbf16>,
    %c0_83 = arith.constant 0 : index
    %c0_84 = arith.constant 0 : index
    %c0_85 = arith.constant 0 : index
    %c0_86 = arith.constant 0 : index
    %103 = vector.load %arg10[%c0_83, %c0_84, %c0_85, %c0_86] : memref<2x18x19x128xbf16, #tpu.memory_space<vmem>>, vector<1x18x19x128xbf16>
    %104 = vector.shape_cast %103 : vector<1x18x19x128xbf16> to vector<18x19x128xbf16>
    %105 = vector.extract_strided_slice %104 {offsets = [0, 0, 0], sizes = [16, 19, 128], strides = [1, 1, 1]} : vector<18x19x128xbf16> to vector<16x19x128xbf16>
    %106 = vector.extract_strided_slice %105 {offsets = [0, 1, 0], sizes = [16, 16, 128], strides = [1, 1, 1]} : vector<16x19x128xbf16> to vector<16x16x128xbf16>
    %107 = vector.extract_strided_slice %105 {offsets = [0, 2, 0], sizes = [16, 16, 128], strides = [1, 1, 1]} : vector<16x19x128xbf16> to vector<16x16x128xbf16>
    %108 = vector.extract_strided_slice %105 {offsets = [0, 3, 0], sizes = [16, 16, 128], strides = [1, 1, 1]} : vector<16x19x128xbf16> to vector<16x16x128xbf16>
    %109 = tpu.concatenate %106, %107, %108 in 2 : vector<16x16x128xbf16>, vector<16x16x128xbf16>, vector<16x16x128xbf16> -> vector<16x16x384xbf16>
    %110 = vector.shape_cast %109 : vector<16x16x384xbf16> to vector<256x384xbf16>
    %c0_87 = arith.constant 0 : index
    %c0_88 = arith.constant 0 : index
    %c0_89 = arith.constant 0 : index
    %111 = vector.load %arg6[%c0_87, %c0_88, %c0_89] : memref<3x384x128xbf16, #tpu.memory_space<vmem>>, vector<1x384x128xbf16>
    %112 = vector.shape_cast %111 : vector<1x384x128xbf16> to vector<384x128xbf16>
    %cst_90 = arith.constant dense<0.000000e+00> : vector<256x128xf32>
    %113 = tpu.matmul %110, %112, %cst_90 {dimension_numbers = #tpu.dot_dimension_numbers<[1], [0], [0], [1], [0, 0, 1, 1], [], []>} : vector<256x384xbf16>, vector<384x128xbf16>, vector<256x128xf32> -> vector<256x128xf32>
    %c0_91 = arith.constant 0 : index
    %c0_92 = arith.constant 0 : index
    %114 = vector.load %arg11[%c0_91, %c0_92] : memref<256x128xf32, #tpu.memory_space<vmem>>, vector<256x128xf32>
    tpu.vector_store %arg11[%c0_91, %c0_92], %113 {strides = array<i32>} : memref<256x128xf32, #tpu.memory_space<vmem>>, vector<256x128xf32>,
    %115 = vector.extract_strided_slice %104 {offsets = [1, 0, 0], sizes = [16, 19, 128], strides = [1, 1, 1]} : vector<18x19x128xbf16> to vector<16x19x128xbf16>
    %116 = vector.extract_strided_slice %115 {offsets = [0, 1, 0], sizes = [16, 16, 128], strides = [1, 1, 1]} : vector<16x19x128xbf16> to vector<16x16x128xbf16>
    %117 = vector.extract_strided_slice %115 {offsets = [0, 2, 0], sizes = [16, 16, 128], strides = [1, 1, 1]} : vector<16x19x128xbf16> to vector<16x16x128xbf16>
    %118 = vector.extract_strided_slice %115 {offsets = [0, 3, 0], sizes = [16, 16, 128], strides = [1, 1, 1]} : vector<16x19x128xbf16> to vector<16x16x128xbf16>
    %119 = tpu.concatenate %116, %117, %118 in 2 : vector<16x16x128xbf16>, vector<16x16x128xbf16>, vector<16x16x128xbf16> -> vector<16x16x384xbf16>
    %120 = vector.shape_cast %119 : vector<16x16x384xbf16> to vector<256x384xbf16>
    %c1_93 = arith.constant 1 : index
    %c0_94 = arith.constant 0 : index
    %c0_95 = arith.constant 0 : index
    %121 = vector.load %arg6[%c1_93, %c0_94, %c0_95] : memref<3x384x128xbf16, #tpu.memory_space<vmem>>, vector<1x384x128xbf16>
    %122 = vector.shape_cast %121 : vector<1x384x128xbf16> to vector<384x128xbf16>
    %cst_96 = arith.constant dense<0.000000e+00> : vector<256x128xf32>
    %123 = tpu.matmul %120, %122, %cst_96 {dimension_numbers = #tpu.dot_dimension_numbers<[1], [0], [0], [1], [0, 0, 1, 1], [], []>} : vector<256x384xbf16>, vector<384x128xbf16>, vector<256x128xf32> -> vector<256x128xf32>
    %c0_97 = arith.constant 0 : index
    %c0_98 = arith.constant 0 : index
    %124 = vector.load %arg11[%c0_97, %c0_98] : memref<256x128xf32, #tpu.memory_space<vmem>>, vector<256x128xf32>
    %125 = arith.addf %124, %123 : vector<256x128xf32>
    %c0_99 = arith.constant 0 : index
    %c0_100 = arith.constant 0 : index
    %126 = vector.load %arg11[%c0_99, %c0_100] : memref<256x128xf32, #tpu.memory_space<vmem>>, vector<256x128xf32>
    tpu.vector_store %arg11[%c0_99, %c0_100], %125 {strides = array<i32>} : memref<256x128xf32, #tpu.memory_space<vmem>>, vector<256x128xf32>,
    %127 = vector.extract_strided_slice %104 {offsets = [2, 0, 0], sizes = [16, 19, 128], strides = [1, 1, 1]} : vector<18x19x128xbf16> to vector<16x19x128xbf16>
    %128 = vector.extract_strided_slice %127 {offsets = [0, 1, 0], sizes = [16, 16, 128], strides = [1, 1, 1]} : vector<16x19x128xbf16> to vector<16x16x128xbf16>
    %129 = vector.extract_strided_slice %127 {offsets = [0, 2, 0], sizes = [16, 16, 128], strides = [1, 1, 1]} : vector<16x19x128xbf16> to vector<16x16x128xbf16>
    %130 = vector.extract_strided_slice %127 {offsets = [0, 3, 0], sizes = [16, 16, 128], strides = [1, 1, 1]} : vector<16x19x128xbf16> to vector<16x16x128xbf16>
    %131 = tpu.concatenate %128, %129, %130 in 2 : vector<16x16x128xbf16>, vector<16x16x128xbf16>, vector<16x16x128xbf16> -> vector<16x16x384xbf16>
    %132 = vector.shape_cast %131 : vector<16x16x384xbf16> to vector<256x384xbf16>
    %c2_101 = arith.constant 2 : index
    %c0_102 = arith.constant 0 : index
    %c0_103 = arith.constant 0 : index
    %133 = vector.load %arg6[%c2_101, %c0_102, %c0_103] : memref<3x384x128xbf16, #tpu.memory_space<vmem>>, vector<1x384x128xbf16>
    %134 = vector.shape_cast %133 : vector<1x384x128xbf16> to vector<384x128xbf16>
    %cst_104 = arith.constant dense<0.000000e+00> : vector<256x128xf32>
    %135 = tpu.matmul %132, %134, %cst_104 {dimension_numbers = #tpu.dot_dimension_numbers<[1], [0], [0], [1], [0, 0, 1, 1], [], []>} : vector<256x384xbf16>, vector<384x128xbf16>, vector<256x128xf32> -> vector<256x128xf32>
    %c0_105 = arith.constant 0 : index
    %c0_106 = arith.constant 0 : index
    %136 = vector.load %arg11[%c0_105, %c0_106] : memref<256x128xf32, #tpu.memory_space<vmem>>, vector<256x128xf32>
    %137 = arith.addf %136, %135 : vector<256x128xf32>
    %c0_107 = arith.constant 0 : index
    %c0_108 = arith.constant 0 : index
    %138 = vector.load %arg11[%c0_107, %c0_108] : memref<256x128xf32, #tpu.memory_space<vmem>>, vector<256x128xf32>
    tpu.vector_store %arg11[%c0_107, %c0_108], %137 {strides = array<i32>} : memref<256x128xf32, #tpu.memory_space<vmem>>, vector<256x128xf32>,
    %c0_109 = arith.constant 0 : index
    %c0_110 = arith.constant 0 : index
    %139 = vector.load %arg11[%c0_109, %c0_110] : memref<256x128xf32, #tpu.memory_space<vmem>>, vector<256x128xf32>
    %c0_111 = arith.constant 0 : index
    %c0_112 = arith.constant 0 : index
    %140 = vector.load %arg7[%c0_111, %c0_112] : memref<1x128xf32, #tpu.memory_space<vmem>>, vector<1x128xf32>
    %141 = vector.broadcast %140 : vector<1x128xf32> to vector<256x128xf32>
    %142 = arith.addf %139, %141 : vector<256x128xf32>
    %cst_113 = arith.constant 0.000000e+00 : f32
    %143 = vector.broadcast %cst_113 : f32 to vector<256x128xf32>
    %144 = arith.maximumf %142, %143 : vector<256x128xf32>
    %145 = vector.shape_cast %144 : vector<256x128xf32> to vector<16x16x128xf32>
    %146 = arith.truncf %145 : vector<16x16x128xf32> to vector<16x16x128xbf16>
    %147 = vector.shape_cast %146 : vector<16x16x128xbf16> to vector<1x16x16x128xbf16>
    %c0_114 = arith.constant 0 : index
    %c0_115 = arith.constant 0 : index
    %c0_116 = arith.constant 0 : index
    %c0_117 = arith.constant 0 : index
    %148 = vector.load %arg9[%c0_114, %c0_115, %c0_116, %c0_117] : memref<1x16x16x128xbf16, #tpu.memory_space<vmem>>, vector<1x16x16x128xbf16>
    tpu.vector_store %arg9[%c0_114, %c0_115, %c0_116, %c0_117], %147 {strides = array<i32>} : memref<1x16x16x128xbf16, #tpu.memory_space<vmem>>, vector<1x16x16x128xbf16>,
    return
  }
  func.func @transform_0(%arg0: i32) -> (i32, i32, i32, i32) {
    %c0_i32 = arith.constant 0 : i32
    %c0_i32_0 = arith.constant 0 : i32
    %c0_i32_1 = arith.constant 0 : i32
    %c0_i32_2 = arith.constant 0 : i32
    return %arg0, %c0_i32, %c0_i32_0, %c0_i32_1 : i32, i32, i32, i32
  }
  func.func @transform_1(%arg0: i32) -> (i32, i32, i32) {
    %c0_i32 = arith.constant 0 : i32
    %c0_i32_0 = arith.constant 0 : i32
    %c0_i32_1 = arith.constant 0 : i32
    %c0_i32_2 = arith.constant 0 : i32
    return %c0_i32, %c0_i32_0, %c0_i32_1 : i32, i32, i32
  }
  func.func @transform_2(%arg0: i32) -> (i32, i32) {
    %c0_i32 = arith.constant 0 : i32
    %c0_i32_0 = arith.constant 0 : i32
    %c0_i32_1 = arith.constant 0 : i32
    return %c0_i32, %c0_i32_0 : i32, i32
  }
  func.func @transform_3(%arg0: i32) -> (i32, i32, i32) {
    %c0_i32 = arith.constant 0 : i32
    %c0_i32_0 = arith.constant 0 : i32
    %c0_i32_1 = arith.constant 0 : i32
    %c0_i32_2 = arith.constant 0 : i32
    return %c0_i32, %c0_i32_0, %c0_i32_1 : i32, i32, i32
  }
  func.func @transform_4(%arg0: i32) -> (i32, i32) {
    %c0_i32 = arith.constant 0 : i32
    %c0_i32_0 = arith.constant 0 : i32
    %c0_i32_1 = arith.constant 0 : i32
    return %c0_i32, %c0_i32_0 : i32, i32
  }
  func.func @transform_5(%arg0: i32) -> (i32, i32, i32) {
    %c0_i32 = arith.constant 0 : i32
    %c0_i32_0 = arith.constant 0 : i32
    %c0_i32_1 = arith.constant 0 : i32
    %c0_i32_2 = arith.constant 0 : i32
    return %c0_i32, %c0_i32_0, %c0_i32_1 : i32, i32, i32
  }
  func.func @transform_6(%arg0: i32) -> (i32, i32) {
    %c0_i32 = arith.constant 0 : i32
    %c0_i32_0 = arith.constant 0 : i32
    %c0_i32_1 = arith.constant 0 : i32
    return %c0_i32, %c0_i32_0 : i32, i32
  }
  func.func @transform_7(%arg0: i32) -> (i32, i32, i32, i32) {
    %c0_i32 = arith.constant 0 : i32
    %c0_i32_0 = arith.constant 0 : i32
    %c0_i32_1 = arith.constant 0 : i32
    %c0_i32_2 = arith.constant 0 : i32
    return %arg0, %c0_i32, %c0_i32_0, %c0_i32_1 : i32, i32, i32, i32
  }
  func.func @transform_8(%arg0: i32) -> (i32, i32, i32, i32) {
    %c0_i32 = arith.constant 0 : i32
    %c0_i32_0 = arith.constant 0 : i32
    %c0_i32_1 = arith.constant 0 : i32
    %c0_i32_2 = arith.constant 0 : i32
    return %arg0, %c0_i32, %c0_i32_0, %c0_i32_1 : i32, i32, i32, i32
  }
}

</mosaic_0001>

<bundles_post_ra>
// kernel: forward.1
= control target key start
LH: loop header
LB: loop body
LE: loop exit
PB: predicated region body
PF: predicated region fallthrough
CT: control target
= control target key end

     0   :  { %14 = vsyncpa [#allocation5], 0  ;;  %s16688_s0 = inlined_call_operand.vmem [shape: bf16[2,16,16,128], index: 0, kind: input, shape index: {}]   ;;  %s16689_s1 = inlined_call_operand.hbm [shape: bf16[3,384,128], index: 1, kind: input, shape index: {}]   ;;  %s16690_s2 = inlined_call_operand.vmem [shape: f32[1,128], index: 2, kind: input, shape index: {}]   ;;  %s16691_s3 = inlined_call_operand.hbm [shape: bf16[3,384,128], index: 3, kind: input, shape index: {}]   ;;  %s16692_s4 = inlined_call_operand.vmem [shape: f32[1,128], index: 4, kind: input, shape index: {}]   ;;  %s16693_s5 = inlined_call_operand.vmem [shape: bf16[3,384,128], index: 5, kind: input, shape index: {}]   ;;  %s16694_s6 = inlined_call_operand.vmem [shape: f32[1,128], index: 6, kind: input, shape index: {}]   ;;  %s16695_s7 = inlined_call_operand.vmem [shape: bf16[2,16,16,128], index: 7, kind: output, shape index: {0}]   ;;  %s16696_s8 = inlined_call_operand.vmem [shape: bf16[2,16,16,128], index: 8, kind: output, shape index: {1}]  }
   0x1   :  { %15 = vsyncpa [#allocation7], 0  ;;  %s13224_s27 = smov 0  }
   0x2 LB: > { %s13230_s28 = sadd.s32 4294967295, %s13172_s27   ;;  %p10244_p0 = scmp.ge.s32.totalorder %s13172_s27, 1  ;;  %s13172_s27 = sphi %s13224_s27, %s21_s27  }
   0x3   : > { %p230_p1 = scmp.lt.s32.totalorder %s13172_s27, 3  ;;  %s13174_s29 = smov [#allocation4]  }
   0x4   : > { %s242_s30 = sshll.u32 %s13174_s29, 4  ;;  %p12754_p3 = scmp.eq.s32.totalorder %s13230_s28, 0  ;;  %s243_s30 = int_to_ptr.vmem [resolvable:$true] %s242_s30 }
   0x5   : > { %p13234_p2 = pnand %p10244_p0, %p230_p1  ;;  %s13175_s10 = smov [#allocation6]  }
   0x6   : > { %s258_s11 = sshll.u32 %s13175_s10, 4  ;;  %s13117_s13 = scalar_lea.vmem %s243_s30, 9216  ;;  %s259_s11 = int_to_ptr.vmem [resolvable:$true] %s258_s11 }
   0x7   : > { %p12747_p4 = pneg %p13234_p2  ;;  %p13118_p7 = scmp.ne.s32.totalorder %s243_s30, %s13117_s13 }
   0x8   : > { %p13125_p10 = scmp.lt.s32.totalorder %s243_s30, %s243_s30  ;;  %p13126_p11 = scmp.lt.s32.totalorder %s13117_s13, %s13117_s13 }
   0x9   : > { %p13243_p5 = pnand %p12754_p3, %p12747_p4 }
   0xa   : > { %p13127_p12 = por %p13126_p11, %p13125_p10 }
   0xb   : > { %p13108_p6 = pneg %p13243_p5 }
   0xd   : > { %p13120_p8 = pnand %p13118_p7, %p13108_p6 }
   0xf   : > { %p13121_p9 = pneg %p13120_p8 }
  0x11   : > { %p13128_p13 = pnand %p13127_p12, %p13121_p9 }
  0x13   : > { %13131 = shalt.err (!%p13128_p13)
}
  0x14   : > { %s13176_s14 = smov 64   ;;  %s13177_s15 = smov 4  }
  0x15   : > { %12750 = dma.hbm_to_vmem [thread:$0]  (!%p13243_p5), %s16689_s1, 9216, %s243_s30, [#allocation5], %s13176_s14, %s13176_s14, %s13177_s15  }
  0x16   : > { %s13143_s18 = scalar_lea.vmem %s259_s11, 9216  ;;  %p13151_p7 = scmp.lt.s32.totalorder %s259_s11, %s259_s11 }
  0x17   : > { %p13144_p0 = scmp.ne.s32.totalorder %s259_s11, %s13143_s18  ;;  %p13152_p8 = scmp.lt.s32.totalorder %s13143_s18, %s13143_s18 }
  0x19   : > { %p13146_p1 = pnand %p13144_p0, %p13108_p6  ;;  %p13153_p10 = por %p13152_p8, %p13151_p7 }
  0x1b   : > { %p13147_p4 = pneg %p13146_p1 }
  0x1d   : > { %p13154_p9 = pnand %p13153_p10, %p13147_p4 }
  0x1f   : > { %13157 = shalt.err (!%p13154_p9)
}
  0x20   : > { %12753 = dma.hbm_to_vmem [thread:$0]  (!%p13243_p5), %s16691_s3, 9216, %s259_s11, [#allocation7], %s13176_s14, %s13176_s14, %s13177_s15  }
  0x21   : > { %291 = sbr.rel (%p13234_p2) target bundleno = 1619 (0x653), region = 48 }
  0x26   : > { %13163 = dma.done.wait (%p12754_p3), [#allocation5], 9216  }
  0x27   : > { %13165 = vsyncadd (%p12754_p3), [#allocation5], 4294958080 }
  0x28   : > { %13167 = dma.done.wait (%p12754_p3), [#allocation7], 9216  }
  0x29   : > { %13169 = vsyncadd (%p12754_p3), [#allocation7], 4294958080  ;;  %v13178_v0 = vmov 0   ;;  %v12771_v1 = vld [vmem:[#allocation4 + $0x78] sm:$0xff]   ;;  %v12773_v3 = vld [vmem:[#allocation4 + $0x70] sm:$0xff]   ;;  %p334_p2 = scmp.lt.s32.totalorder %s13230_s28, 1 }
  0x2a   : > { %350 = vst [vmem:[#allocation2] sm:$0xf] %v13178_v0  ;;  %351 = vst [vmem:[#allocation2 + $0x4] sm:$0xf] %v13178_v0  ;;  %v12772_v2 = vld [vmem:[#allocation4 + $0x38] sm:$0xff]   ;;  %11067 = vmatprep.subr.bf16.mxu0 %v12771_v1  ;;  %12723 = vmatprep.subr.bf16.mxu1 %v12771_v1  ;;  %v12774_v4 = vld [vmem:[#allocation4 + $0x30] sm:$0xff]  }
  0x2b   : > { %358 = vst [vmem:[#allocation2 + $0xc] sm:$0xf] %v13178_v0  ;;  %359 = vst [vmem:[#allocation2 + $0x10] sm:$0xf] %v13178_v0  ;;  %11068 = vmatpush3.bf16.msra.mxu0 %v12772_v2  ;;  %12731 = vmatpush3.bf16.msra.mxu1 %v12772_v2  ;;  %v12775_v5 = vld [vmem:[#allocation4 + $0x68] sm:$0xff]   ;;  %s16859_s28 = smov (!%p334_p2, %s13230_s28), 1 }
  0x2c   : > { %363 = vst [vmem:[#allocation2 + $0x18] sm:$0xf] %v13178_v0  ;;  %364 = vst [vmem:[#allocation2 + $0x1c] sm:$0xf] %v13178_v0  ;;  %11069 = vmatprep.subr.bf16.mxu0 %v12773_v3  ;;  %12724 = vmatprep.subr.bf16.mxu1 %v12773_v3  ;;  %v12776_v6 = vld [vmem:[#allocation4 + $0x28] sm:$0xff]   ;;  %v12777_v7 = vld [vmem:[#allocation4 + $0x60] sm:$0xff]  }
  0x2d   : > { %368 = vst [vmem:[#allocation2 + $0x24] sm:$0xf] %v13178_v0  ;;  %369 = vst [vmem:[#allocation2 + $0x28] sm:$0xf] %v13178_v0  ;;  %vm352_vm0 = vcmask 1041408   ;;  %v12778_v8 = vld [vmem:[#allocation4 + $0x20] sm:$0xff]  }
  0x2e   : > { %373 = vst [vmem:[#allocation2 + $0x30] sm:$0xf] %v13178_v0  ;;  %374 = vst [vmem:[#allocation2 + $0x34] sm:$0xf] %v13178_v0  ;;  %vm353_vm1 = vsmask.f32 1280 }
  0x2f   : > { %378 = vst [vmem:[#allocation2 + $0x3c] sm:$0xf] %v13178_v0  ;;  %379 = vst [vmem:[#allocation2 + $0x40] sm:$0xf] %v13178_v0  ;;  %11070 = vmatpush3.bf16.msra.mxu0 %v12774_v4  ;;  %12732 = vmatpush3.bf16.msra.mxu1 %v12774_v4  ;;  %s13349_s21 = sshll.u32 %s16859_s28, 7  ;;  %v12779_v9 = vld [vmem:[#allocation4 + $0x58] sm:$0xff]  }
  0x30   : > { %383 = vst [vmem:[#allocation2 + $0x48] sm:$0xf] %v13178_v0  ;;  %384 = vst [vmem:[#allocation2 + $0x4c] sm:$0xf] %v13178_v0  ;;  %11071 = vmatprep.subr.bf16.mxu0 %v12775_v5  ;;  %12725 = vmatprep.subr.bf16.mxu1 %v12775_v5  ;;  %v16723_v10 = vmov 0  ;;  %v12780_v11 = vld [vmem:[#allocation4 + $0x18] sm:$0xff]   ;;  %s13359_s24 = scalar_lea.vmem %s16688_s0, %s13349_s21  ;;  %s15486_s12 = scalar_lea.vmem %s16695_s7, %s13349_s21 }
  0x31   : > { %388 = vst [vmem:[#allocation2 + $0x54] sm:$0xf] %v13178_v0  ;;  %389 = vst [vmem:[#allocation2 + $0x58] sm:$0xf] %v13178_v0  ;;  %vm597_vm3 = vcmask 1040384   ;;  %v12781_v12 = vld [vmem:[#allocation4 + $0x50] sm:$0xff]   ;;  %s16585_s28 = scalar_lea.vmem %s16696_s8, %s13349_s21 }
  0x32   : > { %393 = vst [vmem:[#allocation2 + $0x60] sm:$0xf] %v13178_v0  ;;  %394 = vst [vmem:[#allocation2 + $0x64] sm:$0xf] %v13178_v0  ;;  %vm598_vm4 = vcmask 1044484   ;;  %v13363_v15 = vld [vmem:[#allocation2] sm:$0xff]  }
  0x33   : > { %398 = vst [vmem:[#allocation2 + $0x6c] sm:$0xf] %v13178_v0  ;;  %399 = vst [vmem:[#allocation2 + $0x70] sm:$0xf] %v13178_v0  ;;  %11072 = vmatpush3.bf16.msra.mxu0 %v12776_v6  ;;  %12733 = vmatpush3.bf16.msra.mxu1 %v12776_v6  ;;  %v355_v13 = vld [vmem:[#allocation2 + $0x8] sm:$0x3] }
  0x34   : > { %403 = vst [vmem:[#allocation2 + $0x78] sm:$0xf] %v13178_v0  ;;  %404 = vst [vmem:[#allocation2 + $0x7c] sm:$0xf] %v13178_v0  ;;  %11073 = vmatprep.subr.bf16.mxu0 %v12777_v7  ;;  %12726 = vmatprep.subr.bf16.mxu1 %v12777_v7  ;;  %v415_v16 = vld [vmem:[#allocation2 + $0x98] sm:$0x3] }
  0x35   : > { %408 = vst [vmem:[#allocation2 + $0x84] sm:$0xf] %v13178_v0  ;;  %409 = vst [vmem:[#allocation2 + $0x88] sm:$0xf] %v13178_v0  ;;  %v555_v17 = vld [vmem:[%s13359_s24 + $0x58] sm:$0xf] }
  0x36   : > { %413 = vst [vmem:[#allocation2 + $0x90] sm:$0xf] %v13178_v0  ;;  %414 = vst [vmem:[#allocation2 + $0x94] sm:$0xf] %v13178_v0  ;;  %v556_v19 = vld [vmem:[%s13359_s24 + $0x5c] sm:$0xf] }
  0x37   : > { %418 = vst [vmem:[#allocation2 + $0x9c] sm:$0xf] %v13178_v0  ;;  %419 = vst [vmem:[#allocation2 + $0xa0] sm:$0xf] %v13178_v0  ;;  %11074 = vmatpush3.bf16.msra.mxu0 %v12778_v8  ;;  %12734 = vmatpush3.bf16.msra.mxu1 %v12778_v8  ;;  %v655_v20 = vrot.slane %v555_v17, 7  ;;  %v12782_v21 = vld [vmem:[#allocation4 + $0x10] sm:$0xff]  }
  0x38   : > { %423 = vst [vmem:[#allocation2 + $0xa8] sm:$0xf] %v13178_v0  ;;  %424 = vst [vmem:[#allocation2 + $0xac] sm:$0xf] %v13178_v0  ;;  %11075 = vmatprep.subr.bf16.mxu0 %v12779_v9  ;;  %12727 = vmatprep.subr.bf16.mxu1 %v12779_v9  ;;  %v963_v22 = vshll.u32 %v13363_v15, 16  ;;  %v16726_v23 = vmov 0 }
  0x39   : > { %428 = vst [vmem:[#allocation2 + $0xb4] sm:$0xf] %v13178_v0  ;;  %429 = vst [vmem:[#allocation2 + $0xb8] sm:$0xf] %v13178_v0  ;;  %v657_v24 = vrot.slane %v556_v19, 7  ;;  %v12783_v25 = vld [vmem:[#allocation4 + $0x48] sm:$0xff]  }
  0x3a   : > { %433 = vst [vmem:[#allocation2 + $0xc0] sm:$0xf] %v13178_v0  ;;  %434 = vst [vmem:[#allocation2 + $0xc4] sm:$0xf] %v13178_v0  ;;  %vm959_vm6 = vsmask.f32 7424 }
  0x3b   : > { %438 = vst [vmem:[#allocation2 + $0xcc] sm:$0xf] %v13178_v0  ;;  %439 = vst [vmem:[#allocation2 + $0xd0] sm:$0xf] %v13178_v0  ;;  %11076 = vmatpush3.bf16.msra.mxu0 %v12780_v11  ;;  %12735 = vmatpush3.bf16.msra.mxu1 %v12780_v11  ;;  %v656_v26 = vrot.slane %v655_v20, 4  ;;  %v12784_v27 = vld [vmem:[#allocation4 + $0x8] sm:$0xff]  }
  0x3c   : > { %443 = vst [vmem:[#allocation2 + $0xd8] sm:$0xf] %v13178_v0  ;;  %444 = vst [vmem:[#allocation2 + $0xdc] sm:$0xf] %v13178_v0  ;;  %11077 = vmatprep.subr.bf16.mxu0 %v12781_v12  ;;  %12728 = vmatprep.subr.bf16.mxu1 %v12781_v12  ;;  %v659_v28 = vrot.slane %v657_v24, 4  ;;  %v12785_v29 = vld [vmem:[#allocation4 + $0x40] sm:$0xff]  }
  0x3d   : > { %448 = vst [vmem:[#allocation2 + $0xe4] sm:$0xf] %v13178_v0  ;;  %449 = vst [vmem:[#allocation2 + $0xe8] sm:$0xf] %v13178_v0  ;;  %v961_v30 = vshrl.u32 %v13363_v15, 16  ;;  %v965_v31 = vrot.slane %v963_v22, 1 }
  0x3e   : > { %453 = vst [vmem:[#allocation2 + $0xf0] sm:$0xf] %v13178_v0  ;;  %454 = vst [vmem:[#allocation2 + $0xf4] sm:$0xf] %v13178_v0  ;;  %v360_v33 = vld [vmem:[#allocation2 + $0x14] sm:$0x3] }
  0x3f   : > { %458 = vst [vmem:[#allocation2 + $0xfc] sm:$0xf] %v13178_v0  ;;  %459 = vst [vmem:[#allocation2 + $0x100] sm:$0xf] %v13178_v0  ;;  %v533_v34 = vld [vmem:[%s13359_s24] sm:$0xf]  ;;  %11078 = vmatpush3.bf16.msra.mxu0 %v12782_v21  ;;  %12736 = vmatpush3.bf16.msra.mxu1 %v12782_v21  ;;  %v966_v51 = vor.u32 %v965_v31, %v961_v30 }
  0x40   : > { %463 = vst [vmem:[#allocation2 + $0x108] sm:$0xf] %v13178_v0  ;;  %464 = vst [vmem:[#allocation2 + $0x10c] sm:$0xf] %v13178_v0  ;;  %v534_v36 = vld [vmem:[%s13359_s24 + $0x4] sm:$0xf]  ;;  %11079 = vmatprep.subr.bf16.mxu0 %v12783_v25  ;;  %12729 = vmatprep.subr.bf16.mxu1 %v12783_v25 }
  0x41   : > { %468 = vst [vmem:[#allocation2 + $0x114] sm:$0xf] %v13178_v0  ;;  %469 = vst [vmem:[#allocation2 + $0x118] sm:$0xf] %v13178_v0  ;;  %v600_v37 = vrot.slane %v533_v34, 7  ;;  %v602_v39 = vrot.slane %v534_v36, 7 }
  0x42   : > { %473 = vst [vmem:[#allocation2 + $0x120] sm:$0xf] %v13178_v0  ;;  %474 = vst [vmem:[#allocation2 + $0x124] sm:$0xf] %v13178_v0  ;;  %v420_v38 = vld [vmem:[#allocation2 + $0xa4] sm:$0x3] }
  0x43   : > { %478 = vst [vmem:[#allocation2 + $0x12c] sm:$0xf] %v13178_v0  ;;  %479 = vst [vmem:[#allocation2 + $0x130] sm:$0xf] %v13178_v0  ;;  %v557_v41 = vld [vmem:[%s13359_s24 + $0x60] sm:$0xf]  ;;  %11080 = vmatpush3.bf16.msra.mxu0 %v12784_v27  ;;  %12737 = vmatpush3.bf16.msra.mxu1 %v12784_v27 }
  0x44   : > { %483 = vst [vmem:[#allocation2 + $0x138] sm:$0xf] %v13178_v0  ;;  %484 = vst [vmem:[#allocation2 + $0x13c] sm:$0xf] %v13178_v0  ;;  %v558_v42 = vld [vmem:[%s13359_s24 + $0x64] sm:$0xf]  ;;  %11081 = vmatprep.subr.bf16.mxu0 %v12785_v29  ;;  %12730 = vmatprep.subr.bf16.mxu1 %v12785_v29 }
  0x45   : > { %488 = vst [vmem:[#allocation2 + $0x144] sm:$0xf] %v13178_v0  ;;  %489 = vst [vmem:[#allocation2 + $0x148] sm:$0xf] %v13178_v0  ;;  %v12786_v43 = vld [vmem:[#allocation4] sm:$0xff]   ;;  %v601_v45 = vrot.slane %v600_v37, 4 }
  0x46   : > { %493 = vst [vmem:[#allocation2 + $0x150] sm:$0xf] %v13178_v0  ;;  %494 = vst [vmem:[#allocation2 + $0x154] sm:$0xf] %v13178_v0  ;;  %v13389_v46 = vld [vmem:[#allocation4 + $0xb8] sm:$0xff]   ;;  %v604_v48 = vrot.slane %v602_v39, 4 }
  0x47   : > { %498 = vst [vmem:[#allocation2 + $0x15c] sm:$0xf] %v13178_v0  ;;  %499 = vst [vmem:[#allocation2 + $0x160] sm:$0xf] %v13178_v0  ;;  %v13391_v47 = vld [vmem:[#allocation4 + $0x178] sm:$0xff]   ;;  %v660_v49 = vrot.slane %v557_v41, 7  ;;  %11082 = vmatpush3.bf16.msra.mxu0 %v12786_v43  ;;  %12738 = vmatpush3.bf16.msra.mxu1 %v12786_v43 }
  0x48   : > { %503 = vst [vmem:[#allocation2 + $0x168] sm:$0xf] %v13178_v0  ;;  %504 = vst [vmem:[#allocation2 + $0x16c] sm:$0xf] %v13178_v0  ;;  %v662_v50 = vrot.slane %v558_v42, 7  ;;  %12291 = vmatprep.subr.bf16.mxu1 %v13389_v46  ;;  %12339 = vmatprep.subr.bf16.mxu0 %v13391_v47  ;;  %v1185_v11 = vrot.slane %v13363_v15, 1 }
  0x49   : > { %508 = vst [vmem:[#allocation2 + $0x174] sm:$0xf] %v13178_v0  ;;  %509 = vst [vmem:[#allocation2 + $0x178] sm:$0xf] %v13178_v0  ;;  %v661_v55 = vrot.slane %v660_v49, 4  ;;  %v12805_v31 = vld [vmem:[#allocation4 + $0x170] sm:$0xff]  }
  0x4a   : > { %513 = vst [vmem:[#allocation2 + $0x180] sm:$0xf] %v13178_v0  ;;  %514 = vst [vmem:[#allocation2 + $0x184] sm:$0xf] %v13178_v0  ;;  %v664_v56 = vrot.slane %v662_v50, 4  ;;  %vm1184_vm7 = vcmask 1046528  }
  0x4b   : > { %518 = vst [vmem:[#allocation2 + $0x18c] sm:$0xf] %v13178_v0  ;;  %519 = vst [vmem:[#allocation2 + $0x190] sm:$0xf] %v13178_v0  ;;  %v365_v59 = vld [vmem:[#allocation2 + $0x20] sm:$0x3] }
  0x4c   : > { %523 = vst [vmem:[#allocation2 + $0x198] sm:$0xf] %v13178_v0  ;;  %524 = vst [vmem:[#allocation2 + $0x19c] sm:$0xf] %v13178_v0  ;;  %v535_v1 = vld [vmem:[%s13359_s24 + $0x8] sm:$0xf] }
  0x4d   : > { %528 = vst [vmem:[#allocation2 + $0x1a4] sm:$0xf] %v13178_v0  ;;  %529 = vst [vmem:[#allocation2 + $0x1a8] sm:$0xf] %v13178_v0  ;;  %v536_v8 = vld [vmem:[%s13359_s24 + $0xc] sm:$0xf] }
  0x4e   : > { %vm13351_vm2 = vmand %vm352_vm0, %vm353_vm1  ;;  %762 = vst [vmem:[#allocation2 + $0x90] sm:$0xe] %v655_v20  ;;  %v605_v9 = vrot.slane %v535_v1, 7 }
  0x4f   : > { %v16724_v10 = vsel %vm13351_vm2, 4294967295, %v16723_v10  ;;  %v356_v14 = vsel %vm13351_vm2, 0, %v355_v13  ;;  %v416_v18 = vsel %vm13351_vm2, 0, %v415_v16  ;;  %vm13372_vm5 = vmor %vm597_vm3, %vm598_vm4  ;;  %v361_v35 = vsel %vm13351_vm2, 0, %v360_v33  ;;  %729 = vst [vmem:[#allocation2 + $0xc] sm:$0xe] %v600_v37 }
  0x50   : > { %16725 = vst [vmem:[#allocation10_spill] sm:$0xff] %v16724_v10  ;;  %357 = vst [vmem:[#allocation2 + $0x8] sm:$0x3] %v356_v14  ;;  %v16727_v23 = vsel %vm13372_vm5, 4294967295, %v16726_v23  ;;  %v658_v32 = vsel %vm13372_vm5, %v656_v26, %v657_v24  ;;  %v421_v40 = vsel %vm13351_vm2, 0, %v420_v38  ;;  %v603_v54 = vsel %vm13372_vm5, %v601_v45, %v602_v39 }
  0x51   : > { %417 = vst [vmem:[#allocation2 + $0x98] sm:$0x3] %v416_v18  ;;  %16728 = vst [vmem:[#allocation11_spill] sm:$0xff] %v16727_v23  ;;  %v663_v61 = vsel %vm13372_vm5, %v661_v55, %v662_v50  ;;  %v366_v62 = vsel %vm13351_vm2, 0, %v365_v59  ;;  %v607_v16 = vrot.slane %v536_v8, 7 }
  0x52   : > { %763 = vst [vmem:[#allocation2 + $0x94] sm:$0xf] %v658_v32  ;;  %764 = vst [vmem:[#allocation2 + $0x98] sm:$0x1] %v659_v28 }
  0x53   : > { %362 = vst [vmem:[#allocation2 + $0x14] sm:$0x3] %v361_v35  ;;  %422 = vst [vmem:[#allocation2 + $0xa4] sm:$0x3] %v421_v40  ;;  %v425_v40 = vld [vmem:[#allocation2 + $0xb0] sm:$0x3] }
  0x54   : > { %730 = vst [vmem:[#allocation2 + $0x10] sm:$0xf] %v603_v54  ;;  %731 = vst [vmem:[#allocation2 + $0x14] sm:$0x1] %v604_v48  ;;  %v559_v48 = vld [vmem:[%s13359_s24 + $0x68] sm:$0xf] }
  0x55   : > { %765 = vst [vmem:[#allocation2 + $0x9c] sm:$0xe] %v660_v49  ;;  %767 = vst [vmem:[#allocation2 + $0xa4] sm:$0x1] %v664_v56  ;;  %v560_v49 = vld [vmem:[%s13359_s24 + $0x6c] sm:$0xf] }
  0x56   : > { %766 = vst [vmem:[#allocation2 + $0xa0] sm:$0xf] %v663_v61  ;;  %367 = vst [vmem:[#allocation2 + $0x20] sm:$0x3] %v366_v62  ;;  %v426_v61 = vsel %vm13351_vm2, 0, %v425_v40 }
  0x57   : > { %v13387_v44 = vld [vmem:[#allocation2 + $0x8] ss:$0 sps:$4 sm:$0x33]   ;;  %732 = vst [vmem:[#allocation2 + $0x18] sm:$0xe] %v605_v9 }
  0x58   : > { %v968_v52 = vshll.u32 %v13387_v44, 16  ;;  %v972_v53 = vshrl.u32 %v13387_v44, 16  ;;  %427 = vst [vmem:[#allocation2 + $0xb0] sm:$0x3] %v426_v61 }
  0x59   : > { %v12789_v60 = vld [vmem:[#allocation2 + $0x90] sm:$0xff]   ;;  %v12790_v0 = vld [vmem:[#allocation2 + $0x98] ss:$0 sps:$4 sm:$0x33]  }
  0x5a   : > { %v970_v57 = vrot.slane %v968_v52, 1  ;;  %v1241_v58 = vshll.u32 %v972_v53, 16  ;;  %v1129_v4 = vshrl.u32 %v12789_v60, 16  ;;  %v1131_v5 = vshll.u32 %v12789_v60, 16 }
  0x5b   : > { %v1136_v6 = vshll.u32 %v12790_v0, 16  ;;  %v1140_v7 = vshrl.u32 %v12790_v0, 16  ;;  %v13407_v21 = vld [vmem:[#allocation2 + $0xc] sm:$0xff]   ;;  %v13409_v22 = vld [vmem:[#allocation2 + $0x14] ss:$0 sps:$4 sm:$0x33]  }
  0x5c   : > { %v971_v63 = vsel %vm959_vm6, %v966_v51, %v970_v57  ;;  %v1243_v13 = vrot.slane %v1241_v58, 1  ;;  %v1133_v14 = vrot.slane %v1131_v5, 1  ;;  %v12797_v25 = vld [vmem:[#allocation2 + $0xa4] ss:$0 sps:$4 sm:$0x33]   ;;  %v975_v28 = vshrl.u32 %v13407_v21, 16 }
  0x5d   : > { %v1234_v2 = vshrl.u32 %v971_v63, 16  ;;  %v1236_v3 = vshll.u32 %v971_v63, 16  ;;  %v1138_v17 = vrot.slane %v1136_v6, 1  ;;  %v1529_v18 = vshll.u32 %v1140_v7, 16  ;;  %v12796_v30 = vld [vmem:[#allocation2 + $0x9c] sm:$0xff]  }
  0x5e   : > { %v1134_v20 = vor.u32 %v1133_v14, %v1129_v4  ;;  %v977_v29 = vshll.u32 %v13407_v21, 16  ;;  %v982_v34 = vshll.u32 %v13409_v22, 16  ;;  %v986_v35 = vshrl.u32 %v13409_v22, 16  ;;  %v12813_v58 = vld [vmem:[#allocation4 + $0x168] sm:$0xff]   ;;  %v370_v6 = vld [vmem:[#allocation2 + $0x2c] sm:$0x3] }
  0x5f   : > { %v1238_v12 = vrot.slane %v1236_v3, 1  ;;  %v1531_v24 = vrot.slane %v1529_v18, 1  ;;  %v1143_v37 = vshrl.u32 %v12796_v30, 16  ;;  %v1145_v38 = vshll.u32 %v12796_v30, 16  ;;  %v537_v14 = vld [vmem:[%s13359_s24 + $0x10] sm:$0xf] }
  0x60   : > { %v13413_v27 = vsel %vm959_vm6, %v1134_v20, %v1138_v17  ;;  %v979_v36 = vrot.slane %v977_v29, 1  ;;  %v1150_v39 = vshll.u32 %v12797_v25, 16  ;;  %v984_v42 = vrot.slane %v982_v34, 1  ;;  %v538_v18 = vld [vmem:[%s13359_s24 + $0x14] sm:$0xf] }
  0x61   : > { %v1239_v19 = vor.u32 %v1238_v12, %v1234_v2  ;;  %v1522_v32 = vshrl.u32 %v13413_v27, 16  ;;  %v1524_v33 = vshll.u32 %v13413_v27, 16  ;;  %v13421_v43 = vshll.u32 %v986_v35, 16  ;;  %v12798_v12 = vld [vmem:[#allocation4 + $0xa8] sm:$0xff]   ;;  %v561_v29 = vld [vmem:[%s13359_s24 + $0x70] sm:$0xf] }
  0x62   : > { %v1154_v45 = vshrl.u32 %v12797_v25, 16  ;;  %v980_v50 = vor.u32 %v979_v36, %v975_v28  ;;  %v1147_v51 = vrot.slane %v1145_v38, 1  ;;  %v1152_v52 = vrot.slane %v1150_v39, 1  ;;  %v430_v28 = vld [vmem:[#allocation2 + $0xbc] sm:$0x3]  ;;  %v12799_v36 = vld [vmem:[#allocation4 + $0xa0] sm:$0xff]  }
  0x63   : > { %v1244_v26 = vsel %vm959_vm6, %v1239_v19, %v1243_v13  ;;  %v1526_v41 = vrot.slane %v1524_v33, 1  ;;  %v606_v53 = vrot.slane %v605_v9, 4  ;;  %v1267_v55 = vrot.slane %v13421_v43, 1 }
  0x64   : > { %1889 = vmatprep.mubr.bf16.mxu0 %v1244_v26  ;;  %v13427_v56 = vshll.u32 %v1154_v45, 16  ;;  %v609_v57 = vrot.slane %v607_v16, 4  ;;  %v13430_v59 = vsel %vm959_vm6, %v980_v50, %v984_v42  ;;  %v1148_v60 = vor.u32 %v1147_v51, %v1143_v37 }
  0x65   : > { %1890 = vmatmul.mubr.bf16.vlgmr.msra.gmra.mxu0 %v971_v63  ;;  %v1527_v54 = vor.u32 %v1526_v41, %v1522_v32  ;;  %v12792_v63 = vld [vmem:[#allocation4 + $0xb0] sm:$0xff]   ;;  %v1258_v0 = vshrl.u32 %v13430_v59, 16  ;;  %v1260_v1 = vshll.u32 %v13430_v59, 16  ;;  %v665_v4 = vrot.slane %v559_v48, 7  ;;  %v562_v32 = vld [vmem:[%s13359_s24 + $0x74] sm:$0xf] }
  0x66   : > { %12340 = vmatpush3.bf16.msra.mxu0 %v13391_v47  ;;  %v608_v47 = vsel %vm13372_vm5, %v606_v53, %v607_v16  ;;  %v1555_v2 = vrot.slane %v13427_v56, 1  ;;  %734 = vst [vmem:[#allocation2 + $0x20] sm:$0x1] %v609_v57  ;;  %v13444_v3 = vsel %vm959_vm6, %v1148_v60, %v1152_v52  ;;  %v667_v5 = vrot.slane %v560_v49, 7  ;;  %v539_v56 = vld [vmem:[%s13359_s24 + $0x18] sm:$0xf] }
  0x67   : > { %12341 = vmatprep.subr.bf16.mxu0 %v12805_v31  ;;  %v13437_v62 = vsel %vm959_vm6, %v1527_v54, %v1531_v24  ;;  %733 = vst [vmem:[#allocation2 + $0x1c] sm:$0xf] %v608_v47  ;;  %16729 = vst [vmem:[#allocation12_spill] sm:$0xff] %v13444_v3  ;;  %v1262_v7 = vrot.slane %v1260_v1, 1  ;;  %v1546_v8 = vshrl.u32 %v13444_v3, 16  ;;  %v1548_v9 = vshll.u32 %v13444_v3, 16 }
  0x68   : > { %1985 = vmatprep.mubr.bf16.mxu1 %v13437_v62  ;;  %v371_v13 = vsel %vm13351_vm2, 0, %v370_v6  ;;  %v666_v16 = vrot.slane %v665_v4, 4  ;;  %v669_v17 = vrot.slane %v667_v5, 4  ;;  %768 = vst [vmem:[#allocation2 + $0xa8] sm:$0xe] %v665_v4  ;;  %v610_v19 = vrot.slane %v537_v14, 7 }
  0x69   : > { %1986 = vmatmul.mubr.bf16.vlgmr.msra.gmra.mxu1 %v13413_v27  ;;  %372 = vst [vmem:[#allocation2 + $0x2c] sm:$0x3] %v371_v13  ;;  %v1186_v20 = vrot.slane %v13387_v44, 1  ;;  %v1263_v24 = vor.u32 %v1262_v7, %v1258_v0  ;;  %v1550_v25 = vrot.slane %v1548_v9, 1  ;;  %v612_v26 = vrot.slane %v538_v18, 7  ;;  %v12804_v54 = vld [vmem:[#allocation4 + $0x98] sm:$0xff]  }
  0x6a   : > { %12342 = vmatpush3.bf16.msra.mxu0 %v12805_v31  ;;  %12292 = vmatpush3.bf16.msra.mxu1 %v13389_v46  ;;  %v668_v30 = vsel %vm13372_vm5, %v666_v16, %v667_v5  ;;  %770 = vst [vmem:[#allocation2 + $0xb0] sm:$0x1] %v669_v17  ;;  %v611_v46 = vrot.slane %v610_v19, 4  ;;  %735 = vst [vmem:[#allocation2 + $0x24] sm:$0xe] %v610_v19  ;;  %v431_v31 = vsel %vm13351_vm2, 0, %v430_v28 }
  0x6b   : > { %12343 = vmatprep.subr.bf16.mxu0 %v12813_v58  ;;  %12293 = vmatprep.subr.bf16.mxu1 %v12792_v63  ;;  %v670_v33 = vrot.slane %v561_v29, 7  ;;  %v13462_v34 = vsel %vm959_vm6, %v1263_v24, %v1267_v55  ;;  %v1551_v35 = vor.u32 %v1550_v25, %v1546_v8  ;;  %769 = vst [vmem:[#allocation2 + $0xac] sm:$0xf] %v668_v30  ;;  %v614_v37 = vrot.slane %v612_v26, 4  ;;  %v375_v55 = vld [vmem:[#allocation2 + $0x38] sm:$0x3] }
  0x6c   : > { %432 = vst [vmem:[#allocation2 + $0xbc] sm:$0x3] %v431_v31  ;;  %v672_v38 = vrot.slane %v562_v32, 7  ;;  %1897 = vmatprep.mubr.bf16.mxu0 %v13462_v34  ;;  %v613_v40 = vsel %vm13372_vm5, %v611_v46, %v612_v26  ;;  %v12806_v1 = vld [vmem:[#allocation4 + $0x90] sm:$0xff]   ;;  %v615_v13 = vrot.slane %v539_v56, 7  ;;  %v12811_v46 = vld [vmem:[#allocation4 + $0x88] sm:$0xff]  }
  0x6d   : > { %v671_v41 = vrot.slane %v670_v33, 4  ;;  %771 = vst [vmem:[#allocation2 + $0xb4] sm:$0xe] %v670_v33  ;;  %v13470_v42 = vsel %vm959_vm6, %v1551_v35, %v1555_v2  ;;  %1898 = vmatmul.mubr.bf16.gmra.mxu0 %v13430_v59  ;;  %v13473_v43 = vld [vmem:[#allocation2 + $0x20] ss:$0 sps:$4 sm:$0x33]  }
  0x6e   : > { %12344 = vmatpush3.bf16.msra.mxu0 %v12813_v58  ;;  %12294 = vmatpush3.bf16.msra.mxu1 %v12792_v63  ;;  %v13465_v39 = vld [vmem:[#allocation2 + $0x18] sm:$0xff]   ;;  %736 = vst [vmem:[#allocation2 + $0x28] sm:$0xf] %v613_v40  ;;  %737 = vst [vmem:[#allocation2 + $0x2c] sm:$0x1] %v614_v37  ;;  %v674_v45 = vrot.slane %v672_v38, 4  ;;  %v13489_v63 = vsel %vm1184_vm7, %v1185_v11, %v1186_v20 }
  0x6f   : > { %12295 = vmatprep.subr.bf16.mxu1 %v12798_v12  ;;  %1993 = vmatprep.mubr.bf16.mxu1 %v13470_v42  ;;  %v989_v48 = vshrl.u32 %v13465_v39, 16  ;;  %v991_v49 = vshll.u32 %v13465_v39, 16  ;;  %v673_v50 = vsel %vm13372_vm5, %v671_v41, %v672_v38  ;;  %v996_v51 = vshll.u32 %v13473_v43, 16  ;;  %738 = vst [vmem:[#allocation2 + $0x30] sm:$0xe] %v615_v13 }
  0x70   : > { %v1000_v52 = vshrl.u32 %v13473_v43, 16  ;;  %772 = vst [vmem:[#allocation2 + $0xb8] sm:$0xf] %v673_v50  ;;  %773 = vst [vmem:[#allocation2 + $0xbc] sm:$0x1] %v674_v45  ;;  %v376_v2 = vsel %vm13351_vm2, 0, %v375_v55 }
  0x71   : > { %1994 = vmatmul.mubr.bf16.gmra.mxu1 %v13444_v3  ;;  %v993_v53 = vrot.slane %v991_v49, 1  ;;  %v998_v57 = vrot.slane %v996_v51, 1  ;;  %v12803_v61 = vld [vmem:[#allocation2 + $0xb0] ss:$0 sps:$4 sm:$0x33]   ;;  %v1246_v4 = vshrl.u32 %v13489_v63, 16 }
  0x72   : > { %12296 = vmatpush3.bf16.msra.mxu1 %v12798_v12  ;;  %v1289_v58 = vshll.u32 %v1000_v52, 16  ;;  %v12802_v47 = vld [vmem:[#allocation2 + $0xa8] sm:$0xff]   ;;  %v1164_v8 = vshll.u32 %v12803_v61, 16  ;;  %377 = vst [vmem:[#allocation2 + $0x38] sm:$0x3] %v376_v2  ;;  %v1168_v12 = vshrl.u32 %v12803_v61, 16 }
  0x73   : > { %12297 = vmatprep.subr.bf16.mxu1 %v12799_v36  ;;  %v994_v60 = vor.u32 %v993_v53, %v989_v48  ;;  %v1157_v6 = vshrl.u32 %v12802_v47, 16  ;;  %v1159_v7 = vshll.u32 %v12802_v47, 16  ;;  %v540_v31 = vld [vmem:[%s13359_s24 + $0x1c] sm:$0xf]  ;;  %v616_v32 = vrot.slane %v615_v13, 4  ;;  %v12822_v49 = vld [vmem:[#allocation4 + $0x160] sm:$0xff]  }
  0x74   : > { %v1291_v0 = vrot.slane %v1289_v58, 1  ;;  %v1166_v16 = vrot.slane %v1164_v8, 1  ;;  %v1577_v24 = vshll.u32 %v1168_v12, 16  ;;  %v12812_v47 = vld [vmem:[#allocation4 + $0x80] sm:$0xff]   ;;  %v617_v61 = vrot.slane %v540_v31, 7  ;;  %12345 = vmatprep.subr.bf16.mxu0 %v12822_v49  ;;  %v12816_v13 = vld [vmem:[#allocation4 + $0x138] sm:$0xff]  }
  0x75   : > { %v13495_v5 = vsel %vm959_vm6, %v994_v60, %v998_v57  ;;  %v13497_v9 = vld [vmem:[#allocation2 + $0x24] sm:$0xff]   ;;  %v1161_v14 = vrot.slane %v1159_v7, 1  ;;  %v13501_v17 = vld [vmem:[#allocation2 + $0x2c] ss:$0 sps:$4 sm:$0x33]   ;;  %12346 = vmatpush3.bf16.msra.mxu0 %v12822_v49  ;;  %v1188_v44 = vrot.slane %v13407_v21, 1 }
  0x76   : > { %12298 = vmatpush3.bf16.msra.mxu1 %v12799_v36  ;;  %v1282_v15 = vshrl.u32 %v13495_v5, 16  ;;  %v1284_v11 = vshll.u32 %v13495_v5, 16  ;;  %v1003_v18 = vshrl.u32 %v13497_v9, 16  ;;  %v1005_v25 = vshll.u32 %v13497_v9, 16  ;;  %v542_v31 = vld [vmem:[%s13359_s24 + $0x24] sm:$0xf] }
  0x77   : > { %12299 = vmatprep.subr.bf16.mxu1 %v12804_v54  ;;  %v12809_v26 = vld [vmem:[#allocation2 + $0xb4] sm:$0xff]   ;;  %v1162_v28 = vor.u32 %v1161_v14, %v1157_v6  ;;  %v1010_v29 = vshll.u32 %v13501_v17, 16  ;;  %v1014_v30 = vshrl.u32 %v13501_v17, 16  ;;  %v1579_v35 = vrot.slane %v1577_v24, 1  ;;  %v380_v14 = vld [vmem:[#allocation2 + $0x44] sm:$0x3] }
  0x78   : > { %v1286_v19 = vrot.slane %v1284_v11, 1  ;;  %v1007_v36 = vrot.slane %v1005_v25, 1  ;;  %v12810_v37 = vld [vmem:[#allocation2 + $0xbc] ss:$0 sps:$4 sm:$0x33]   ;;  %v1171_v38 = vshrl.u32 %v12809_v26, 16  ;;  %v618_v11 = vsel %vm13372_vm5, %v616_v32, %v617_v61 }
  0x79   : > { %v13509_v40 = vsel %vm959_vm6, %v1162_v28, %v1166_v16  ;;  %v1012_v41 = vrot.slane %v1010_v29, 1  ;;  %v1313_v45 = vshll.u32 %v1014_v30, 16  ;;  %v1173_v48 = vshll.u32 %v12809_v26, 16  ;;  %v541_v16 = vld [vmem:[%s13359_s24 + $0x20] sm:$0xf]  ;;  %v12827_v26 = vld [vmem:[#allocation4 + $0x158] sm:$0xff]  }
  0x7a   : > { %12300 = vmatpush3.bf16.msra.mxu1 %v12804_v54  ;;  %v1287_v33 = vor.u32 %v1286_v19, %v1282_v15  ;;  %16730 = vst [vmem:[#allocation13_spill] sm:$0xff] %v13509_v40  ;;  %v1570_v51 = vshrl.u32 %v13509_v40, 16  ;;  %v1572_v52 = vshll.u32 %v13509_v40, 16  ;;  %v1008_v53 = vor.u32 %v1007_v36, %v1003_v18  ;;  %739 = vst [vmem:[#allocation2 + $0x34] sm:$0xf] %v618_v11 }
  0x7b   : > { %12301 = vmatprep.subr.bf16.mxu1 %v12806_v1  ;;  %v1315_v54 = vrot.slane %v1313_v45, 1  ;;  %v1175_v55 = vrot.slane %v1173_v48, 1  ;;  %v1178_v56 = vshll.u32 %v12810_v37, 16  ;;  %v1182_v57 = vshrl.u32 %v12810_v37, 16  ;;  %12347 = vmatprep.subr.bf16.mxu0 %v12827_v26 }
  0x7c   : > { %v13512_v50 = vsel %vm959_vm6, %v1287_v33, %v1291_v0  ;;  %v1574_v58 = vrot.slane %v1572_v52, 1  ;;  %v13519_v60 = vsel %vm959_vm6, %v1008_v53, %v1012_v41  ;;  %v1248_v0 = vshll.u32 %v13489_v63, 16  ;;  %12348 = vmatpush3.bf16.msra.mxu0 %v12827_v26 }
  0x7d   : > { %1905 = vmatprep.mubr.bf16.mxu0 %v13512_v50  ;;  %v1306_v2 = vshrl.u32 %v13519_v60, 16  ;;  %v1176_v6 = vor.u32 %v1175_v55, %v1171_v38  ;;  %v1180_v7 = vrot.slane %v1178_v56, 1  ;;  %v1601_v15 = vshll.u32 %v1182_v57, 16 }
  0x7e   : > { %12302 = vmatpush3.bf16.msra.mxu1 %v12806_v1  ;;  %1906 = vmatmul.mubr.bf16.gmra.mxu0 %v13495_v5  ;;  %v1308_v1 = vshll.u32 %v13519_v60, 16  ;;  %v1575_v8 = vor.u32 %v1574_v58, %v1570_v51  ;;  %v619_v12 = vrot.slane %v617_v61, 4  ;;  %v1250_v24 = vrot.slane %v1248_v0, 1 }
  0x7f   : > { %12303 = vmatprep.subr.bf16.mxu1 %v12811_v46  ;;  %v13528_v19 = vsel %vm959_vm6, %v1176_v6, %v1180_v7  ;;  %v1253_v25 = vshll.u32 %v1186_v20, 16  ;;  %v381_v36 = vsel %vm13351_vm2, 0, %v380_v14  ;;  %v620_v37 = vrot.slane %v541_v16, 7 }
  0x80   : > { %v1310_v18 = vrot.slane %v1308_v1, 1  ;;  %16731 = vst [vmem:[#allocation14_spill] sm:$0xff] %v13528_v19  ;;  %v13533_v28 = vsel %vm959_vm6, %v1575_v8, %v1579_v35  ;;  %v1594_v29 = vshrl.u32 %v13528_v19, 16  ;;  %v1596_v30 = vshll.u32 %v13528_v19, 16  ;;  %740 = vst [vmem:[#allocation2 + $0x38] sm:$0x1] %v619_v12 }
  0x81   : > { %16732 = vst [vmem:[#allocation15_spill] sm:$0xff] %v13533_v28  ;;  %2001 = vmatprep.mubr.bf16.mxu1 %v13533_v28  ;;  %v1251_v33 = vor.u32 %v1250_v24, %v1246_v4  ;;  %v1189_v35 = vrot.slane %v13409_v22, 1  ;;  %v1255_v41 = vrot.slane %v1253_v25, 1  ;;  %382 = vst [vmem:[#allocation2 + $0x44] sm:$0x3] %v381_v36  ;;  %v622_v63 = vrot.slane %v542_v31, 7 }
  0x82   : > { %12304 = vmatpush3.bf16.msra.mxu1 %v12811_v46  ;;  %v1311_v32 = vor.u32 %v1310_v18, %v1306_v2  ;;  %v1603_v46 = vrot.slane %v1601_v15, 1  ;;  %v1598_v20 = vrot.slane %v1596_v30, 1  ;;  %v1191_v21 = vrot.slane %v13465_v39, 1  ;;  %741 = vst [vmem:[#allocation2 + $0x3c] sm:$0xe] %v620_v37  ;;  %v13557_v39 = vld [vmem:[#allocation2 + $0x30] sm:$0xff]  }
  0x83   : > { %12305 = vmatprep.subr.bf16.mxu1 %v12812_v47  ;;  %2002 = vmatmul.mubr.bf16.gmra.mxu1 %v13509_v40  ;;  %v1190_v45 = vsel %vm1184_vm7, %v1188_v44, %v1189_v35  ;;  %v1277_v22 = vshll.u32 %v1189_v35, 16  ;;  %v621_v48 = vrot.slane %v620_v37, 4  ;;  %v624_v52 = vrot.slane %v622_v63, 4  ;;  %v543_v8 = vld [vmem:[%s13359_s24 + $0x28] sm:$0xf] }
  0x84   : > { %v13547_v38 = vsel %vm959_vm6, %v1311_v32, %v1315_v54  ;;  %v1599_v4 = vor.u32 %v1598_v20, %v1594_v29  ;;  %v1270_v49 = vshrl.u32 %v1190_v45, 16  ;;  %v1272_v51 = vshll.u32 %v1190_v45, 16  ;;  %v385_v54 = vld [vmem:[#allocation2 + $0x50] sm:$0x3]  ;;  %v12817_v44 = vld [vmem:[#allocation4 + $0xf8] sm:$0xff]  }
  0x85   : > { %1913 = vmatprep.mubr.bf16.mxu0 %v13547_v38  ;;  %v1192_v53 = vrot.slane %v13473_v43, 1  ;;  %v1279_v56 = vrot.slane %v1277_v22, 1  ;;  %v623_v57 = vsel %vm13372_vm5, %v621_v48, %v622_v63  ;;  %v1194_v58 = vrot.slane %v13497_v9, 1  ;;  %743 = vst [vmem:[#allocation2 + $0x44] sm:$0x1] %v624_v52 }
  0x86   : > { %12306 = vmatpush3.bf16.msra.mxu1 %v12812_v47  ;;  %1914 = vmatmul.mubr.bf16.gmra.mxu0 %v13519_v60  ;;  %v13555_v55 = vsel %vm959_vm6, %v1599_v4, %v1603_v46  ;;  %v1256_v61 = vsel %vm959_vm6, %v1251_v33, %v1255_v41  ;;  %v1274_v43 = vrot.slane %v1272_v51, 1  ;;  %742 = vst [vmem:[#allocation2 + $0x40] sm:$0xf] %v623_v57  ;;  %v1017_v2 = vshrl.u32 %v13557_v39, 16  ;;  %v12838_v46 = vld [vmem:[#allocation4 + $0x150] sm:$0xff]  }
  0x87   : > { %11203 = vmatprep.subr.bf16.mxu1 %v12816_v13  ;;  %16733 = vst [vmem:[#allocation16_spill] sm:$0xff] %v13555_v55  ;;  %2009 = vmatprep.mubr.bf16.mxu1 %v13555_v55  ;;  %v13563_v47 = vld [vmem:[#allocation2 + $0x38] ss:$0 sps:$4 sm:$0x33]   ;;  %v1193_v0 = vsel %vm1184_vm7, %v1191_v21, %v1192_v53  ;;  %v1019_v1 = vshll.u32 %v13557_v39, 16  ;;  %v1301_v12 = vshll.u32 %v1192_v53, 16 }
  0x88   : > { %v1294_v6 = vshrl.u32 %v1193_v0, 16  ;;  %v1296_v7 = vshll.u32 %v1193_v0, 16  ;;  %v1024_v9 = vshll.u32 %v13563_v47, 16  ;;  %v1028_v15 = vshrl.u32 %v13563_v47, 16  ;;  %v12820_v4 = vld [vmem:[#allocation4 + $0x130] sm:$0xff]   ;;  %12349 = vmatprep.subr.bf16.mxu0 %v12838_v46 }
  0x89   : > { %v1275_v11 = vor.u32 %v1274_v43, %v1270_v49  ;;  %v1021_v13 = vrot.slane %v1019_v1, 1  ;;  %v1195_v16 = vrot.slane %v13501_v17, 1  ;;  %v386_v18 = vsel %vm13351_vm2, 0, %v385_v54  ;;  %v544_v17 = vld [vmem:[%s13359_s24 + $0x2c] sm:$0xf]  ;;  %12350 = vmatpush3.bf16.msra.mxu0 %v12838_v46 }
  0x8a   : > { %v1298_v14 = vrot.slane %v1296_v7, 1  ;;  %v1026_v24 = vrot.slane %v1024_v9, 1  ;;  %v1337_v25 = vshll.u32 %v1028_v15, 16  ;;  %v1303_v26 = vrot.slane %v1301_v12, 1  ;;  %387 = vst [vmem:[#allocation2 + $0x50] sm:$0x3] %v386_v18 }
  0x8b   : > { %2010 = vmatmul.mubr.bf16.gmra.mxu1 %v13528_v19  ;;  %v1022_v29 = vor.u32 %v1021_v13, %v1017_v2  ;;  %v1196_v31 = vsel %vm1184_vm7, %v1194_v58, %v1195_v16  ;;  %v1325_v32 = vshll.u32 %v1195_v16, 16  ;;  %v625_v36 = vrot.slane %v543_v8, 7  ;;  %v390_v57 = vld [vmem:[#allocation2 + $0x5c] sm:$0x3]  ;;  %v12821_v2 = vld [vmem:[#allocation4 + $0xf0] sm:$0xff]  }
  0x8c   : > { %12307 = vmatprep.mubr.bf16.mxu1 %v1256_v61  ;;  %v1299_v30 = vor.u32 %v1298_v14, %v1294_v6  ;;  %v1339_v33 = vrot.slane %v1337_v25, 1  ;;  %v1318_v20 = vshrl.u32 %v1196_v31, 16  ;;  %v1320_v35 = vshll.u32 %v1196_v31, 16  ;;  %v12819_v48 = vld [vmem:[#allocation2 + $0x44] ss:$0 sps:$4 sm:$0x33]  }
  0x8d   : > { %v13579_v37 = vsel %vm959_vm6, %v1022_v29, %v1026_v24  ;;  %v13582_v41 = vsel %vm959_vm6, %v1275_v11, %v1279_v56  ;;  %v12818_v63 = vld [vmem:[#allocation2 + $0x3c] sm:$0xff]   ;;  %v1327_v21 = vrot.slane %v1325_v32, 1  ;;  %744 = vst [vmem:[#allocation2 + $0x48] sm:$0xe] %v625_v36  ;;  %v626_v54 = vrot.slane %v625_v36, 4 }
  0x8e   : > { %v1330_v45 = vshrl.u32 %v13579_v37, 16  ;;  %v1332_v22 = vshll.u32 %v13579_v37, 16  ;;  %v13587_v49 = vsel %vm959_vm6, %v1299_v30, %v1303_v26  ;;  %v1322_v51 = vrot.slane %v1320_v35, 1  ;;  %v545_v1 = vld [vmem:[%s13359_s24 + $0x30] sm:$0xf]  ;;  %v12825_v15 = vld [vmem:[#allocation4 + $0x128] sm:$0xff]  }
  0x8f   : > { %v1031_v52 = vshrl.u32 %v12818_v63, 16  ;;  %v1033_v53 = vshll.u32 %v12818_v63, 16  ;;  %v627_v56 = vrot.slane %v544_v17, 7  ;;  %v1038_v61 = vshll.u32 %v12819_v48, 16  ;;  %v12845_v25 = vld [vmem:[#allocation4 + $0x148] sm:$0xff]  }
  0x90   : > { %v1334_v58 = vrot.slane %v1332_v22, 1  ;;  %v1042_v43 = vshrl.u32 %v12819_v48, 16  ;;  %v1323_v0 = vor.u32 %v1322_v51, %v1318_v20  ;;  %v1197_v9 = vrot.slane %v13557_v39, 1  ;;  %v12826_v20 = vld [vmem:[#allocation4 + $0xe8] sm:$0xff]   ;;  %12351 = vmatprep.subr.bf16.mxu0 %v12845_v25  ;;  %v12830_v51 = vld [vmem:[#allocation4 + $0x120] sm:$0xff]  }
  0x91   : > { %v1035_v6 = vrot.slane %v1033_v53, 1  ;;  %v628_v7 = vsel %vm13372_vm5, %v626_v54, %v627_v56  ;;  %v629_v8 = vrot.slane %v627_v56, 4  ;;  %v1040_v12 = vrot.slane %v1038_v61, 1  ;;  %12352 = vmatpush3.bf16.msra.mxu0 %v12845_v25 }
  0x92   : > { %v1335_v11 = vor.u32 %v1334_v58, %v1330_v45  ;;  %v13594_v13 = vshll.u32 %v1042_v43, 16  ;;  %v13598_v14 = vsel %vm959_vm6, %v1323_v0, %v1327_v21  ;;  %745 = vst [vmem:[#allocation2 + $0x4c] sm:$0xf] %v628_v7  ;;  %v1198_v18 = vrot.slane %v13563_v47, 1  ;;  %v395_v21 = vld [vmem:[#allocation2 + $0x68] sm:$0x3] }
  0x93   : > { %12308 = vmatmul.mubr.bf16.vlgmr.msra.gmra.mxu1 %v13582_v41  ;;  %v1036_v16 = vor.u32 %v1035_v6, %v1031_v52  ;;  %746 = vst [vmem:[#allocation2 + $0x50] sm:$0x1] %v629_v8  ;;  %v1200_v24 = vrot.slane %v12818_v63, 1  ;;  %v1201_v39 = vrot.slane %v12819_v48, 1  ;;  %v391_v30 = vsel %vm13351_vm2, 0, %v390_v57  ;;  %v12831_v57 = vld [vmem:[#allocation4 + $0xe0] sm:$0xff]  }
  0x94   : > { %11204 = vmatpush3.bf16.msra.mxu1 %v12817_v44  ;;  %12311 = vmatprep.mubr.bf16.mxu1 %v13587_v49  ;;  %v13602_v26 = vsel %vm959_vm6, %v1335_v11, %v1339_v33  ;;  %v1363_v29 = vrot.slane %v13594_v13, 1  ;;  %v630_v31 = vrot.slane %v545_v1, 7  ;;  %v1199_v46 = vsel %vm1184_vm7, %v1197_v9, %v1198_v18  ;;  %392 = vst [vmem:[#allocation2 + $0x5c] sm:$0x3] %v391_v30  ;;  %v546_v33 = vld [vmem:[%s13359_s24 + $0x34] sm:$0xf] }
  0x95   : > { %11205 = vmatprep.subr.bf16.mxu1 %v12820_v4  ;;  %1921 = vmatprep.mubr.bf16.mxu0 %v13602_v26  ;;  %v13609_v32 = vsel %vm959_vm6, %v1036_v16, %v1040_v12  ;;  %v1349_v47 = vshll.u32 %v1198_v18, 16  ;;  %v1202_v44 = vsel %vm1184_vm7, %v1200_v24, %v1201_v39  ;;  %v1342_v36 = vshrl.u32 %v1199_v46, 16  ;;  %v547_v58 = vld [vmem:[%s13359_s24 + $0x38] sm:$0xf]  ;;  %v548_v1 = vld [vmem:[%s13359_s24 + $0x3c] sm:$0xf] }
  0x96   : > { %1922 = vmatmul.mubr.bf16.gmra.mxu0 %v13579_v37  ;;  %v1354_v35 = vshrl.u32 %v13609_v32, 16  ;;  %v1356_v17 = vshll.u32 %v13609_v32, 16  ;;  %v1344_v63 = vshll.u32 %v1199_v46, 16  ;;  %747 = vst [vmem:[#allocation2 + $0x54] sm:$0xe] %v630_v31  ;;  %v1366_v45 = vshrl.u32 %v1202_v44, 16 }
  0x97   : > { %v1351_v4 = vrot.slane %v1349_v47, 1  ;;  %v1368_v22 = vshll.u32 %v1202_v44, 16  ;;  %v1373_v48 = vshll.u32 %v1201_v39, 16  ;;  %v631_v54 = vrot.slane %v630_v31, 4  ;;  %v400_v18 = vld [vmem:[#allocation2 + $0x74] sm:$0x3] }
  0x98   : > { %11206 = vmatpush3.bf16.msra.mxu1 %v12821_v2  ;;  %v1358_v52 = vrot.slane %v1356_v17, 1  ;;  %v1346_v53 = vrot.slane %v1344_v63, 1  ;;  %v632_v56 = vrot.slane %v546_v33, 7  ;;  %v396_v2 = vsel %vm13351_vm2, 0, %v395_v21  ;;  %v12836_v24 = vld [vmem:[#allocation4 + $0x118] sm:$0xff]  }
  0x99   : > { %11207 = vmatprep.subr.bf16.mxu1 %v12825_v15  ;;  %v12823_v61 = vld [vmem:[#allocation2 + $0x48] sm:$0xff]   ;;  %v1370_v43 = vrot.slane %v1368_v22, 1  ;;  %v1375_v0 = vrot.slane %v1373_v48, 1  ;;  %397 = vst [vmem:[#allocation2 + $0x68] sm:$0x3] %v396_v2  ;;  %v637_v63 = vrot.slane %v548_v1, 7 }
  0x9a   : > { %v1359_v6 = vor.u32 %v1358_v52, %v1354_v35  ;;  %v12824_v7 = vld [vmem:[#allocation2 + $0x50] ss:$0 sps:$4 sm:$0x33]   ;;  %v1347_v8 = vor.u32 %v1346_v53, %v1342_v36  ;;  %v633_v9 = vsel %vm13372_vm5, %v631_v54, %v632_v56  ;;  %v634_v15 = vrot.slane %v632_v56, 4  ;;  %v549_v46 = vld [vmem:[%s13359_s24 + $0x40] sm:$0xf] }
  0x9b   : > { %12312 = vmatmul.mubr.bf16.gmra.mxu1 %v13598_v14  ;;  %v1045_v11 = vshrl.u32 %v12823_v61, 16  ;;  %v1047_v12 = vshll.u32 %v12823_v61, 16  ;;  %v1371_v13 = vor.u32 %v1370_v43, %v1366_v45  ;;  %748 = vst [vmem:[#allocation2 + $0x58] sm:$0xf] %v633_v9  ;;  %v1203_v16 = vrot.slane %v12823_v61, 1  ;;  %v12837_v47 = vld [vmem:[#allocation4 + $0xd8] sm:$0xff]  }
  0x9c   : > { %11208 = vmatpush3.bf16.msra.mxu1 %v12826_v20  ;;  %v13625_v39 = vsel %vm959_vm6, %v1359_v6, %v1363_v29  ;;  %v1052_v25 = vshll.u32 %v12824_v7, 16  ;;  %v1056_v30 = vshrl.u32 %v12824_v7, 16  ;;  %v13628_v31 = vsel %vm959_vm6, %v1347_v8, %v1351_v4  ;;  %749 = vst [vmem:[#allocation2 + $0x5c] sm:$0x1] %v634_v15  ;;  %v12843_v29 = vld [vmem:[#allocation4 + $0x110] sm:$0xff]   ;;  %v12846_v2 = vld [vmem:[#allocation4 + $0x108] sm:$0xff]  }
  0x9d   : > { %11209 = vmatprep.subr.bf16.mxu1 %v12830_v51  ;;  %1929 = vmatprep.mubr.bf16.mxu0 %v13625_v39  ;;  %v1049_v44 = vrot.slane %v1047_v12, 1  ;;  %v13634_v20 = vsel %vm959_vm6, %v1371_v13, %v1375_v0  ;;  %v1204_v33 = vrot.slane %v12824_v7, 1  ;;  %v635_v35 = vrot.slane %v547_v58, 7  ;;  %v550_v61 = vld [vmem:[%s13359_s24 + $0x44] sm:$0xf] }
  0x9e   : > { %12315 = vmatprep.mubr.bf16.mxu1 %v13628_v31  ;;  %1930 = vmatmul.mubr.bf16.gmra.mxu0 %v13609_v32  ;;  %v1054_v17 = vrot.slane %v1052_v25, 1  ;;  %v1385_v36 = vshll.u32 %v1056_v30, 16  ;;  %v401_v21 = vsel %vm13351_vm2, 0, %v400_v18  ;;  %v639_v54 = vrot.slane %v637_v63, 4  ;;  %v12844_v0 = vld [vmem:[#allocation4 + $0xd0] sm:$0xff]   ;;  %v12850_v18 = vld [vmem:[#allocation4 + $0x140] sm:$0xff]  }
  0x9f   : > { %v1050_v4 = vor.u32 %v1049_v44, %v1045_v11  ;;  %v1205_v45 = vsel %vm1184_vm7, %v1203_v16, %v1204_v33  ;;  %v1397_v22 = vshll.u32 %v1204_v33, 16  ;;  %v636_v48 = vrot.slane %v635_v35, 4  ;;  %750 = vst [vmem:[#allocation2 + $0x60] sm:$0xe] %v635_v35  ;;  %402 = vst [vmem:[#allocation2 + $0x74] sm:$0x3] %v401_v21  ;;  %12353 = vmatprep.subr.bf16.mxu0 %v12850_v18 }
  0xa0   : > { %11210 = vmatpush3.bf16.msra.mxu1 %v12831_v57  ;;  %v1387_v51 = vrot.slane %v1385_v36, 1  ;;  %v1390_v52 = vshrl.u32 %v1205_v45, 16  ;;  %v1392_v53 = vshll.u32 %v1205_v45, 16  ;;  %v640_v43 = vrot.slane %v549_v46, 7  ;;  %752 = vst [vmem:[#allocation2 + $0x68] sm:$0x1] %v639_v54  ;;  %12354 = vmatpush3.bf16.msra.mxu0 %v12850_v18 }
  0xa1   : > { %11211 = vmatprep.subr.bf16.mxu1 %v12836_v24  ;;  %v13641_v56 = vsel %vm959_vm6, %v1050_v4, %v1054_v17  ;;  %v1399_v57 = vrot.slane %v1397_v22, 1  ;;  %v638_v58 = vsel %vm13372_vm5, %v636_v48, %v637_v63  ;;  %v12847_v44 = vld [vmem:[#allocation4 + $0xc8] sm:$0xff]   ;;  %v405_v36 = vld [vmem:[#allocation2 + $0x80] sm:$0x3]  ;;  %v551_v45 = vld [vmem:[%s13359_s24 + $0x48] sm:$0xf] }
  0xa2   : > { %v1378_v1 = vshrl.u32 %v13641_v56, 16  ;;  %v1380_v6 = vshll.u32 %v13641_v56, 16  ;;  %v12828_v7 = vld [vmem:[#allocation2 + $0x54] sm:$0xff]   ;;  %v1394_v8 = vrot.slane %v1392_v53, 1  ;;  %751 = vst [vmem:[#allocation2 + $0x64] sm:$0xf] %v638_v58 }
  0xa3   : > { %12316 = vmatmul.mubr.bf16.gmra.mxu1 %v13634_v20  ;;  %v12829_v9 = vld [vmem:[#allocation2 + $0x5c] ss:$0 sps:$4 sm:$0x33]   ;;  %v641_v15 = vrot.slane %v640_v43, 4  ;;  %753 = vst [vmem:[#allocation2 + $0x6c] sm:$0xe] %v640_v43 }
  0xa4   : > { %11212 = vmatpush3.bf16.msra.mxu1 %v12837_v47  ;;  %v1382_v11 = vrot.slane %v1380_v6, 1  ;;  %v1059_v12 = vshrl.u32 %v12828_v7, 16  ;;  %v1061_v13 = vshll.u32 %v12828_v7, 16  ;;  %v1395_v16 = vor.u32 %v1394_v8, %v1390_v52  ;;  %v12848_v22 = vld [vmem:[#allocation4 + $0x100] sm:$0xff]  }
  0xa5   : > { %11213 = vmatprep.subr.bf16.mxu1 %v12843_v29  ;;  %v1066_v24 = vshll.u32 %v12829_v9, 16  ;;  %v1070_v25 = vshrl.u32 %v12829_v9, 16  ;;  %v1206_v30 = vrot.slane %v12828_v7, 1  ;;  %v1207_v46 = vrot.slane %v12829_v9, 1 }
  0xa6   : > { %v1383_v33 = vor.u32 %v1382_v11, %v1378_v1  ;;  %v1063_v35 = vrot.slane %v1061_v13, 1  ;;  %v13650_v17 = vsel %vm959_vm6, %v1395_v16, %v1399_v57  ;;  %v642_v47 = vrot.slane %v550_v61, 7  ;;  %v12849_v57 = vld [vmem:[#allocation4 + $0xc0] sm:$0xff]   ;;  %v552_v11 = vld [vmem:[%s13359_s24 + $0x4c] sm:$0xf] }
  0xa7   : > { %v1068_v29 = vrot.slane %v1066_v24, 1  ;;  %v13652_v63 = vshll.u32 %v1070_v25, 16  ;;  %12319 = vmatprep.mubr.bf16.mxu1 %v13650_v17  ;;  %v1208_v21 = vsel %vm1184_vm7, %v1206_v30, %v1207_v46  ;;  %v1421_v4 = vshll.u32 %v1207_v46, 16  ;;  %v12833_v6 = vld [vmem:[#allocation2 + $0x68] ss:$0 sps:$4 sm:$0x33]  }
  0xa8   : > { %11214 = vmatpush3.bf16.msra.mxu1 %v12844_v0  ;;  %v13658_v48 = vsel %vm959_vm6, %v1383_v33, %v1387_v51  ;;  %v1064_v52 = vor.u32 %v1063_v35, %v1059_v12  ;;  %v1414_v53 = vshrl.u32 %v1208_v21, 16  ;;  %v1416_v54 = vshll.u32 %v1208_v21, 16  ;;  %v13664_v0 = vld [vmem:[#allocation4 + $0x238] sm:$0xff]  }
  0xa9   : > { %11215 = vmatprep.subr.bf16.mxu1 %v12846_v2  ;;  %1937 = vmatprep.mubr.bf16.mxu0 %v13658_v48  ;;  %v1411_v58 = vrot.slane %v13652_v63, 1  ;;  %v1423_v61 = vrot.slane %v1421_v4, 1  ;;  %v643_v43 = vsel %vm13372_vm5, %v641_v15, %v642_v47  ;;  %v12832_v1 = vld [vmem:[#allocation2 + $0x60] sm:$0xff]   ;;  %v644_v7 = vrot.slane %v642_v47, 4  ;;  %v410_v25 = vld [vmem:[#allocation2 + $0x8c] sm:$0x3] }
  0xaa   : > { %1938 = vmatmul.mubr.bf16.gmra.mxu0 %v13641_v56  ;;  %v13668_v51 = vsel %vm959_vm6, %v1064_v52, %v1068_v29  ;;  %v1418_v2 = vrot.slane %v1416_v54, 1  ;;  %754 = vst [vmem:[#allocation2 + $0x70] sm:$0xf] %v643_v43  ;;  %v406_v15 = vsel %vm13351_vm2, 0, %v405_v36  ;;  %v645_v12 = vrot.slane %v551_v45, 7  ;;  %v12852_v30 = vld [vmem:[#allocation4 + $0x1f8] sm:$0xff]  }
  0xab   : > { %v1402_v8 = vshrl.u32 %v13668_v51, 16  ;;  %v1404_v9 = vshll.u32 %v13668_v51, 16  ;;  %v1073_v16 = vshrl.u32 %v12832_v1, 16  ;;  %v1075_v18 = vshll.u32 %v12832_v1, 16  ;;  %755 = vst [vmem:[#allocation2 + $0x74] sm:$0x1] %v644_v7  ;;  %11339 = vmatprep.subr.bf16.mxu0 %v12852_v30 }
  0xac   : > { %11216 = vmatpush3.bf16.msra.mxu1 %v12847_v44  ;;  %v1419_v13 = vor.u32 %v1418_v2, %v1414_v53  ;;  %v1080_v24 = vshll.u32 %v12833_v6, 16  ;;  %407 = vst [vmem:[#allocation2 + $0x80] sm:$0x3] %v406_v15  ;;  %v1084_v44 = vshrl.u32 %v12833_v6, 16  ;;  %v1209_v33 = vrot.slane %v12832_v1, 1 }
  0xad   : > { %11217 = vmatprep.subr.bf16.mxu1 %v12848_v22  ;;  %v1406_v46 = vrot.slane %v1404_v9, 1  ;;  %v1210_v35 = vrot.slane %v12833_v6, 1  ;;  %756 = vst [vmem:[#allocation2 + $0x78] sm:$0xe] %v645_v12  ;;  %v1077_v36 = vrot.slane %v1075_v18, 1  ;;  %v646_v63 = vrot.slane %v645_v12, 4 }
  0xae   : > { %v13676_v47 = vsel %vm959_vm6, %v1419_v13, %v1423_v61  ;;  %v1082_v29 = vrot.slane %v1080_v24, 1  ;;  %v1433_v4 = vshll.u32 %v1084_v44, 16  ;;  %v647_v61 = vrot.slane %v552_v11, 7  ;;  %v553_v43 = vld [vmem:[%s13359_s24 + $0x50] sm:$0xf] }
  0xaf   : > { %v1407_v21 = vor.u32 %v1406_v46, %v1402_v8  ;;  %12320 = vmatmul.mubr.bf16.gmra.mxu1 %v13676_v47  ;;  %v1211_v45 = vsel %vm1184_vm7, %v1209_v33, %v1210_v35  ;;  %v1445_v22 = vshll.u32 %v1210_v35, 16  ;;  %v1078_v52 = vor.u32 %v1077_v36, %v1073_v16  ;;  %v554_v2 = vld [vmem:[%s13359_s24 + $0x54] sm:$0xf] }
  0xb0   : > { %11218 = vmatpush3.bf16.msra.mxu1 %v12849_v57  ;;  %v1438_v53 = vshrl.u32 %v1211_v45, 16  ;;  %v1440_v54 = vshll.u32 %v1211_v45, 16  ;;  %v1435_v57 = vrot.slane %v1433_v4, 1  ;;  %v411_v8 = vsel %vm13351_vm2, 0, %v410_v25  ;;  %v13095_v35 = vld [vmem:[#allocation2 + $0x90] sm:$0xff]  }
  0xb1   : > { %12387 = vmatprep.subr.bf16.mxu1 %v13664_v0  ;;  %v13684_v1 = vsel %vm959_vm6, %v1407_v21, %v1411_v58  ;;  %v1447_v6 = vrot.slane %v1445_v22, 1  ;;  %v12834_v7 = vld [vmem:[#allocation2 + $0x6c] sm:$0xff]   ;;  %v13690_v9 = vsel %vm959_vm6, %v1078_v52, %v1082_v29  ;;  %v648_v11 = vsel %vm13372_vm5, %v646_v63, %v647_v61  ;;  %412 = vst [vmem:[#allocation2 + $0x8c] sm:$0x3] %v411_v8 }
  0xb2   : > { %1945 = vmatprep.mubr.bf16.mxu0 %v13684_v1  ;;  %v1442_v15 = vrot.slane %v1440_v54, 1  ;;  %v649_v12 = vrot.slane %v647_v61, 4  ;;  %v1426_v58 = vshrl.u32 %v13690_v9, 16  ;;  %v1428_v13 = vshll.u32 %v13690_v9, 16  ;;  %757 = vst [vmem:[#allocation2 + $0x7c] sm:$0xf] %v648_v11 }
  0xb3   : > { %1946 = vmatmul.mubr.bf16.gmra.mxu0 %v13668_v51  ;;  %v1212_v16 = vrot.slane %v12834_v7, 1  ;;  %v1087_v18 = vshrl.u32 %v12834_v7, 16  ;;  %v12835_v25 = vld [vmem:[#allocation2 + $0x74] ss:$0 sps:$4 sm:$0x33]   ;;  %v1089_v30 = vshll.u32 %v12834_v7, 16 }
  0xb4   : > { %v1443_v24 = vor.u32 %v1442_v15, %v1438_v53  ;;  %758 = vst [vmem:[#allocation2 + $0x80] sm:$0x1] %v649_v12  ;;  %v1430_v46 = vrot.slane %v1428_v13, 1  ;;  %v650_v44 = vrot.slane %v553_v43, 7  ;;  %v652_v33 = vrot.slane %v554_v2, 7 }
  0xb5   : > { %v1221_v36 = vrot.slane %v13095_v35, 1  ;;  %v1094_v63 = vshll.u32 %v12835_v25, 16  ;;  %v1213_v21 = vrot.slane %v12835_v25, 1  ;;  %v1091_v4 = vrot.slane %v1089_v30, 1 }
  0xb6   : > { %v13698_v29 = vsel %vm959_vm6, %v1443_v24, %v1447_v6  ;;  %v1431_v45 = vor.u32 %v1430_v46, %v1426_v58  ;;  %v1098_v22 = vshrl.u32 %v12835_v25, 16  ;;  %v651_v52 = vrot.slane %v650_v44, 4  ;;  %759 = vst [vmem:[#allocation2 + $0x84] sm:$0xe] %v650_v44 }
  0xb7   : > { %12323 = vmatprep.mubr.bf16.mxu1 %v13698_v29  ;;  %v654_v53 = vrot.slane %v652_v33, 4  ;;  %v1096_v54 = vrot.slane %v1094_v63, 1  ;;  %v1214_v61 = vsel %vm1184_vm7, %v1212_v16, %v1213_v21  ;;  %v1469_v43 = vshll.u32 %v1213_v21, 16  ;;  %v13096_v16 = vld [vmem:[#allocation2 + $0x98] ss:$0 sps:$4 sm:$0x33]  }
  0xb8   : > { %v1092_v2 = vor.u32 %v1091_v4, %v1087_v18  ;;  %v13703_v7 = vsel %vm959_vm6, %v1431_v45, %v1435_v57  ;;  %v1462_v6 = vshrl.u32 %v1214_v61, 16  ;;  %v1464_v8 = vshll.u32 %v1214_v61, 16 }
  0xb9   : > { %v1457_v15 = vshll.u32 %v1098_v22, 16  ;;  %761 = vst [vmem:[#allocation2 + $0x8c] sm:$0x1] %v654_v53  ;;  %1953 = vmatprep.mubr.bf16.mxu0 %v13703_v7  ;;  %v1471_v11 = vrot.slane %v1469_v43, 1  ;;  %v12839_v58 = vld [vmem:[#allocation2 + $0x78] sm:$0xff]   ;;  %v653_v13 = vsel %vm13372_vm5, %v651_v52, %v652_v33  ;;  %v1222_v24 = vrot.slane %v13096_v16, 1 }
  0xba   : > { %v13707_v12 = vsel %vm959_vm6, %v1092_v2, %v1096_v54  ;;  %v1466_v57 = vrot.slane %v1464_v8, 1  ;;  %760 = vst [vmem:[#allocation2 + $0x88] sm:$0xf] %v653_v13  ;;  %v1215_v44 = vrot.slane %v12839_v58, 1  ;;  %v1101_v35 = vshrl.u32 %v12839_v58, 16 }
  0xbb   : > { %1954 = vmatmul.mubr.bf16.gmra.mxu0 %v13690_v9  ;;  %v1450_v18 = vshrl.u32 %v13707_v12, 16  ;;  %v1452_v25 = vshll.u32 %v13707_v12, 16  ;;  %v1459_v30 = vrot.slane %v1457_v15, 1  ;;  %v12840_v46 = vld [vmem:[#allocation2 + $0x80] ss:$0 sps:$4 sm:$0x33]   ;;  %v1223_v21 = vsel %vm1184_vm7, %v1221_v36, %v1222_v24 }
  0xbc   : > { %v1103_v63 = vshll.u32 %v12839_v58, 16  ;;  %v1467_v4 = vor.u32 %v1466_v57, %v1462_v6  ;;  %v1534_v33 = vshrl.u32 %v1223_v21, 16  ;;  %v1536_v22 = vshll.u32 %v1223_v21, 16 }
  0xbd   : > { %v1454_v45 = vrot.slane %v1452_v25, 1  ;;  %v1108_v52 = vshll.u32 %v12840_v46, 16  ;;  %v1216_v53 = vrot.slane %v12840_v46, 1  ;;  %v1112_v61 = vshrl.u32 %v12840_v46, 16 }
  0xbe   : > { %v1105_v54 = vrot.slane %v1103_v63, 1  ;;  %v13716_v43 = vsel %vm959_vm6, %v1467_v4, %v1471_v11  ;;  %v1538_v8 = vrot.slane %v1536_v22, 1  ;;  %v1541_v15 = vshll.u32 %v1222_v24, 16 }
  0xbf   : > { %v1455_v2 = vor.u32 %v1454_v45, %v1450_v18  ;;  %12324 = vmatmul.mubr.bf16.gmra.mxu1 %v13716_v43  ;;  %v1110_v13 = vrot.slane %v1108_v52, 1  ;;  %v1217_v58 = vsel %vm1184_vm7, %v1215_v44, %v1216_v53  ;;  %v1493_v36 = vshll.u32 %v1216_v53, 16 }
  0xc0   : > { %v1106_v6 = vor.u32 %v1105_v54, %v1101_v35  ;;  %v1486_v57 = vshrl.u32 %v1217_v58, 16  ;;  %v1488_v25 = vshll.u32 %v1217_v58, 16  ;;  %v12842_v63 = vld [vmem:[#allocation2 + $0x8c] ss:$0 sps:$4 sm:$0x33]   ;;  %v1481_v24 = vshll.u32 %v1112_v61, 16 }
  0xc1   : > { %v13721_v16 = vsel %vm959_vm6, %v1455_v2, %v1459_v30  ;;  %v12841_v11 = vld [vmem:[#allocation2 + $0x84] sm:$0xff]   ;;  %v1495_v21 = vrot.slane %v1493_v36, 1  ;;  %v1219_v44 = vrot.slane %v12842_v63, 1  ;;  %v1539_v4 = vor.u32 %v1538_v8, %v1534_v33  ;;  %v13097_v2 = vld [vmem:[#allocation2 + $0x9c] sm:$0xff]  }
  0xc2   : > { %1961 = vmatprep.mubr.bf16.mxu0 %v13721_v16  ;;  %v13725_v18 = vsel %vm959_vm6, %v1106_v6, %v1110_v13  ;;  %v1490_v46 = vrot.slane %v1488_v25, 1  ;;  %v1218_v35 = vrot.slane %v12841_v11, 1  ;;  %v1543_v22 = vrot.slane %v1541_v15, 1  ;;  %v13098_v36 = vld [vmem:[#allocation2 + $0xa4] ss:$0 sps:$4 sm:$0x33]  }
  0xc3   : > { %1962 = vmatmul.mubr.bf16.gmra.mxu0 %v13707_v12  ;;  %v1474_v30 = vshrl.u32 %v13725_v18, 16  ;;  %v1476_v45 = vshll.u32 %v13725_v18, 16  ;;  %v1122_v53 = vshll.u32 %v12842_v63, 16  ;;  %v1517_v54 = vshll.u32 %v1219_v44, 16 }
  0xc4   : > { %v1491_v52 = vor.u32 %v1490_v46, %v1486_v57  ;;  %v1224_v58 = vrot.slane %v13097_v2, 1  ;;  %v1220_v13 = vsel %vm1184_vm7, %v1218_v35, %v1219_v44  ;;  %v1483_v6 = vrot.slane %v1481_v24, 1 }
  0xc5   : > { %v1478_v61 = vrot.slane %v1476_v45, 1  ;;  %v1225_v25 = vrot.slane %v13098_v36, 1  ;;  %v1510_v33 = vshrl.u32 %v1220_v13, 16  ;;  %v1512_v8 = vshll.u32 %v1220_v13, 16 }
  0xc6   : > { %v13732_v19 = vsel %vm959_vm6, %v1491_v52, %v1495_v21  ;;  %v1115_v55 = vshrl.u32 %v12841_v11, 16  ;;  %v1519_v15 = vrot.slane %v1517_v54, 1  ;;  %v1117_v40 = vshll.u32 %v12841_v11, 16  ;;  %v13099_v52 = vld [vmem:[#allocation2 + $0xa8] sm:$0xff]  }
  0xc7   : > { %12327 = vmatprep.mubr.bf16.mxu1 %v13732_v19  ;;  %v1479_v57 = vor.u32 %v1478_v61, %v1474_v30  ;;  %v1226_v46 = vsel %vm1184_vm7, %v1224_v58, %v1225_v25  ;;  %v1514_v2 = vrot.slane %v1512_v8, 1  ;;  %v1565_v44 = vshll.u32 %v1225_v25, 16  ;;  %v13100_v30 = vld [vmem:[#allocation2 + $0xb0] ss:$0 sps:$4 sm:$0x33]  }
  0xc8   : > { %v1560_v28 = vshll.u32 %v1226_v46, 16  ;;  %v1126_v35 = vshrl.u32 %v12842_v63, 16  ;;  %v1124_v24 = vrot.slane %v1122_v53, 1  ;;  %v1119_v21 = vrot.slane %v1117_v40, 1  ;;  %v13101_v53 = vld [vmem:[#allocation2 + $0xb4] sm:$0xff]  }
  0xc9   : > { %v13737_v45 = vsel %vm959_vm6, %v1479_v57, %v1483_v6  ;;  %v1227_v36 = vrot.slane %v13099_v52, 1  ;;  %v1515_v13 = vor.u32 %v1514_v2, %v1510_v33  ;;  %v1558_v3 = vshrl.u32 %v1226_v46, 16  ;;  %v13102_v6 = vld [vmem:[#allocation2 + $0xbc] ss:$0 sps:$4 sm:$0x33]  }
  0xca   : > { %1969 = vmatprep.mubr.bf16.mxu0 %v13737_v45  ;;  %v1562_v54 = vrot.slane %v1560_v28, 1  ;;  %v1228_v61 = vrot.slane %v13100_v30, 1  ;;  %v13741_v11 = vsel %vm959_vm6, %v1539_v4, %v1543_v22  ;;  %v1120_v63 = vor.u32 %v1119_v21, %v1115_v55 }
  0xcb   : > { %1970 = vmatmul.mubr.bf16.gmra.mxu0 %v13725_v18  ;;  %v1230_v58 = vrot.slane %v13101_v53, 1  ;;  %v1231_v25 = vrot.slane %v13102_v6, 1  ;;  %v13745_v40 = vsel %vm959_vm6, %v1515_v13, %v1519_v15  ;;  %v1567_v33 = vrot.slane %v1565_v44, 1  ;;  %v435_v6 = vld [vmem:[#allocation2 + $0xc8] sm:$0x3] }
  0xcc   : > { %v1505_v8 = vshll.u32 %v1126_v35, 16  ;;  %v1229_v57 = vsel %vm1184_vm7, %v1227_v36, %v1228_v61  ;;  %12328 = vmatmul.mubr.bf16.gmra.mxu1 %v13745_v40  ;;  %v13750_v28 = vsel %vm959_vm6, %v1120_v63, %v1124_v24  ;;  %v1589_v46 = vshll.u32 %v1228_v61, 16 }
  0xcd   : > { %v1582_v4 = vshrl.u32 %v1229_v57, 16  ;;  %v1584_v22 = vshll.u32 %v1229_v57, 16  ;;  %12331 = vmatprep.mubr.bf16.mxu1 %v13741_v11  ;;  %v1563_v55 = vor.u32 %v1562_v54, %v1558_v3  ;;  %v1498_v2 = vshrl.u32 %v13750_v28, 16  ;;  %v563_v57 = vld [vmem:[%s13359_s24 + $0x78] sm:$0xf] }
  0xce   : > { %v1500_v15 = vshll.u32 %v13750_v28, 16  ;;  %v1232_v44 = vsel %vm1184_vm7, %v1230_v58, %v1231_v25  ;;  %v1591_v21 = vrot.slane %v1589_v46, 1  ;;  %v1507_v13 = vrot.slane %v1505_v8, 1 }
  0xcf   : > { %v1586_v35 = vrot.slane %v1584_v22, 1  ;;  %v1608_v52 = vshll.u32 %v1232_v44, 16  ;;  %v1606_v24 = vshrl.u32 %v1232_v44, 16  ;;  %v13757_v61 = vsel %vm959_vm6, %v1563_v55, %v1567_v33  ;;  %v12853_v44 = vld [vmem:[#allocation4 + $0x1b8] sm:$0xff]  }
  0xd0   : > { %v1502_v36 = vrot.slane %v1500_v15, 1  ;;  %v1613_v54 = vshll.u32 %v1231_v25, 16  ;;  %v436_v25 = vsel %vm13351_vm2, 0, %v435_v6  ;;  %v675_v22 = vrot.slane %v563_v57, 7 }
  0xd1   : > { %v1587_v30 = vor.u32 %v1586_v35, %v1582_v4  ;;  %v1610_v3 = vrot.slane %v1608_v52, 1  ;;  %v564_v4 = vld [vmem:[%s13359_s24 + $0x7c] sm:$0xf]  ;;  %437 = vst [vmem:[#allocation2 + $0xc8] sm:$0x3] %v436_v25  ;;  %v12855_v52 = vld [vmem:[#allocation4 + $0x1b0] sm:$0xff]  }
  0xd2   : > { %v1503_v63 = vor.u32 %v1502_v36, %v1498_v2  ;;  %v1615_v8 = vrot.slane %v1613_v54, 1  ;;  %v677_v46 = vrot.slane %v564_v4, 7  ;;  %v676_v55 = vrot.slane %v675_v22, 4  ;;  %774 = vst [vmem:[#allocation2 + $0xc0] sm:$0xe] %v675_v22  ;;  %v12856_v36 = vld [vmem:[#allocation4 + $0x230] sm:$0xff]  }
  0xd3   : > { %v13760_v53 = vsel %vm959_vm6, %v1587_v30, %v1591_v21  ;;  %v1611_v33 = vor.u32 %v1610_v3, %v1606_v24  ;;  %v12854_v21 = vld [vmem:[#allocation4 + $0x1f0] sm:$0xff]   ;;  %v12859_v24 = vld [vmem:[#allocation4 + $0x1e0] sm:$0xff]   ;;  %v12862_v3 = vld [vmem:[#allocation4 + $0x1d8] sm:$0xff]  }
  0xd4   : > { %v13763_v58 = vsel %vm959_vm6, %v1503_v63, %v1507_v13  ;;  %12332 = vmatmul.mubr.bf16.gmra.mxu1 %v13757_v61  ;;  %v679_v2 = vrot.slane %v677_v46, 4  ;;  %v678_v35 = vsel %vm13372_vm5, %v676_v55, %v677_v46  ;;  %v12858_v13 = vld [vmem:[#allocation4 + $0x1a8] sm:$0xff]   ;;  %v12864_v25 = vld [vmem:[#allocation4 + $0x1d0] sm:$0xff]   ;;  %v12873_v22 = vld [vmem:[#allocation4 + $0x218] sm:$0xff]  }
  0xd5   : > { %1977 = vmatprep.mubr.bf16.mxu0 %v13763_v58  ;;  %12335 = vmatprep.mubr.bf16.mxu1 %v13760_v53  ;;  %v13775_v15 = vsel %vm959_vm6, %v1611_v33, %v1615_v8  ;;  %775 = vst [vmem:[#allocation2 + $0xc4] sm:$0xf] %v678_v35  ;;  %v12861_v63 = vld [vmem:[#allocation4 + $0x228] sm:$0xff]   ;;  %v12863_v33 = vld [vmem:[#allocation4 + $0x198] sm:$0xff]   ;;  %v12865_v46 = vld [vmem:[#allocation4 + $0x190] sm:$0xff]  }
  0xd6   : > { %1978 = vmatmul.mubr.bf16.gmra.mxu0 %v13750_v28  ;;  %776 = vst [vmem:[#allocation2 + $0xc8] sm:$0x1] %v679_v2  ;;  %v12874_v35 = vld [vmem:[#allocation4 + $0x210] sm:$0xff]  }
  0xd7   : > { %12355 = vmatprep.mubr.bf16.mxu0 %v13582_v41  ;;  %v12857_v41 = vld [vmem:[#allocation4 + $0x1e8] sm:$0xff]  }
  0xdc   : > { %12336 = vmatmul.mubr.bf16.gmra.mxu1 %v13775_v15  ;;  %v13790_v54 = vld [vmem:[#allocation2 + $0xc0] sm:$0xff]  }
  0xdd   : > { %2488 = vmatprep.mubr.bf16.mxu1 %v13462_v34  ;;  %v13783_v30 = vld [vmem:[#allocation2 + $0xc8] ss:$0 sps:$4 sm:$0x33]   ;;  %v12860_v34 = vld [vmem:[#allocation4 + $0x1a0] sm:$0xff]   ;;  %v2233_v57 = vrot.slane %v13790_v54, 1  ;;  %v2220_v4 = vshrl.u32 %v13790_v54, 16 }
  0xde   : > { %12356 = vmatmul.mubr.bf16.vlgmr.msra.gmra.mxu0 %v13587_v49  ;;  %v2234_v6 = vrot.slane %v13783_v30, 1  ;;  %v2227_v8 = vshll.u32 %v13783_v30, 16 }
  0xdf   : > { %12359 = vmatprep.mubr.bf16.mxu0 %v13598_v14  ;;  %11340 = vmatpush3.bf16.msra.mxu0 %v12853_v44  ;;  %v12867_v44 = vld [vmem:[#allocation4 + $0x1c8] sm:$0xff]  }
  0xe0   : > { %11341 = vmatprep.subr.bf16.mxu0 %v12854_v21  ;;  %v2256_v55 = vshll.u32 %v2234_v6, 16  ;;  %v12868_v21 = vld [vmem:[#allocation4 + $0x188] sm:$0xff]  }
  0xe3   : > { %11342 = vmatpush3.bf16.msra.mxu0 %v12855_v52  ;;  %v12871_v52 = vld [vmem:[#allocation4 + $0x1c0] sm:$0xff]  }
  0xe4   : > { %11343 = vmatprep.subr.bf16.mxu0 %v12857_v41  ;;  %2489 = vmatmul.mubr.bf16.vlgmr.msra.gmra.mxu1 %v13430_v59  ;;  %v12866_v59 = vld [vmem:[#allocation4 + $0x220] sm:$0xff]   ;;  %v12875_v41 = vld [vmem:[#allocation4 + $0x208] sm:$0xff]  }
  0xe5   : > { %12388 = vmatpush3.bf16.msra.mxu1 %v13664_v0  ;;  %2496 = vmatprep.mubr.bf16.mxu1 %v13512_v50  ;;  %v2222_v0 = vshll.u32 %v13790_v54, 16 }
  0xe6   : > { %12360 = vmatmul.mubr.bf16.gmra.mxu0 %v13628_v31  ;;  %12389 = vmatprep.subr.bf16.mxu1 %v12856_v36 }
  0xe7   : > { %12363 = vmatprep.mubr.bf16.mxu0 %v13634_v20  ;;  %11344 = vmatpush3.bf16.msra.mxu0 %v12858_v13  ;;  %v2224_v2 = vrot.slane %v2222_v0, 1  ;;  %v12876_v13 = vld [vmem:[#allocation4 + $0x200] sm:$0xff]  }
  0xe8   : > { %11345 = vmatprep.subr.bf16.mxu0 %v12859_v24  ;;  %v2235_v24 = vsel %vm1184_vm7, %v2233_v57, %v2234_v6  ;;  %v2229_v6 = vrot.slane %v2227_v8, 1 }
  0xe9   : > { %12390 = vmatpush3.bf16.msra.mxu1 %v12856_v36  ;;  %v12872_v36 = vld [vmem:[#allocation4 + $0x180] sm:$0xff]   ;;  %v2249_v54 = vshrl.u32 %v2235_v24, 16 }
  0xea   : > { %12391 = vmatprep.subr.bf16.mxu1 %v12861_v63 }
  0xeb   : > { %11346 = vmatpush3.bf16.msra.mxu0 %v12860_v34  ;;  %v440_v34 = vld [vmem:[#allocation2 + $0xd4] sm:$0x3] }
  0xec   : > { %2497 = vmatmul.mubr.bf16.gmra.mxu1 %v13495_v5  ;;  %11347 = vmatprep.subr.bf16.mxu0 %v12862_v3  ;;  %v441_v3 = vsel %vm13351_vm2, 0, %v440_v34 }
  0xed   : > { %2504 = vmatprep.mubr.bf16.mxu1 %v13547_v38  ;;  %12392 = vmatpush3.bf16.msra.mxu1 %v12861_v63  ;;  %v2251_v63 = vshll.u32 %v2235_v24, 16  ;;  %442 = vst [vmem:[#allocation2 + $0xd4] sm:$0x3] %v441_v3 }
  0xee   : > { %12364 = vmatmul.mubr.bf16.gmra.mxu0 %v13650_v17  ;;  %12393 = vmatprep.subr.bf16.mxu1 %v12866_v59 }
  0xef   : > { %12367 = vmatprep.mubr.bf16.mxu0 %v13676_v47  ;;  %11348 = vmatpush3.bf16.msra.mxu0 %v12863_v33  ;;  %v2225_v33 = vor.u32 %v2224_v2, %v2220_v4 }
  0xf0   : > { %11349 = vmatprep.subr.bf16.mxu0 %v12864_v25  ;;  %v2258_v25 = vrot.slane %v2256_v55, 1 }
  0xf1   : > { %12394 = vmatpush3.bf16.msra.mxu1 %v12866_v59  ;;  %v2253_v59 = vrot.slane %v2251_v63, 1  ;;  %v13821_v57 = vsel %vm959_vm6, %v2225_v33, %v2229_v6 }
  0xf2   : > { %12395 = vmatprep.subr.bf16.mxu1 %v12873_v22  ;;  %v2239_v8 = vshll.u32 %v13821_v57, 16  ;;  %v2237_v55 = vshrl.u32 %v13821_v57, 16 }
  0xf3   : > { %11350 = vmatpush3.bf16.msra.mxu0 %v12865_v46  ;;  %v2254_v0 = vor.u32 %v2253_v59, %v2249_v54  ;;  %v2231_v46 = vshrl.u32 %v13783_v30, 16 }
  0xf4   : > { %2505 = vmatmul.mubr.bf16.gmra.mxu1 %v13519_v60  ;;  %11351 = vmatprep.subr.bf16.mxu0 %v12867_v44  ;;  %v13835_v2 = vrot.slane %v2239_v8, 1 }
  0xf5   : > { %2512 = vmatprep.mubr.bf16.mxu1 %v13602_v26  ;;  %12396 = vmatpush3.bf16.msra.mxu1 %v12873_v22  ;;  %v13824_v22 = vsel %vm959_vm6, %v2254_v0, %v2258_v25  ;;  %v13832_v4 = vshll.u32 %v2231_v46, 16 }
  0xf6   : > { %12368 = vmatmul.mubr.bf16.gmra.mxu0 %v13698_v29  ;;  %12397 = vmatprep.subr.bf16.mxu1 %v12874_v35 }
  0xf7   : > { %12371 = vmatprep.mubr.bf16.mxu0 %v13716_v43  ;;  %11352 = vmatpush3.bf16.msra.mxu0 %v12868_v21 }
  0xf8   : > { %11353 = vmatprep.subr.bf16.mxu0 %v12871_v52 }
  0xf9   : > { %12398 = vmatpush3.bf16.msra.mxu1 %v12874_v35 }
  0xfa   : > { %12399 = vmatprep.subr.bf16.mxu1 %v12875_v41 }
  0xfb   : > { %11354 = vmatpush3.bf16.msra.mxu0 %v12872_v36 }
  0xfc   : > { %2513 = vmatmul.mubr.bf16.gmra.mxu1 %v13579_v37 }
  0xfd   : > { %2520 = vmatprep.mubr.bf16.mxu1 %v13625_v39  ;;  %12400 = vmatpush3.bf16.msra.mxu1 %v12875_v41 }
  0xfe   : > { %12372 = vmatmul.mubr.bf16.gmra.mxu0 %v13732_v19  ;;  %12401 = vmatprep.subr.bf16.mxu1 %v12876_v13 }
  0xff   : > { %12375 = vmatprep.mubr.bf16.mxu0 %v13745_v40 }
 0x101   : > { %12402 = vmatpush3.bf16.msra.mxu1 %v12876_v13 }
 0x104   : > { %2521 = vmatmul.mubr.bf16.gmra.mxu1 %v13609_v32 }
 0x105   : > { %2528 = vmatprep.mubr.bf16.mxu1 %v13658_v48 }
 0x106   : > { %12376 = vmatmul.mubr.bf16.gmra.mxu0 %v13741_v11 }
 0x107   : > { %12379 = vmatprep.mubr.bf16.mxu0 %v13757_v61 }
 0x10c   : > { %2529 = vmatmul.mubr.bf16.gmra.mxu1 %v13641_v56 }
 0x10d   : > { %2536 = vmatprep.mubr.bf16.mxu1 %v13684_v1 }
 0x10e   : > { %12380 = vmatmul.mubr.bf16.gmra.mxu0 %v13760_v53 }
 0x10f   : > { %12383 = vmatprep.mubr.bf16.mxu0 %v13775_v15 }
 0x114   : > { %2537 = vmatmul.mubr.bf16.gmra.mxu1 %v13668_v51 }
 0x115   : > { %2544 = vmatprep.mubr.bf16.mxu1 %v13703_v7 }
 0x116   : > { %12384 = vmatmul.mubr.bf16.gmra.mxu0 %v13824_v22 }
 0x117   : > { %3151 = vmatprep.mubr.bf16.mxu0 %v13512_v50 }
 0x11c   : > { %2545 = vmatmul.mubr.bf16.gmra.mxu1 %v13690_v9 }
 0x11d   : > { %2552 = vmatprep.mubr.bf16.mxu1 %v13721_v16 }
 0x11e   : > { %3152 = vmatmul.mubr.bf16.vlgmr.msra.gmra.mxu0 %v13495_v5 }
 0x11f   : > { %3159 = vmatprep.mubr.bf16.mxu0 %v13547_v38 }
 0x124   : > { %2553 = vmatmul.mubr.bf16.gmra.mxu1 %v13707_v12 }
 0x125   : > { %v11083_v44 = vpop.f32.mrf.mxu0  ;;  %2560 = vmatprep.mubr.bf16.mxu1 %v13737_v45 }
 0x126   : > { %3160 = vmatmul.mubr.bf16.gmra.mxu0 %v13519_v60 }
 0x127   : > { %v11084_v30 = vpop.f32.mrf.mxu0  ;;  %3167 = vmatprep.mubr.bf16.mxu0 %v13602_v26 }
 0x128   : > { %v13841_v35 = vadd.f32 %v11084_v30, %v11083_v44 }
 0x129   : > { %v11086_v21 = vpop.f32.mrf.mxu0  ;;  %v11155_v52 = vpop.f32.mrf.mxu1 }
 0x12b   : > { %v11087_v50 = vpop.f32.mrf.mxu0  ;;  %v11156_v36 = vpop.f32.mrf.mxu1 }
 0x12c   : > { %v13843_v41 = vadd.f32 %v11087_v50, %v11086_v21  ;;  %v13848_v13 = vadd.f32 %v11156_v36, %v11155_v52  ;;  %2561 = vmatmul.mubr.bf16.gmra.mxu1 %v13725_v18 }
 0x12d   : > { %v11158_v5 = vpop.f32.mrf.mxu1  ;;  %v11089_v24 = vpop.f32.mrf.mxu0  ;;  %2568 = vmatprep.mubr.bf16.mxu1 %v13763_v58 }
 0x12e   : > { %3168 = vmatmul.mubr.bf16.gmra.mxu0 %v13579_v37 }
 0x12f   : > { %v11159_v38 = vpop.f32.mrf.mxu1  ;;  %v11090_v3 = vpop.f32.mrf.mxu0  ;;  %3175 = vmatprep.mubr.bf16.mxu0 %v13625_v39 }
 0x130   : > { %v13851_v34 = vadd.f32 %v11159_v38, %v11158_v5  ;;  %v11091_v54 = vadd.f32 %v11090_v3, %v11089_v24  ;;  %v16734_v5 = vld [vmem:[#allocation12_spill] sm:$0xff]  ;;  %v16735_v24 = vld [vmem:[#allocation15_spill] sm:$0xff] }
 0x131   : > { %v11161_v63 = vpop.f32.mrf.mxu1  ;;  %v11092_v6 = vpop.f32.mrf.mxu0 }
 0x133   : > { %v11162_v59 = vpop.f32.mrf.mxu1  ;;  %v11093_v33 = vpop.f32.mrf.mxu0 }
 0x134   : > { %v13856_v60 = vadd.f32 %v11162_v59, %v11161_v63  ;;  %v11094_v0 = vadd.f32 %v11093_v33, %v11092_v6  ;;  %2569 = vmatmul.mubr.bf16.gmra.mxu1 %v13750_v28 }
 0x135   : > { %v11164_v26 = vpop.f32.mrf.mxu1  ;;  %2576 = vmatprep.mubr.bf16.mxu1 %v13437_v62 }
 0x136   : > { %3176 = vmatmul.mubr.bf16.gmra.mxu0 %v13609_v32 }
 0x137   : > { %v11165_v25 = vpop.f32.mrf.mxu1  ;;  %3183 = vmatprep.mubr.bf16.mxu0 %v13658_v48 }
 0x138   : > { %v13859_v46 = vadd.f32 %v11165_v25, %v11164_v26 }
 0x13c   : > { %2577 = vmatmul.mubr.bf16.gmra.mxu1 %v13413_v27 }
 0x13d   : > { %2584 = vmatprep.mubr.bf16.mxu1 %v13470_v42 }
 0x13e   : > { %v11095_v8 = vpop.f32.mrf.mxu0  ;;  %3184 = vmatmul.mubr.bf16.gmra.mxu0 %v13641_v56 }
 0x13f   : > { %3191 = vmatprep.mubr.bf16.mxu0 %v13684_v1 }
 0x140   : > { %v11096_v37 = vpop.f32.mrf.mxu0 }
 0x141   : > { %v11097_v44 = vadd.f32 %v11096_v37, %v11095_v8  ;;  %v16737_v37 = vld [vmem:[#allocation13_spill] sm:$0xff] }
 0x142   : > { %v11098_v39 = vpop.f32.mrf.mxu0 }
 0x143   : > { %v11167_v30 = vpop.f32.mrf.mxu1 }
 0x144   : > { %v11099_v21 = vpop.f32.mrf.mxu0  ;;  %2585 = vmatmul.mubr.bf16.gmra.mxu1 %v16734_v5 }
 0x145   : > { %v13869_v50 = vadd.f32 %v11099_v21, %v11098_v39  ;;  %v11168_v52 = vpop.f32.mrf.mxu1  ;;  %2592 = vmatprep.mubr.bf16.mxu1 %v16735_v24  ;;  %v16738_v39 = vld [vmem:[#allocation16_spill] sm:$0xff]  ;;  %v12879_v21 = vld [vmem:[#allocation6 + $0xb8] sm:$0xff]  }
 0x146   : > { %v13871_v32 = vadd.f32 %v11168_v52, %v11167_v30  ;;  %v11101_v48 = vpop.f32.mrf.mxu0  ;;  %3192 = vmatmul.mubr.bf16.gmra.mxu0 %v13668_v51  ;;  %v2242_v51 = vor.u32 %v13835_v2, %v2237_v55  ;;  %12435 = vmatprep.subr.bf16.mxu0 %v12879_v21  ;;  %v16739_v55 = vld [vmem:[#allocation14_spill] sm:$0xff] }
 0x147   : > { %v11170_v36 = vpop.f32.mrf.mxu1  ;;  %3199 = vmatprep.mubr.bf16.mxu0 %v13703_v7  ;;  %v2246_v7 = vrot.slane %v13832_v4, 1  ;;  %12436 = vmatpush3.bf16.msra.mxu0 %v12879_v21 }
 0x148   : > { %v11102_v38 = vpop.f32.mrf.mxu0 }
 0x149   : > { %v11171_v63 = vpop.f32.mrf.mxu1  ;;  %v11103_v3 = vadd.f32 %v11102_v38, %v11101_v48 }
 0x14a   : > { %v13876_v56 = vadd.f32 %v11171_v63, %v11170_v36  ;;  %v11104_v1 = vpop.f32.mrf.mxu0  ;;  %v13894_v63 = vsel %vm959_vm6, %v2242_v51, %v2246_v7 }
 0x14b   : > { %v11173_v59 = vpop.f32.mrf.mxu1 }
 0x14c   : > { %16736 = vst [vmem:[#allocation12_spill] sm:$0xff] %v13876_v56  ;;  %v11105_v6 = vpop.f32.mrf.mxu0  ;;  %2593 = vmatmul.mubr.bf16.gmra.mxu1 %v16737_v37 }
 0x14d   : > { %v11174_v26 = vpop.f32.mrf.mxu1  ;;  %v11106_v33 = vadd.f32 %v11105_v6, %v11104_v1  ;;  %2600 = vmatprep.mubr.bf16.mxu1 %v16738_v39 }
 0x14e   : > { %v13879_v25 = vadd.f32 %v11174_v26, %v11173_v59  ;;  %3200 = vmatmul.mubr.bf16.gmra.mxu0 %v13690_v9 }
 0x14f   : > { %v11176_v8 = vpop.f32.mrf.mxu1  ;;  %3207 = vmatprep.mubr.bf16.mxu0 %v13721_v16 }
 0x151   : > { %v11177_v30 = vpop.f32.mrf.mxu1 }
 0x152   : > { %v13888_v52 = vadd.f32 %v11177_v30, %v11176_v8 }
 0x153   : > { %v12309_v48 = vpop.f32.mrf.mxu1 }
 0x154   : > { %v13891_v36 = vadd.f32 %v12309_v48, %v11091_v54  ;;  %2601 = vmatmul.mubr.bf16.gmra.mxu1 %v16739_v55 }
 0x155   : > { %v2052_v38 = vpop.f32.mrf.mxu1  ;;  %2608 = vmatprep.mubr.bf16.mxu1 %v13894_v63 }
 0x156   : > { %v13897_v9 = vadd.f32 %v13841_v35, %v2052_v38  ;;  %v11107_v4 = vpop.f32.mrf.mxu0  ;;  %3208 = vmatmul.mubr.bf16.gmra.mxu0 %v13707_v12 }
 0x157   : > { %v12310_v1 = vpop.f32.mrf.mxu1  ;;  %3215 = vmatprep.mubr.bf16.mxu0 %v13737_v45  ;;  %v12880_v45 = vld [vmem:[#allocation6 + $0xb0] sm:$0xff]  }
 0x158   : > { %v13900_v2 = vadd.f32 %v12310_v1, %v11094_v0  ;;  %v11108_v54 = vpop.f32.mrf.mxu0  ;;  %12437 = vmatprep.subr.bf16.mxu0 %v12880_v45 }
 0x159   : > { %v2055_v16 = vpop.f32.mrf.mxu1  ;;  %v11109_v6 = vadd.f32 %v11108_v54, %v11107_v4  ;;  %12438 = vmatpush3.bf16.msra.mxu0 %v12880_v45 }
 0x15a   : > { %v13905_v59 = vadd.f32 %v13843_v41, %v2055_v16  ;;  %v11110_v26 = vpop.f32.mrf.mxu0 }
 0x15b   : > { %v12313_v35 = vpop.f32.mrf.mxu1 }
 0x15c   : > { %v13908_v8 = vadd.f32 %v12313_v35, %v11103_v3  ;;  %v11111_v21 = vpop.f32.mrf.mxu0  ;;  %2609 = vmatmul.mubr.bf16.gmra.mxu1 %v13821_v57 }
 0x15d   : > { %v2068_v30 = vpop.f32.mrf.mxu1  ;;  %v11112_v51 = vadd.f32 %v11111_v21, %v11110_v26  ;;  %12403 = vmatprep.mubr.bf16.mxu1 %v13587_v49 }
 0x15e   : > { %v13910_v0 = vadd.f32 %v11097_v44, %v2068_v30  ;;  %v11113_v12 = vpop.f32.mrf.mxu0  ;;  %3216 = vmatmul.mubr.bf16.gmra.mxu0 %v13725_v18 }
 0x15f   : > { %v12314_v7 = vpop.f32.mrf.mxu1  ;;  %3223 = vmatprep.mubr.bf16.mxu0 %v13763_v58 }
 0x160   : > { %v13913_v48 = vadd.f32 %v12314_v7, %v11106_v33  ;;  %v11114_v38 = vpop.f32.mrf.mxu0 }
 0x161   : > { %v2071_v41 = vpop.f32.mrf.mxu1  ;;  %v11115_v44 = vadd.f32 %v11114_v38, %v11113_v12  ;;  %v13935_v12 = vld [vmem:[#allocation2 + $0xcc] sm:$0xff]   ;;  %v13941_v38 = vld [vmem:[#allocation2 + $0xd4] ss:$0 sps:$4 sm:$0x33]  }
 0x162   : > { %v13918_v3 = vadd.f32 %v13869_v50, %v2071_v41  ;;  %v11116_v4 = vpop.f32.mrf.mxu0 }
 0x163   : > { %v12317_v1 = vpop.f32.mrf.mxu1 }
 0x164   : > { %v13921_v16 = vadd.f32 %v12317_v1, %v11115_v44  ;;  %v11117_v54 = vpop.f32.mrf.mxu0  ;;  %12404 = vmatmul.mubr.bf16.vlgmr.msra.gmra.mxu1 %v13598_v14 }
 0x165   : > { %v2084_v33 = vpop.f32.mrf.mxu1  ;;  %v11118_v35 = vadd.f32 %v11117_v54, %v11116_v4  ;;  %12407 = vmatprep.mubr.bf16.mxu1 %v13628_v31  ;;  %v12881_v31 = vld [vmem:[#allocation6 + $0xa8] sm:$0xff]  }
 0x166   : > { %v13923_v49 = vadd.f32 %v11109_v6, %v2084_v33  ;;  %3224 = vmatmul.mubr.bf16.gmra.mxu0 %v13750_v28  ;;  %12439 = vmatprep.subr.bf16.mxu0 %v12881_v31  ;;  %v2883_v33 = vshrl.u32 %v13935_v12, 16 }
 0x167   : > { %v12318_v26 = vpop.f32.mrf.mxu1  ;;  %3231 = vmatprep.mubr.bf16.mxu0 %v13437_v62  ;;  %12440 = vmatpush3.bf16.msra.mxu0 %v12881_v31 }
 0x168   : > { %v13927_v18 = vadd.f32 %v12318_v26, %v11118_v35  ;;  %v2890_v35 = vshll.u32 %v13941_v38, 16 }
 0x169   : > { %v2087_v58 = vpop.f32.mrf.mxu1 }
 0x16a   : > { %v13930_v50 = vadd.f32 %v11112_v51, %v2087_v58  ;;  %v11119_v30 = vpop.f32.mrf.mxu0 }
 0x16c   : > { %v11120_v21 = vpop.f32.mrf.mxu0  ;;  %12408 = vmatmul.mubr.bf16.gmra.mxu1 %v13634_v20 }
 0x16d   : > { %v11121_v7 = vadd.f32 %v11120_v21, %v11119_v30  ;;  %12411 = vmatprep.mubr.bf16.mxu1 %v13650_v17  ;;  %v2885_v17 = vshll.u32 %v13935_v12, 16 }
 0x16e   : > { %v11122_v6 = vpop.f32.mrf.mxu0  ;;  %3232 = vmatmul.mubr.bf16.gmra.mxu0 %v13413_v27 }
 0x16f   : > { %v12321_v14 = vpop.f32.mrf.mxu1  ;;  %3239 = vmatprep.mubr.bf16.mxu0 %v13470_v42  ;;  %v2887_v54 = vrot.slane %v2885_v17, 1 }
 0x170   : > { %v11123_v41 = vpop.f32.mrf.mxu0 }
 0x171   : > { %v11124_v28 = vadd.f32 %v11123_v41, %v11122_v6  ;;  %v2100_v51 = vpop.f32.mrf.mxu1  ;;  %v2888_v21 = vor.u32 %v2887_v54, %v2883_v33  ;;  %v2896_v54 = vrot.slane %v13935_v12, 1 }
 0x172   : > { %v13939_v62 = vadd.f32 %v11121_v7, %v2100_v51  ;;  %v2892_v7 = vrot.slane %v2890_v35, 1  ;;  %v2897_v35 = vrot.slane %v13941_v38, 1 }
 0x173   : > { %v11125_v45 = vpop.f32.mrf.mxu0  ;;  %v12322_v20 = vpop.f32.mrf.mxu1 }
 0x174   : > { %12412 = vmatmul.mubr.bf16.gmra.mxu1 %v13676_v47 }
 0x175   : > { %v11126_v44 = vpop.f32.mrf.mxu0  ;;  %v2103_v1 = vpop.f32.mrf.mxu1  ;;  %12415 = vmatprep.mubr.bf16.mxu1 %v13698_v29 }
 0x176   : > { %v11127_v27 = vadd.f32 %v11126_v44, %v11125_v45  ;;  %v13945_v4 = vadd.f32 %v11124_v28, %v2103_v1  ;;  %3240 = vmatmul.mubr.bf16.gmra.mxu0 %v16734_v5  ;;  %v13961_v5 = vsel %vm959_vm6, %v2888_v21, %v2892_v7 }
 0x177   : > { %v11128_v42 = vpop.f32.mrf.mxu0  ;;  %3247 = vmatprep.mubr.bf16.mxu0 %v16735_v24  ;;  %v2902_v45 = vshll.u32 %v13961_v5, 16 }
 0x178   : > { %v13951_v26 = vadd.f32 %v12321_v14, %v11127_v27  ;;  %v12882_v14 = vld [vmem:[#allocation6 + $0xa0] sm:$0xff]  }
 0x179   : > { %v11129_v58 = vpop.f32.mrf.mxu0  ;;  %12441 = vmatprep.subr.bf16.mxu0 %v12882_v14  ;;  %v2904_v27 = vrot.slane %v2902_v45, 1 }
 0x17a   : > { %v11130_v30 = vadd.f32 %v11129_v58, %v11128_v42  ;;  %12442 = vmatpush3.bf16.msra.mxu0 %v12882_v14  ;;  %v12883_v14 = vld [vmem:[#allocation6 + $0x78] sm:$0xff]  }
 0x17b   : > { %v11131_v47 = vpop.f32.mrf.mxu0  ;;  %11475 = vmatprep.subr.bf16.mxu1 %v12883_v14 }
 0x17c   : > { %v13954_v6 = vadd.f32 %v12322_v20, %v11130_v30  ;;  %12416 = vmatmul.mubr.bf16.gmra.mxu1 %v13716_v43  ;;  %v2894_v43 = vshrl.u32 %v13941_v38, 16 }
 0x17d   : > { %v11132_v29 = vpop.f32.mrf.mxu0  ;;  %12419 = vmatprep.mubr.bf16.mxu1 %v13732_v19 }
 0x17e   : > { %v11133_v31 = vadd.f32 %v11132_v29, %v11131_v47  ;;  %3248 = vmatmul.mubr.bf16.gmra.mxu0 %v16737_v37  ;;  %v2900_v37 = vshrl.u32 %v13961_v5, 16  ;;  %v2907_v42 = vshll.u32 %v2894_v43, 16  ;;  %v2898_v29 = vsel %vm1184_vm7, %v2896_v54, %v2897_v35 }
 0x17f   : > { %v13958_v41 = vpop.f32.mrf.mxu0  ;;  %v12325_v28 = vpop.f32.mrf.mxu1  ;;  %3255 = vmatprep.mubr.bf16.mxu0 %v16738_v39 }
 0x180   : > { %v2905_v47 = vor.u32 %v2904_v27, %v2900_v37  ;;  %v2909_v21 = vrot.slane %v2907_v42, 1 }
 0x181   : > { %v13964_v24 = vpop.f32.mrf.mxu0  ;;  %v2116_v51 = vpop.f32.mrf.mxu1 }
 0x182   : > { %v13969_v19 = vadd.f32 %v11133_v31, %v2116_v51  ;;  %v2910_v12 = vsel %vm959_vm6, %v2905_v47, %v2909_v21  ;;  %v12885_v51 = vld [vmem:[#allocation6 + $0x98] sm:$0xff]  }
 0x183   : > { %v11137_v20 = vpop.f32.mrf.mxu0  ;;  %v12326_v44 = vpop.f32.mrf.mxu1  ;;  %12443 = vmatprep.subr.bf16.mxu0 %v12885_v51 }
 0x184   : > { %12420 = vmatmul.mubr.bf16.gmra.mxu1 %v13745_v40  ;;  %12444 = vmatpush3.bf16.msra.mxu0 %v12885_v51  ;;  %v12889_v51 = vld [vmem:[#allocation6 + $0x28] sm:$0xff]  }
 0x185   : > { %v11138_v17 = vpop.f32.mrf.mxu0  ;;  %12423 = vmatprep.mubr.bf16.mxu1 %v13741_v11  ;;  %v13980_v40 = vpop.f32.mrf.mxu1 }
 0x186   : > { %v11139_v1 = vadd.f32 %v11138_v17, %v11137_v20  ;;  %3256 = vmatmul.mubr.bf16.gmra.mxu0 %v16739_v55 }
 0x187   : > { %v11140_v39 = vpop.f32.mrf.mxu0  ;;  %3263 = vmatprep.mubr.bf16.mxu0 %v13894_v63  ;;  %v2914_v63 = vshll.u32 %v2898_v29, 16 }
 0x188   : > { %v13975_v33 = vadd.f32 %v12325_v28, %v11139_v1  ;;  %v12884_v28 = vld [vmem:[#allocation6 + $0x38] sm:$0xff]   ;;  %v2919_v1 = vshll.u32 %v2897_v35, 16 }
 0x189   : > { %v11141_v58 = vpop.f32.mrf.mxu0  ;;  %11476 = vmatpush3.bf16.msra.mxu1 %v12884_v28  ;;  %v12888_v28 = vld [vmem:[#allocation6 + $0x68] sm:$0xff]  }
 0x18a   : > { %v11142_v30 = vadd.f32 %v11141_v58, %v11140_v39  ;;  %v2921_v54 = vrot.slane %v2919_v1, 1  ;;  %v12886_v58 = vld [vmem:[#allocation6 + $0x70] sm:$0xff]  }
 0x18b   : > { %v11143_v11 = vpop.f32.mrf.mxu0  ;;  %11477 = vmatprep.subr.bf16.mxu1 %v12886_v58 }
 0x18c   : > { %v13982_v7 = vadd.f32 %v12326_v44, %v11142_v30  ;;  %v12329_v55 = vpop.f32.mrf.mxu1  ;;  %12424 = vmatmul.mubr.bf16.gmra.mxu1 %v13757_v61  ;;  %v2916_v44 = vrot.slane %v2914_v63, 1  ;;  %v12887_v30 = vld [vmem:[#allocation6 + $0x30] sm:$0xff]  }
 0x18d   : > { %v11144_v31 = vpop.f32.mrf.mxu0  ;;  %12427 = vmatprep.mubr.bf16.mxu1 %v13760_v53  ;;  %v2912_v53 = vshrl.u32 %v2898_v29, 16  ;;  %11478 = vmatpush3.bf16.msra.mxu1 %v12887_v30 }
 0x18e   : > { %v11145_v38 = vadd.f32 %v11144_v31, %v11143_v11  ;;  %v2132_v43 = vpop.f32.mrf.mxu1  ;;  %3264 = vmatmul.mubr.bf16.gmra.mxu0 %v13821_v57  ;;  %11479 = vmatprep.subr.bf16.mxu1 %v12888_v28 }
 0x18f   : > { %v13989_v45 = vpop.f32.mrf.mxu0  ;;  %3271 = vmatprep.mubr.bf16.mxu0 %v2910_v12  ;;  %v2917_v39 = vor.u32 %v2916_v44, %v2912_v53 }
 0x190   : > { %v13991_v20 = vadd.f32 %v11145_v38, %v2132_v43  ;;  %v12330_v61 = vpop.f32.mrf.mxu1  ;;  %v12890_v43 = vld [vmem:[#allocation6 + $0x90] sm:$0xff]  }
 0x191   : > { %v13993_v17 = vpop.f32.mrf.mxu0  ;;  %12445 = vmatprep.subr.bf16.mxu0 %v12890_v43  ;;  %11480 = vmatpush3.bf16.msra.mxu1 %v12889_v51 }
 0x192   : > { %v13995_v37 = vpop.f32.mrf.mxu1  ;;  %12446 = vmatpush3.bf16.msra.mxu0 %v12890_v43  ;;  %v445_v43 = vld [vmem:[#allocation2 + $0xe0] sm:$0x3] }
 0x194   : > { %v12333_v27 = vpop.f32.mrf.mxu1  ;;  %12428 = vmatmul.mubr.bf16.gmra.mxu1 %v13775_v15 }
 0x195   : > { %v13999_v57 = vadd.f32 %v12333_v27, %v13856_v60  ;;  %12431 = vmatprep.mubr.bf16.mxu1 %v13824_v22  ;;  %v2922_v22 = vsel %vm959_vm6, %v2917_v39, %v2921_v54 }
 0x196   : > { %v11149_v42 = vpop.f32.mrf.mxu0  ;;  %v2148_v47 = vpop.f32.mrf.mxu1  ;;  %3272 = vmatmul.mubr.bf16.gmra.mxu0 %v13961_v5 }
 0x197   : > { %v14004_v35 = vadd.f32 %v13848_v13, %v2148_v47 }
 0x198   : > { %v11150_v21 = vpop.f32.mrf.mxu0  ;;  %v12334_v11 = vpop.f32.mrf.mxu1 }
 0x199   : > { %v11151_v15 = vadd.f32 %v11150_v21, %v11149_v42  ;;  %v14007_v60 = vadd.f32 %v12334_v11, %v13859_v46 }
 0x19a   : > { %v11152_v29 = vpop.f32.mrf.mxu0  ;;  %v14010_v31 = vpop.f32.mrf.mxu1 }
 0x19b   : > { %v14012_v12 = vadd.f32 %v12329_v55, %v11151_v15 }
 0x19c   : > { %v11153_v38 = vpop.f32.mrf.mxu0  ;;  %v12337_v5 = vpop.f32.mrf.mxu1  ;;  %12432 = vmatmul.mubr.bf16.gmra.mxu1 %v2922_v22 }
 0x19d   : > { %v11154_v13 = vadd.f32 %v11153_v38, %v11152_v29  ;;  %v14015_v63 = vadd.f32 %v12337_v5, %v13879_v25 }
 0x19e   : > { %v12357_v14 = vpop.f32.mrf.mxu0  ;;  %v2164_v46 = vpop.f32.mrf.mxu1 }
 0x19f   : > { %16740 = vst [vmem:[#allocation15_spill] sm:$0xff] %v14015_v63  ;;  %v14017_v53 = vadd.f32 %v12330_v61, %v11154_v13  ;;  %v14020_v44 = vadd.f32 %v13871_v32, %v2164_v46  ;;  %v12891_v32 = vld [vmem:[#allocation6 + $0x60] sm:$0xff]  }
 0x1a0   : > { %v2651_v1 = vpop.f32.mrf.mxu0  ;;  %v12338_v55 = vpop.f32.mrf.mxu1  ;;  %11481 = vmatprep.subr.bf16.mxu1 %v12891_v32 }
 0x1a1   : > { %v14023_v27 = vadd.f32 %v12338_v55, %v13888_v52 }
 0x1a2   : > { %v12358_v25 = vpop.f32.mrf.mxu0  ;;  %v14025_v42 = vpop.f32.mrf.mxu1 }
 0x1a3   : > { %16741 = vst [vmem:[#allocation13_spill] sm:$0xff] %v14023_v27  ;;  %16742 = vst [vmem:[#allocation16_spill] sm:$0xff] %v14025_v42 }
 0x1a4   : > { %v2654_v39 = vpop.f32.mrf.mxu0  ;;  %v11219_v54 = vpop.f32.mrf.mxu1 }
 0x1a6   : > { %v11220_v58 = vpop.f32.mrf.mxu1  ;;  %v14027_v61 = vpop.f32.mrf.mxu0 }
 0x1a7   : > { %v11221_v30 = vadd.f32 %v11220_v58, %v11219_v54  ;;  %v446_v54 = vsel %vm13351_vm2, 0, %v445_v43 }
 0x1a8   : > { %v11222_v47 = vpop.f32.mrf.mxu1  ;;  %v2667_v21 = vpop.f32.mrf.mxu0  ;;  %447 = vst [vmem:[#allocation2 + $0xe0] sm:$0x3] %v446_v54  ;;  %v450_v54 = vld [vmem:[#allocation2 + $0xec] sm:$0x3] }
 0x1a9   : > { %v2652_v11 = vadd.f32 %v11221_v30, %v2651_v1  ;;  %v12892_v1 = vld [vmem:[#allocation6 + $0x20] sm:$0xff]  }
 0x1aa   : > { %v11223_v15 = vpop.f32.mrf.mxu1  ;;  %v14029_v22 = vpop.f32.mrf.mxu0  ;;  %11482 = vmatpush3.bf16.msra.mxu1 %v12892_v1 }
 0x1ab   : > { %v14032_v52 = vadd.f32 %v2652_v11, %v13897_v9  ;;  %v11224_v29 = vadd.f32 %v11223_v15, %v11222_v47  ;;  %v12893_v47 = vld [vmem:[#allocation6 + $0x58] sm:$0xff]  }
 0x1ac   : > { %v11225_v38 = vpop.f32.mrf.mxu1  ;;  %v2670_v5 = vpop.f32.mrf.mxu0  ;;  %11483 = vmatprep.subr.bf16.mxu1 %v12893_v47 }
 0x1ad   : > { %16743 = vst [vmem:[#allocation14_spill] sm:$0xff] %v14032_v52  ;;  %v2655_v13 = vadd.f32 %v11224_v29, %v2654_v39 }
 0x1ae   : > { %v11226_v28 = vpop.f32.mrf.mxu1  ;;  %v14034_v51 = vpop.f32.mrf.mxu0 }
 0x1af   : > { %v14037_v46 = vadd.f32 %v2655_v13, %v13905_v59  ;;  %v11227_v55 = vadd.f32 %v11226_v28, %v11225_v38  ;;  %v455_v59 = vld [vmem:[#allocation2 + $0xf8] sm:$0x3]  ;;  %v12894_v28 = vld [vmem:[#allocation6 + $0x18] sm:$0xff]  }
 0x1b0   : > { %v11228_v58 = vpop.f32.mrf.mxu1  ;;  %v14041_v30 = vpop.f32.mrf.mxu0  ;;  %v456_v13 = vsel %vm13351_vm2, 0, %v455_v59  ;;  %11484 = vmatpush3.bf16.msra.mxu1 %v12894_v28 }
 0x1b1   : > { %16744 = vst [vmem:[#allocation17_spill] sm:$0xff] %v14037_v46  ;;  %v2660_v9 = vadd.f32 %v12357_v14, %v11227_v55  ;;  %457 = vst [vmem:[#allocation2 + $0xf8] sm:$0x3] %v456_v13  ;;  %v14052_v14 = vld [vmem:[#allocation2 + $0xd8] sm:$0xff]  }
 0x1b2   : > { %v11229_v32 = vpop.f32.mrf.mxu1  ;;  %v14043_v39 = vpop.f32.mrf.mxu0  ;;  %v4099_v47 = vshll.u32 %v14052_v14, 16  ;;  %v14064_v13 = vld [vmem:[#allocation2 + $0xe0] ss:$0 sps:$4 sm:$0x33]  }
 0x1b3   : > { %v11230_v11 = vadd.f32 %v11229_v32, %v11228_v58  ;;  %v14046_v15 = vadd.f32 %v2660_v9, %v13891_v36  ;;  %v451_v9 = vsel %vm13351_vm2, 0, %v450_v54  ;;  %v12896_v32 = vld [vmem:[#allocation6 + $0x50] sm:$0xff]   ;;  %v4104_v54 = vshll.u32 %v14064_v13, 16 }
 0x1b4   : > { %v11231_v29 = vpop.f32.mrf.mxu1  ;;  %v14048_v38 = vpop.f32.mrf.mxu0  ;;  %452 = vst [vmem:[#allocation2 + $0xec] sm:$0x3] %v451_v9  ;;  %11485 = vmatprep.subr.bf16.mxu1 %v12896_v32  ;;  %v4101_v28 = vrot.slane %v4099_v47, 1  ;;  %v12898_v9 = vld [vmem:[#allocation6 + $0x48] sm:$0xff]  }
 0x1b5   : > { %16745 = vst [vmem:[#allocation18_spill] sm:$0xff] %v14046_v15  ;;  %v2663_v43 = vadd.f32 %v12358_v25, %v11230_v11  ;;  %v12897_v11 = vld [vmem:[#allocation6 + $0x10] sm:$0xff]   ;;  %v4106_v32 = vrot.slane %v4104_v54, 1 }
 0x1b6   : > { %v11232_v55 = vpop.f32.mrf.mxu1  ;;  %v14054_v1 = vpop.f32.mrf.mxu0  ;;  %11486 = vmatpush3.bf16.msra.mxu1 %v12897_v11 }
 0x1b7   : > { %v11233_v36 = vadd.f32 %v11232_v55, %v11231_v29  ;;  %v14057_v58 = vadd.f32 %v2663_v43, %v13900_v2  ;;  %v4097_v29 = vshrl.u32 %v14052_v14, 16  ;;  %v12895_v55 = vld [vmem:[#allocation6 + $0x88] sm:$0xff]   ;;  %11487 = vmatprep.subr.bf16.mxu1 %v12898_v9 }
 0x1b8   : > { %v11234_v59 = vpop.f32.mrf.mxu1  ;;  %v14062_v25 = vpop.f32.mrf.mxu0  ;;  %12447 = vmatprep.subr.bf16.mxu0 %v12895_v55 }
 0x1b9   : > { %16746 = vst [vmem:[#allocation19_spill] sm:$0xff] %v14057_v58  ;;  %v2668_v23 = vadd.f32 %v11233_v36, %v2667_v21  ;;  %v4102_v52 = vor.u32 %v4101_v28, %v4097_v29  ;;  %v465_v21 = vld [vmem:[#allocation2 + $0x110] sm:$0x3]  ;;  %v12899_v36 = vld [vmem:[#allocation6 + $0x8] sm:$0xff]   ;;  %12448 = vmatpush3.bf16.msra.mxu0 %v12895_v55  ;;  %v460_v28 = vld [vmem:[#allocation2 + $0x104] sm:$0x3] }
 0x1ba   : > { %v11235_v2 = vpop.f32.mrf.mxu1  ;;  %v14067_v43 = vpop.f32.mrf.mxu0  ;;  %v466_v11 = vsel %vm13351_vm2, 0, %v465_v21  ;;  %11488 = vmatpush3.bf16.msra.mxu1 %v12899_v36  ;;  %v461_v9 = vsel %vm13351_vm2, 0, %v460_v28  ;;  %v12902_v21 = vld [vmem:[#allocation6] sm:$0xff]   ;;  %v4320_v28 = vrot.slane %v14052_v14, 1 }
 0x1bb   : > { %v11236_v46 = vadd.f32 %v11235_v2, %v11234_v59  ;;  %v14071_v58 = vadd.f32 %v2668_v23, %v13910_v0  ;;  %467 = vst [vmem:[#allocation2 + $0x110] sm:$0x3] %v466_v11  ;;  %v4107_v23 = vsel %vm959_vm6, %v4102_v52, %v4106_v32  ;;  %v4108_v0 = vshrl.u32 %v14064_v13, 16  ;;  %462 = vst [vmem:[#allocation2 + $0x104] sm:$0x3] %v461_v9 }
 0x1bc   : > { %v11237_v15 = vpop.f32.mrf.mxu1  ;;  %v14073_v27 = vpop.f32.mrf.mxu0  ;;  %v4369_v11 = vshrl.u32 %v4107_v23, 16 }
 0x1bd   : > { %16747 = vst [vmem:[#allocation20_spill] sm:$0xff] %v14071_v58  ;;  %v2671_v47 = vadd.f32 %v11236_v46, %v2670_v5  ;;  %v12901_v5 = vld [vmem:[#allocation6 + $0x40] sm:$0xff]   ;;  %v4371_v46 = vshll.u32 %v4107_v23, 16  ;;  %v4376_v36 = vshll.u32 %v4108_v0, 16  ;;  %v475_v58 = vld [vmem:[#allocation2 + $0x128] sm:$0x3] }
 0x1be   : > { %v11238_v63 = vpop.f32.mrf.mxu1  ;;  %v14077_v59 = vpop.f32.mrf.mxu0  ;;  %11489 = vmatprep.subr.bf16.mxu1 %v12901_v5 }
 0x1bf   : > { %v11239_v29 = vadd.f32 %v11238_v63, %v11237_v15  ;;  %v14082_v2 = vadd.f32 %v2671_v47, %v13918_v3  ;;  %v4373_v63 = vrot.slane %v4371_v46, 1  ;;  %11490 = vmatpush3.bf16.msra.mxu1 %v12902_v21  ;;  %v4378_v3 = vrot.slane %v4376_v36, 1  ;;  %v12900_v36 = vld [vmem:[#allocation6 + $0x80] sm:$0xff]  }
 0x1c0   : > { %v11240_v55 = vpop.f32.mrf.mxu1  ;;  %v14084_v54 = vpop.f32.mrf.mxu0  ;;  %12449 = vmatprep.subr.bf16.mxu0 %v12900_v36 }
 0x1c1   : > { %16748 = vst [vmem:[#allocation21_spill] sm:$0xff] %v14082_v2  ;;  %v2676_v52 = vadd.f32 %v14027_v61, %v11239_v29  ;;  %v4374_v56 = vor.u32 %v4373_v63, %v4369_v11  ;;  %v476_v61 = vsel %vm13351_vm2, 0, %v475_v58  ;;  %v4321_v29 = vrot.slane %v14064_v13, 1  ;;  %v470_v11 = vld [vmem:[#allocation2 + $0x11c] sm:$0x3]  ;;  %12450 = vmatpush3.bf16.msra.mxu0 %v12900_v36 }
 0x1c2   : > { %v11241_v15 = vpop.f32.mrf.mxu1  ;;  %v14089_v32 = vpop.f32.mrf.mxu0  ;;  %477 = vst [vmem:[#allocation2 + $0x128] sm:$0x3] %v476_v61 }
 0x1c3   : > { %v11242_v47 = vadd.f32 %v11241_v15, %v11240_v55  ;;  %v14092_v2 = vadd.f32 %v2676_v52, %v13908_v8  ;;  %v4379_v46 = vsel %vm959_vm6, %v4374_v56, %v4378_v3  ;;  %v4322_v9 = vsel %vm1184_vm7, %v4320_v28, %v4321_v29 }
 0x1c4   : > { %v11243_v42 = vpop.f32.mrf.mxu1  ;;  %v14095_v0 = vpop.f32.mrf.mxu0  ;;  %5024 = vmatprep.mubr.bf16.mxu1 %v4379_v46  ;;  %v4383_v58 = vshll.u32 %v4322_v9, 16  ;;  %v471_v56 = vsel %vm13351_vm2, 0, %v470_v11  ;;  %v4388_v63 = vshll.u32 %v4321_v29, 16 }
 0x1c5   : > { %v2679_v5 = vadd.f32 %v14029_v22, %v11242_v47  ;;  %5025 = vmatmul.mubr.bf16.vlgmr.msra.gmra.mxu1 %v4107_v23  ;;  %v4381_v22 = vshrl.u32 %v4322_v9, 16  ;;  %472 = vst [vmem:[#allocation2 + $0x11c] sm:$0x3] %v471_v56 }
 0x1c6   : > { %v11244_v55 = vpop.f32.mrf.mxu1  ;;  %v14102_v8 = vpop.f32.mrf.mxu0  ;;  %v4390_v47 = vrot.slane %v4388_v63, 1 }
 0x1c7   : > { %v11245_v14 = vadd.f32 %v11244_v55, %v11243_v42  ;;  %v14106_v21 = vadd.f32 %v2679_v5, %v13913_v48  ;;  %v4385_v42 = vrot.slane %v4383_v58, 1  ;;  %v485_v55 = vld [vmem:[#allocation2 + $0x140] sm:$0x3]  ;;  %v480_v58 = vld [vmem:[#allocation2 + $0x134] sm:$0x3] }
 0x1c8   : > { %v11246_v13 = vpop.f32.mrf.mxu1  ;;  %v14108_v52 = vpop.f32.mrf.mxu0 }
 0x1c9   : > { %v2684_v15 = vadd.f32 %v11245_v14, %v14041_v30  ;;  %v4386_v61 = vor.u32 %v4385_v42, %v4381_v22  ;;  %v486_v30 = vsel %vm13351_vm2, 0, %v485_v55 }
 0x1ca   : > { %v11247_v3 = vpop.f32.mrf.mxu1  ;;  %v14113_v48 = vpop.f32.mrf.mxu0  ;;  %487 = vst [vmem:[#allocation2 + $0x140] sm:$0x3] %v486_v30 }
 0x1cb   : > { %v11248_v23 = vadd.f32 %v11247_v3, %v11246_v13  ;;  %v14116_v28 = vadd.f32 %v2684_v15, %v13923_v49  ;;  %v4391_v9 = vsel %vm959_vm6, %v4386_v61, %v4390_v47 }
 0x1cc   : > { %v11249_v5 = vpop.f32.mrf.mxu1  ;;  %v14118_v46 = vpop.f32.mrf.mxu0  ;;  %12451 = vmatprep.mubr.bf16.mxu0 %v4391_v9 }
 0x1cd   : > { %v2687_v29 = vadd.f32 %v11248_v23, %v14048_v38  ;;  %v481_v38 = vsel %vm13351_vm2, 0, %v480_v58  ;;  %v495_v23 = vld [vmem:[#allocation2 + $0x158] sm:$0x3] }
 0x1ce   : > { %v11250_v14 = vpop.f32.mrf.mxu1  ;;  %v14124_v11 = vpop.f32.mrf.mxu0  ;;  %482 = vst [vmem:[#allocation2 + $0x134] sm:$0x3] %v481_v38  ;;  %v12905_v38 = vld [vmem:[#allocation6 + $0x178] sm:$0xff]  }
 0x1cf   : > { %v11251_v36 = vadd.f32 %v11250_v14, %v11249_v5  ;;  %v14127_v49 = vadd.f32 %v2687_v29, %v13930_v50  ;;  %v496_v5 = vsel %vm13351_vm2, 0, %v495_v23  ;;  %v490_v14 = vld [vmem:[#allocation2 + $0x14c] sm:$0x3]  ;;  %12483 = vmatprep.subr.bf16.mxu1 %v12905_v38 }
 0x1d0   : > { %v11252_v13 = vpop.f32.mrf.mxu1  ;;  %v14129_v56 = vpop.f32.mrf.mxu0  ;;  %497 = vst [vmem:[#allocation2 + $0x158] sm:$0x3] %v496_v5  ;;  %12484 = vmatpush3.bf16.msra.mxu1 %v12905_v38 }
 0x1d1   : > { %v2692_v22 = vadd.f32 %v14034_v51, %v11251_v36 }
 0x1d2   : > { %v11253_v63 = vpop.f32.mrf.mxu1  ;;  %v14134_v15 = vpop.f32.mrf.mxu0 }
 0x1d3   : > { %v11254_v42 = vadd.f32 %v11253_v63, %v11252_v13  ;;  %v14137_v3 = vadd.f32 %v2692_v22, %v13921_v16  ;;  %v12908_v22 = vld [vmem:[#allocation6 + $0x138] sm:$0xff]  }
 0x1d4   : > { %v11255_v47 = vpop.f32.mrf.mxu1  ;;  %v14139_v50 = vpop.f32.mrf.mxu0  ;;  %11611 = vmatprep.subr.bf16.mxu0 %v12908_v22 }
 0x1d5   : > { %v2695_v61 = vadd.f32 %v14043_v39, %v11254_v42  ;;  %v491_v39 = vsel %vm13351_vm2, 0, %v490_v14  ;;  %v505_v14 = vld [vmem:[#allocation2 + $0x170] sm:$0x3] }
 0x1d6   : > { %v11256_v55 = vpop.f32.mrf.mxu1  ;;  %v14144_v29 = vpop.f32.mrf.mxu0  ;;  %492 = vst [vmem:[#allocation2 + $0x14c] sm:$0x3] %v491_v39 }
 0x1d7   : > { %v11257_v51 = vadd.f32 %v11256_v55, %v11255_v47  ;;  %v14147_v30 = vadd.f32 %v2695_v61, %v13927_v18 }
 0x1d8   : > { %v11258_v9 = vpop.f32.mrf.mxu1  ;;  %v14149_v16 = vpop.f32.mrf.mxu0 }
 0x1d9   : > { %v2700_v36 = vadd.f32 %v11257_v51, %v14062_v25 }
 0x1da   : > { %v11259_v58 = vpop.f32.mrf.mxu1  ;;  %v14154_v13 = vpop.f32.mrf.mxu0 }
 0x1db   : > { %v11260_v63 = vadd.f32 %v11259_v58, %v11258_v9  ;;  %v14157_v42 = vadd.f32 %v2700_v36, %v13939_v62 }
 0x1dc   : > { %v11261_v18 = vpop.f32.mrf.mxu1  ;;  %v14159_v47 = vpop.f32.mrf.mxu0 }
 0x1dd   : > { %v2703_v25 = vadd.f32 %v11260_v63, %v14073_v27  ;;  %v506_v27 = vsel %vm13351_vm2, 0, %v505_v14 }
 0x1de   : > { %v11262_v23 = vpop.f32.mrf.mxu1  ;;  %v14162_v61 = vpop.f32.mrf.mxu0  ;;  %507 = vst [vmem:[#allocation2 + $0x170] sm:$0x3] %v506_v27 }
 0x1df   : > { %v11263_v5 = vadd.f32 %v11262_v23, %v11261_v18  ;;  %v14165_v55 = vadd.f32 %v2703_v25, %v13945_v4 }
 0x1e0   : > { %v11264_v51 = vpop.f32.mrf.mxu1  ;;  %v14167_v9 = vpop.f32.mrf.mxu0 }
 0x1e1   : > { %16749 = vst [vmem:[#allocation22_spill] sm:$0xff] %v14165_v55  ;;  %v2708_v62 = vadd.f32 %v14054_v1, %v11263_v5 }
 0x1e2   : > { %v11265_v36 = vpop.f32.mrf.mxu1  ;;  %v14170_v39 = vpop.f32.mrf.mxu0 }
 0x1e3   : > { %v11266_v58 = vadd.f32 %v11265_v36, %v11264_v51  ;;  %v14175_v38 = vadd.f32 %v2708_v62, %v13951_v26  ;;  %v11136_v26 = vadd.f32 %v13964_v24, %v13958_v41  ;;  %v500_v36 = vld [vmem:[#allocation2 + $0x164] sm:$0x3] }
 0x1e4   : > { %v11267_v22 = vpop.f32.mrf.mxu1  ;;  %v14177_v4 = vpop.f32.mrf.mxu0 }
 0x1e5   : > { %v2711_v63 = vadd.f32 %v14067_v43, %v11266_v58 }
 0x1e6   : > { %v11268_v18 = vpop.f32.mrf.mxu1  ;;  %v14180_v25 = vpop.f32.mrf.mxu0 }
 0x1e7   : > { %v11269_v1 = vadd.f32 %v11268_v18, %v11267_v22  ;;  %v14183_v23 = vadd.f32 %v2711_v63, %v13954_v6  ;;  %v501_v6 = vsel %vm13351_vm2, 0, %v500_v36  ;;  %v2120_v63 = vadd.f32 %v11136_v26, %v13980_v40 }
 0x1e8   : > { %v11270_v5 = vpop.f32.mrf.mxu1  ;;  %v14185_v55 = vpop.f32.mrf.mxu0  ;;  %502 = vst [vmem:[#allocation2 + $0x164] sm:$0x3] %v501_v6 }
 0x1e9   : > { %v2716_v51 = vadd.f32 %v11269_v1, %v14084_v54 }
 0x1ea   : > { %v11271_v62 = vpop.f32.mrf.mxu1  ;;  %v14190_v14 = vpop.f32.mrf.mxu0 }
 0x1eb   : > { %v11272_v43 = vadd.f32 %v11271_v62, %v11270_v5  ;;  %v14193_v27 = vadd.f32 %v2716_v51, %v13969_v19 }
 0x1ec   : > { %v11273_v58 = vpop.f32.mrf.mxu1  ;;  %v14197_v22 = vpop.f32.mrf.mxu0 }
 0x1ed   : > { %16750 = vst [vmem:[#allocation23_spill] sm:$0xff] %v14193_v27  ;;  %v2719_v41 = vadd.f32 %v11272_v43, %v14095_v0 }
 0x1ee   : > { %v11274_v24 = vpop.f32.mrf.mxu1  ;;  %v14201_v54 = vpop.f32.mrf.mxu0 }
 0x1ef   : > { %v11275_v18 = vadd.f32 %v11274_v24, %v11273_v58  ;;  %v14203_v1 = vadd.f32 %v2719_v41, %v2120_v63  ;;  %v515_v63 = vld [vmem:[#allocation2 + $0x188] sm:$0x3] }
 0x1f0   : > { %v11276_v5 = vpop.f32.mrf.mxu1  ;;  %v14205_v19 = vpop.f32.mrf.mxu0 }
 0x1f1   : > { %16751 = vst [vmem:[#allocation24_spill] sm:$0xff] %v14203_v1  ;;  %v2724_v51 = vadd.f32 %v14077_v59, %v11275_v18  ;;  %v516_v59 = vsel %vm13351_vm2, 0, %v515_v63 }
 0x1f2   : > { %v11277_v62 = vpop.f32.mrf.mxu1  ;;  %v14208_v36 = vpop.f32.mrf.mxu0  ;;  %517 = vst [vmem:[#allocation2 + $0x188] sm:$0x3] %v516_v59 }
 0x1f3   : > { %v11278_v27 = vadd.f32 %v11277_v62, %v11276_v5  ;;  %v14211_v6 = vadd.f32 %v2724_v51, %v13975_v33  ;;  %v11148_v33 = vadd.f32 %v13993_v17, %v13989_v45 }
 0x1f4   : > { %v11279_v40 = vpop.f32.mrf.mxu1  ;;  %v14213_v0 = vpop.f32.mrf.mxu0 }
 0x1f5   : > { %v2727_v26 = vadd.f32 %v14089_v32, %v11278_v27  ;;  %v510_v27 = vld [vmem:[#allocation2 + $0x17c] sm:$0x3]  ;;  %v2136_v59 = vadd.f32 %v11148_v33, %v13995_v37 }
 0x1f6   : > { %v11280_v43 = vpop.f32.mrf.mxu1  ;;  %v14216_v58 = vpop.f32.mrf.mxu0 }
 0x1f7   : > { %v11281_v41 = vadd.f32 %v11280_v43, %v11279_v40  ;;  %v14219_v24 = vadd.f32 %v2727_v26, %v13982_v7  ;;  %v511_v7 = vsel %vm13351_vm2, 0, %v510_v27 }
 0x1f8   : > { %v11282_v18 = vpop.f32.mrf.mxu1  ;;  %v14223_v5 = vpop.f32.mrf.mxu0  ;;  %512 = vst [vmem:[#allocation2 + $0x17c] sm:$0x3] %v511_v7 }
 0x1f9   : > { %16752 = vst [vmem:[#allocation25_spill] sm:$0xff] %v14219_v24  ;;  %v2732_v32 = vadd.f32 %v11281_v41, %v14108_v52  ;;  %v12918_v24 = vld [vmem:[#allocation6 + $0x170] sm:$0xff]  }
 0x1fa   : > { %v11283_v51 = vpop.f32.mrf.mxu1  ;;  %v14228_v62 = vpop.f32.mrf.mxu0  ;;  %12485 = vmatprep.subr.bf16.mxu1 %v12918_v24 }
 0x1fb   : > { %v11284_v40 = vadd.f32 %v11283_v51, %v11282_v18  ;;  %v14233_v26 = vadd.f32 %v2732_v32, %v13991_v20  ;;  %12486 = vmatpush3.bf16.msra.mxu1 %v12918_v24 }
 0x1fc   : > { %v11285_v43 = vpop.f32.mrf.mxu1  ;;  %v14235_v63 = vpop.f32.mrf.mxu0 }
 0x1fd   : > { %16753 = vst [vmem:[#allocation26_spill] sm:$0xff] %v14233_v26  ;;  %v2735_v45 = vadd.f32 %v11284_v40, %v14118_v46 }
 0x1fe   : > { %v11286_v17 = vpop.f32.mrf.mxu1  ;;  %v14239_v52 = vpop.f32.mrf.mxu0 }
 0x1ff   : > { %v11287_v41 = vadd.f32 %v11286_v17, %v11285_v43  ;;  %v14241_v1 = vadd.f32 %v2735_v45, %v2136_v59  ;;  %v525_v43 = vld [vmem:[#allocation2 + $0x1a0] sm:$0x3] }
 0x200   : > { %v11288_v27 = vpop.f32.mrf.mxu1  ;;  %v14243_v18 = vpop.f32.mrf.mxu0 }
 0x201   : > { %16754 = vst [vmem:[#allocation27_spill] sm:$0xff] %v14241_v1  ;;  %v2740_v20 = vadd.f32 %v14102_v8, %v11287_v41  ;;  %v526_v8 = vsel %vm13351_vm2, 0, %v525_v43 }
 0x202   : > { %v11289_v32 = vpop.f32.mrf.mxu1  ;;  %v14246_v51 = vpop.f32.mrf.mxu0  ;;  %527 = vst [vmem:[#allocation2 + $0x1a0] sm:$0x3] %v526_v8  ;;  %v520_v8 = vld [vmem:[#allocation2 + $0x194] sm:$0x3] }
 0x203   : > { %v11290_v37 = vadd.f32 %v11289_v32, %v11288_v27  ;;  %v14249_v46 = vadd.f32 %v2740_v20, %v14012_v12 }
 0x204   : > { %v11291_v33 = vpop.f32.mrf.mxu1  ;;  %v14251_v7 = vpop.f32.mrf.mxu0 }
 0x205   : > { %v2743_v40 = vadd.f32 %v14113_v48, %v11290_v37 }
 0x206   : > { %v11292_v59 = vpop.f32.mrf.mxu1  ;;  %v14254_v45 = vpop.f32.mrf.mxu0 }
 0x207   : > { %v11293_v17 = vadd.f32 %v11292_v59, %v11291_v33  ;;  %v14259_v41 = vadd.f32 %v2743_v40, %v14017_v53  ;;  %v2152_v53 = vadd.f32 %v13851_v34, %v14010_v31 }
 0x208   : > { %v11294_v24 = vpop.f32.mrf.mxu1  ;;  %v14261_v12 = vpop.f32.mrf.mxu0 }
 0x209   : > { %16755 = vst [vmem:[#allocation28_spill] sm:$0xff] %v14259_v41  ;;  %v2748_v27 = vadd.f32 %v11293_v17, %v14129_v56 }
 0x20a   : > { %v11295_v20 = vpop.f32.mrf.mxu1  ;;  %v14264_v32 = vpop.f32.mrf.mxu0 }
 0x20b   : > { %v11296_v48 = vadd.f32 %v11295_v20, %v11294_v24  ;;  %v14267_v37 = vadd.f32 %v2748_v27, %v14004_v35  ;;  %v521_v35 = vsel %vm13351_vm2, 0, %v520_v8 }
 0x20c   : > { %v11297_v1 = vpop.f32.mrf.mxu1  ;;  %v14269_v26 = vpop.f32.mrf.mxu0  ;;  %522 = vst [vmem:[#allocation2 + $0x194] sm:$0x3] %v521_v35 }
 0x20d   : > { %16756 = vst [vmem:[#allocation29_spill] sm:$0xff] %v14267_v37  ;;  %v2751_v33 = vadd.f32 %v11296_v48, %v14139_v50 }
 0x20e   : > { %v11298_v40 = vpop.f32.mrf.mxu1  ;;  %v14274_v43 = vpop.f32.mrf.mxu0 }
 0x20f   : > { %v11299_v59 = vadd.f32 %v11298_v40, %v11297_v1  ;;  %v14276_v56 = vadd.f32 %v2751_v33, %v2152_v53 }
 0x210   : > { %v11300_v17 = vpop.f32.mrf.mxu1  ;;  %v14278_v24 = vpop.f32.mrf.mxu0 }
 0x211   : > { %16757 = vst [vmem:[#allocation30_spill] sm:$0xff] %v14276_v56  ;;  %v2756_v27 = vadd.f32 %v14124_v11, %v11299_v59  ;;  %v12931_v56 = vld [vmem:[#allocation6 + $0x168] sm:$0xff]  }
 0x212   : > { %v11301_v20 = vpop.f32.mrf.mxu1  ;;  %v14283_v34 = vpop.f32.mrf.mxu0  ;;  %12487 = vmatprep.subr.bf16.mxu1 %v12931_v56 }
 0x213   : > { %v11302_v31 = vadd.f32 %v11301_v20, %v11300_v17  ;;  %v14286_v50 = vadd.f32 %v2756_v27, %v13999_v57  ;;  %12488 = vmatpush3.bf16.msra.mxu1 %v12931_v56 }
 0x214   : > { %v11303_v1 = vpop.f32.mrf.mxu1  ;;  %v14288_v48 = vpop.f32.mrf.mxu0 }
 0x215   : > { %16758 = vst [vmem:[#allocation31_spill] sm:$0xff] %v14286_v50  ;;  %v2759_v53 = vadd.f32 %v14134_v15, %v11302_v31 }
 0x216   : > { %v11304_v33 = vpop.f32.mrf.mxu1  ;;  %v14291_v40 = vpop.f32.mrf.mxu0 }
 0x217   : > { %v11305_v10 = vadd.f32 %v11304_v33, %v11303_v1  ;;  %v14294_v8 = vadd.f32 %v2759_v53, %v14007_v60  ;;  %v16761_v1 = vld [vmem:[#allocation16_spill] sm:$0xff] }
 0x218   : > { %v11306_v11 = vpop.f32.mrf.mxu1  ;;  %v14296_v59 = vpop.f32.mrf.mxu0  ;;  %v16762_v33 = vld [vmem:[#allocation12_spill] sm:$0xff] }
 0x219   : > { %16759 = vst [vmem:[#allocation32_spill] sm:$0xff] %v14294_v8  ;;  %v2764_v17 = vadd.f32 %v11305_v10, %v14149_v16  ;;  %v2168_v60 = vadd.f32 %v16762_v33, %v16761_v1  ;;  %v11363_v1 = vadd.f32 %v14185_v55, %v14180_v25  ;;  %v16764_v33 = vld [vmem:[#allocation15_spill] sm:$0xff]  ;;  %v11366_v55 = vadd.f32 %v14197_v22, %v14190_v14  ;;  %v16765_v25 = vld [vmem:[#allocation13_spill] sm:$0xff] }
 0x21a   : > { %v11307_v35 = vpop.f32.mrf.mxu1  ;;  %v14299_v57 = vpop.f32.mrf.mxu0  ;;  %v11372_v14 = vadd.f32 %v14213_v0, %v14208_v36  ;;  %v11375_v22 = vadd.f32 %v14223_v5, %v14216_v58  ;;  %v11387_v36 = vadd.f32 %v14261_v12, %v14254_v45  ;;  %v14363_v0 = vadd.f32 %v14269_v26, %v14264_v32 }
 0x21b   : > { %v11308_v27 = vadd.f32 %v11307_v35, %v11306_v11  ;;  %v14302_v20 = vadd.f32 %v2764_v17, %v14020_v44  ;;  %v14379_v26 = vadd.f32 %v14296_v59, %v14291_v40 }
 0x21c   : > { %v11309_v15 = vpop.f32.mrf.mxu1  ;;  %v14304_v31 = vpop.f32.mrf.mxu0 }
 0x21d   : > { %16760 = vst [vmem:[#allocation33_spill] sm:$0xff] %v14302_v20  ;;  %v2767_v53 = vadd.f32 %v11308_v27, %v14159_v47 }
 0x21e   : > { %v11310_v8 = vpop.f32.mrf.mxu1  ;;  %v14309_v37 = vpop.f32.mrf.mxu0 }
 0x21f   : > { %v11311_v10 = vadd.f32 %v11310_v8, %v11309_v15  ;;  %v14311_v16 = vadd.f32 %v2767_v53, %v2168_v60  ;;  %v11357_v8 = vadd.f32 %v14167_v9, %v14162_v61 }
 0x220   : > { %v11312_v11 = vpop.f32.mrf.mxu1  ;;  %v11404_v44 = vpop.f32.mrf.mxu0 }
 0x221   : > { %16763 = vst [vmem:[#allocation16_spill] sm:$0xff] %v14311_v16  ;;  %v2772_v17 = vadd.f32 %v14144_v29, %v11311_v10  ;;  %v14327_v29 = vld [vmem:[%s16690_s2] ss:$0 sm:$0xff]  ;;  %v11369_v16 = vadd.f32 %v14205_v19, %v14201_v54  ;;  %v14353_v54 = vadd.f32 %v14243_v18, %v14239_v52  ;;  %v14357_v19 = vadd.f32 %v14251_v7, %v14246_v51  ;;  %v16769_v18 = vld [vmem:[#allocation17_spill] sm:$0xff] }
 0x222   : > { %v11313_v35 = vpop.f32.mrf.mxu1  ;;  %v14314_v20 = vpop.f32.mrf.mxu0  ;;  %v14371_v51 = vadd.f32 %v14278_v24, %v14274_v43  ;;  %v14375_v7 = vadd.f32 %v14288_v48, %v14283_v34  ;;  %v14386_v43 = vadd.f32 %v14304_v31, %v14299_v57  ;;  %v14389_v24 = vadd.f32 %v11404_v44, %v14309_v37  ;;  %v16770_v57 = vld [vmem:[#allocation20_spill] sm:$0xff] }
 0x223   : > { %v14319_v47 = vadd.f32 %v2772_v17, %v16764_v33  ;;  %v11314_v27 = vadd.f32 %v11313_v35, %v11312_v11  ;;  %v16766_v11 = vld [vmem:[#allocation18_spill] sm:$0xff] }
 0x224   : > { %v12405_v50 = vpop.f32.mrf.mxu1  ;;  %v11407_v41 = vpop.f32.mrf.mxu0 }
 0x225   : > { %v2775_v56 = vadd.f32 %v14154_v13, %v11314_v27  ;;  %v3323_v15 = vadd.f32 %v12405_v50, %v11363_v1  ;;  %v11360_v13 = vadd.f32 %v14177_v4, %v14170_v39  ;;  %v16767_v1 = vld [vmem:[#allocation14_spill] sm:$0xff] }
 0x226   : > { %v3314_v60 = vpop.f32.mrf.mxu1  ;;  %v11409_v53 = vpop.f32.mrf.mxu0 }
 0x227   : > { %v14332_v10 = vadd.f32 %v2775_v56, %v16765_v25  ;;  %v3475_v17 = vadd.f32 %v3323_v15, %v16766_v11  ;;  %v3315_v35 = vadd.f32 %v11357_v8, %v3314_v60  ;;  %v11378_v8 = vadd.f32 %v14235_v63, %v14228_v62  ;;  %v16768_v60 = vld [vmem:[#allocation19_spill] sm:$0xff]  ;;  %v12944_v62 = vld [vmem:[#allocation6 + $0x160] sm:$0xff]  }
 0x228   : > { %v12406_v61 = vpop.f32.mrf.mxu1  ;;  %v11410_v9 = vpop.f32.mrf.mxu0  ;;  %12489 = vmatprep.subr.bf16.mxu1 %v12944_v62 }
 0x229   : > { %v3578_v50 = vadd.f32 %v14327_v29, %v3475_v17  ;;  %v3473_v33 = vadd.f32 %v3315_v35, %v16767_v1  ;;  %v3326_v27 = vadd.f32 %v12406_v61, %v11366_v55  ;;  %12490 = vmatpush3.bf16.msra.mxu1 %v12944_v62 }
 0x22a   : > { %v3317_v56 = vpop.f32.mrf.mxu1  ;;  %v14347_v15 = vpop.f32.mrf.mxu0 }
 0x22b   : > { %v3610_v39 = vmax.f32 %v3578_v50, 0.0  ;;  %v3576_v4 = vadd.f32 %v14327_v29, %v3473_v33  ;;  %v3476_v55 = vadd.f32 %v3326_v27, %v16768_v60  ;;  %v3318_v25 = vadd.f32 %v11360_v13, %v3317_v56 }
 0x22c   : > { %v12409_v58 = vpop.f32.mrf.mxu1  ;;  %v14365_v5 = vpop.f32.mrf.mxu0  ;;  %v14393_v27 = vadd.f32 %v11407_v41, %v14314_v20 }
 0x22d   : > { %v10783_v63 = vpack.c.bf16 %v3610_v39, %v3610_v39  ;;  %v3608_v11 = vmax.f32 %v3576_v4, 0.0  ;;  %v3579_v52 = vadd.f32 %v14327_v29, %v3476_v55  ;;  %v3474_v17 = vadd.f32 %v3318_v25, %v16769_v18 }
 0x22e   : > { %v3339_v45 = vadd.f32 %v12409_v58, %v11375_v22  ;;  %v3330_v12 = vpop.f32.mrf.mxu1  ;;  %v14381_v32 = vpop.f32.mrf.mxu0  ;;  %v14396_v39 = vadd.f32 %v11410_v9, %v11409_v53 }
 0x22f   : > { %v3741_v35 = vrot.slane %v10783_v63, 7  ;;  %v10781_v61 = vpack.c.bf16 %v3608_v11, %v3608_v11  ;;  %v3611_v13 = vmax.f32 %v3579_v52, 0.0  ;;  %v3577_v50 = vadd.f32 %v14327_v29, %v3474_v17  ;;  %v16772_v52 = vld [vmem:[#allocation21_spill] sm:$0xff] }
 0x230   : > { %v3479_v34 = vadd.f32 %v3339_v45, %v14092_v2  ;;  %v3331_v48 = vadd.f32 %v11369_v16, %v3330_v12  ;;  %v12410_v40 = vpop.f32.mrf.mxu1  ;;  %v11416_v59 = vpop.f32.mrf.mxu0 }
 0x231   : > { %3868 = vst [vmem:[#allocation2 + $0xf0] sm:$0xe] %v3741_v35  ;;  %v3736_v1 = vrot.slane %v10781_v61, 7  ;;  %v10784_v33 = vpack.c.bf16 %v3611_v13, %v3611_v13  ;;  %v3609_v22 = vmax.f32 %v3577_v50, 0.0  ;;  %v3342_v37 = vadd.f32 %v12410_v40, %v11378_v8 }
 0x232   : > { %v3582_v56 = vadd.f32 %v14327_v29, %v3479_v34  ;;  %v3477_v31 = vadd.f32 %v3331_v48, %v16770_v57  ;;  %v3333_v44 = vpop.f32.mrf.mxu1  ;;  %v14399_v4 = vpop.f32.mrf.mxu0  ;;  %v3742_v2 = vrot.slane %v3741_v35, 4 }
 0x233   : > { %3865 = vst [vmem:[#allocation2 + $0xe4] sm:$0xe] %v3736_v1  ;;  %v3743_v16 = vrot.slane %v10784_v33, 7  ;;  %v10782_v60 = vpack.c.bf16 %v3609_v22, %v3609_v22  ;;  %v3334_v55 = vadd.f32 %v11372_v14, %v3333_v44  ;;  %v3737_v25 = vrot.slane %v3736_v1, 4 }
 0x234   : > { %v3614_v58 = vmax.f32 %v3582_v56, 0.0  ;;  %v3580_v41 = vadd.f32 %v14327_v29, %v3477_v31  ;;  %v3480_v20 = vadd.f32 %v3342_v37, %v14106_v21  ;;  %v12413_v62 = vpop.f32.mrf.mxu1  ;;  %v14403_v53 = vpop.f32.mrf.mxu0  ;;  %v14418_v56 = vadd.f32 %v14365_v5, %v14347_v15 }
 0x235   : > { %v3744_v8 = vsel %vm13372_vm5, %v3742_v2, %v3743_v16  ;;  %v3745_v63 = vrot.slane %v3743_v16, 4  ;;  %v3738_v11 = vrot.slane %v10782_v60, 7  ;;  %v3478_v18 = vadd.f32 %v3334_v55, %v16772_v52 }
 0x236   : > { %3869 = vst [vmem:[#allocation2 + $0xf4] sm:$0xf] %v3744_v8  ;;  %v10787_v17 = vpack.c.bf16 %v3614_v58, %v3614_v58  ;;  %v3612_v45 = vmax.f32 %v3580_v41, 0.0  ;;  %v3583_v14 = vadd.f32 %v14327_v29, %v3480_v20  ;;  %v3355_v12 = vadd.f32 %v12413_v62, %v11387_v36  ;;  %v3346_v35 = vpop.f32.mrf.mxu1  ;;  %v14409_v61 = vpop.f32.mrf.mxu0 }
 0x237   : > { %3870 = vst [vmem:[#allocation2 + $0xf8] sm:$0x1] %v3745_v63  ;;  %v3739_v21 = vsel %vm13372_vm5, %v3737_v25, %v3738_v11  ;;  %v3740_v13 = vrot.slane %v3738_v11, 4  ;;  %v3581_v50 = vadd.f32 %v14327_v29, %v3478_v18  ;;  %v3347_v34 = vadd.f32 %v14353_v54, %v3346_v35  ;;  %v12955_v25 = vld [vmem:[#allocation6 + $0x158] sm:$0xff]  }
 0x238   : > { %3866 = vst [vmem:[#allocation2 + $0xe8] sm:$0xf] %v3739_v21  ;;  %v3751_v48 = vrot.slane %v10787_v17, 7  ;;  %v10785_v40 = vpack.c.bf16 %v3612_v45, %v3612_v45  ;;  %v3615_v1 = vmax.f32 %v3583_v14, 0.0  ;;  %v3483_v33 = vadd.f32 %v3355_v12, %v14137_v3  ;;  %v12414_v22 = vpop.f32.mrf.mxu1  ;;  %v11422_v36 = vpop.f32.mrf.mxu0  ;;  %12491 = vmatprep.subr.bf16.mxu1 %v12955_v25 }
 0x239   : > { %3867 = vst [vmem:[#allocation2 + $0xec] sm:$0x1] %v3740_v13  ;;  %v3613_v57 = vmax.f32 %v3581_v50, 0.0  ;;  %v3481_v31 = vadd.f32 %v3347_v34, %v14116_v28  ;;  %v3358_v37 = vadd.f32 %v12414_v22, %v14363_v0  ;;  %v14424_v16 = vadd.f32 %v11416_v59, %v14381_v32  ;;  %12492 = vmatpush3.bf16.msra.mxu1 %v12955_v25 }
 0x23a   : > { %3874 = vst [vmem:[#allocation2 + $0x108] sm:$0xe] %v3751_v48  ;;  %v3746_v54 = vrot.slane %v10785_v40, 7  ;;  %v10788_v44 = vpack.c.bf16 %v3615_v1, %v3615_v1  ;;  %v3586_v2 = vadd.f32 %v14327_v29, %v3483_v33  ;;  %v3349_v3 = vpop.f32.mrf.mxu1  ;;  %v14426_v60 = vpop.f32.mrf.mxu0  ;;  %v3752_v0 = vrot.slane %v3751_v48, 4 }
 0x23b   : > { %v10786_v55 = vpack.c.bf16 %v3613_v57, %v3613_v57  ;;  %v3584_v15 = vadd.f32 %v14327_v29, %v3481_v31  ;;  %v3484_v5 = vadd.f32 %v3358_v37, %v14147_v30  ;;  %v3350_v28 = vadd.f32 %v14357_v19, %v3349_v3 }
 0x23c   : > { %v3747_v58 = vrot.slane %v3746_v54, 4  ;;  %3871 = vst [vmem:[#allocation2 + $0xfc] sm:$0xe] %v3746_v54  ;;  %v3753_v41 = vrot.slane %v10788_v44, 7  ;;  %v3618_v20 = vmax.f32 %v3586_v2, 0.0  ;;  %v12417_v62 = vpop.f32.mrf.mxu1  ;;  %v11425_v8 = vpop.f32.mrf.mxu0  ;;  %v14445_v1 = vadd.f32 %v14403_v53, %v14399_v4 }
 0x23d   : > { %v3748_v32 = vrot.slane %v10786_v55, 7  ;;  %v3616_v59 = vmax.f32 %v3584_v15, 0.0  ;;  %v3587_v63 = vadd.f32 %v14327_v29, %v3484_v5  ;;  %v3482_v11 = vadd.f32 %v3350_v28, %v14127_v49  ;;  %v16773_v5 = vld [vmem:[#allocation22_spill] sm:$0xff] }
 0x23e   : > { %v3754_v30 = vsel %vm13372_vm5, %v3752_v0, %v3753_v41  ;;  %v3755_v52 = vrot.slane %v3753_v41, 4  ;;  %v10791_v19 = vpack.c.bf16 %v3618_v20, %v3618_v20  ;;  %v3371_v18 = vadd.f32 %v12417_v62, %v14379_v26  ;;  %v3362_v17 = vpop.f32.mrf.mxu1  ;;  %v14436_v45 = vpop.f32.mrf.mxu0 }
 0x23f   : > { %3875 = vst [vmem:[#allocation2 + $0x10c] sm:$0xf] %v3754_v30  ;;  %v3749_v14 = vsel %vm13372_vm5, %v3747_v58, %v3748_v32  ;;  %v3750_v12 = vrot.slane %v3748_v32, 4  ;;  %v10789_v35 = vpack.c.bf16 %v3616_v59, %v3616_v59  ;;  %v3619_v21 = vmax.f32 %v3587_v63, 0.0  ;;  %v14465_v20 = vld [vmem:[#allocation2 + $0xe4] sm:$0xff]  }
 0x240   : > { %3876 = vst [vmem:[#allocation2 + $0x110] sm:$0x1] %v3755_v52  ;;  %3872 = vst [vmem:[#allocation2 + $0x100] sm:$0xf] %v3749_v14  ;;  %v3761_v49 = vrot.slane %v10791_v19, 7  ;;  %v3585_v13 = vadd.f32 %v14327_v29, %v3482_v11  ;;  %v3487_v50 = vadd.f32 %v3371_v18, %v14175_v38  ;;  %v3363_v26 = vadd.f32 %v14371_v51, %v3362_v17  ;;  %v12418_v34 = vpop.f32.mrf.mxu1  ;;  %v14453_v37 = vpop.f32.mrf.mxu0  ;;  %v12957_v17 = vld [vmem:[#allocation6 + $0x150] sm:$0xff]  }
 0x241   : > { %3873 = vst [vmem:[#allocation2 + $0x104] sm:$0x1] %v3750_v12  ;;  %v3756_v48 = vrot.slane %v10789_v35, 7  ;;  %v10792_v40 = vpack.c.bf16 %v3619_v21, %v3619_v21  ;;  %v3374_v33 = vadd.f32 %v12418_v34, %v14386_v43  ;;  %v14450_v31 = vadd.f32 %v11422_v36, %v14409_v61  ;;  %v14467_v62 = vld [vmem:[#allocation2 + $0xec] ss:$0 sps:$4 sm:$0x33]   ;;  %12493 = vmatprep.subr.bf16.mxu1 %v12957_v17 }
 0x242   : > { %3880 = vst [vmem:[#allocation2 + $0x120] sm:$0xe] %v3761_v49  ;;  %v3617_v22 = vmax.f32 %v3585_v13, 0.0  ;;  %v3590_v57 = vadd.f32 %v14327_v29, %v3487_v50  ;;  %v3485_v38 = vadd.f32 %v3363_v26, %v14157_v42  ;;  %v3365_v51 = vpop.f32.mrf.mxu1  ;;  %v3762_v54 = vrot.slane %v3761_v49, 4  ;;  %v14463_v41 = vpop.f32.mrf.mxu0  ;;  %v16774_v21 = vld [vmem:[#allocation23_spill] sm:$0xff]  ;;  %12494 = vmatpush3.bf16.msra.mxu1 %v12957_v17 }
 0x243   : > { %3877 = vst [vmem:[#allocation2 + $0x114] sm:$0xe] %v3756_v48  ;;  %v3763_v44 = vrot.slane %v10792_v40, 7  ;;  %v3488_v4 = vadd.f32 %v3374_v33, %v14183_v23  ;;  %v3366_v53 = vadd.f32 %v14375_v7, %v3365_v51  ;;  %v3757_v43 = vrot.slane %v3756_v48, 4 }
 0x244   : > { %v10790_v2 = vpack.c.bf16 %v3617_v22, %v3617_v22  ;;  %v3622_v3 = vmax.f32 %v3590_v57, 0.0  ;;  %v3588_v55 = vadd.f32 %v14327_v29, %v3485_v38  ;;  %v12421_v15 = vpop.f32.mrf.mxu1  ;;  %v14470_v59 = vadd.f32 %v11425_v8, %v14426_v60  ;;  %v14479_v13 = vpop.f32.mrf.mxu0  ;;  %v16775_v22 = vld [vmem:[#allocation25_spill] sm:$0xff] }
 0x245   : > { %v3764_v61 = vsel %vm13372_vm5, %v3762_v54, %v3763_v44  ;;  %v3765_v42 = vrot.slane %v3763_v44, 4  ;;  %v3591_v36 = vadd.f32 %v14327_v29, %v3488_v4  ;;  %v3486_v28 = vadd.f32 %v3366_v53, %v16773_v5 }
 0x246   : > { %3881 = vst [vmem:[#allocation2 + $0x124] sm:$0xf] %v3764_v61  ;;  %v3758_v25 = vrot.slane %v10790_v2, 7  ;;  %v10795_v0 = vpack.c.bf16 %v3622_v3, %v3622_v3  ;;  %v3620_v23 = vmax.f32 %v3588_v55, 0.0  ;;  %v3387_v7 = vadd.f32 %v12421_v15, %v14396_v39  ;;  %v3378_v58 = vpop.f32.mrf.mxu1  ;;  %v16776_v3 = vld [vmem:[#allocation24_spill] sm:$0xff]  ;;  %v11433_v15 = vpop.f32.mrf.mxu0 }
 0x247   : > { %3882 = vst [vmem:[#allocation2 + $0x128] sm:$0x1] %v3765_v42  ;;  %v3623_v32 = vmax.f32 %v3591_v36, 0.0  ;;  %v3589_v63 = vadd.f32 %v14327_v29, %v3486_v28  ;;  %v3379_v11 = vadd.f32 %v14389_v24, %v3378_v58  ;;  %v4323_v26 = vrot.slane %v14465_v20, 1 }
 0x248   : > { %v3759_v30 = vsel %vm13372_vm5, %v3757_v43, %v3758_v25  ;;  %v3760_v39 = vrot.slane %v3758_v25, 4  ;;  %v3771_v52 = vrot.slane %v10795_v0, 7  ;;  %v10793_v19 = vpack.c.bf16 %v3620_v23, %v3620_v23  ;;  %v12422_v18 = vpop.f32.mrf.mxu1  ;;  %v11434_v17 = vpop.f32.mrf.mxu0 }
 0x249   : > { %3878 = vst [vmem:[#allocation2 + $0x118] sm:$0xf] %v3759_v30  ;;  %v10796_v14 = vpack.c.bf16 %v3623_v32, %v3623_v32  ;;  %v3621_v12 = vmax.f32 %v3589_v63, 0.0  ;;  %v3491_v35 = vadd.f32 %v3387_v7, %v14211_v6  ;;  %v3489_v60 = vadd.f32 %v3379_v11, %v16774_v21  ;;  %v14497_v7 = vld [vmem:[#allocation2 + $0xf8] ss:$0 sps:$4 sm:$0x33]  }
 0x24a   : > { %3879 = vst [vmem:[#allocation2 + $0x11c] sm:$0x1] %v3760_v39  ;;  %v3772_v8 = vrot.slane %v3771_v52, 4  ;;  %3886 = vst [vmem:[#allocation2 + $0x138] sm:$0xe] %v3771_v52  ;;  %v3766_v49 = vrot.slane %v10793_v19, 7  ;;  %v3390_v24 = vadd.f32 %v12422_v18, %v14418_v56  ;;  %v3381_v50 = vpop.f32.mrf.mxu1 }
 0x24b   : > { %v3773_v34 = vrot.slane %v10796_v14, 7  ;;  %v10794_v48 = vpack.c.bf16 %v3621_v12, %v3621_v12  ;;  %v3594_v40 = vadd.f32 %v14327_v29, %v3491_v35  ;;  %v3592_v6 = vadd.f32 %v14327_v29, %v3489_v60  ;;  %v14503_v30 = vld [vmem:[#allocation2 + $0xf0] sm:$0xff]  }
 0x24c   : > { %v3767_v33 = vrot.slane %v3766_v49, 4  ;;  %3883 = vst [vmem:[#allocation2 + $0x12c] sm:$0xe] %v3766_v49  ;;  %v3492_v57 = vadd.f32 %v3390_v24, %v16775_v22  ;;  %v3382_v38 = vadd.f32 %v14393_v27, %v3381_v50  ;;  %v12425_v56 = vpop.f32.mrf.mxu1  ;;  %v4324_v51 = vrot.slane %v14467_v62, 1  ;;  %v11436_v22 = vpop.f32.mrf.mxu0 }
 0x24d   : > { %v3774_v54 = vsel %vm13372_vm5, %v3772_v8, %v3773_v34  ;;  %v3775_v44 = vrot.slane %v3773_v34, 4  ;;  %v3768_v4 = vrot.slane %v10794_v48, 7  ;;  %v3626_v53 = vmax.f32 %v3594_v40, 0.0 }
 0x24e   : > { %3887 = vst [vmem:[#allocation2 + $0x13c] sm:$0xf] %v3774_v54  ;;  %v3624_v43 = vmax.f32 %v3592_v6, 0.0  ;;  %v3595_v2 = vadd.f32 %v14327_v29, %v3492_v57  ;;  %v3490_v55 = vadd.f32 %v3382_v38, %v16776_v3  ;;  %v3403_v61 = vadd.f32 %v12425_v56, %v14450_v31  ;;  %v3394_v11 = vpop.f32.mrf.mxu1  ;;  %v12914_v57 = vld [vmem:[#allocation6 + $0x130] sm:$0xff]   ;;  %v16777_v56 = vld [vmem:[#allocation26_spill] sm:$0xff] }
 0x24f   : > { %3888 = vst [vmem:[#allocation2 + $0x140] sm:$0x1] %v3775_v44  ;;  %v3769_v27 = vsel %vm13372_vm5, %v3767_v33, %v3768_v4  ;;  %v3770_v42 = vrot.slane %v3768_v4, 4  ;;  %v10799_v36 = vpack.c.bf16 %v3626_v53, %v3626_v53  ;;  %v4325_v5 = vsel %vm1184_vm7, %v4323_v26, %v4324_v51  ;;  %v12911_v26 = vld [vmem:[#allocation6 + $0xf8] sm:$0xff]  }
 0x250   : > { %3884 = vst [vmem:[#allocation2 + $0x130] sm:$0xf] %v3769_v27  ;;  %v10797_v28 = vpack.c.bf16 %v3624_v43, %v3624_v43  ;;  %v3627_v25 = vmax.f32 %v3595_v2, 0.0  ;;  %v3593_v0 = vadd.f32 %v14327_v29, %v3490_v55  ;;  %v3495_v23 = vadd.f32 %v3403_v61, %v14249_v46  ;;  %v12426_v34 = vpop.f32.mrf.mxu1  ;;  %v12959_v2 = vld [vmem:[#allocation6 + $0x148] sm:$0xff]   ;;  %v12917_v61 = vld [vmem:[#allocation6 + $0xf0] sm:$0xff]  }
 0x251   : > { %3885 = vst [vmem:[#allocation2 + $0x134] sm:$0x1] %v3770_v42  ;;  %v3781_v58 = vrot.slane %v10799_v36, 7  ;;  %v14501_v31 = vadd.f32 %v14453_v37, %v14436_v45  ;;  %v4407_v32 = vshll.u32 %v4325_v5, 16  ;;  %v4412_v63 = vshll.u32 %v4324_v51, 16  ;;  %v16778_v36 = vld [vmem:[#allocation28_spill] sm:$0xff]  ;;  %12495 = vmatprep.subr.bf16.mxu1 %v12959_v2 }
 0x252   : > { %v3776_v39 = vrot.slane %v10797_v28, 7  ;;  %v10800_v52 = vpack.c.bf16 %v3627_v25, %v3627_v25  ;;  %v3625_v19 = vmax.f32 %v3593_v0, 0.0  ;;  %v3598_v18 = vadd.f32 %v14327_v29, %v3495_v23  ;;  %v11437_v28 = vpop.f32.mrf.mxu0  ;;  %v3397_v25 = vpop.f32.mrf.mxu1  ;;  %12496 = vmatpush3.bf16.msra.mxu1 %v12959_v2 }
 0x253   : > { %v3782_v46 = vrot.slane %v3781_v58, 4  ;;  %3892 = vst [vmem:[#allocation2 + $0x150] sm:$0xe] %v3781_v58  ;;  %v4405_v14 = vshrl.u32 %v4325_v5, 16  ;;  %v4409_v12 = vrot.slane %v4407_v32, 1  ;;  %v4414_v35 = vrot.slane %v4412_v63, 1 }
 0x254   : > { %v3777_v21 = vrot.slane %v3776_v39, 4  ;;  %3889 = vst [vmem:[#allocation2 + $0x144] sm:$0xe] %v3776_v39  ;;  %v3783_v45 = vrot.slane %v10800_v52, 7  ;;  %v10798_v37 = vpack.c.bf16 %v3625_v19, %v3625_v19  ;;  %v3630_v60 = vmax.f32 %v3598_v18, 0.0 }
 0x255   : > { %v4410_v8 = vor.u32 %v4409_v12, %v4405_v14  ;;  %v3395_v49 = vadd.f32 %v14424_v16, %v3394_v11  ;;  %v4132_v24 = vshll.u32 %v14497_v7, 16  ;;  %v4326_v50 = vrot.slane %v14503_v30, 1  ;;  %v12924_v14 = vld [vmem:[#allocation6 + $0xe8] sm:$0xff]  }
 0x256   : > { %v3784_v48 = vsel %vm13372_vm5, %v3782_v46, %v3783_v45  ;;  %v3785_v40 = vrot.slane %v3783_v45, 4  ;;  %v3778_v6 = vrot.slane %v10798_v37, 7  ;;  %v10803_v33 = vpack.c.bf16 %v3630_v60, %v3630_v60  ;;  %v14537_v45 = vpop.f32.mrf.mxu0  ;;  %v12927_v37 = vld [vmem:[#allocation6 + $0x120] sm:$0xff]  }
 0x257   : > { %3893 = vst [vmem:[#allocation2 + $0x154] sm:$0xf] %v3784_v48  ;;  %v14513_v38 = vadd.f32 %v14479_v13, %v14463_v41  ;;  %v14516_v16 = vsel %vm959_vm6, %v4410_v8, %v4414_v35  ;;  %v3493_v51 = vadd.f32 %v3395_v49, %v16777_v56  ;;  %v4327_v54 = vrot.slane %v14497_v7, 1  ;;  %v16779_v49 = vld [vmem:[#allocation27_spill] sm:$0xff] }
 0x258   : > { %3894 = vst [vmem:[#allocation2 + $0x158] sm:$0x1] %v3785_v40  ;;  %v3779_v44 = vsel %vm13372_vm5, %v3777_v21, %v3778_v6  ;;  %v3780_v4 = vrot.slane %v3778_v6, 4  ;;  %v3791_v53 = vrot.slane %v10803_v33, 7  ;;  %12452 = vmatmul.mubr.bf16.vlgmr.msra.gmra.mxu0 %v14516_v16  ;;  %v3406_v43 = vadd.f32 %v12426_v34, %v14470_v59  ;;  %v12429_v6 = vpop.f32.mrf.mxu1 }
 0x259   : > { %3890 = vst [vmem:[#allocation2 + $0x148] sm:$0xf] %v3779_v44  ;;  %v14524_v41 = vadd.f32 %v11434_v17, %v11433_v15  ;;  %v3596_v13 = vadd.f32 %v14327_v29, %v3493_v51  ;;  %v14527_v3 = vrot.slane %v4132_v24, 1  ;;  %v4328_v55 = vsel %vm1184_vm7, %v4326_v50, %v4327_v54  ;;  %11612 = vmatpush3.bf16.msra.mxu0 %v12911_v26  ;;  %v12921_v15 = vld [vmem:[#allocation6 + $0x128] sm:$0xff]   ;;  %v12930_v26 = vld [vmem:[#allocation6 + $0xe0] sm:$0xff]  }
 0x25a   : > { %3891 = vst [vmem:[#allocation2 + $0x14c] sm:$0x1] %v3780_v4  ;;  %3898 = vst [vmem:[#allocation2 + $0x168] sm:$0xe] %v3791_v53  ;;  %v4431_v27 = vshll.u32 %v4328_v55, 16  ;;  %v4436_v42 = vshll.u32 %v4327_v54, 16  ;;  %v3496_v5 = vadd.f32 %v3406_v43, %v16778_v36  ;;  %11613 = vmatprep.subr.bf16.mxu0 %v12914_v57  ;;  %v3398_v46 = vadd.f32 %v14445_v1, %v3397_v25 }
 0x25b   : > { %v4111_v59 = vshrl.u32 %v14465_v20, 16  ;;  %v3792_v0 = vrot.slane %v3791_v53, 4  ;;  %v3628_v23 = vmax.f32 %v3596_v13, 0.0  ;;  %v4113_v58 = vshll.u32 %v14465_v20, 16  ;;  %v14541_v50 = vld [vmem:[#allocation2 + $0xfc] sm:$0xff]   ;;  %v14560_v53 = vpop.f32.mrf.mxu0  ;;  %v12934_v43 = vld [vmem:[#allocation6 + $0x118] sm:$0xff]  }
 0x25c   : > { %v4118_v32 = vshll.u32 %v14467_v62, 16  ;;  %v4429_v63 = vshrl.u32 %v4328_v55, 16  ;;  %v4433_v11 = vrot.slane %v4431_v27, 1  ;;  %v3599_v39 = vadd.f32 %v14327_v29, %v3496_v5  ;;  %v14549_v33 = vld [vmem:[#allocation2 + $0x104] ss:$0 sps:$4 sm:$0x33]   ;;  %v3410_v5 = vpop.f32.mrf.mxu1 }
 0x25d   : > { %v4122_v52 = vshrl.u32 %v14467_v62, 16  ;;  %v10801_v19 = vpack.c.bf16 %v3628_v23, %v3628_v23  ;;  %v4115_v18 = vrot.slane %v4113_v58, 1  ;;  %11614 = vmatpush3.bf16.msra.mxu0 %v12917_v61  ;;  %v4438_v35 = vrot.slane %v4436_v42, 1  ;;  %v16780_v25 = vld [vmem:[#allocation31_spill] sm:$0xff]  ;;  %v12937_v23 = vld [vmem:[#allocation6 + $0xd8] sm:$0xff]   ;;  %v12940_v58 = vld [vmem:[#allocation6 + $0x110] sm:$0xff]  }
 0x25e   : > { %v4120_v17 = vrot.slane %v4118_v32, 1  ;;  %v4434_v12 = vor.u32 %v4433_v11, %v4429_v63  ;;  %v3631_v21 = vmax.f32 %v3599_v39, 0.0  ;;  %11615 = vmatprep.subr.bf16.mxu0 %v12921_v15  ;;  %v3494_v24 = vadd.f32 %v3398_v46, %v16779_v49  ;;  %v14575_v39 = vld [vmem:[#allocation2 + $0x110] ss:$0 sps:$4 sm:$0x33]   ;;  %v14582_v46 = vld [vmem:[#allocation2 + $0x108] sm:$0xff]  }
 0x25f   : > { %v4400_v20 = vshll.u32 %v4122_v52, 16  ;;  %v3786_v60 = vrot.slane %v10801_v19, 7  ;;  %v4116_v8 = vor.u32 %v4115_v18, %v4111_v59  ;;  %v4127_v62 = vshll.u32 %v14503_v30, 16  ;;  %v14577_v52 = vpop.f32.mrf.mxu0 }
 0x260   : > { %v14544_v1 = vsel %vm959_vm6, %v4434_v12, %v4438_v35  ;;  %v10804_v34 = vpack.c.bf16 %v3631_v21, %v3631_v21  ;;  %v14546_v48 = vadd.f32 %v11437_v28, %v11436_v22  ;;  %v4136_v40 = vshrl.u32 %v14497_v7, 16 }
 0x261   : > { %3895 = vst [vmem:[#allocation2 + $0x15c] sm:$0xe] %v3786_v60  ;;  %12455 = vmatprep.mubr.bf16.mxu0 %v14544_v1  ;;  %v14553_v57 = vsel %vm959_vm6, %v4116_v8, %v4120_v17  ;;  %v3597_v56 = vadd.f32 %v14327_v29, %v3494_v24  ;;  %v4125_v51 = vshrl.u32 %v14503_v30, 16  ;;  %v4129_v54 = vrot.slane %v4127_v62, 1  ;;  %11616 = vmatpush3.bf16.msra.mxu0 %v12924_v14  ;;  %v12943_v62 = vld [vmem:[#allocation6 + $0xd0] sm:$0xff]  }
 0x262   : > { %v3793_v44 = vrot.slane %v10804_v34, 7  ;;  %v4395_v22 = vshll.u32 %v14553_v57, 16  ;;  %v4402_v4 = vrot.slane %v4400_v20, 1  ;;  %v14558_v7 = vshll.u32 %v4136_v40, 16  ;;  %11617 = vmatprep.subr.bf16.mxu0 %v12927_v37  ;;  %v12430_v20 = vpop.f32.mrf.mxu1  ;;  %v12961_v37 = vld [vmem:[#allocation6 + $0x140] sm:$0xff]  }
 0x263   : > { %v3629_v2 = vmax.f32 %v3597_v56, 0.0  ;;  %v4130_v13 = vor.u32 %v4129_v54, %v4125_v51  ;;  %v3419_v55 = vadd.f32 %v12429_v6, %v14524_v41  ;;  %v4329_v61 = vrot.slane %v14541_v50, 1  ;;  %v14593_v56 = vpop.f32.mrf.mxu0  ;;  %v12947_v51 = vld [vmem:[#allocation6 + $0x108] sm:$0xff]   ;;  %12497 = vmatprep.subr.bf16.mxu1 %v12961_v37 }
 0x264   : > { %v3794_v30 = vsel %vm13372_vm5, %v3792_v0, %v3793_v44  ;;  %v3795_v27 = vrot.slane %v3793_v44, 4  ;;  %v4393_v42 = vshrl.u32 %v14553_v57, 16  ;;  %v4397_v36 = vrot.slane %v4395_v22, 1  ;;  %12498 = vmatpush3.bf16.msra.mxu1 %v12961_v37 }
 0x265   : > { %3899 = vst [vmem:[#allocation2 + $0x16c] sm:$0xf] %v3794_v30  ;;  %v10802_v59 = vpack.c.bf16 %v3629_v2, %v3629_v2  ;;  %v14569_v28 = vsel %vm959_vm6, %v4130_v13, %v14527_v3  ;;  %v3499_v15 = vadd.f32 %v3419_v55, %v16780_v25  ;;  %v4330_v41 = vrot.slane %v14549_v33, 1  ;;  %11618 = vmatpush3.bf16.msra.mxu0 %v12930_v26  ;;  %v16781_v2 = vld [vmem:[#allocation29_spill] sm:$0xff] }
 0x266   : > { %v3787_v32 = vrot.slane %v3786_v60, 4  ;;  %3900 = vst [vmem:[#allocation2 + $0x170] sm:$0x1] %v3795_v27  ;;  %v4398_v0 = vor.u32 %v4397_v36, %v4393_v42  ;;  %v4419_v63 = vshll.u32 %v14569_v28, 16  ;;  %v4426_v11 = vrot.slane %v14558_v7, 1  ;;  %11619 = vmatprep.subr.bf16.mxu0 %v12934_v43  ;;  %v16782_v27 = vld [vmem:[#allocation32_spill] sm:$0xff]  ;;  %v3413_v36 = vpop.f32.mrf.mxu1 }
 0x267   : > { %v3788_v3 = vrot.slane %v10802_v59, 7  ;;  %v4417_v19 = vshrl.u32 %v14569_v28, 16  ;;  %v3602_v18 = vadd.f32 %v14327_v29, %v3499_v15  ;;  %v4331_v17 = vsel %vm1184_vm7, %v4329_v61, %v4330_v41 }
 0x268   : > { %v14585_v14 = vsel %vm959_vm6, %v4398_v0, %v4402_v4  ;;  %v4421_v12 = vrot.slane %v4419_v63, 1  ;;  %v4455_v35 = vshll.u32 %v4331_v17, 16  ;;  %v4460_v21 = vshll.u32 %v4330_v41, 16  ;;  %v11445_v41 = vpop.f32.mrf.mxu0  ;;  %v12433_v37 = vpop.f32.mrf.mxu1 }
 0x269   : > { %5032 = vmatprep.mubr.bf16.mxu1 %v14585_v14  ;;  %v3789_v60 = vsel %vm13372_vm5, %v3787_v32, %v3788_v3  ;;  %v3790_v8 = vrot.slane %v3788_v3, 4  ;;  %v3634_v49 = vmax.f32 %v3602_v18, 0.0  ;;  %v4453_v24 = vshrl.u32 %v4331_v17, 16  ;;  %11620 = vmatpush3.bf16.msra.mxu0 %v12937_v23  ;;  %v14613_v23 = vld [vmem:[#allocation2 + $0x114] sm:$0xff]  }
 0x26a   : > { %5033 = vmatmul.mubr.bf16.gmra.mxu1 %v14553_v57  ;;  %3896 = vst [vmem:[#allocation2 + $0x160] sm:$0xf] %v3789_v60  ;;  %v4422_v26 = vor.u32 %v4421_v12, %v4417_v19  ;;  %v4457_v34 = vrot.slane %v4455_v35, 1  ;;  %v3411_v40 = vadd.f32 %v14501_v31, %v3410_v5  ;;  %v4160_v6 = vshll.u32 %v14575_v39, 16  ;;  %11621 = vmatprep.subr.bf16.mxu0 %v12940_v58  ;;  %v12953_v58 = vld [vmem:[#allocation6 + $0x100] sm:$0xff]  }
 0x26b   : > { %3897 = vst [vmem:[#allocation2 + $0x164] sm:$0x1] %v3790_v8  ;;  %v10807_v54 = vpack.c.bf16 %v3634_v49, %v3634_v49  ;;  %v4332_v44 = vrot.slane %v14582_v46, 1  ;;  %v4333_v22 = vrot.slane %v14575_v39, 1  ;;  %v3422_v4 = vadd.f32 %v12430_v20, %v14546_v48  ;;  %v12950_v48 = vld [vmem:[#allocation6 + $0xc8] sm:$0xff]   ;;  %v12954_v3 = vld [vmem:[#allocation6 + $0xc0] sm:$0xff]  }
 0x26c   : > { %v14599_v7 = vsel %vm959_vm6, %v4422_v26, %v4426_v11  ;;  %v4458_v43 = vor.u32 %v4457_v34, %v4453_v24  ;;  %v4462_v31 = vrot.slane %v4460_v21, 1  ;;  %v3497_v13 = vadd.f32 %v3411_v40, %v16781_v2  ;;  %v14621_v17 = vld [vmem:[#allocation2 + $0x11c] ss:$0 sps:$4 sm:$0x33]   ;;  %v16783_v49 = vld [vmem:[#allocation30_spill] sm:$0xff]  ;;  %v14629_v26 = vld [vmem:[#allocation6 + $0x238] sm:$0xff]   ;;  %v3426_v2 = vpop.f32.mrf.mxu1 }
 0x26d   : > { %5040 = vmatprep.mubr.bf16.mxu1 %v14599_v7  ;;  %v3801_v55 = vrot.slane %v10807_v54, 7  ;;  %v4334_v61 = vsel %vm1184_vm7, %v4332_v44, %v4333_v22  ;;  %v4484_v30 = vshll.u32 %v4333_v22, 16  ;;  %v3500_v42 = vadd.f32 %v3422_v4, %v16782_v27  ;;  %11622 = vmatpush3.bf16.msra.mxu0 %v12943_v62  ;;  %v11446_v62 = vpop.f32.mrf.mxu0 }
 0x26e   : > { %v14606_v5 = vsel %vm959_vm6, %v4458_v43, %v4462_v31  ;;  %v14610_v59 = vadd.f32 %v14560_v53, %v14537_v45  ;;  %v3600_v25 = vadd.f32 %v14327_v29, %v3497_v13  ;;  %v4479_v15 = vshll.u32 %v4334_v61, 16  ;;  %11623 = vmatprep.subr.bf16.mxu0 %v12947_v51 }
 0x26f   : > { %3904 = vst [vmem:[#allocation2 + $0x180] sm:$0xe] %v3801_v55  ;;  %12456 = vmatmul.mubr.bf16.gmra.mxu0 %v14606_v5  ;;  %v14616_v32 = vrot.slane %v4160_v6, 1  ;;  %v4477_v0 = vshrl.u32 %v4334_v61, 16  ;;  %v4486_v63 = vrot.slane %v4484_v30, 1  ;;  %v3603_v11 = vadd.f32 %v14327_v29, %v3500_v42  ;;  %v14640_v42 = vld [vmem:[#allocation2 + $0x120] sm:$0xff]  }
 0x270   : > { %v3632_v45 = vmax.f32 %v3600_v25, 0.0  ;;  %v4481_v53 = vrot.slane %v4479_v15, 1  ;;  %v3414_v19 = vadd.f32 %v14513_v38, %v3413_v36  ;;  %v4139_v18 = vshrl.u32 %v14541_v50, 16  ;;  %v14648_v25 = vld [vmem:[#allocation2 + $0x128] ss:$0 sps:$4 sm:$0x33]  }
 0x271   : > { %v3635_v12 = vmax.f32 %v3603_v11, 0.0  ;;  %v4141_v35 = vshll.u32 %v14541_v50, 16  ;;  %v4146_v21 = vshll.u32 %v14549_v33, 16  ;;  %v4150_v20 = vshrl.u32 %v14549_v33, 16  ;;  %11624 = vmatpush3.bf16.msra.mxu0 %v12950_v48 }
 0x272   : > { %v10805_v60 = vpack.c.bf16 %v3632_v45, %v3632_v45  ;;  %v4482_v8 = vor.u32 %v4481_v53, %v4477_v0  ;;  %5041 = vmatmul.mubr.bf16.gmra.mxu1 %v14569_v28  ;;  %v3498_v24 = vadd.f32 %v3414_v19, %v16783_v49  ;;  %v4335_v38 = vrot.slane %v14613_v23, 1  ;;  %11625 = vmatprep.subr.bf16.mxu0 %v12953_v58  ;;  %v11448_v58 = vpop.f32.mrf.mxu0  ;;  %v12963_v0 = vld [vmem:[#allocation6 + $0x1f8] sm:$0xff]   ;;  %v12434_v53 = vpop.f32.mrf.mxu1 }
 0x273   : > { %v10808_v34 = vpack.c.bf16 %v3635_v12, %v3635_v12  ;;  %v4143_v50 = vrot.slane %v4141_v35, 1  ;;  %v4148_v40 = vrot.slane %v4146_v21, 1  ;;  %v4448_v6 = vshll.u32 %v4150_v20, 16  ;;  %11747 = vmatprep.subr.bf16.mxu1 %v12963_v0 }
 0x274   : > { %v3796_v51 = vrot.slane %v10805_v60, 7  ;;  %v14632_v33 = vsel %vm959_vm6, %v4482_v8, %v4486_v63  ;;  %v3601_v54 = vadd.f32 %v14327_v29, %v3498_v24  ;;  %v4336_v44 = vrot.slane %v14621_v17, 1  ;;  %v16784_v60 = vld [vmem:[#allocation33_spill] sm:$0xff] }
 0x275   : > { %v3802_v22 = vrot.slane %v3801_v55, 4  ;;  %12459 = vmatprep.mubr.bf16.mxu0 %v14632_v33  ;;  %v3803_v4 = vrot.slane %v10808_v34, 7  ;;  %v4144_v43 = vor.u32 %v4143_v50, %v4139_v18  ;;  %v11447_v31 = vadd.f32 %v11446_v62, %v11445_v41  ;;  %11626 = vmatpush3.bf16.msra.mxu0 %v12954_v3  ;;  %v11449_v62 = vpop.f32.mrf.mxu0  ;;  %v13103_v34 = vld [vmem:[%s16690_s2] ss:$0 sm:$0xff] }
 0x276   : > { %3901 = vst [vmem:[#allocation2 + $0x174] sm:$0xe] %v3796_v51  ;;  %v11444_v13 = vadd.f32 %v14593_v56, %v14577_v52  ;;  %v3633_v61 = vmax.f32 %v3601_v54, 0.0  ;;  %v4450_v30 = vrot.slane %v4448_v6, 1  ;;  %v4337_v27 = vsel %vm1184_vm7, %v4335_v38, %v4336_v44  ;;  %12531 = vmatprep.subr.bf16.mxu0 %v14629_v26 }
 0x277   : > { %v3804_v29 = vsel %vm13372_vm5, %v3802_v22, %v3803_v4  ;;  %v3805_v55 = vrot.slane %v3803_v4, 4  ;;  %v14646_v36 = vsel %vm959_vm6, %v4144_v43, %v4148_v40  ;;  %v4508_v48 = vshll.u32 %v4336_v44, 16  ;;  %v14669_v43 = vld [vmem:[#allocation2 + $0x12c] sm:$0xff]  }
 0x278   : > { %v3797_v15 = vrot.slane %v3796_v51, 4  ;;  %3905 = vst [vmem:[#allocation2 + $0x184] sm:$0xf] %v3804_v29  ;;  %v10806_v52 = vpack.c.bf16 %v3633_v61, %v3633_v61  ;;  %v4443_v56 = vshll.u32 %v14646_v36, 16  ;;  %v4503_v41 = vshll.u32 %v4337_v27, 16  ;;  %v3429_v51 = vpop.f32.mrf.mxu1 }
 0x279   : > { %3906 = vst [vmem:[#allocation2 + $0x188] sm:$0x1] %v3805_v55  ;;  %v4441_v63 = vshrl.u32 %v14646_v36, 16  ;;  %v4501_v11 = vshrl.u32 %v4337_v27, 16  ;;  %v3435_v3 = vadd.f32 %v12433_v37, %v11447_v31  ;;  %v3427_v45 = vadd.f32 %v14610_v59, %v3426_v2 }
 0x27a   : > { %v3798_v19 = vrot.slane %v10806_v52, 7  ;;  %v4445_v18 = vrot.slane %v4443_v56, 1  ;;  %v4505_v12 = vrot.slane %v4503_v41, 1  ;;  %v4338_v35 = vrot.slane %v14640_v42, 1 }
 0x27b   : > { %v4510_v21 = vrot.slane %v4508_v48, 1  ;;  %v3503_v20 = vadd.f32 %v3435_v3, %v14319_v47  ;;  %v3501_v8 = vadd.f32 %v3427_v45, %v16784_v60  ;;  %v4339_v49 = vrot.slane %v14648_v25, 1  ;;  %v14671_v31 = vld [vmem:[#allocation2 + $0x134] ss:$0 sps:$4 sm:$0x33]  }
 0x27c   : > { %v3799_v24 = vsel %vm13372_vm5, %v3797_v15, %v3798_v19  ;;  %v3800_v37 = vrot.slane %v3798_v19, 4  ;;  %v4446_v38 = vor.u32 %v4445_v18, %v4441_v63  ;;  %v4506_v59 = vor.u32 %v4505_v12, %v4501_v11  ;;  %v16785_v11 = vld [vmem:[#allocation16_spill] sm:$0xff] }
 0x27d   : > { %3902 = vst [vmem:[#allocation2 + $0x178] sm:$0xf] %v3799_v24  ;;  %v3606_v50 = vadd.f32 %v13103_v34, %v3503_v20  ;;  %v3604_v40 = vadd.f32 %v13103_v34, %v3501_v8  ;;  %v4340_v47 = vsel %vm1184_vm7, %v4338_v35, %v4339_v49  ;;  %v4532_v6 = vshll.u32 %v4339_v49, 16  ;;  %v14690_v60 = vld [vmem:[#allocation2 + $0x140] ss:$0 sps:$4 sm:$0x33]  }
 0x27e   : > { %3903 = vst [vmem:[#allocation2 + $0x17c] sm:$0x1] %v3800_v37  ;;  %v14664_v54 = vsel %vm959_vm6, %v4446_v38, %v4450_v30  ;;  %v14667_v44 = vsel %vm959_vm6, %v4506_v59, %v4510_v21  ;;  %v4525_v22 = vshrl.u32 %v4340_v47, 16  ;;  %v4527_v4 = vshll.u32 %v4340_v47, 16 }
 0x27f   : > { %5048 = vmatprep.mubr.bf16.mxu1 %v14664_v54  ;;  %12460 = vmatmul.mubr.bf16.gmra.mxu0 %v14667_v44  ;;  %v3638_v2 = vmax.f32 %v3606_v50, 0.0  ;;  %v3636_v61 = vmax.f32 %v3604_v40, 0.0  ;;  %v4534_v27 = vrot.slane %v4532_v6, 1  ;;  %v11450_v29 = vadd.f32 %v11449_v62, %v11448_v58 }
 0x280   : > { %v4529_v55 = vrot.slane %v4527_v4, 1  ;;  %5049 = vmatmul.mubr.bf16.gmra.mxu1 %v14646_v36  ;;  %v3430_v30 = vadd.f32 %v11444_v13, %v3429_v51  ;;  %v4153_v48 = vshrl.u32 %v14582_v46, 16  ;;  %v4155_v15 = vshll.u32 %v14582_v46, 16 }
 0x281   : > { %v10811_v52 = vpack.c.bf16 %v3638_v2, %v3638_v2  ;;  %v10809_v56 = vpack.c.bf16 %v3636_v61, %v3636_v61  ;;  %v3438_v41 = vadd.f32 %v12434_v53, %v11450_v29  ;;  %v4164_v0 = vshrl.u32 %v14575_v39, 16  ;;  %v14686_v53 = vld [vmem:[#allocation2 + $0x138] sm:$0xff]  }
 0x282   : > { %v4530_v63 = vor.u32 %v4529_v55, %v4525_v22  ;;  %v3502_v3 = vadd.f32 %v3430_v30, %v16785_v11  ;;  %v4157_v45 = vrot.slane %v4155_v15, 1  ;;  %v4341_v19 = vrot.slane %v14669_v43, 1  ;;  %v14702_v15 = vld [vmem:[#allocation2 + $0x144] sm:$0xff]  }
 0x283   : > { %v3811_v58 = vrot.slane %v10811_v52, 7  ;;  %v3806_v18 = vrot.slane %v10809_v56, 7  ;;  %v3504_v12 = vadd.f32 %v3438_v41, %v14332_v10  ;;  %v4342_v21 = vrot.slane %v14671_v31, 1  ;;  %v14704_v52 = vld [vmem:[#allocation2 + $0x14c] ss:$0 sps:$4 sm:$0x33]  }
 0x284   : > { %v14683_v13 = vsel %vm959_vm6, %v4530_v63, %v4534_v27  ;;  %v3605_v35 = vadd.f32 %v13103_v34, %v3502_v3  ;;  %v4158_v46 = vor.u32 %v4157_v45, %v4153_v48  ;;  %v4188_v39 = vshll.u32 %v14648_v25, 16 }
 0x285   : > { %3910 = vst [vmem:[#allocation2 + $0x198] sm:$0xe] %v3811_v58  ;;  %3907 = vst [vmem:[#allocation2 + $0x18c] sm:$0xe] %v3806_v18  ;;  %12463 = vmatprep.mubr.bf16.mxu0 %v14683_v13  ;;  %v3607_v20 = vadd.f32 %v13103_v34, %v3504_v12  ;;  %v4472_v49 = vshll.u32 %v4164_v0, 16  ;;  %v4343_v24 = vsel %vm1184_vm7, %v4341_v19, %v4342_v21  ;;  %v3812_v37 = vrot.slane %v3811_v58, 4 }
 0x286   : > { %v3637_v8 = vmax.f32 %v3605_v35, 0.0  ;;  %v14694_v10 = vsel %vm959_vm6, %v4158_v46, %v14616_v32  ;;  %v4556_v62 = vshll.u32 %v4342_v21, 16  ;;  %v3807_v50 = vrot.slane %v3806_v18, 4  ;;  %v14713_v58 = vld [vmem:[#allocation2 + $0x150] sm:$0xff]  }
 0x287   : > { %v3639_v38 = vmax.f32 %v3607_v20, 0.0  ;;  %v4467_v59 = vshll.u32 %v14694_v10, 16  ;;  %v4465_v47 = vshrl.u32 %v14694_v10, 16  ;;  %v4551_v34 = vshll.u32 %v4343_v24, 16 }
 0x288   : > { %v10810_v40 = vpack.c.bf16 %v3637_v8, %v3637_v8  ;;  %v4344_v22 = vrot.slane %v14686_v53, 1  ;;  %v4345_v32 = vrot.slane %v14690_v60, 1  ;;  %v4474_v2 = vrot.slane %v4472_v49, 1  ;;  %v14721_v21 = vld [vmem:[#allocation2 + $0x158] ss:$0 sps:$4 sm:$0x33]  }
 0x289   : > { %v10812_v6 = vpack.c.bf16 %v3639_v38, %v3639_v38  ;;  %v4469_v51 = vrot.slane %v4467_v59, 1  ;;  %v4549_v61 = vshrl.u32 %v4343_v24, 16  ;;  %v4553_v27 = vrot.slane %v4551_v34, 1 }
 0x28a   : > { %v3808_v4 = vrot.slane %v10810_v40, 7  ;;  %v4558_v30 = vrot.slane %v4556_v62, 1  ;;  %v4346_v48 = vsel %vm1184_vm7, %v4344_v22, %v4345_v32  ;;  %v4580_v63 = vshll.u32 %v4345_v32, 16  ;;  %v14731_v32 = vld [vmem:[#allocation2 + $0x15c] sm:$0xff]  }
 0x28b   : > { %v3813_v29 = vrot.slane %v10812_v6, 7  ;;  %v4470_v55 = vor.u32 %v4469_v51, %v4465_v47  ;;  %v4554_v0 = vor.u32 %v4553_v27, %v4549_v61  ;;  %v4575_v19 = vshll.u32 %v4346_v48, 16  ;;  %v14737_v61 = vld [vmem:[#allocation2 + $0x164] ss:$0 sps:$4 sm:$0x33]  }
 0x28c   : > { %v3809_v56 = vsel %vm13372_vm5, %v3807_v50, %v3808_v4  ;;  %v3810_v41 = vrot.slane %v3808_v4, 4  ;;  %v4573_v12 = vshrl.u32 %v4346_v48, 16  ;;  %v4169_v35 = vshll.u32 %v14613_v23, 16 }
 0x28d   : > { %v3814_v11 = vsel %vm13372_vm5, %v3812_v37, %v3813_v29  ;;  %v3815_v3 = vrot.slane %v3813_v29, 4  ;;  %3908 = vst [vmem:[#allocation2 + $0x190] sm:$0xf] %v3809_v56  ;;  %v14711_v45 = vsel %vm959_vm6, %v4470_v55, %v4474_v2  ;;  %v14717_v18 = vsel %vm959_vm6, %v4554_v0, %v4558_v30 }
 0x28e   : > { %3911 = vst [vmem:[#allocation2 + $0x19c] sm:$0xf] %v3814_v11  ;;  %3909 = vst [vmem:[#allocation2 + $0x194] sm:$0x1] %v3810_v41  ;;  %5056 = vmatprep.mubr.bf16.mxu1 %v14711_v45  ;;  %v4174_v46 = vshll.u32 %v14621_v17, 16  ;;  %12464 = vmatmul.mubr.bf16.gmra.mxu0 %v14717_v18  ;;  %v4577_v20 = vrot.slane %v4575_v19, 1 }
 0x28f   : > { %3912 = vst [vmem:[#allocation2 + $0x1a0] sm:$0x1] %v3815_v3  ;;  %5057 = vmatmul.mubr.bf16.gmra.mxu1 %v14694_v10  ;;  %v4178_v8 = vshrl.u32 %v14621_v17, 16  ;;  %v4347_v49 = vrot.slane %v14702_v15, 1  ;;  %v4348_v24 = vrot.slane %v14704_v52, 1  ;;  %v4582_v37 = vrot.slane %v4580_v63, 1 }
 0x290   : > { %v4167_v38 = vshrl.u32 %v14613_v23, 16  ;;  %v4171_v59 = vrot.slane %v4169_v35, 1  ;;  %v4176_v62 = vrot.slane %v4174_v46, 1  ;;  %v4578_v50 = vor.u32 %v4577_v20, %v4573_v12  ;;  %v14748_v19 = vld [vmem:[#allocation2 + $0x168] sm:$0xff]  }
 0x291   : > { %v4349_v40 = vsel %vm1184_vm7, %v4347_v49, %v4348_v24  ;;  %v4604_v47 = vshll.u32 %v4348_v24, 16  ;;  %v4350_v34 = vrot.slane %v14713_v58, 1  ;;  %v4190_v6 = vrot.slane %v4188_v39, 1 }
 0x292   : > { %v4172_v51 = vor.u32 %v4171_v59, %v4167_v38  ;;  %v4599_v22 = vshll.u32 %v4349_v40, 16  ;;  %v14734_v17 = vsel %vm959_vm6, %v4578_v50, %v4582_v37  ;;  %v4496_v4 = vshll.u32 %v4178_v8, 16  ;;  %v14757_v50 = vld [vmem:[#allocation2 + $0x170] ss:$0 sps:$4 sm:$0x33]  }
 0x293   : > { %v4597_v2 = vshrl.u32 %v4349_v40, 16  ;;  %v4351_v23 = vrot.slane %v14721_v21, 1  ;;  %12467 = vmatprep.mubr.bf16.mxu0 %v14734_v17  ;;  %v4606_v39 = vrot.slane %v4604_v47, 1  ;;  %v4183_v55 = vshll.u32 %v14640_v42, 16 }
 0x294   : > { %v14741_v27 = vsel %vm959_vm6, %v4172_v51, %v4176_v62  ;;  %v4601_v29 = vrot.slane %v4599_v22, 1  ;;  %v4181_v41 = vshrl.u32 %v14640_v42, 16  ;;  %v4192_v46 = vshrl.u32 %v14648_v25, 16 }
 0x295   : > { %v4491_v30 = vshll.u32 %v14741_v27, 16  ;;  %v4352_v48 = vsel %vm1184_vm7, %v4350_v34, %v4351_v23  ;;  %v4628_v56 = vshll.u32 %v4351_v23, 16  ;;  %v4489_v0 = vshrl.u32 %v14741_v27, 16 }
 0x296   : > { %v4602_v63 = vor.u32 %v4601_v29, %v4597_v2  ;;  %v4623_v11 = vshll.u32 %v4352_v48, 16  ;;  %v4185_v3 = vrot.slane %v4183_v55, 1  ;;  %v4621_v35 = vshrl.u32 %v4352_v48, 16  ;;  %v14768_v2 = vld [vmem:[#allocation2 + $0x174] sm:$0xff]  }
 0x297   : > { %v4493_v12 = vrot.slane %v4491_v30, 1  ;;  %v4353_v20 = vrot.slane %v14731_v32, 1  ;;  %v4354_v42 = vrot.slane %v14737_v61, 1  ;;  %v4498_v38 = vrot.slane %v4496_v4, 1 }
 0x298   : > { %v14753_v8 = vsel %vm959_vm6, %v4602_v63, %v4606_v39  ;;  %v4625_v49 = vrot.slane %v4623_v11, 1  ;;  %v4186_v24 = vor.u32 %v4185_v3, %v4181_v41  ;;  %v4630_v59 = vrot.slane %v4628_v56, 1  ;;  %v14775_v55 = vld [vmem:[#allocation2 + $0x17c] ss:$0 sps:$4 sm:$0x33]  }
 0x299   : > { %v4494_v37 = vor.u32 %v4493_v12, %v4489_v0  ;;  %12468 = vmatmul.mubr.bf16.gmra.mxu0 %v14753_v8  ;;  %v4520_v62 = vshll.u32 %v4192_v46, 16  ;;  %v4355_v47 = vsel %vm1184_vm7, %v4353_v20, %v4354_v42  ;;  %v4652_v34 = vshll.u32 %v4354_v42, 16 }
 0x29a   : > { %v4626_v40 = vor.u32 %v4625_v49, %v4621_v35  ;;  %v14760_v25 = vsel %vm959_vm6, %v4186_v24, %v4190_v6  ;;  %v4356_v4 = vrot.slane %v14748_v19, 1  ;;  %v4647_v39 = vshll.u32 %v4355_v47, 16  ;;  %v14785_v49 = vld [vmem:[#allocation2 + $0x180] sm:$0xff]   ;;  %v14787_v24 = vld [vmem:[#allocation2 + $0x188] ss:$0 sps:$4 sm:$0x33]  }
 0x29b   : > { %v14764_v51 = vsel %vm959_vm6, %v4494_v37, %v4498_v38  ;;  %v4515_v22 = vshll.u32 %v14760_v25, 16  ;;  %v4513_v6 = vshrl.u32 %v14760_v25, 16  ;;  %v4522_v29 = vrot.slane %v4520_v62, 1 }
 0x29c   : > { %5064 = vmatprep.mubr.bf16.mxu1 %v14764_v51  ;;  %v14772_v23 = vsel %vm959_vm6, %v4626_v40, %v4630_v59  ;;  %v4645_v48 = vshrl.u32 %v4355_v47, 16  ;;  %v4654_v56 = vrot.slane %v4652_v34, 1  ;;  %v4357_v41 = vrot.slane %v14757_v50, 1 }
 0x29d   : > { %16786 = vst [vmem:[#allocation12_spill] sm:$0xff] %v14772_v23  ;;  %12471 = vmatprep.mubr.bf16.mxu0 %v14772_v23  ;;  %5065 = vmatmul.mubr.bf16.gmra.mxu1 %v14741_v27  ;;  %v4517_v30 = vrot.slane %v4515_v22, 1  ;;  %v4649_v0 = vrot.slane %v4647_v39, 1  ;;  %v4197_v63 = vshll.u32 %v14669_v43, 16  ;;  %v4202_v11 = vshll.u32 %v14671_v31, 16 }
 0x29e   : > { %v4206_v3 = vshrl.u32 %v14671_v31, 16  ;;  %v4358_v35 = vsel %vm1184_vm7, %v4356_v4, %v4357_v41  ;;  %v4676_v46 = vshll.u32 %v4357_v41, 16  ;;  %v4195_v20 = vshrl.u32 %v14669_v43, 16 }
 0x29f   : > { %v4518_v12 = vor.u32 %v4517_v30, %v4513_v6  ;;  %v4650_v42 = vor.u32 %v4649_v0, %v4645_v48  ;;  %v4671_v37 = vshll.u32 %v4358_v35, 16  ;;  %v4199_v38 = vrot.slane %v4197_v63, 1 }
 0x2a0   : > { %v4359_v59 = vrot.slane %v14768_v2, 1  ;;  %v4669_v40 = vshrl.u32 %v4358_v35, 16  ;;  %v4204_v31 = vrot.slane %v4202_v11, 1  ;;  %v4544_v47 = vshll.u32 %v4206_v3, 16 }
 0x2a1   : > { %v14791_v62 = vsel %vm959_vm6, %v4518_v12, %v4522_v29  ;;  %v14795_v34 = vsel %vm959_vm6, %v4650_v42, %v4654_v56  ;;  %v4673_v43 = vrot.slane %v4671_v37, 1  ;;  %v4200_v22 = vor.u32 %v4199_v38, %v4195_v20  ;;  %v14808_v12 = vld [vmem:[#allocation2 + $0x18c] sm:$0xff]   ;;  %v14815_v37 = vld [vmem:[#allocation2 + $0x194] ss:$0 sps:$4 sm:$0x33]  }
 0x2a2   : > { %5072 = vmatprep.mubr.bf16.mxu1 %v14791_v62  ;;  %16787 = vst [vmem:[#allocation15_spill] sm:$0xff] %v14795_v34  ;;  %v4360_v4 = vrot.slane %v14775_v55, 1  ;;  %12472 = vmatmul.mubr.bf16.gmra.mxu0 %v14795_v34  ;;  %v4678_v6 = vrot.slane %v4676_v46, 1  ;;  %v4362_v39 = vrot.slane %v14785_v49, 1  ;;  %v4363_v29 = vrot.slane %v14787_v24, 1 }
 0x2a3   : > { %v4674_v30 = vor.u32 %v4673_v43, %v4669_v40  ;;  %v14802_v48 = vsel %vm959_vm6, %v4200_v22, %v4204_v31  ;;  %v4216_v56 = vshll.u32 %v14690_v60, 16  ;;  %v4546_v11 = vrot.slane %v4544_v47, 1 }
 0x2a4   : > { %v4361_v41 = vsel %vm1184_vm7, %v4359_v59, %v4360_v4  ;;  %v4700_v0 = vshll.u32 %v4360_v4, 16  ;;  %v4539_v63 = vshll.u32 %v14802_v48, 16  ;;  %v4537_v46 = vshrl.u32 %v14802_v48, 16 }
 0x2a5   : > { %5073 = vmatmul.mubr.bf16.gmra.mxu1 %v14760_v25  ;;  %v4695_v3 = vshll.u32 %v4361_v41, 16  ;;  %v14811_v35 = vsel %vm959_vm6, %v4674_v30, %v4678_v6  ;;  %v4693_v20 = vshrl.u32 %v4361_v41, 16  ;;  %v4364_v42 = vsel %vm1184_vm7, %v4362_v39, %v4363_v29 }
 0x2a6   : > { %12475 = vmatprep.mubr.bf16.mxu0 %v14811_v35  ;;  %v4541_v38 = vrot.slane %v4539_v63, 1  ;;  %v4702_v40 = vrot.slane %v4700_v0, 1  ;;  %v4719_v31 = vshll.u32 %v4364_v42, 16  ;;  %v4717_v47 = vshrl.u32 %v4364_v42, 16 }
 0x2a7   : > { %v4697_v59 = vrot.slane %v4695_v3, 1  ;;  %v4724_v43 = vshll.u32 %v4363_v29, 16  ;;  %v4211_v22 = vshll.u32 %v14686_v53, 16  ;;  %v4220_v4 = vshrl.u32 %v14690_v60, 16 }
 0x2a8   : > { %v4542_v6 = vor.u32 %v4541_v38, %v4537_v46  ;;  %v4721_v9 = vrot.slane %v4719_v31, 1  ;;  %v4365_v41 = vrot.slane %v14808_v12, 1  ;;  %v4218_v39 = vrot.slane %v4216_v56, 1 }
 0x2a9   : > { %v4698_v30 = vor.u32 %v4697_v59, %v4693_v20  ;;  %v4209_v34 = vshrl.u32 %v14686_v53, 16  ;;  %v4213_v23 = vrot.slane %v4211_v22, 1  ;;  %v4366_v63 = vrot.slane %v14815_v37, 1 }
 0x2aa   : > { %v14824_v0 = vsel %vm959_vm6, %v4542_v6, %v4546_v11  ;;  %v4722_v3 = vor.u32 %v4721_v9, %v4717_v47  ;;  %v4726_v42 = vrot.slane %v4724_v43, 1  ;;  %v4244_v60 = vshll.u32 %v14721_v21, 16 }
 0x2ab   : > { %v14827_v29 = vsel %vm959_vm6, %v4698_v30, %v4702_v40  ;;  %5080 = vmatprep.mubr.bf16.mxu1 %v14824_v0  ;;  %v4214_v56 = vor.u32 %v4213_v23, %v4209_v34  ;;  %v4367_v53 = vsel %vm1184_vm7, %v4365_v41, %v4366_v63  ;;  %v4748_v46 = vshll.u32 %v4366_v63, 16 }
 0x2ac   : > { %12476 = vmatmul.mubr.bf16.gmra.mxu0 %v14827_v29  ;;  %v14834_v20 = vsel %vm959_vm6, %v4722_v3, %v4726_v42  ;;  %v4568_v11 = vshll.u32 %v4220_v4, 16  ;;  %v4743_v38 = vshll.u32 %v4367_v53, 16  ;;  %v4225_v9 = vshll.u32 %v14702_v15, 16 }
 0x2ad   : > { %16788 = vst [vmem:[#allocation13_spill] sm:$0xff] %v14834_v20  ;;  %5081 = vmatmul.mubr.bf16.gmra.mxu1 %v14802_v48  ;;  %12479 = vmatprep.mubr.bf16.mxu0 %v14834_v20  ;;  %v14840_v59 = vsel %vm959_vm6, %v4214_v56, %v4218_v39  ;;  %v4741_v40 = vshrl.u32 %v4367_v53, 16  ;;  %v4223_v23 = vshrl.u32 %v14702_v15, 16  ;;  %v4230_v34 = vshll.u32 %v14704_v52, 16 }
 0x2ae   : > { %v4563_v31 = vshll.u32 %v14840_v59, 16  ;;  %v4745_v47 = vrot.slane %v4743_v38, 1  ;;  %v4227_v43 = vrot.slane %v4225_v9, 1  ;;  %v4234_v22 = vshrl.u32 %v14704_v52, 16 }
 0x2af   : > { %v4246_v4 = vrot.slane %v4244_v60, 1  ;;  %v4750_v6 = vrot.slane %v4748_v46, 1  ;;  %v4232_v30 = vrot.slane %v4230_v34, 1  ;;  %v4239_v41 = vshll.u32 %v14713_v58, 16 }
 0x2b0   : > { %v4561_v63 = vshrl.u32 %v14840_v59, 16  ;;  %v4565_v39 = vrot.slane %v4563_v31, 1  ;;  %v4746_v3 = vor.u32 %v4745_v47, %v4741_v40  ;;  %v4228_v42 = vor.u32 %v4227_v43, %v4223_v23 }
 0x2b1   : > { %v4570_v56 = vrot.slane %v4568_v11, 1  ;;  %v4237_v15 = vshrl.u32 %v14713_v58, 16  ;;  %v4241_v53 = vrot.slane %v4239_v41, 1  ;;  %v4253_v20 = vshll.u32 %v14731_v32, 16 }
 0x2b2   : > { %v4566_v38 = vor.u32 %v4565_v39, %v4561_v63  ;;  %v14851_v9 = vsel %vm959_vm6, %v4746_v3, %v4750_v6  ;;  %v14854_v52 = vsel %vm959_vm6, %v4228_v42, %v4232_v30  ;;  %v4592_v60 = vshll.u32 %v4234_v22, 16 }
 0x2b3   : > { %v4587_v46 = vshll.u32 %v14854_v52, 16  ;;  %v4242_v40 = vor.u32 %v4241_v53, %v4237_v15  ;;  %v4251_v11 = vshrl.u32 %v14731_v32, 16  ;;  %v4255_v23 = vrot.slane %v4253_v20, 1 }
 0x2b4   : > { %12480 = vmatmul.mubr.bf16.gmra.mxu0 %v14851_v9  ;;  %v14860_v58 = vsel %vm959_vm6, %v4566_v38, %v4570_v56  ;;  %v4248_v34 = vshrl.u32 %v14721_v21, 16  ;;  %v4258_v31 = vshll.u32 %v14737_v61, 16  ;;  %v4585_v47 = vshrl.u32 %v14854_v52, 16  ;;  %v12958_v56 = vld [vmem:[#allocation6 + $0x230] sm:$0xff]  }
 0x2b5   : > { %5623 = vmatprep.mubr.bf16.mxu0 %v14585_v14  ;;  %5088 = vmatprep.mubr.bf16.mxu1 %v14860_v58  ;;  %v4589_v43 = vrot.slane %v4587_v46, 1  ;;  %v14868_v22 = vsel %vm959_vm6, %v4242_v40, %v4246_v4  ;;  %v4256_v6 = vor.u32 %v4255_v23, %v4251_v11  ;;  %v4272_v14 = vshll.u32 %v14757_v50, 16 }
 0x2b6   : > { %5089 = vmatmul.mubr.bf16.gmra.mxu1 %v14840_v59  ;;  %v4611_v32 = vshll.u32 %v14868_v22, 16  ;;  %v4260_v20 = vrot.slane %v4258_v31, 1  ;;  %v4594_v21 = vrot.slane %v4592_v60, 1  ;;  %v4267_v41 = vshll.u32 %v14748_v19, 16 }
 0x2b7   : > { %v4590_v30 = vor.u32 %v4589_v43, %v4585_v47  ;;  %v4609_v63 = vshrl.u32 %v14868_v22, 16  ;;  %v4616_v3 = vshll.u32 %v4248_v34, 16  ;;  %v4265_v15 = vshrl.u32 %v14748_v19, 16  ;;  %v12960_v19 = vld [vmem:[#allocation6 + $0x228] sm:$0xff]  }
 0x2b8   : > { %v4613_v39 = vrot.slane %v4611_v32, 1  ;;  %v14876_v42 = vsel %vm959_vm6, %v4256_v6, %v4260_v20  ;;  %v4269_v53 = vrot.slane %v4267_v41, 1  ;;  %v4274_v46 = vrot.slane %v4272_v14, 1  ;;  %v12962_v20 = vld [vmem:[#allocation6 + $0x220] sm:$0xff]  }
 0x2b9   : > { %v14879_v4 = vsel %vm959_vm6, %v4590_v30, %v4594_v21  ;;  %v4635_v60 = vshll.u32 %v14876_v42, 16  ;;  %v4281_v11 = vshll.u32 %v14768_v2, 16  ;;  %v4618_v23 = vrot.slane %v4616_v3, 1 }
 0x2ba   : > { %5096 = vmatprep.mubr.bf16.mxu1 %v14879_v4  ;;  %v4614_v38 = vor.u32 %v4613_v39, %v4609_v63  ;;  %v4270_v40 = vor.u32 %v4269_v53, %v4265_v15  ;;  %v4262_v34 = vshrl.u32 %v14737_v61, 16  ;;  %v4286_v6 = vshll.u32 %v14775_v55, 16 }
 0x2bb   : > { %v4637_v47 = vrot.slane %v4635_v60, 1  ;;  %v4283_v43 = vrot.slane %v4281_v11, 1  ;;  %v4279_v61 = vshrl.u32 %v14768_v2, 16  ;;  %v4295_v63 = vshll.u32 %v14785_v49, 16  ;;  %v12965_v2 = vld [vmem:[#allocation6 + $0x218] sm:$0xff]  }
 0x2bc   : > { %5624 = vmatmul.mubr.bf16.vlgmr.msra.gmra.mxu0 %v14553_v57  ;;  %v14891_v31 = vsel %vm959_vm6, %v4614_v38, %v4618_v23  ;;  %v14895_v57 = vsel %vm959_vm6, %v4270_v40, %v4274_v46  ;;  %v4640_v32 = vshll.u32 %v4262_v34, 16  ;;  %v4288_v41 = vrot.slane %v4286_v6, 1  ;;  %v12970_v34 = vld [vmem:[#allocation6 + $0x210] sm:$0xff]  }
 0x2bd   : > { %5631 = vmatprep.mubr.bf16.mxu0 %v14599_v7  ;;  %12532 = vmatpush3.bf16.msra.mxu0 %v14629_v26  ;;  %v4633_v26 = vshrl.u32 %v14876_v42, 16  ;;  %v4659_v30 = vshll.u32 %v14895_v57, 16  ;;  %v4284_v21 = vor.u32 %v4283_v43, %v4279_v61  ;;  %v4276_v3 = vshrl.u32 %v14757_v50, 16 }
 0x2be   : > { %12533 = vmatprep.subr.bf16.mxu0 %v12958_v56  ;;  %5097 = vmatmul.mubr.bf16.gmra.mxu1 %v14854_v52  ;;  %v4642_v39 = vrot.slane %v4640_v32, 1  ;;  %v4300_v38 = vshll.u32 %v14787_v24, 16  ;;  %v4297_v46 = vrot.slane %v4295_v63, 1  ;;  %v4657_v50 = vshrl.u32 %v14895_v57, 16 }
 0x2bf   : > { %5104 = vmatprep.mubr.bf16.mxu1 %v14891_v31  ;;  %v4638_v14 = vor.u32 %v4637_v47, %v4633_v26  ;;  %v4661_v53 = vrot.slane %v4659_v30, 1  ;;  %v14912_v60 = vsel %vm959_vm6, %v4284_v21, %v4288_v41  ;;  %v4664_v40 = vshll.u32 %v4276_v3, 16 }
 0x2c0   : > { %v4293_v23 = vshrl.u32 %v14785_v49, 16  ;;  %v4683_v43 = vshll.u32 %v14912_v60, 16  ;;  %v4302_v6 = vrot.slane %v4300_v38, 1  ;;  %v4309_v32 = vshll.u32 %v14808_v12, 16  ;;  %v12975_v49 = vld [vmem:[#allocation6 + $0x208] sm:$0xff]  }
 0x2c1   : > { %12534 = vmatpush3.bf16.msra.mxu0 %v12958_v56  ;;  %v11491_v56 = vpop.f32.mrf.mxu1  ;;  %v14907_v15 = vsel %vm959_vm6, %v4638_v14, %v4642_v39  ;;  %v4662_v47 = vor.u32 %v4661_v53, %v4657_v50  ;;  %v4666_v61 = vrot.slane %v4664_v40, 1  ;;  %v4314_v63 = vshll.u32 %v14815_v37, 16 }
 0x2c2   : > { %12535 = vmatprep.subr.bf16.mxu0 %v12960_v19  ;;  %v4298_v26 = vor.u32 %v4297_v46, %v4293_v23  ;;  %v4685_v30 = vrot.slane %v4683_v43, 1  ;;  %v4311_v41 = vrot.slane %v4309_v32, 1  ;;  %v4681_v39 = vshrl.u32 %v14912_v60, 16 }
 0x2c3   : > { %v11492_v11 = vpop.f32.mrf.mxu1  ;;  %v14925_v14 = vsel %vm959_vm6, %v4662_v47, %v4666_v61  ;;  %v4307_v3 = vshrl.u32 %v14808_v12, 16  ;;  %v4316_v46 = vrot.slane %v4314_v63, 1  ;;  %v4304_v40 = vshrl.u32 %v14787_v24, 16  ;;  %v12964_v63 = vld [vmem:[#allocation6 + $0x1b8] sm:$0xff]  }
 0x2c4   : > { %5632 = vmatmul.mubr.bf16.gmra.mxu0 %v14569_v28  ;;  %v14929_v21 = vsel %vm959_vm6, %v4298_v26, %v4302_v6  ;;  %v4318_v26 = vshrl.u32 %v14815_v37, 16 }
 0x2c5   : > { %5639 = vmatprep.mubr.bf16.mxu0 %v14664_v54  ;;  %12536 = vmatpush3.bf16.msra.mxu0 %v12960_v19  ;;  %v14916_v19 = vadd.f32 %v11492_v11, %v11491_v56  ;;  %v12980_v56 = vld [vmem:[#allocation6 + $0x200] sm:$0xff]   ;;  %v4707_v53 = vshll.u32 %v14929_v21, 16  ;;  %v4312_v38 = vor.u32 %v4311_v41, %v4307_v3  ;;  %v4712_v47 = vshll.u32 %v4304_v40, 16  ;;  %v12968_v3 = vld [vmem:[#allocation6 + $0x1e8] sm:$0xff]  }
 0x2c6   : > { %12537 = vmatprep.subr.bf16.mxu0 %v12962_v20  ;;  %5105 = vmatmul.mubr.bf16.gmra.mxu1 %v14868_v22  ;;  %v12978_v40 = vld [vmem:[#allocation6 + $0x1c8] sm:$0xff]  }
 0x2c7   : > { %5112 = vmatprep.mubr.bf16.mxu1 %v14907_v15  ;;  %v4709_v11 = vrot.slane %v4707_v53, 1  ;;  %v14944_v23 = vsel %vm959_vm6, %v4312_v38, %v4316_v46  ;;  %v4714_v6 = vrot.slane %v4712_v47, 1  ;;  %v12973_v53 = vld [vmem:[#allocation6 + $0x1d8] sm:$0xff]   ;;  %v12976_v46 = vld [vmem:[#allocation6 + $0x1d0] sm:$0xff]   ;;  %v12983_v47 = vld [vmem:[#allocation6 + $0x1c0] sm:$0xff]  }
 0x2c8   : > { %v4731_v24 = vshll.u32 %v14944_v23, 16  ;;  %v12974_v38 = vld [vmem:[#allocation6 + $0x198] sm:$0xff]  }
 0x2c9   : > { %12538 = vmatpush3.bf16.msra.mxu0 %v12962_v20  ;;  %v4290_v20 = vshrl.u32 %v14775_v55, 16 }
 0x2ca   : > { %12539 = vmatprep.subr.bf16.mxu0 %v12965_v2  ;;  %v4733_v61 = vrot.slane %v4731_v24, 1  ;;  %v12982_v24 = vld [vmem:[#allocation2 + $0x1a0] ss:$0 sps:$4 sm:$0x33]  }
 0x2cb   : > { %v4688_v55 = vshll.u32 %v4290_v20, 16  ;;  %v4729_v20 = vshrl.u32 %v14944_v23, 16 }
 0x2cc   : > { %5640 = vmatmul.mubr.bf16.gmra.mxu0 %v14646_v36 }
 0x2cd   : > { %5647 = vmatprep.mubr.bf16.mxu0 %v14711_v45  ;;  %12540 = vmatpush3.bf16.msra.mxu0 %v12965_v2  ;;  %v4686_v2 = vor.u32 %v4685_v30, %v4681_v39  ;;  %v4690_v50 = vrot.slane %v4688_v55, 1  ;;  %v4734_v30 = vor.u32 %v4733_v61, %v4729_v20  ;;  %v12966_v39 = vld [vmem:[#allocation6 + $0x1f0] sm:$0xff]   ;;  %v5362_v61 = vshll.u32 %v12982_v24, 16  ;;  %v11494_v20 = vpop.f32.mrf.mxu1 }
 0x2ce   : > { %12541 = vmatprep.subr.bf16.mxu0 %v12970_v34  ;;  %5113 = vmatmul.mubr.bf16.gmra.mxu1 %v14876_v42  ;;  %v12967_v55 = vld [vmem:[#allocation6 + $0x1b0] sm:$0xff]  }
 0x2cf   : > { %5120 = vmatprep.mubr.bf16.mxu1 %v14925_v14  ;;  %v14940_v12 = vsel %vm959_vm6, %v4686_v2, %v4690_v50  ;;  %v12972_v2 = vld [vmem:[#allocation6 + $0x1a0] sm:$0xff]   ;;  %v12977_v50 = vld [vmem:[#allocation6 + $0x190] sm:$0xff]  }
 0x2d1   : > { %12542 = vmatpush3.bf16.msra.mxu0 %v12970_v34  ;;  %v4705_v34 = vshrl.u32 %v14929_v21, 16 }
 0x2d2   : > { %12543 = vmatprep.subr.bf16.mxu0 %v12975_v49 }
 0x2d3   : > { %v4710_v43 = vor.u32 %v4709_v11, %v4705_v34  ;;  %v12979_v11 = vld [vmem:[#allocation6 + $0x188] sm:$0xff]  }
 0x2d4   : > { %5648 = vmatmul.mubr.bf16.gmra.mxu0 %v14694_v10  ;;  %v12981_v34 = vld [vmem:[#allocation2 + $0x198] sm:$0xff]  }
 0x2d5   : > { %5655 = vmatprep.mubr.bf16.mxu0 %v14764_v51  ;;  %12544 = vmatpush3.bf16.msra.mxu0 %v12975_v49  ;;  %v14953_v32 = vsel %vm959_vm6, %v4710_v43, %v4714_v6  ;;  %v4736_v49 = vshll.u32 %v4318_v26, 16  ;;  %v12984_v43 = vld [vmem:[#allocation6 + $0x180] sm:$0xff]   ;;  %v5357_v6 = vshll.u32 %v12981_v34, 16 }
 0x2d6   : > { %12545 = vmatprep.subr.bf16.mxu0 %v12980_v56  ;;  %5121 = vmatmul.mubr.bf16.gmra.mxu1 %v14895_v57 }
 0x2d7   : > { %5128 = vmatprep.mubr.bf16.mxu1 %v14940_v12  ;;  %v4738_v41 = vrot.slane %v4736_v49, 1  ;;  %v5359_v26 = vrot.slane %v5357_v6, 1  ;;  %v16789_v49 = vld [vmem:[#allocation12_spill] sm:$0xff] }
 0x2d9   : > { %12546 = vmatpush3.bf16.msra.mxu0 %v12980_v56  ;;  %v14961_v37 = vsel %vm959_vm6, %v4734_v30, %v4738_v41  ;;  %v12969_v56 = vld [vmem:[#allocation6 + $0x1a8] sm:$0xff]   ;;  %v5355_v30 = vshrl.u32 %v12981_v34, 16 }
 0x2da   : > { %v16790_v41 = vld [vmem:[#allocation15_spill] sm:$0xff] }
 0x2dc   : > { %5656 = vmatmul.mubr.bf16.gmra.mxu0 %v14741_v27 }
 0x2dd   : > { %5663 = vmatprep.mubr.bf16.mxu0 %v14791_v62 }
 0x2de   : > { %5129 = vmatmul.mubr.bf16.gmra.mxu1 %v14912_v60 }
 0x2df   : > { %5136 = vmatprep.mubr.bf16.mxu1 %v14953_v32 }
 0x2e4   : > { %5664 = vmatmul.mubr.bf16.gmra.mxu0 %v14760_v25 }
 0x2e5   : > { %5671 = vmatprep.mubr.bf16.mxu0 %v14824_v0 }
 0x2e6   : > { %5137 = vmatmul.mubr.bf16.gmra.mxu1 %v14929_v21 }
 0x2e7   : > { %5144 = vmatprep.mubr.bf16.mxu1 %v14961_v37 }
 0x2ec   : > { %5672 = vmatmul.mubr.bf16.gmra.mxu0 %v14802_v48 }
 0x2ed   : > { %5679 = vmatprep.mubr.bf16.mxu0 %v14860_v58 }
 0x2ee   : > { %5145 = vmatmul.mubr.bf16.gmra.mxu1 %v14944_v23 }
 0x2ef   : > { %12499 = vmatprep.mubr.bf16.mxu1 %v14516_v16  ;;  %v12971_v16 = vld [vmem:[#allocation6 + $0x1e0] sm:$0xff]  }
 0x2f4   : > { %5680 = vmatmul.mubr.bf16.gmra.mxu0 %v14840_v59 }
 0x2f5   : > { %5687 = vmatprep.mubr.bf16.mxu0 %v14879_v4 }
 0x2f6   : > { %12500 = vmatmul.mubr.bf16.vlgmr.msra.gmra.mxu1 %v14544_v1 }
 0x2f7   : > { %12503 = vmatprep.mubr.bf16.mxu1 %v14606_v5  ;;  %11748 = vmatpush3.bf16.msra.mxu1 %v12964_v63 }
 0x2f8   : > { %11749 = vmatprep.subr.bf16.mxu1 %v12966_v39  ;;  %v5360_v39 = vor.u32 %v5359_v26, %v5355_v30  ;;  %v16792_v30 = vld [vmem:[#allocation13_spill] sm:$0xff] }
 0x2fb   : > { %11750 = vmatpush3.bf16.msra.mxu1 %v12967_v55  ;;  %v5364_v55 = vrot.slane %v5362_v61, 1 }
 0x2fc   : > { %5688 = vmatmul.mubr.bf16.gmra.mxu0 %v14854_v52  ;;  %11751 = vmatprep.subr.bf16.mxu1 %v12968_v3  ;;  %v11495_v3 = vpop.f32.mrf.mxu1 }
 0x2fd   : > { %5695 = vmatprep.mubr.bf16.mxu0 %v14891_v31 }
 0x2fe   : > { %12504 = vmatmul.mubr.bf16.gmra.mxu1 %v14632_v33 }
 0x2ff   : > { %12507 = vmatprep.mubr.bf16.mxu1 %v14667_v44  ;;  %11752 = vmatpush3.bf16.msra.mxu1 %v12969_v56 }
 0x300   : > { %11753 = vmatprep.subr.bf16.mxu1 %v12971_v16  ;;  %v5368_v16 = vrot.slane %v12981_v34, 1  ;;  %v5366_v34 = vshrl.u32 %v12982_v24, 16 }
 0x302   : > { %v5379_v61 = vshll.u32 %v5366_v34, 16 }
 0x303   : > { %11754 = vmatpush3.bf16.msra.mxu1 %v12972_v2  ;;  %v5369_v2 = vrot.slane %v12982_v24, 1 }
 0x304   : > { %5696 = vmatmul.mubr.bf16.gmra.mxu0 %v14868_v22  ;;  %11755 = vmatprep.subr.bf16.mxu1 %v12973_v53 }
 0x305   : > { %5703 = vmatprep.mubr.bf16.mxu0 %v14907_v15 }
 0x306   : > { %12508 = vmatmul.mubr.bf16.gmra.mxu1 %v14683_v13 }
 0x307   : > { %12511 = vmatprep.mubr.bf16.mxu1 %v14717_v18  ;;  %11756 = vmatpush3.bf16.msra.mxu1 %v12974_v38 }
 0x308   : > { %11757 = vmatprep.subr.bf16.mxu1 %v12976_v46  ;;  %v14994_v46 = vsel %vm959_vm6, %v5360_v39, %v5364_v55 }
 0x309   : > { %v5372_v26 = vshrl.u32 %v14994_v46, 16 }
 0x30b   : > { %11758 = vmatpush3.bf16.msra.mxu1 %v12977_v50  ;;  %v11496_v50 = vadd.f32 %v11495_v3, %v11494_v20  ;;  %v5391_v3 = vshll.u32 %v5369_v2, 16 }
 0x30c   : > { %5704 = vmatmul.mubr.bf16.gmra.mxu0 %v14876_v42  ;;  %11759 = vmatprep.subr.bf16.mxu1 %v12978_v40 }
 0x30d   : > { %5711 = vmatprep.mubr.bf16.mxu0 %v14925_v14 }
 0x30e   : > { %12512 = vmatmul.mubr.bf16.gmra.mxu1 %v14734_v17 }
 0x30f   : > { %12515 = vmatprep.mubr.bf16.mxu1 %v14753_v8  ;;  %11760 = vmatpush3.bf16.msra.mxu1 %v12979_v11  ;;  %v5370_v11 = vsel %vm1184_vm7, %v5368_v16, %v5369_v2 }
 0x310   : > { %11761 = vmatprep.subr.bf16.mxu1 %v12983_v47  ;;  %v5384_v55 = vshrl.u32 %v5370_v11, 16 }
 0x313   : > { %11762 = vmatpush3.bf16.msra.mxu1 %v12984_v43  ;;  %v5386_v43 = vshll.u32 %v5370_v11, 16 }
 0x314   : > { %5712 = vmatmul.mubr.bf16.gmra.mxu0 %v14895_v57 }
 0x315   : > { %5719 = vmatprep.mubr.bf16.mxu0 %v14940_v12  ;;  %v5388_v20 = vrot.slane %v5386_v43, 1  ;;  %v5393_v43 = vrot.slane %v5391_v3, 1 }
 0x316   : > { %12516 = vmatmul.mubr.bf16.gmra.mxu1 %v16789_v49 }
 0x317   : > { %12519 = vmatprep.mubr.bf16.mxu1 %v16790_v41 }
 0x318   : > { %v12453_v63 = vpop.f32.mrf.mxu0 }
 0x31a   : > { %v5187_v56 = vpop.f32.mrf.mxu0 }
 0x31b   : > { %v14989_v53 = vadd.f32 %v14916_v19, %v5187_v56  ;;  %v5374_v19 = vshll.u32 %v14994_v46, 16  ;;  %v530_v56 = vld [vmem:[#allocation2 + $0x1ac] sm:$0x3] }
 0x31c   : > { %5720 = vmatmul.mubr.bf16.gmra.mxu0 %v14912_v60  ;;  %v12454_v38 = vpop.f32.mrf.mxu0  ;;  %v531_v24 = vsel %vm13351_vm2, 0, %v530_v56 }
 0x31d   : > { %5727 = vmatprep.mubr.bf16.mxu0 %v14953_v32  ;;  %v5376_v6 = vrot.slane %v5374_v19, 1  ;;  %532 = vst [vmem:[#allocation2 + $0x1ac] sm:$0x3] %v531_v24 }
 0x31e   : > { %v5190_v40 = vpop.f32.mrf.mxu0  ;;  %12520 = vmatmul.mubr.bf16.gmra.mxu1 %v14811_v35 }
 0x31f   : > { %v14998_v47 = vadd.f32 %v11496_v50, %v5190_v40  ;;  %12523 = vmatprep.mubr.bf16.mxu1 %v14827_v29  ;;  %v5377_v39 = vor.u32 %v5376_v6, %v5372_v26  ;;  %v5381_v50 = vrot.slane %v5379_v61, 1  ;;  %v5389_v40 = vor.u32 %v5388_v20, %v5384_v55 }
 0x321   : > { %16791 = vst [vmem:[#allocation18_spill] sm:$0xff] %v14998_v47  ;;  %v15011_v34 = vsel %vm959_vm6, %v5377_v39, %v5381_v50  ;;  %v15015_v2 = vsel %vm959_vm6, %v5389_v40, %v5393_v43 }
 0x324   : > { %5728 = vmatmul.mubr.bf16.gmra.mxu0 %v14929_v21 }
 0x325   : > { %5735 = vmatprep.mubr.bf16.mxu0 %v14961_v37 }
 0x326   : > { %12524 = vmatmul.mubr.bf16.gmra.mxu1 %v16792_v30 }
 0x327   : > { %12527 = vmatprep.mubr.bf16.mxu1 %v14851_v9 }
 0x32a   : > { %v11497_v19 = vpop.f32.mrf.mxu1 }
 0x32c   : > { %5736 = vmatmul.mubr.bf16.gmra.mxu0 %v14944_v23  ;;  %v11498_v47 = vpop.f32.mrf.mxu1 }
 0x32d   : > { %5743 = vmatprep.mubr.bf16.mxu0 %v15011_v34  ;;  %v11499_v6 = vadd.f32 %v11498_v47, %v11497_v19 }
 0x32e   : > { %v11500_v11 = vpop.f32.mrf.mxu1  ;;  %12528 = vmatmul.mubr.bf16.gmra.mxu1 %v15015_v2 }
 0x32f   : > { %v15018_v26 = vadd.f32 %v12453_v63, %v11499_v6  ;;  %v12457_v61 = vpop.f32.mrf.mxu0  ;;  %6286 = vmatprep.mubr.bf16.mxu1 %v14599_v7 }
 0x330   : > { %v11501_v20 = vpop.f32.mrf.mxu1 }
 0x331   : > { %v11502_v55 = vadd.f32 %v11501_v20, %v11500_v11  ;;  %v5203_v39 = vpop.f32.mrf.mxu0 }
 0x332   : > { %v11503_v56 = vpop.f32.mrf.mxu1 }
 0x333   : > { %v15021_v3 = vadd.f32 %v12454_v38, %v11502_v55  ;;  %v12458_v24 = vpop.f32.mrf.mxu0 }
 0x334   : > { %5744 = vmatmul.mubr.bf16.gmra.mxu0 %v14994_v46  ;;  %v11504_v47 = vpop.f32.mrf.mxu1 }
 0x335   : > { %12547 = vmatprep.mubr.bf16.mxu0 %v14544_v1  ;;  %v11505_v16 = vadd.f32 %v11504_v47, %v11503_v56  ;;  %v5206_v19 = vpop.f32.mrf.mxu0 }
 0x336   : > { %v11506_v50 = vpop.f32.mrf.mxu1  ;;  %6287 = vmatmul.mubr.bf16.vlgmr.msra.gmra.mxu1 %v14569_v28 }
 0x337   : > { %v15026_v63 = vadd.f32 %v11505_v16, %v5203_v39  ;;  %6294 = vmatprep.mubr.bf16.mxu1 %v14664_v54 }
 0x338   : > { %v11507_v7 = vpop.f32.mrf.mxu1 }
 0x339   : > { %v11508_v40 = vadd.f32 %v11507_v7, %v11506_v50  ;;  %v15063_v50 = vld [vmem:[#allocation2 + $0x1ac] ss:$0 sps:$4 sm:$0x33]  }
 0x33b   : > { %v15029_v43 = vadd.f32 %v11508_v40, %v5206_v19 }
 0x33c   : > { %12548 = vmatmul.mubr.bf16.vlgmr.msra.gmra.mxu0 %v14606_v5 }
 0x33d   : > { %12551 = vmatprep.mubr.bf16.mxu0 %v14632_v33 }
 0x33e   : > { %6295 = vmatmul.mubr.bf16.gmra.mxu1 %v14646_v36 }
 0x33f   : > { %v12461_v1 = vpop.f32.mrf.mxu0  ;;  %6302 = vmatprep.mubr.bf16.mxu1 %v14711_v45 }
 0x340   : > { %v11509_v38 = vpop.f32.mrf.mxu1 }
 0x341   : > { %v5219_v6 = vpop.f32.mrf.mxu0 }
 0x342   : > { %v11510_v28 = vpop.f32.mrf.mxu1 }
 0x343   : > { %v11511_v11 = vadd.f32 %v11510_v28, %v11509_v38  ;;  %v12462_v5 = vpop.f32.mrf.mxu0 }
 0x344   : > { %12552 = vmatmul.mubr.bf16.gmra.mxu0 %v14667_v44  ;;  %v11512_v54 = vpop.f32.mrf.mxu1 }
 0x345   : > { %12555 = vmatprep.mubr.bf16.mxu0 %v14683_v13  ;;  %v15037_v20 = vadd.f32 %v12457_v61, %v11511_v11  ;;  %v5222_v45 = vpop.f32.mrf.mxu0 }
 0x346   : > { %v11513_v55 = vpop.f32.mrf.mxu1  ;;  %6303 = vmatmul.mubr.bf16.gmra.mxu1 %v14694_v10 }
 0x347   : > { %v11514_v33 = vadd.f32 %v11513_v55, %v11512_v54  ;;  %6310 = vmatprep.mubr.bf16.mxu1 %v14764_v51 }
 0x349   : > { %v15041_v36 = vadd.f32 %v12458_v24, %v11514_v33  ;;  %v15061_v24 = vld [vmem:[#allocation2 + $0x1a4] sm:$0xff]  }
 0x34c   : > { %12556 = vmatmul.mubr.bf16.gmra.mxu0 %v14717_v18 }
 0x34d   : > { %12559 = vmatprep.mubr.bf16.mxu0 %v14734_v17 }
 0x34e   : > { %6311 = vmatmul.mubr.bf16.gmra.mxu1 %v14741_v27  ;;  %v15046_v44 = vpop.f32.mrf.mxu0 }
 0x34f   : > { %v11515_v13 = vpop.f32.mrf.mxu1  ;;  %6318 = vmatprep.mubr.bf16.mxu1 %v14791_v62 }
 0x350   : > { %v5235_v61 = vpop.f32.mrf.mxu0 }
 0x351   : > { %v11516_v10 = vpop.f32.mrf.mxu1 }
 0x352   : > { %v11517_v39 = vadd.f32 %v11516_v10, %v11515_v13  ;;  %v15049_v56 = vpop.f32.mrf.mxu0 }
 0x353   : > { %v11518_v51 = vpop.f32.mrf.mxu1 }
 0x354   : > { %12560 = vmatmul.mubr.bf16.gmra.mxu0 %v14753_v8  ;;  %v15052_v47 = vadd.f32 %v11517_v39, %v5219_v6  ;;  %v5238_v18 = vpop.f32.mrf.mxu0 }
 0x355   : > { %12563 = vmatprep.mubr.bf16.mxu0 %v16789_v49  ;;  %v11519_v17 = vpop.f32.mrf.mxu1 }
 0x356   : > { %v11520_v27 = vadd.f32 %v11519_v17, %v11518_v51  ;;  %6319 = vmatmul.mubr.bf16.gmra.mxu1 %v14760_v25  ;;  %v6031_v25 = vrot.slane %v15061_v24, 1 }
 0x357   : > { %6326 = vmatprep.mubr.bf16.mxu1 %v14824_v0  ;;  %v6032_v0 = vrot.slane %v15063_v50, 1 }
 0x358   : > { %v15057_v62 = vadd.f32 %v11520_v27, %v5222_v45 }
 0x359   : > { %v15059_v16 = vpop.f32.mrf.mxu0 }
 0x35b   : > { %v15065_v8 = vpop.f32.mrf.mxu0 }
 0x35c   : > { %12564 = vmatmul.mubr.bf16.gmra.mxu0 %v16790_v41  ;;  %v12987_v41 = vld [vmem:[%s16693_s5 + $0x78] sm:$0xff]  }
 0x35d   : > { %12567 = vmatprep.mubr.bf16.mxu0 %v14811_v35  ;;  %v11521_v49 = vpop.f32.mrf.mxu1  ;;  %v15069_v7 = vpop.f32.mrf.mxu0  ;;  %v6033_v35 = vsel %vm1184_vm7, %v6031_v25, %v6032_v0  ;;  %11883 = vmatprep.subr.bf16.mxu0 %v12987_v41 }
 0x35e   : > { %6327 = vmatmul.mubr.bf16.gmra.mxu1 %v14802_v48  ;;  %v6049_v45 = vshll.u32 %v6033_v35, 16  ;;  %v6047_v17 = vshrl.u32 %v6033_v35, 16 }
 0x35f   : > { %v11522_v40 = vpop.f32.mrf.mxu1  ;;  %v15074_v19 = vpop.f32.mrf.mxu0  ;;  %6334 = vmatprep.mubr.bf16.mxu1 %v14860_v58  ;;  %v12988_v58 = vld [vmem:[%s16693_s5 + $0x38] sm:$0xff]  }
 0x360   : > { %16794 = vst [vmem:[#allocation14_spill] sm:$0xff] %v15074_v19  ;;  %v11523_v38 = vadd.f32 %v11522_v40, %v11521_v49  ;;  %11884 = vmatpush3.bf16.msra.mxu0 %v12988_v58  ;;  %v6051_v27 = vrot.slane %v6049_v45, 1  ;;  %v6054_v49 = vshll.u32 %v6032_v0, 16  ;;  %v12990_v40 = vld [vmem:[%s16693_s5 + $0x70] sm:$0xff]  }
 0x361   : > { %v11524_v28 = vpop.f32.mrf.mxu1  ;;  %11885 = vmatprep.subr.bf16.mxu0 %v12990_v40 }
 0x362   : > { %v15077_v6 = vadd.f32 %v12461_v1, %v11523_v38  ;;  %v15083_v11 = vpop.f32.mrf.mxu0  ;;  %v12989_v1 = vld [vmem:[%s16693_s5 + $0xb8] sm:$0xff]   ;;  %v6052_v0 = vor.u32 %v6051_v27, %v6047_v17 }
 0x363   : > { %v11525_v54 = vpop.f32.mrf.mxu1  ;;  %12579 = vmatprep.subr.bf16.mxu1 %v12989_v1 }
 0x364   : > { %12568 = vmatmul.mubr.bf16.gmra.mxu0 %v14827_v29  ;;  %v11526_v48 = vadd.f32 %v11525_v54, %v11524_v28  ;;  %v15093_v55 = vpop.f32.mrf.mxu0  ;;  %12580 = vmatpush3.bf16.msra.mxu1 %v12989_v1 }
 0x365   : > { %12571 = vmatprep.mubr.bf16.mxu0 %v16792_v30  ;;  %v11527_v33 = vpop.f32.mrf.mxu1 }
 0x366   : > { %v15095_v13 = vadd.f32 %v12462_v5, %v11526_v48  ;;  %v15097_v29 = vpop.f32.mrf.mxu0  ;;  %6335 = vmatmul.mubr.bf16.gmra.mxu1 %v14840_v59 }
 0x367   : > { %v11528_v10 = vpop.f32.mrf.mxu1  ;;  %6342 = vmatprep.mubr.bf16.mxu1 %v14879_v4  ;;  %v12991_v4 = vld [vmem:[%s16693_s5 + $0x30] sm:$0xff]  }
 0x368   : > { %v11529_v39 = vadd.f32 %v11528_v10, %v11527_v33  ;;  %v15101_v51 = vpop.f32.mrf.mxu0  ;;  %11886 = vmatpush3.bf16.msra.mxu0 %v12991_v4 }
 0x369   : > { %16795 = vst [vmem:[#allocation19_spill] sm:$0xff] %v15101_v51  ;;  %v11530_v30 = vpop.f32.mrf.mxu1 }
 0x36a   : > { %v15103_v25 = vadd.f32 %v11529_v39, %v5235_v61  ;;  %v6056_v61 = vrot.slane %v6054_v49, 1  ;;  %v12994_v39 = vld [vmem:[%s16693_s5 + $0xb0] sm:$0xff]  }
 0x36b   : > { %v11531_v5 = vpop.f32.mrf.mxu1  ;;  %12581 = vmatprep.subr.bf16.mxu1 %v12994_v39 }
 0x36c   : > { %v15108_v38 = vpop.f32.mrf.mxu0  ;;  %12572 = vmatmul.mubr.bf16.gmra.mxu0 %v14851_v9  ;;  %v11532_v59 = vadd.f32 %v11531_v5, %v11530_v30  ;;  %v6057_v1 = vsel %vm959_vm6, %v6052_v0, %v6056_v61  ;;  %12582 = vmatpush3.bf16.msra.mxu1 %v12994_v39 }
 0x36d   : > { %12575 = vmatprep.mubr.bf16.mxu0 %v15015_v2  ;;  %v11533_v28 = vpop.f32.mrf.mxu1  ;;  %v12992_v2 = vld [vmem:[%s16693_s5 + $0x68] sm:$0xff]  }
 0x36e   : > { %v15115_v35 = vadd.f32 %v11532_v59, %v5238_v18  ;;  %v15117_v41 = vpop.f32.mrf.mxu0  ;;  %6343 = vmatmul.mubr.bf16.gmra.mxu1 %v14854_v52  ;;  %11887 = vmatprep.subr.bf16.mxu0 %v12992_v2 }
 0x36f   : > { %v11534_v54 = vpop.f32.mrf.mxu1  ;;  %6350 = vmatprep.mubr.bf16.mxu1 %v14891_v31  ;;  %v12993_v31 = vld [vmem:[%s16693_s5 + $0x28] sm:$0xff]  }
 0x370   : > { %v15120_v9 = vpop.f32.mrf.mxu0  ;;  %v11535_v48 = vadd.f32 %v11534_v54, %v11533_v28  ;;  %11888 = vmatpush3.bf16.msra.mxu0 %v12993_v31 }
 0x371   : > { %v11536_v58 = vpop.f32.mrf.mxu1 }
 0x372   : > { %v15128_v18 = vadd.f32 %v15046_v44, %v11535_v48  ;;  %v15130_v33 = vpop.f32.mrf.mxu0  ;;  %v12996_v48 = vld [vmem:[%s16693_s5 + $0x20] sm:$0xff]  }
 0x373   : > { %16796 = vst [vmem:[#allocation17_spill] sm:$0xff] %v15130_v33  ;;  %v11537_v52 = vpop.f32.mrf.mxu1 }
 0x374   : > { %v15132_v45 = vpop.f32.mrf.mxu0  ;;  %v11538_v10 = vadd.f32 %v11537_v52, %v11536_v58  ;;  %12576 = vmatmul.mubr.bf16.gmra.mxu0 %v6057_v1 }
 0x376   : > { %v15141_v30 = vadd.f32 %v15049_v56, %v11538_v10  ;;  %v15143_v44 = vpop.f32.mrf.mxu0  ;;  %v11539_v17 = vpop.f32.mrf.mxu1  ;;  %6351 = vmatmul.mubr.bf16.gmra.mxu1 %v14868_v22  ;;  %v12995_v56 = vld [vmem:[%s16693_s5 + $0x60] sm:$0xff]  }
 0x377   : > { %6358 = vmatprep.mubr.bf16.mxu1 %v14907_v15  ;;  %11889 = vmatprep.subr.bf16.mxu0 %v12995_v56 }
 0x378   : > { %v15146_v27 = vpop.f32.mrf.mxu0  ;;  %v11540_v49 = vpop.f32.mrf.mxu1  ;;  %11890 = vmatpush3.bf16.msra.mxu0 %v12996_v48 }
 0x379   : > { %v11541_v5 = vadd.f32 %v11540_v49, %v11539_v17 }
 0x37a   : > { %v15149_v40 = vpop.f32.mrf.mxu0  ;;  %v11542_v59 = vpop.f32.mrf.mxu1 }
 0x37b   : > { %16797 = vst [vmem:[#allocation20_spill] sm:$0xff] %v15149_v40  ;;  %v15155_v4 = vadd.f32 %v11541_v5, %v15065_v8 }
 0x37c   : > { %v11627_v28 = vpop.f32.mrf.mxu0  ;;  %v11543_v0 = vpop.f32.mrf.mxu1 }
 0x37d   : > { %16798 = vst [vmem:[#allocation21_spill] sm:$0xff] %v15155_v4  ;;  %v15157_v22 = vadd.f32 %v11543_v0, %v11542_v59  ;;  %v6020_v0 = vshll.u32 %v15061_v24, 16 }
 0x37e   : > { %v11628_v61 = vpop.f32.mrf.mxu0  ;;  %v11545_v54 = vpop.f32.mrf.mxu1  ;;  %6359 = vmatmul.mubr.bf16.gmra.mxu1 %v14876_v42 }
 0x37f   : > { %16799 = vst [vmem:[#allocation22_spill] sm:$0xff] %v15157_v22  ;;  %v15159_v15 = vadd.f32 %v11628_v61, %v11627_v28  ;;  %6366 = vmatprep.mubr.bf16.mxu1 %v14925_v14 }
 0x380   : > { %v15165_v2 = vpop.f32.mrf.mxu0  ;;  %v11546_v8 = vpop.f32.mrf.mxu1 }
 0x381   : > { %v11547_v58 = vadd.f32 %v11546_v8, %v11545_v54  ;;  %v12997_v54 = vld [vmem:[%s16693_s5 + $0x58] sm:$0xff]  }
 0x382   : > { %v15168_v1 = vpop.f32.mrf.mxu0  ;;  %v11548_v52 = vpop.f32.mrf.mxu1  ;;  %11891 = vmatprep.subr.bf16.mxu0 %v12997_v54 }
 0x383   : > { %v15171_v10 = vadd.f32 %v15059_v16, %v11547_v58  ;;  %v6018_v58 = vshrl.u32 %v15061_v24, 16  ;;  %v12999_v24 = vld [vmem:[%s16693_s5 + $0xa8] sm:$0xff]  }
 0x384   : > { %v11633_v31 = vpop.f32.mrf.mxu0  ;;  %v11549_v39 = vpop.f32.mrf.mxu1  ;;  %12583 = vmatprep.subr.bf16.mxu1 %v12999_v24 }
 0x385   : > { %v11550_v42 = vadd.f32 %v11549_v39, %v11548_v52  ;;  %v6022_v52 = vrot.slane %v6020_v0, 1  ;;  %12584 = vmatpush3.bf16.msra.mxu1 %v12999_v24  ;;  %v6029_v24 = vshrl.u32 %v15063_v50, 16 }
 0x386   : > { %v11634_v17 = vpop.f32.mrf.mxu0  ;;  %v11551_v5 = vpop.f32.mrf.mxu1  ;;  %6367 = vmatmul.mubr.bf16.gmra.mxu1 %v14895_v57 }
 0x387   : > { %v15173_v49 = vadd.f32 %v11634_v17, %v11633_v31  ;;  %v15177_v14 = vadd.f32 %v15069_v7, %v11550_v42  ;;  %6374 = vmatprep.mubr.bf16.mxu1 %v14940_v12  ;;  %v6025_v31 = vshll.u32 %v15063_v50, 16  ;;  %v6023_v0 = vor.u32 %v6022_v52, %v6018_v58 }
 0x388   : > { %v15179_v59 = vpop.f32.mrf.mxu0  ;;  %v11552_v56 = vpop.f32.mrf.mxu1 }
 0x389   : > { %16800 = vst [vmem:[#allocation23_spill] sm:$0xff] %v15177_v14  ;;  %v11553_v28 = vadd.f32 %v11552_v56, %v11551_v5  ;;  %v12998_v5 = vld [vmem:[%s16693_s5 + $0x18] sm:$0xff]  }
 0x38a   : > { %v15182_v16 = vpop.f32.mrf.mxu0  ;;  %v11554_v61 = vpop.f32.mrf.mxu1  ;;  %11892 = vmatpush3.bf16.msra.mxu0 %v12998_v5 }
 0x38b   : > { %v15189_v57 = vadd.f32 %v11553_v28, %v15093_v55 }
 0x38c   : > { %v11639_v7 = vpop.f32.mrf.mxu0  ;;  %v11555_v48 = vpop.f32.mrf.mxu1 }
 0x38d   : > { %16801 = vst [vmem:[#allocation25_spill] sm:$0xff] %v15189_v57  ;;  %v15191_v8 = vadd.f32 %v11555_v48, %v11554_v61  ;;  %v6027_v61 = vrot.slane %v6025_v31, 1 }
 0x38e   : > { %v11640_v12 = vpop.f32.mrf.mxu0  ;;  %v11557_v42 = vpop.f32.mrf.mxu1  ;;  %6375 = vmatmul.mubr.bf16.gmra.mxu1 %v14912_v60 }
 0x38f   : > { %16802 = vst [vmem:[#allocation24_spill] sm:$0xff] %v15191_v8  ;;  %v15195_v39 = vadd.f32 %v11640_v12, %v11639_v7  ;;  %6382 = vmatprep.mubr.bf16.mxu1 %v14953_v32  ;;  %v15213_v40 = vsel %vm959_vm6, %v6023_v0, %v6027_v61 }
 0x390   : > { %v15198_v17 = vpop.f32.mrf.mxu0  ;;  %v11558_v55 = vpop.f32.mrf.mxu1 }
 0x391   : > { %v11559_v56 = vadd.f32 %v11558_v55, %v11557_v42  ;;  %v13000_v42 = vld [vmem:[%s16693_s5 + $0x50] sm:$0xff]  }
 0x392   : > { %v15207_v28 = vpop.f32.mrf.mxu0  ;;  %v11560_v54 = vpop.f32.mrf.mxu1  ;;  %11893 = vmatprep.subr.bf16.mxu0 %v13000_v42  ;;  %v13001_v55 = vld [vmem:[%s16693_s5 + $0x10] sm:$0xff]  }
 0x393   : > { %v15210_v60 = vadd.f32 %v15083_v11, %v11559_v56  ;;  %v6037_v56 = vshll.u32 %v15213_v40, 16  ;;  %11894 = vmatpush3.bf16.msra.mxu0 %v13001_v55 }
 0x394   : > { %v11645_v32 = vpop.f32.mrf.mxu0  ;;  %v11561_v7 = vpop.f32.mrf.mxu1 }
 0x395   : > { %16803 = vst [vmem:[#allocation26_spill] sm:$0xff] %v15210_v60  ;;  %v11562_v48 = vadd.f32 %v11561_v7, %v11560_v54  ;;  %v6039_v7 = vrot.slane %v6037_v56, 1 }
 0x396   : > { %v11646_v12 = vpop.f32.mrf.mxu0  ;;  %v11563_v52 = vpop.f32.mrf.mxu1  ;;  %6383 = vmatmul.mubr.bf16.gmra.mxu1 %v14929_v21 }
 0x397   : > { %v15218_v58 = vadd.f32 %v11646_v12, %v11645_v32  ;;  %v15222_v11 = vadd.f32 %v15097_v29, %v11562_v48  ;;  %6390 = vmatprep.mubr.bf16.mxu1 %v14961_v37  ;;  %v6035_v32 = vshrl.u32 %v15213_v40, 16  ;;  %v6042_v48 = vshll.u32 %v6029_v24, 16 }
 0x398   : > { %v15224_v31 = vpop.f32.mrf.mxu0  ;;  %v11564_v5 = vpop.f32.mrf.mxu1 }
 0x399   : > { %16804 = vst [vmem:[#allocation28_spill] sm:$0xff] %v15222_v11  ;;  %v11565_v0 = vadd.f32 %v11564_v5, %v11563_v52  ;;  %v13002_v52 = vld [vmem:[%s16693_s5 + $0x48] sm:$0xff]   ;;  %v6040_v56 = vor.u32 %v6039_v7, %v6035_v32  ;;  %v13006_v32 = vld [vmem:[%s16693_s5 + $0x40] sm:$0xff]  }
 0x39a   : > { %v15232_v61 = vpop.f32.mrf.mxu0  ;;  %v15234_v21 = vpop.f32.mrf.mxu1  ;;  %v13004_v5 = vld [vmem:[%s16693_s5 + $0x8] sm:$0xff]   ;;  %11895 = vmatprep.subr.bf16.mxu0 %v13002_v52  ;;  %v13007_v7 = vld [vmem:[%s16693_s5] sm:$0xff]  }
 0x39b   : > { %16805 = vst [vmem:[#allocation27_spill] sm:$0xff] %v15234_v21  ;;  %v15237_v29 = vadd.f32 %v11565_v0, %v15117_v41  ;;  %v13003_v41 = vld [vmem:[%s16693_s5 + $0xa0] sm:$0xff]   ;;  %v6044_v0 = vrot.slane %v6042_v48, 1  ;;  %11896 = vmatpush3.bf16.msra.mxu0 %v13004_v5  ;;  %v13011_v5 = vld [vmem:[%s16693_s5 + $0x88] sm:$0xff]  }
 0x39c   : > { %v11651_v37 = vpop.f32.mrf.mxu0  ;;  %v15239_v54 = vpop.f32.mrf.mxu1  ;;  %12585 = vmatprep.subr.bf16.mxu1 %v13003_v41  ;;  %11897 = vmatprep.subr.bf16.mxu0 %v13006_v32  ;;  %v13009_v52 = vld [vmem:[#allocation2] sm:$0xff]  }
 0x39d   : > { %16806 = vst [vmem:[#allocation31_spill] sm:$0xff] %v15237_v29  ;;  %16807 = vst [vmem:[#allocation29_spill] sm:$0xff] %v15239_v54  ;;  %12586 = vmatpush3.bf16.msra.mxu1 %v13003_v41  ;;  %v6045_v21 = vsel %vm959_vm6, %v6040_v56, %v6044_v0  ;;  %v13010_v41 = vld [vmem:[#allocation2 + $0x8] ss:$0 sps:$4 sm:$0x33]  }
 0x39e   : > { %v11652_v12 = vpop.f32.mrf.mxu0  ;;  %v11569_v42 = vpop.f32.mrf.mxu1  ;;  %6391 = vmatmul.mubr.bf16.gmra.mxu1 %v14944_v23  ;;  %v13005_v23 = vld [vmem:[%s16693_s5 + $0x98] sm:$0xff]  }
 0x39f   : > { %v15242_v50 = vadd.f32 %v11652_v12, %v11651_v37  ;;  %6398 = vmatprep.mubr.bf16.mxu1 %v15011_v34  ;;  %12587 = vmatprep.subr.bf16.mxu1 %v13005_v23 }
 0x3a0   : > { %v15251_v55 = vpop.f32.mrf.mxu0  ;;  %v11570_v24 = vpop.f32.mrf.mxu1  ;;  %11898 = vmatpush3.bf16.msra.mxu0 %v13007_v7 }
 0x3a1   : > { %v11571_v37 = vadd.f32 %v11570_v24, %v11569_v42  ;;  %12588 = vmatpush3.bf16.msra.mxu1 %v13005_v23 }
 0x3a2   : > { %v15260_v12 = vpop.f32.mrf.mxu0  ;;  %v11572_v33 = vpop.f32.mrf.mxu1 }
 0x3a3   : > { %v15263_v34 = vadd.f32 %v15108_v38, %v11571_v37  ;;  %v13008_v38 = vld [vmem:[%s16693_s5 + $0x90] sm:$0xff]  }
 0x3a4   : > { %v11657_v29 = vpop.f32.mrf.mxu0  ;;  %v11573_v54 = vpop.f32.mrf.mxu1  ;;  %12589 = vmatprep.subr.bf16.mxu1 %v13008_v38 }
 0x3a5   : > { %16808 = vst [vmem:[#allocation32_spill] sm:$0xff] %v15263_v34  ;;  %v11574_v11 = vadd.f32 %v11573_v54, %v11572_v33  ;;  %12590 = vmatpush3.bf16.msra.mxu1 %v13008_v38 }
 0x3a6   : > { %v11658_v8 = vpop.f32.mrf.mxu0  ;;  %v11575_v42 = vpop.f32.mrf.mxu1  ;;  %6399 = vmatmul.mubr.bf16.gmra.mxu1 %v14994_v46  ;;  %v7294_v46 = vshrl.u32 %v13009_v52, 16  ;;  %12591 = vmatprep.subr.bf16.mxu1 %v13011_v5 }
 0x3a7   : > { %v15275_v48 = vadd.f32 %v11658_v8, %v11657_v29  ;;  %v15279_v33 = vadd.f32 %v15120_v9, %v11574_v11  ;;  %6406 = vmatprep.mubr.bf16.mxu1 %v6045_v21  ;;  %v7296_v9 = vshll.u32 %v13009_v52, 16  ;;  %v7301_v11 = vshll.u32 %v13010_v41, 16 }
 0x3a8   : > { %v15281_v54 = vpop.f32.mrf.mxu0  ;;  %v11576_v23 = vpop.f32.mrf.mxu1  ;;  %v7305_v21 = vshrl.u32 %v13010_v41, 16 }
 0x3a9   : > { %16809 = vst [vmem:[#allocation30_spill] sm:$0xff] %v15279_v33  ;;  %v11577_v8 = vadd.f32 %v11576_v23, %v11575_v42  ;;  %v7298_v37 = vrot.slane %v7296_v9, 1  ;;  %v7303_v32 = vrot.slane %v7301_v11, 1  ;;  %12592 = vmatpush3.bf16.msra.mxu1 %v13011_v5  ;;  %v7518_v5 = vrot.slane %v13010_v41, 1 }
 0x3aa   : > { %v15286_v29 = vpop.f32.mrf.mxu0  ;;  %v15288_v24 = vpop.f32.mrf.mxu1  ;;  %v7573_v34 = vshll.u32 %v7305_v21, 16 }
 0x3ab   : > { %16810 = vst [vmem:[#allocation33_spill] sm:$0xff] %v15288_v24  ;;  %v15291_v56 = vadd.f32 %v11577_v8, %v15143_v44  ;;  %v7299_v42 = vor.u32 %v7298_v37, %v7294_v46  ;;  %v13012_v24 = vld [vmem:[%s16693_s5 + $0x80] sm:$0xff]   ;;  %v13013_v44 = vld [vmem:[%s16693_s5 + $0x178] sm:$0xff]   ;;  %v7517_v46 = vrot.slane %v13009_v52, 1 }
 0x3ac   : > { %v11663_v0 = vpop.f32.mrf.mxu0  ;;  %v15293_v33 = vpop.f32.mrf.mxu1  ;;  %12593 = vmatprep.subr.bf16.mxu1 %v13012_v24  ;;  %12627 = vmatprep.subr.bf16.mxu0 %v13013_v44  ;;  %v7575_v57 = vrot.slane %v7573_v34, 1 }
 0x3ad   : > { %16811 = vst [vmem:[#allocation16_spill] sm:$0xff] %v15291_v56  ;;  %16812 = vst [vmem:[#allocation12_spill] sm:$0xff] %v15293_v33  ;;  %v7304_v9 = vsel %vm959_vm6, %v7299_v42, %v7303_v32  ;;  %12594 = vmatpush3.bf16.msra.mxu1 %v13012_v24  ;;  %v7585_v56 = vshll.u32 %v7518_v5, 16 }
 0x3ae   : > { %v11664_v7 = vpop.f32.mrf.mxu0  ;;  %v11581_v38 = vpop.f32.mrf.mxu1  ;;  %6407 = vmatmul.mubr.bf16.gmra.mxu1 %v15213_v40  ;;  %v7568_v37 = vshll.u32 %v7304_v9, 16 }
 0x3af   : > { %v15295_v23 = vadd.f32 %v11664_v7, %v11663_v0  ;;  %v7566_v0 = vshrl.u32 %v7304_v9, 16  ;;  %v7519_v7 = vsel %vm1184_vm7, %v7517_v46, %v7518_v5  ;;  %v7587_v19 = vrot.slane %v7585_v56, 1 }
 0x3b0   : > { %v15304_v8 = vpop.f32.mrf.mxu0  ;;  %v11582_v11 = vpop.f32.mrf.mxu1  ;;  %v7570_v51 = vrot.slane %v7568_v37, 1  ;;  %v7578_v60 = vshrl.u32 %v7519_v7, 16  ;;  %v7580_v14 = vshll.u32 %v7519_v7, 16  ;;  %v16813_v7 = vld [vmem:[#allocation18_spill] sm:$0xff] }
 0x3b1   : > { %v11583_v40 = vadd.f32 %v11582_v11, %v11581_v38 }
 0x3b2   : > { %v15307_v21 = vpop.f32.mrf.mxu0  ;;  %v11584_v33 = vpop.f32.mrf.mxu1  ;;  %v7571_v42 = vor.u32 %v7570_v51, %v7566_v0  ;;  %v7582_v22 = vrot.slane %v7580_v14, 1  ;;  %v11638_v14 = vadd.f32 %v15182_v16, %v15179_v59 }
 0x3b3   : > { %v15311_v52 = vadd.f32 %v15132_v45, %v11583_v40 }
 0x3b4   : > { %v11669_v41 = vpop.f32.mrf.mxu0  ;;  %v11585_v32 = vpop.f32.mrf.mxu1  ;;  %v7576_v46 = vsel %vm959_vm6, %v7571_v42, %v7575_v57  ;;  %v7583_v5 = vor.u32 %v7582_v22, %v7578_v60 }
 0x3b5   : > { %v11586_v38 = vadd.f32 %v11585_v32, %v11584_v33  ;;  %8221 = vmatprep.mubr.bf16.mxu0 %v7576_v46 }
 0x3b6   : > { %v11670_v11 = vpop.f32.mrf.mxu0  ;;  %v12501_v24 = vpop.f32.mrf.mxu1  ;;  %8222 = vmatmul.mubr.bf16.vlgmr.msra.gmra.mxu0 %v7304_v9  ;;  %v7588_v51 = vsel %vm959_vm6, %v7583_v5, %v7587_v19 }
 0x3b7   : > { %v15313_v4 = vadd.f32 %v11670_v11, %v11669_v41  ;;  %v15317_v34 = vadd.f32 %v15146_v27, %v11586_v38  ;;  %v5795_v45 = vadd.f32 %v12501_v24, %v15173_v49  ;;  %12628 = vmatpush3.bf16.msra.mxu0 %v13013_v44  ;;  %12595 = vmatprep.mubr.bf16.mxu1 %v7588_v51  ;;  %v13018_v44 = vld [vmem:[%s16693_s5 + $0x170] sm:$0xff]  }
 0x3b8   : > { %v15319_v37 = vpop.f32.mrf.mxu0  ;;  %v5786_v40 = vpop.f32.mrf.mxu1  ;;  %v11632_v49 = vadd.f32 %v15168_v1, %v15165_v2  ;;  %12629 = vmatprep.subr.bf16.mxu0 %v13018_v44  ;;  %v11644_v24 = vadd.f32 %v15207_v28, %v15198_v17 }
 0x3b9   : > { %v15326_v33 = vadd.f32 %v5795_v45, %v15018_v26  ;;  %v5787_v22 = vadd.f32 %v15159_v15, %v5786_v40 }
 0x3ba   : > { %v11673_v57 = vpop.f32.mrf.mxu0  ;;  %v12502_v27 = vpop.f32.mrf.mxu1 }
 0x3bb   : > { %v15332_v60 = vadd.f32 %v5787_v22, %v14989_v53  ;;  %v5798_v19 = vadd.f32 %v12502_v27, %v11638_v14  ;;  %12630 = vmatpush3.bf16.msra.mxu0 %v13018_v44 }
 0x3bc   : > { %v11675_v56 = vpop.f32.mrf.mxu0  ;;  %v5789_v9 = vpop.f32.mrf.mxu1 }
 0x3bd   : > { %v15335_v59 = vadd.f32 %v5798_v19, %v15021_v3  ;;  %v5790_v16 = vadd.f32 %v11632_v49, %v5789_v9  ;;  %v11650_v3 = vadd.f32 %v15232_v61, %v15224_v31 }
 0x3be   : > { %v11676_v26 = vpop.f32.mrf.mxu0  ;;  %v12505_v15 = vpop.f32.mrf.mxu1 }
 0x3bf   : > { %v15337_v0 = vadd.f32 %v11676_v26, %v11675_v56  ;;  %v15343_v2 = vadd.f32 %v5790_v16, %v16813_v7  ;;  %v5811_v1 = vadd.f32 %v12505_v15, %v15218_v58  ;;  %v11656_v56 = vadd.f32 %v15260_v12, %v15251_v55 }
 0x3c0   : > { %v15345_v53 = vpop.f32.mrf.mxu0  ;;  %v5802_v41 = vpop.f32.mrf.mxu1 }
 0x3c1   : > { %v15351_v32 = vadd.f32 %v5811_v1, %v15037_v20  ;;  %v5803_v38 = vadd.f32 %v15195_v39, %v5802_v41  ;;  %v11668_v41 = vadd.f32 %v15307_v21, %v15304_v8 }
 0x3c2   : > { %v15353_v42 = vpop.f32.mrf.mxu0  ;;  %v12506_v11 = vpop.f32.mrf.mxu1 }
 0x3c3   : > { %v15359_v46 = vadd.f32 %v5803_v38, %v15026_v63  ;;  %v5814_v5 = vadd.f32 %v12506_v11, %v11650_v3  ;;  %v11662_v63 = vadd.f32 %v15286_v29, %v15281_v54 }
 0x3c4   : > { %v11681_v58 = vpop.f32.mrf.mxu0  ;;  %v5805_v45 = vpop.f32.mrf.mxu1 }
 0x3c5   : > { %v15362_v31 = vadd.f32 %v5814_v5, %v15041_v36  ;;  %v5806_v61 = vadd.f32 %v11644_v24, %v5805_v45 }
 0x3c6   : > { %v11682_v20 = vpop.f32.mrf.mxu0  ;;  %v12509_v51 = vpop.f32.mrf.mxu1 }
 0x3c7   : > { %v11683_v40 = vadd.f32 %v11682_v20, %v11681_v58  ;;  %v15365_v39 = vadd.f32 %v5806_v61, %v15029_v43  ;;  %v5827_v22 = vadd.f32 %v12509_v51, %v15275_v48  ;;  %v11680_v51 = vadd.f32 %v15353_v42, %v15345_v53 }
 0x3c8   : > { %v11684_v14 = vpop.f32.mrf.mxu0  ;;  %v5818_v17 = vpop.f32.mrf.mxu1 }
 0x3c9   : > { %v15371_v28 = vadd.f32 %v5827_v22, %v15077_v6  ;;  %v5819_v36 = vadd.f32 %v15242_v50, %v5818_v17  ;;  %v16814_v22 = vld [vmem:[#allocation21_spill] sm:$0xff] }
 0x3ca   : > { %v11685_v27 = vpop.f32.mrf.mxu0  ;;  %v12510_v49 = vpop.f32.mrf.mxu1 }
 0x3cb   : > { %v15377_v43 = vadd.f32 %v5819_v36, %v15052_v47  ;;  %v5830_v9 = vadd.f32 %v12510_v49, %v11662_v63  ;;  %v11674_v47 = vadd.f32 %v11673_v57, %v15319_v37  ;;  %v11686_v5 = vadd.f32 %v11685_v27, %v11684_v14  ;;  %v16815_v49 = vld [vmem:[#allocation14_spill] sm:$0xff]  ;;  %v16817_v14 = vld [vmem:[#allocation23_spill] sm:$0xff] }
 0x3cc   : > { %v11687_v19 = vpop.f32.mrf.mxu0  ;;  %v5821_v48 = vpop.f32.mrf.mxu1 }
 0x3cd   : > { %v15380_v26 = vadd.f32 %v5830_v9, %v15095_v13  ;;  %v5822_v29 = vadd.f32 %v11656_v56, %v5821_v48 }
 0x3ce   : > { %v11688_v54 = vpop.f32.mrf.mxu0  ;;  %v12513_v16 = vpop.f32.mrf.mxu1 }
 0x3cf   : > { %v11689_v6 = vadd.f32 %v11688_v54, %v11687_v19  ;;  %v15383_v15 = vadd.f32 %v5822_v29, %v15057_v62  ;;  %v5843_v44 = vadd.f32 %v12513_v16, %v15313_v4  ;;  %v13023_v4 = vld [vmem:[%s16693_s5 + $0x168] sm:$0xff]   ;;  %v16818_v16 = vld [vmem:[#allocation26_spill] sm:$0xff] }
 0x3d0   : > { %v11690_v50 = vpop.f32.mrf.mxu0  ;;  %v5834_v55 = vpop.f32.mrf.mxu1  ;;  %12631 = vmatprep.subr.bf16.mxu0 %v13023_v4 }
 0x3d1   : > { %v15388_v12 = vadd.f32 %v5843_v44, %v15128_v18  ;;  %v5835_v13 = vadd.f32 %v15295_v23, %v5834_v55  ;;  %12632 = vmatpush3.bf16.msra.mxu0 %v13023_v4 }
 0x3d2   : > { %v11691_v7 = vpop.f32.mrf.mxu0  ;;  %v12514_v1 = vpop.f32.mrf.mxu1 }
 0x3d3   : > { %v15394_v3 = vadd.f32 %v5835_v13, %v15103_v25  ;;  %v5846_v38 = vadd.f32 %v12514_v1, %v11674_v47  ;;  %v11692_v1 = vadd.f32 %v11691_v7, %v11690_v50 }
 0x3d4   : > { %v11693_v62 = vpop.f32.mrf.mxu0  ;;  %v5837_v37 = vpop.f32.mrf.mxu1 }
 0x3d5   : > { %v15400_v18 = vadd.f32 %v5846_v38, %v15141_v30  ;;  %v5838_v11 = vadd.f32 %v11668_v41, %v5837_v37  ;;  %v16819_v41 = vld [vmem:[#allocation25_spill] sm:$0xff] }
 0x3d6   : > { %v11694_v57 = vpop.f32.mrf.mxu0  ;;  %v12517_v24 = vpop.f32.mrf.mxu1 }
 0x3d7   : > { %v11695_v23 = vadd.f32 %v11694_v57, %v11693_v62  ;;  %v15403_v8 = vadd.f32 %v5838_v11, %v15115_v35  ;;  %v5859_v21 = vadd.f32 %v12517_v24, %v11683_v40  ;;  %v16816_v40 = vld [vmem:[#allocation22_spill] sm:$0xff]  ;;  %v16820_v57 = vld [vmem:[#allocation19_spill] sm:$0xff]  ;;  %v16821_v11 = vld [vmem:[#allocation24_spill] sm:$0xff] }
 0x3d8   : > { %v11696_v25 = vpop.f32.mrf.mxu0  ;;  %v5850_v58 = vpop.f32.mrf.mxu1  ;;  %v5255_v56 = vadd.f32 %v16816_v40, %v16815_v49  ;;  %v5271_v24 = vadd.f32 %v16821_v11, %v16820_v57  ;;  %v16825_v49 = vld [vmem:[#allocation32_spill] sm:$0xff] }
 0x3d9   : > { %v15406_v45 = vadd.f32 %v5859_v21, %v15171_v10  ;;  %v5851_v30 = vadd.f32 %v15337_v0, %v5850_v58  ;;  %v16822_v21 = vld [vmem:[#allocation28_spill] sm:$0xff] }
 0x3da   : > { %v11697_v20 = vpop.f32.mrf.mxu0  ;;  %v12518_v61 = vpop.f32.mrf.mxu1  ;;  %v16830_v11 = vld [vmem:[#allocation12_spill] sm:$0xff] }
 0x3db   : > { %v15412_v17 = vadd.f32 %v5851_v30, %v16814_v22  ;;  %v5862_v35 = vadd.f32 %v12518_v61, %v11686_v5  ;;  %v11698_v29 = vadd.f32 %v11697_v20, %v11696_v25  ;;  %v13028_v61 = vld [vmem:[%s16693_s5 + $0x160] sm:$0xff]   ;;  %v16824_v22 = vld [vmem:[#allocation29_spill] sm:$0xff] }
 0x3dc   : > { %v11699_v63 = vpop.f32.mrf.mxu0  ;;  %v5853_v36 = vpop.f32.mrf.mxu1  ;;  %12633 = vmatprep.subr.bf16.mxu0 %v13028_v61 }
 0x3dd   : > { %v15417_v27 = vadd.f32 %v5862_v35, %v16817_v14  ;;  %v5854_v19 = vadd.f32 %v11680_v51, %v5853_v36  ;;  %v16823_v51 = vld [vmem:[#allocation27_spill] sm:$0xff]  ;;  %12634 = vmatpush3.bf16.msra.mxu0 %v13028_v61  ;;  %v16832_v61 = vld [vmem:[#allocation20_spill] sm:$0xff] }
 0x3de   : > { %v11700_v10 = vpop.f32.mrf.mxu0  ;;  %v12521_v0 = vpop.f32.mrf.mxu1 }
 0x3df   : > { %v11701_v9 = vadd.f32 %v11700_v10, %v11699_v63  ;;  %v15419_v48 = vadd.f32 %v5854_v19, %v5255_v56  ;;  %v5875_v53 = vadd.f32 %v12521_v0, %v11695_v23  ;;  %v11568_v63 = vadd.f32 %v16824_v22, %v16823_v51  ;;  %v16826_v19 = vld [vmem:[#allocation31_spill] sm:$0xff] }
 0x3e0   : > { %v11702_v54 = vpop.f32.mrf.mxu0  ;;  %v5866_v42 = vpop.f32.mrf.mxu1 }
 0x3e1   : > { %v15422_v44 = vadd.f32 %v5875_v53, %v16818_v16  ;;  %v5867_v47 = vadd.f32 %v11689_v6, %v5866_v42  ;;  %v16827_v16 = vld [vmem:[#allocation17_spill] sm:$0xff] }
 0x3e2   : > { %v11703_v55 = vpop.f32.mrf.mxu0  ;;  %v12522_v13 = vpop.f32.mrf.mxu1 }
 0x3e3   : > { %v15425_v62 = vadd.f32 %v5867_v47, %v16819_v41  ;;  %v5878_v4 = vadd.f32 %v12522_v13, %v11698_v29  ;;  %v11704_v10 = vadd.f32 %v11703_v55, %v11702_v54  ;;  %v5287_v47 = vadd.f32 %v11568_v63, %v16827_v16  ;;  %v16828_v41 = vld [vmem:[#allocation30_spill] sm:$0xff]  ;;  %v16829_v55 = vld [vmem:[#allocation33_spill] sm:$0xff] }
 0x3e4   : > { %v11705_v38 = vpop.f32.mrf.mxu0  ;;  %v5869_v37 = vpop.f32.mrf.mxu1 }
 0x3e5   : > { %v15430_v23 = vadd.f32 %v5878_v4, %v16822_v21  ;;  %v5870_v58 = vadd.f32 %v11692_v1, %v5869_v37 }
 0x3e6   : > { %v11706_v25 = vpop.f32.mrf.mxu0  ;;  %v12525_v20 = vpop.f32.mrf.mxu1 }
 0x3e7   : > { %v11707_v5 = vadd.f32 %v11706_v25, %v11705_v38  ;;  %v15432_v30 = vadd.f32 %v5870_v58, %v5271_v24  ;;  %v11580_v24 = vadd.f32 %v16830_v11, %v16829_v55 }
 0x3e8   : > { %v11708_v6 = vpop.f32.mrf.mxu0  ;;  %v5882_v7 = vpop.f32.mrf.mxu1 }
 0x3e9   : > { %v5891_v50 = vadd.f32 %v12525_v20, %v11707_v5  ;;  %v5883_v36 = vadd.f32 %v11701_v9, %v5882_v7  ;;  %v16831_v20 = vld [vmem:[#allocation16_spill] sm:$0xff]  ;;  %v5303_v51 = vadd.f32 %v11580_v24, %v16832_v61 }
 0x3ea   : > { %v11709_v35 = vpop.f32.mrf.mxu0  ;;  %v12526_v14 = vpop.f32.mrf.mxu1 }
 0x3eb   : > { %v15440_v40 = vadd.f32 %v5891_v50, %v16825_v49  ;;  %v11710_v56 = vadd.f32 %v11709_v35, %v11708_v6  ;;  %v15443_v0 = vadd.f32 %v5883_v36, %v16826_v19 }
 0x3ec   : > { %v11711_v53 = vpop.f32.mrf.mxu0  ;;  %v5885_v29 = vpop.f32.mrf.mxu1 }
 0x3ed   : > { %v5894_v42 = vadd.f32 %v12526_v14, %v11710_v56  ;;  %v5886_v1 = vadd.f32 %v11704_v10, %v5885_v29 }
 0x3ee   : > { %v11712_v13 = vpop.f32.mrf.mxu0  ;;  %v12529_v4 = vpop.f32.mrf.mxu1 }
 0x3ef   : > { %v15447_v9 = vadd.f32 %v5894_v42, %v16828_v41  ;;  %v11713_v38 = vadd.f32 %v11712_v13, %v11711_v53  ;;  %v15449_v37 = vadd.f32 %v5886_v1, %v5287_v47 }
 0x3f0   : > { %v11714_v57 = vpop.f32.mrf.mxu0  ;;  %v5898_v54 = vpop.f32.mrf.mxu1 }
 0x3f1   : > { %v5899_v25 = vadd.f32 %v11713_v38, %v5898_v54 }
 0x3f2   : > { %v11715_v21 = vpop.f32.mrf.mxu0  ;;  %v12530_v58 = vpop.f32.mrf.mxu1 }
 0x3f3   : > { %v11716_v5 = vadd.f32 %v11715_v21, %v11714_v57  ;;  %v15454_v6 = vadd.f32 %v5899_v25, %v16831_v20 }
 0x3f4   : > { %v11717_v50 = vpop.f32.mrf.mxu0  ;;  %v5901_v7 = vpop.f32.mrf.mxu1 }
 0x3f5   : > { %v5902_v63 = vadd.f32 %v11716_v5, %v5901_v7 }
 0x3f6   : > { %v11718_v22 = vpop.f32.mrf.mxu0  ;;  %v11763_v36 = vpop.f32.mrf.mxu1 }
 0x3f7   : > { %v11719_v35 = vadd.f32 %v11718_v22, %v11717_v50  ;;  %v15457_v49 = vadd.f32 %v5902_v63, %v5303_v51 }
 0x3f8   : > { %v11720_v56 = vpop.f32.mrf.mxu0  ;;  %v11764_v10 = vpop.f32.mrf.mxu1 }
 0x3f9   : > { %v5907_v14 = vadd.f32 %v12529_v4, %v11719_v35  ;;  %v11765_v13 = vadd.f32 %v11764_v10, %v11763_v36  ;;  %v15468_v4 = vld [vmem:[%s16692_s4] ss:$0 sm:$0xff] }
 0x3fa   : > { %v11721_v19 = vpop.f32.mrf.mxu0  ;;  %v11766_v29 = vpop.f32.mrf.mxu1 }
 0x3fb   : > { %v15460_v53 = vadd.f32 %v5907_v14, %v15311_v52  ;;  %v11722_v42 = vadd.f32 %v11721_v19, %v11720_v56  ;;  %v13033_v52 = vld [vmem:[%s16693_s5 + $0x158] sm:$0xff]  }
 0x3fc   : > { %v12549_v16 = vpop.f32.mrf.mxu0  ;;  %v11767_v1 = vpop.f32.mrf.mxu1  ;;  %12635 = vmatprep.subr.bf16.mxu0 %v13033_v52 }
 0x3fd   : > { %v5910_v47 = vadd.f32 %v12530_v58, %v11722_v42  ;;  %v11768_v11 = vadd.f32 %v11767_v1, %v11766_v29  ;;  %12636 = vmatpush3.bf16.msra.mxu0 %v13033_v52 }
 0x3fe   : > { %v6449_v41 = vpop.f32.mrf.mxu0  ;;  %v11769_v54 = vpop.f32.mrf.mxu1 }
 0x3ff   : > { %v15463_v38 = vadd.f32 %v5910_v47, %v15317_v34  ;;  %v6450_v57 = vadd.f32 %v11765_v13, %v6449_v41  ;;  %v13036_v34 = vld [vmem:[%s16693_s5 + $0x138] sm:$0xff]  }
 0x400   : > { %v12550_v55 = vpop.f32.mrf.mxu0  ;;  %v11770_v21 = vpop.f32.mrf.mxu1  ;;  %12019 = vmatprep.subr.bf16.mxu1 %v13036_v34 }
 0x401   : > { %v6608_v24 = vadd.f32 %v6450_v57, %v15332_v60  ;;  %v11771_v25 = vadd.f32 %v11770_v21, %v11769_v54 }
 0x402   : > { %v6452_v58 = vpop.f32.mrf.mxu0  ;;  %v11772_v50 = vpop.f32.mrf.mxu1 }
 0x403   : > { %v6711_v5 = vadd.f32 %v15468_v4, %v6608_v24  ;;  %v6453_v20 = vadd.f32 %v11768_v11, %v6452_v58  ;;  %v6458_v7 = vadd.f32 %v12549_v16, %v11771_v25 }
 0x404   : > { %v12553_v61 = vpop.f32.mrf.mxu0  ;;  %v11773_v22 = vpop.f32.mrf.mxu1 }
 0x405   : > { %v6743_v51 = vmax.f32 %v6711_v5, 0.0  ;;  %v6609_v60 = vadd.f32 %v6453_v20, %v15343_v2  ;;  %v6610_v63 = vadd.f32 %v6458_v7, %v15326_v33  ;;  %v11774_v35 = vadd.f32 %v11773_v22, %v11772_v50 }
 0x406   : > { %v11775_v14 = vpop.f32.mrf.mxu1  ;;  %v6465_v42 = vpop.f32.mrf.mxu0 }
 0x407   : > { %v10813_v36 = vpack.c.bf16 %v6743_v51, %v6743_v51  ;;  %v6712_v56 = vadd.f32 %v15468_v4, %v6609_v60  ;;  %v6713_v10 = vadd.f32 %v15468_v4, %v6610_v63  ;;  %v6461_v19 = vadd.f32 %v12550_v55, %v11774_v35 }
 0x408   : > { %v11776_v16 = vpop.f32.mrf.mxu1  ;;  %v12554_v52 = vpop.f32.mrf.mxu0 }
 0x409   : > { %v6871_v29 = vrot.slane %v10813_v36, 7  ;;  %v6744_v47 = vmax.f32 %v6712_v56, 0.0  ;;  %v6745_v13 = vmax.f32 %v6713_v10, 0.0  ;;  %v6611_v33 = vadd.f32 %v6461_v19, %v15335_v59 }
 0x40a   : > { %v11777_v2 = vadd.f32 %v11776_v16, %v11775_v14  ;;  %v11778_v57 = vpop.f32.mrf.mxu1  ;;  %v6468_v35 = vpop.f32.mrf.mxu0 }
 0x40b   : > { %6999 = vst [vmem:[#allocation2 + $0xc] sm:$0xe] %v6871_v29  ;;  %v10814_v1 = vpack.c.bf16 %v6744_v47, %v6744_v47  ;;  %v10880_v41 = vpack.c.bf16 %v6744_v47, %v6743_v51  ;;  %v10815_v54 = vpack.c.bf16 %v6745_v13, %v6745_v13  ;;  %v6714_v55 = vadd.f32 %v15468_v4, %v6611_v33 }
 0x40c   : > { %v6466_v11 = vadd.f32 %v11777_v2, %v6465_v42  ;;  %v6872_v24 = vrot.slane %v6871_v29, 4  ;;  %v11779_v34 = vpop.f32.mrf.mxu1 }
 0x40d   : > { %v6873_v21 = vrot.slane %v10814_v1, 7  ;;  %10881 = vst [vmem:[%s15486_s12] sm:$0xff] %v10880_v41   ;;  %v6876_v25 = vrot.slane %v10815_v54, 7  ;;  %v6746_v58 = vmax.f32 %v6714_v55, 0.0  ;;  %v11780_v59 = vadd.f32 %v11779_v34, %v11778_v57  ;;  %v13042_v57 = vld [vmem:[%s16693_s5 + $0x150] sm:$0xff]  }
 0x40e   : > { %v6612_v5 = vadd.f32 %v6466_v11, %v15359_v46  ;;  %v11781_v51 = vpop.f32.mrf.mxu1  ;;  %12637 = vmatprep.subr.bf16.mxu0 %v13042_v57 }
 0x40f   : > { %v6874_v50 = vsel %vm13372_vm5, %v6872_v24, %v6873_v21  ;;  %v6875_v7 = vrot.slane %v6873_v21, 4  ;;  %7002 = vst [vmem:[#allocation2 + $0x18] sm:$0xe] %v6876_v25  ;;  %v10816_v60 = vpack.c.bf16 %v6746_v58, %v6746_v58  ;;  %v10885_v22 = vpack.c.bf16 %v6746_v58, %v6745_v13  ;;  %v15499_v13 = vpop.f32.mrf.mxu0  ;;  %12638 = vmatpush3.bf16.msra.mxu0 %v13042_v57 }
 0x410   : > { %7000 = vst [vmem:[#allocation2 + $0x10] sm:$0xf] %v6874_v50  ;;  %v6715_v63 = vadd.f32 %v15468_v4, %v6612_v5  ;;  %v6469_v36 = vadd.f32 %v11780_v59, %v6468_v35  ;;  %v11782_v56 = vpop.f32.mrf.mxu1  ;;  %v6877_v14 = vrot.slane %v6876_v25, 4 }
 0x411   : > { %7001 = vst [vmem:[#allocation2 + $0x14] sm:$0x1] %v6875_v7  ;;  %v6878_v10 = vrot.slane %v10816_v60, 7  ;;  %11037 = vst [vmem:[%s15486_s12 + $0x8] sm:$0xff] %v10885_v22   ;;  %v11783_v19 = vadd.f32 %v11782_v56, %v11781_v51 }
 0x412   : > { %v6747_v46 = vmax.f32 %v6715_v63, 0.0  ;;  %v6613_v42 = vadd.f32 %v6469_v36, %v15365_v39  ;;  %v11784_v29 = vpop.f32.mrf.mxu1 }
 0x413   : > { %v6879_v47 = vsel %vm13372_vm5, %v6877_v14, %v6878_v10  ;;  %v6880_v16 = vrot.slane %v6878_v10, 4  ;;  %v6474_v2 = vadd.f32 %v12553_v61, %v11783_v19  ;;  %v6481_v61 = vpop.f32.mrf.mxu0 }
 0x414   : > { %v10817_v33 = vpack.c.bf16 %v6747_v46, %v6747_v46  ;;  %7003 = vst [vmem:[#allocation2 + $0x1c] sm:$0xf] %v6879_v47  ;;  %v6716_v1 = vadd.f32 %v15468_v4, %v6613_v42  ;;  %v11785_v41 = vpop.f32.mrf.mxu1 }
 0x415   : > { %7004 = vst [vmem:[#allocation2 + $0x20] sm:$0x1] %v6880_v16  ;;  %v6614_v39 = vadd.f32 %v6474_v2, %v15351_v32  ;;  %v11786_v55 = vadd.f32 %v11785_v41, %v11784_v29  ;;  %v15509_v42 = vpop.f32.mrf.mxu0 }
 0x416   : > { %v6881_v54 = vrot.slane %v10817_v33, 7  ;;  %v6748_v11 = vmax.f32 %v6716_v1, 0.0  ;;  %v11787_v24 = vpop.f32.mrf.mxu1 }
 0x417   : > { %v13014_v21 = vld [vmem:[#allocation2 + $0xc] sm:$0xff]   ;;  %v6717_v25 = vadd.f32 %v15468_v4, %v6614_v39  ;;  %v6477_v58 = vadd.f32 %v12554_v52, %v11786_v55 }
 0x418   : > { %v6882_v34 = vrot.slane %v6881_v54, 4  ;;  %7005 = vst [vmem:[#allocation2 + $0x24] sm:$0xe] %v6881_v54  ;;  %v13015_v5 = vld [vmem:[#allocation2 + $0x14] ss:$0 sps:$4 sm:$0x33]   ;;  %v10818_v59 = vpack.c.bf16 %v6748_v11, %v6748_v11  ;;  %v10890_v50 = vpack.c.bf16 %v6748_v11, %v6747_v46  ;;  %v11788_v7 = vpop.f32.mrf.mxu1 }
 0x419   : > { %v7520_v51 = vrot.slane %v13014_v21, 1  ;;  %v7308_v60 = vshrl.u32 %v13014_v21, 16  ;;  %v6749_v32 = vmax.f32 %v6717_v25, 0.0  ;;  %v6615_v22 = vadd.f32 %v6477_v58, %v15362_v31  ;;  %v6484_v58 = vpop.f32.mrf.mxu0 }
 0x41a   : > { %v11789_v63 = vadd.f32 %v11788_v7, %v11787_v24  ;;  %v7521_v35 = vrot.slane %v13015_v5, 1  ;;  %v6883_v36 = vrot.slane %v10818_v59, 7  ;;  %11038 = vst [vmem:[%s15486_s12 + $0x10] sm:$0xff] %v10890_v50   ;;  %v11790_v56 = vpop.f32.mrf.mxu1  ;;  %v7310_v14 = vshll.u32 %v13014_v21, 16 }
 0x41b   : > { %v7315_v10 = vshll.u32 %v13015_v5, 16  ;;  %v7319_v19 = vshrl.u32 %v13015_v5, 16  ;;  %v10819_v52 = vpack.c.bf16 %v6749_v32, %v6749_v32  ;;  %v6718_v29 = vadd.f32 %v15468_v4, %v6615_v22 }
 0x41c   : > { %v6482_v46 = vadd.f32 %v11789_v63, %v6481_v61  ;;  %v7522_v47 = vsel %vm1184_vm7, %v7520_v51, %v7521_v35  ;;  %v6884_v16 = vsel %vm13372_vm5, %v6882_v34, %v6883_v36  ;;  %v6885_v31 = vrot.slane %v6883_v36, 4  ;;  %v11791_v33 = vpop.f32.mrf.mxu1  ;;  %v15516_v55 = vld [vmem:[#allocation2 + $0x20] ss:$0 sps:$4 sm:$0x33]   ;;  %v13037_v36 = vld [vmem:[%s16693_s5 + $0xf8] sm:$0xff]  }
 0x41d   : > { %v7602_v2 = vshrl.u32 %v7522_v47, 16  ;;  %v7604_v1 = vshll.u32 %v7522_v47, 16  ;;  %7006 = vst [vmem:[#allocation2 + $0x28] sm:$0xf] %v6884_v16  ;;  %v6886_v41 = vrot.slane %v10819_v52, 7  ;;  %v6750_v57 = vmax.f32 %v6718_v29, 0.0 }
 0x41e   : > { %v6616_v54 = vadd.f32 %v6482_v46, %v15377_v43  ;;  %v11792_v39 = vadd.f32 %v11791_v33, %v11790_v56  ;;  %7007 = vst [vmem:[#allocation2 + $0x2c] sm:$0x1] %v6885_v31  ;;  %v11793_v11 = vpop.f32.mrf.mxu1  ;;  %v7609_v21 = vshll.u32 %v7521_v35, 16  ;;  %v7312_v61 = vrot.slane %v7310_v14, 1  ;;  %v15533_v47 = vld [vmem:[#allocation2 + $0x18] sm:$0xff]   ;;  %v15536_v31 = vpop.f32.mrf.mxu0 }
 0x41f   : > { %v7606_v24 = vrot.slane %v7604_v1, 1  ;;  %v7317_v25 = vrot.slane %v7315_v10, 1  ;;  %v6887_v34 = vrot.slane %v6886_v41, 4  ;;  %7008 = vst [vmem:[#allocation2 + $0x30] sm:$0xe] %v6886_v41  ;;  %v10820_v5 = vpack.c.bf16 %v6750_v57, %v6750_v57 }
 0x420   : > { %v10895_v59 = vpack.c.bf16 %v6750_v57, %v6749_v32  ;;  %v6719_v50 = vadd.f32 %v15468_v4, %v6616_v54  ;;  %v6485_v7 = vadd.f32 %v11792_v39, %v6484_v58  ;;  %v11794_v51 = vpop.f32.mrf.mxu1  ;;  %v7611_v22 = vrot.slane %v7609_v21, 1  ;;  %v13040_v32 = vld [vmem:[%s16693_s5 + $0x130] sm:$0xff]  }
 0x421   : > { %v7607_v43 = vor.u32 %v7606_v24, %v7602_v2  ;;  %v7313_v63 = vor.u32 %v7312_v61, %v7308_v60  ;;  %v6888_v35 = vrot.slane %v10820_v5, 7  ;;  %v11795_v14 = vadd.f32 %v11794_v51, %v11793_v11  ;;  %v13041_v11 = vld [vmem:[%s16693_s5 + $0xf0] sm:$0xff]  }
 0x422   : > { %11039 = vst [vmem:[%s15486_s12 + $0x18] sm:$0xff] %v10895_v59   ;;  %v6751_v56 = vmax.f32 %v6719_v50, 0.0  ;;  %v7597_v10 = vshll.u32 %v7319_v19, 16  ;;  %v6617_v52 = vadd.f32 %v6485_v7, %v15383_v15  ;;  %v11796_v29 = vpop.f32.mrf.mxu1  ;;  %v7329_v16 = vshll.u32 %v15516_v55, 16  ;;  %v6497_v7 = vpop.f32.mrf.mxu0 }
 0x423   : > { %v15528_v46 = vsel %vm959_vm6, %v7607_v43, %v7611_v22  ;;  %v15531_v60 = vsel %vm959_vm6, %v7313_v63, %v7317_v25  ;;  %v6889_v19 = vsel %vm13372_vm5, %v6887_v34, %v6888_v35  ;;  %v6890_v33 = vrot.slane %v6888_v35, 4  ;;  %v13045_v25 = vld [vmem:[%s16693_s5 + $0x128] sm:$0xff]  }
 0x424   : > { %v10821_v2 = vpack.c.bf16 %v6751_v56, %v6751_v56  ;;  %v6490_v15 = vadd.f32 %v15499_v13, %v11795_v14  ;;  %12596 = vmatmul.mubr.bf16.vlgmr.msra.gmra.mxu1 %v15528_v46  ;;  %7009 = vst [vmem:[#allocation2 + $0x34] sm:$0xf] %v6889_v19  ;;  %v6720_v1 = vadd.f32 %v15468_v4, %v6617_v52  ;;  %v11797_v41 = vpop.f32.mrf.mxu1  ;;  %v7590_v57 = vshrl.u32 %v15531_v60, 16  ;;  %v13051_v63 = vld [vmem:[%s16693_s5 + $0x148] sm:$0xff]  }
 0x425   : > { %v7592_v54 = vshll.u32 %v15531_v60, 16  ;;  %v7599_v39 = vrot.slane %v7597_v10, 1  ;;  %12020 = vmatpush3.bf16.msra.mxu1 %v13037_v36  ;;  %7010 = vst [vmem:[#allocation2 + $0x38] sm:$0x1] %v6890_v33  ;;  %v11798_v21 = vadd.f32 %v11797_v41, %v11796_v29  ;;  %v15549_v61 = vrot.slane %v7329_v16, 1  ;;  %v13046_v52 = vld [vmem:[%s16693_s5 + $0xe8] sm:$0xff]   ;;  %12639 = vmatprep.subr.bf16.mxu0 %v13051_v63 }
 0x426   : > { %v6891_v24 = vrot.slane %v10821_v2, 7  ;;  %v6618_v13 = vadd.f32 %v6490_v15, %v15371_v28  ;;  %12021 = vmatprep.subr.bf16.mxu1 %v13040_v32  ;;  %v6752_v34 = vmax.f32 %v6720_v1, 0.0  ;;  %v11799_v58 = vpop.f32.mrf.mxu1  ;;  %v7523_v59 = vrot.slane %v15533_v47, 1  ;;  %v13049_v33 = vld [vmem:[%s16693_s5 + $0x120] sm:$0xff]   ;;  %12640 = vmatpush3.bf16.msra.mxu0 %v13051_v63 }
 0x427   : > { %v7594_v5 = vrot.slane %v7592_v54, 1  ;;  %v7524_v50 = vrot.slane %v15516_v55, 1  ;;  %v6493_v43 = vadd.f32 %v15509_v42, %v11798_v21  ;;  %v7322_v22 = vshrl.u32 %v15533_v47, 16 }
 0x428   : > { %v6892_v51 = vrot.slane %v6891_v24, 4  ;;  %7011 = vst [vmem:[#allocation2 + $0x3c] sm:$0xe] %v6891_v24  ;;  %v6721_v28 = vadd.f32 %v15468_v4, %v6618_v13  ;;  %v10822_v36 = vpack.c.bf16 %v6752_v34, %v6752_v34  ;;  %v10900_v35 = vpack.c.bf16 %v6752_v34, %v6751_v56  ;;  %v11800_v10 = vpop.f32.mrf.mxu1 }
 0x429   : > { %v7595_v14 = vor.u32 %v7594_v5, %v7590_v57  ;;  %v7525_v32 = vsel %vm1184_vm7, %v7523_v59, %v7524_v50  ;;  %12022 = vmatpush3.bf16.msra.mxu1 %v13041_v11  ;;  %v6619_v42 = vadd.f32 %v6493_v43, %v15380_v26  ;;  %v11801_v16 = vadd.f32 %v11800_v10, %v11799_v58  ;;  %v15574_v57 = vld [vmem:[#allocation2 + $0x24] sm:$0xff]   ;;  %v15576_v26 = vpop.f32.mrf.mxu0 }
 0x42a   : > { %v6753_v29 = vmax.f32 %v6721_v28, 0.0  ;;  %v7626_v19 = vshrl.u32 %v7525_v32, 16  ;;  %12023 = vmatprep.subr.bf16.mxu1 %v13045_v25  ;;  %v6893_v56 = vrot.slane %v10822_v36, 7  ;;  %11040 = vst [vmem:[%s15486_s12 + $0x20] sm:$0xff] %v10900_v35   ;;  %v7628_v15 = vshll.u32 %v7525_v32, 16  ;;  %v11802_v41 = vpop.f32.mrf.mxu1  ;;  %v13050_v5 = vld [vmem:[%s16693_s5 + $0xe0] sm:$0xff]  }
 0x42b   : > { %v15572_v2 = vsel %vm959_vm6, %v7595_v14, %v7599_v39  ;;  %v7633_v1 = vshll.u32 %v7524_v50, 16  ;;  %v6722_v11 = vadd.f32 %v15468_v4, %v6619_v42  ;;  %v6498_v24 = vadd.f32 %v11801_v16, %v6497_v7  ;;  %v15588_v28 = vld [vmem:[#allocation2 + $0x2c] ss:$0 sps:$4 sm:$0x33]   ;;  %v6500_v10 = vpop.f32.mrf.mxu0 }
 0x42c   : > { %v10823_v54 = vpack.c.bf16 %v6753_v29, %v6753_v29  ;;  %8229 = vmatprep.mubr.bf16.mxu0 %v15572_v2  ;;  %v7324_v13 = vshll.u32 %v15533_v47, 16  ;;  %v6894_v39 = vsel %vm13372_vm5, %v6892_v51, %v6893_v56  ;;  %v6895_v21 = vrot.slane %v6893_v56, 4  ;;  %v11803_v58 = vpop.f32.mrf.mxu1  ;;  %v13054_v51 = vld [vmem:[%s16693_s5 + $0x118] sm:$0xff]  }
 0x42d   : > { %8230 = vmatmul.mubr.bf16.gmra.mxu0 %v15531_v60  ;;  %v7630_v25 = vrot.slane %v7628_v15, 1  ;;  %v7635_v34 = vrot.slane %v7633_v1, 1  ;;  %12024 = vmatpush3.bf16.msra.mxu1 %v13046_v52  ;;  %7012 = vst [vmem:[#allocation2 + $0x40] sm:$0xf] %v6894_v39  ;;  %v6754_v50 = vmax.f32 %v6722_v11, 0.0  ;;  %v6620_v7 = vadd.f32 %v6498_v24, %v15394_v3 }
 0x42e   : > { %v6896_v59 = vrot.slane %v10823_v54, 7  ;;  %v11804_v47 = vadd.f32 %v11803_v58, %v11802_v41  ;;  %12025 = vmatprep.subr.bf16.mxu1 %v13049_v33  ;;  %7013 = vst [vmem:[#allocation2 + $0x44] sm:$0x1] %v6895_v21  ;;  %v7326_v63 = vrot.slane %v7324_v13, 1  ;;  %v7333_v36 = vshrl.u32 %v15516_v55, 16  ;;  %v11805_v35 = vpop.f32.mrf.mxu1  ;;  %v13055_v55 = vld [vmem:[%s16693_s5 + $0xd8] sm:$0xff]  }
 0x42f   : > { %v7631_v43 = vor.u32 %v7630_v25, %v7626_v19  ;;  %v7526_v14 = vrot.slane %v15574_v57, 1  ;;  %v10824_v3 = vpack.c.bf16 %v6754_v50, %v6754_v50  ;;  %v10905_v52 = vpack.c.bf16 %v6754_v50, %v6753_v29 }
 0x430   : > { %v6897_v32 = vrot.slane %v6896_v59, 4  ;;  %7014 = vst [vmem:[#allocation2 + $0x48] sm:$0xe] %v6896_v59  ;;  %v6723_v42 = vadd.f32 %v15468_v4, %v6620_v7  ;;  %v6501_v33 = vadd.f32 %v11804_v47, %v6500_v10  ;;  %v7327_v56 = vor.u32 %v7326_v63, %v7322_v22  ;;  %v11806_v15 = vpop.f32.mrf.mxu1  ;;  %v13058_v22 = vld [vmem:[%s16693_s5 + $0x110] sm:$0xff]  }
 0x431   : > { %v15597_v16 = vsel %vm959_vm6, %v7631_v43, %v7635_v34  ;;  %v15599_v19 = vshll.u32 %v7333_v36, 16  ;;  %12026 = vmatpush3.bf16.msra.mxu1 %v13050_v5  ;;  %v6898_v1 = vrot.slane %v10824_v3, 7  ;;  %11041 = vst [vmem:[%s15486_s12 + $0x28] sm:$0xff] %v10905_v52   ;;  %v11807_v29 = vadd.f32 %v11806_v15, %v11805_v35  ;;  %v13059_v47 = vld [vmem:[%s16693_s5 + $0xd0] sm:$0xff]  }
 0x432   : > { %v6755_v41 = vmax.f32 %v6723_v42, 0.0  ;;  %12599 = vmatprep.mubr.bf16.mxu1 %v15597_v16  ;;  %v7527_v54 = vrot.slane %v15588_v28, 1  ;;  %12027 = vmatprep.subr.bf16.mxu1 %v13054_v51  ;;  %v6621_v11 = vadd.f32 %v6501_v33, %v15403_v8  ;;  %v15613_v24 = vsel %vm959_vm6, %v7327_v56, %v15549_v61  ;;  %v11808_v39 = vpop.f32.mrf.mxu1  ;;  %v15627_v51 = vpop.f32.mrf.mxu0 }
 0x433   : > { %v7623_v13 = vrot.slane %v15599_v19, 1  ;;  %v7336_v21 = vshrl.u32 %v15574_v57, 16  ;;  %v6899_v25 = vsel %vm13372_vm5, %v6897_v32, %v6898_v1  ;;  %v6900_v34 = vrot.slane %v6898_v1, 4 }
 0x434   : > { %v10825_v58 = vpack.c.bf16 %v6755_v41, %v6755_v41  ;;  %v7614_v5 = vshrl.u32 %v15613_v24, 16  ;;  %7015 = vst [vmem:[#allocation2 + $0x4c] sm:$0xf] %v6899_v25  ;;  %v6724_v59 = vadd.f32 %v15468_v4, %v6621_v11  ;;  %v7616_v8 = vshll.u32 %v15613_v24, 16  ;;  %v11809_v7 = vpop.f32.mrf.mxu1 }
 0x435   : > { %v6506_v61 = vadd.f32 %v15536_v31, %v11807_v29  ;;  %v7528_v50 = vsel %vm1184_vm7, %v7526_v14, %v7527_v54  ;;  %12028 = vmatpush3.bf16.msra.mxu1 %v13055_v55  ;;  %7016 = vst [vmem:[#allocation2 + $0x50] sm:$0x1] %v6900_v34  ;;  %v7657_v35 = vshll.u32 %v7527_v54, 16  ;;  %v11810_v3 = vadd.f32 %v11809_v7, %v11808_v39  ;;  %v13063_v54 = vld [vmem:[%s16693_s5 + $0x108] sm:$0xff]  }
 0x436   : > { %v6901_v43 = vrot.slane %v10825_v58, 7  ;;  %v7650_v63 = vshrl.u32 %v7528_v50, 16  ;;  %v7652_v36 = vshll.u32 %v7528_v50, 16  ;;  %12029 = vmatprep.subr.bf16.mxu1 %v13058_v22  ;;  %v6756_v10 = vmax.f32 %v6724_v59, 0.0  ;;  %v11811_v14 = vpop.f32.mrf.mxu1  ;;  %v6513_v22 = vpop.f32.mrf.mxu0  ;;  %v13064_v34 = vld [vmem:[%s16693_s5 + $0xc8] sm:$0xff]  }
 0x437   : > { %v7618_v32 = vrot.slane %v7616_v8, 1  ;;  %v6622_v31 = vadd.f32 %v6506_v61, %v15388_v12  ;;  %v7659_v33 = vrot.slane %v7657_v35, 1  ;;  %v7338_v56 = vshll.u32 %v15574_v57, 16  ;;  %v13060_v12 = vld [vmem:[%s16693_s5 + $0x140] sm:$0xff]  }
 0x438   : > { %v6902_v52 = vrot.slane %v6901_v43, 4  ;;  %7017 = vst [vmem:[#allocation2 + $0x54] sm:$0xe] %v6901_v43  ;;  %v7654_v42 = vrot.slane %v7652_v36, 1  ;;  %v10826_v19 = vpack.c.bf16 %v6756_v10, %v6756_v10  ;;  %v10910_v15 = vpack.c.bf16 %v6756_v10, %v6755_v41  ;;  %v11812_v29 = vpop.f32.mrf.mxu1  ;;  %12641 = vmatprep.subr.bf16.mxu0 %v13060_v12  ;;  %v15658_v43 = vld [vmem:[#allocation2 + $0x30] sm:$0xff]  }
 0x439   : > { %v7619_v55 = vor.u32 %v7618_v32, %v7614_v5  ;;  %v6725_v1 = vadd.f32 %v15468_v4, %v6622_v31  ;;  %12030 = vmatpush3.bf16.msra.mxu1 %v13059_v47  ;;  %v6509_v57 = vadd.f32 %v15576_v26, %v11810_v3  ;;  %v7340_v39 = vrot.slane %v7338_v56, 1  ;;  %v15640_v25 = vld [vmem:[#allocation2 + $0x38] ss:$0 sps:$4 sm:$0x33]   ;;  %v13065_v26 = vld [vmem:[%s16693_s5 + $0x100] sm:$0xff]   ;;  %12642 = vmatpush3.bf16.msra.mxu0 %v13060_v12  ;;  %v15664_v32 = vpop.f32.mrf.mxu0 }
 0x43a   : > { %v7655_v11 = vor.u32 %v7654_v42, %v7650_v63  ;;  %v7343_v41 = vshll.u32 %v15588_v28, 16  ;;  %v6903_v58 = vrot.slane %v10826_v19, 7  ;;  %11042 = vst [vmem:[%s15486_s12 + $0x30] sm:$0xff] %v10910_v15   ;;  %v7347_v8 = vshrl.u32 %v15588_v28, 16  ;;  %v11814_v61 = vpop.f32.mrf.mxu1  ;;  %12031 = vmatprep.subr.bf16.mxu1 %v13063_v54 }
 0x43b   : > { %v15647_v5 = vsel %vm959_vm6, %v7619_v55, %v7623_v13  ;;  %v6757_v59 = vmax.f32 %v6725_v1, 0.0  ;;  %v6623_v7 = vadd.f32 %v6509_v57, %v15400_v18  ;;  %v7341_v47 = vor.u32 %v7340_v39, %v7336_v21 }
 0x43c   : > { %8237 = vmatprep.mubr.bf16.mxu0 %v15647_v5  ;;  %v15655_v50 = vsel %vm959_vm6, %v7655_v11, %v7659_v33  ;;  %v7345_v13 = vrot.slane %v7343_v41, 1  ;;  %v6904_v28 = vsel %vm13372_vm5, %v6902_v52, %v6903_v58  ;;  %v6905_v63 = vrot.slane %v6903_v58, 4  ;;  %v11815_v10 = vpop.f32.mrf.mxu1  ;;  %v13066_v52 = vld [vmem:[%s16693_s5 + $0xc0] sm:$0xff]   ;;  %v6516_v41 = vpop.f32.mrf.mxu0 }
 0x43d   : > { %8238 = vmatmul.mubr.bf16.gmra.mxu0 %v15613_v24  ;;  %v10827_v36 = vpack.c.bf16 %v6757_v59, %v6757_v59  ;;  %12600 = vmatmul.mubr.bf16.gmra.mxu1 %v15655_v50  ;;  %v7645_v35 = vshll.u32 %v7347_v8, 16  ;;  %7018 = vst [vmem:[#allocation2 + $0x58] sm:$0xf] %v6904_v28  ;;  %v6726_v18 = vadd.f32 %v15468_v4, %v6623_v7  ;;  %v7357_v3 = vshll.u32 %v15640_v25, 16  ;;  %v15683_v28 = vld [vmem:[#allocation2 + $0x3c] sm:$0xff]  }
 0x43e   : > { %v15668_v21 = vsel %vm959_vm6, %v7341_v47, %v7345_v13  ;;  %v11813_v31 = vadd.f32 %v11812_v29, %v11811_v14  ;;  %12032 = vmatpush3.bf16.msra.mxu1 %v13064_v34  ;;  %7019 = vst [vmem:[#allocation2 + $0x5c] sm:$0x1] %v6905_v63  ;;  %v11817_v15 = vpop.f32.mrf.mxu1  ;;  %v7529_v14 = vrot.slane %v15658_v43, 1  ;;  %v7530_v11 = vrot.slane %v15640_v25, 1 }
 0x43f   : > { %v6906_v42 = vrot.slane %v10827_v36, 7  ;;  %v7638_v33 = vshrl.u32 %v15668_v21, 16  ;;  %v7640_v56 = vshll.u32 %v15668_v21, 16  ;;  %v7647_v19 = vrot.slane %v7645_v35, 1  ;;  %12033 = vmatprep.subr.bf16.mxu1 %v13065_v26 }
 0x440   : > { %v6758_v55 = vmax.f32 %v6726_v18, 0.0  ;;  %v6514_v1 = vadd.f32 %v11813_v31, %v6513_v22  ;;  %v15676_v12 = vrot.slane %v7357_v3, 1  ;;  %v11816_v57 = vadd.f32 %v11815_v10, %v11814_v61  ;;  %v11818_v39 = vpop.f32.mrf.mxu1 }
 0x441   : > { %v6907_v29 = vrot.slane %v6906_v42, 4  ;;  %7020 = vst [vmem:[#allocation2 + $0x60] sm:$0xe] %v6906_v42  ;;  %v7642_v54 = vrot.slane %v7640_v56, 1  ;;  %v7350_v26 = vshrl.u32 %v15658_v43, 16  ;;  %v7531_v7 = vsel %vm1184_vm7, %v7529_v14, %v7530_v11 }
 0x442   : > { %v10828_v34 = vpack.c.bf16 %v6758_v55, %v6758_v55  ;;  %v10915_v58 = vpack.c.bf16 %v6758_v55, %v6757_v59  ;;  %v6624_v8 = vadd.f32 %v6514_v1, %v15412_v17  ;;  %12034 = vmatpush3.bf16.msra.mxu1 %v13066_v52  ;;  %v7681_v47 = vshll.u32 %v7530_v11, 16  ;;  %v11820_v63 = vpop.f32.mrf.mxu1  ;;  %v15687_v59 = vld [vmem:[#allocation2 + $0x44] ss:$0 sps:$4 sm:$0x33]  }
 0x443   : > { %v7643_v22 = vor.u32 %v7642_v54, %v7638_v33  ;;  %v6517_v13 = vadd.f32 %v11816_v57, %v6516_v41  ;;  %v7674_v35 = vshrl.u32 %v7531_v7, 16  ;;  %v7676_v10 = vshll.u32 %v7531_v7, 16  ;;  %v13067_v41 = vld [vmem:[%s16693_s5 + $0x1f8] sm:$0xff]  }
 0x444   : > { %v6908_v36 = vrot.slane %v10828_v34, 7  ;;  %11043 = vst [vmem:[%s15486_s12 + $0x38] sm:$0xff] %v10915_v58   ;;  %v6727_v61 = vadd.f32 %v15468_v4, %v6624_v8  ;;  %v7683_v18 = vrot.slane %v7681_v47, 1  ;;  %v7352_v3 = vshll.u32 %v15658_v43, 16  ;;  %v11821_v52 = vpop.f32.mrf.mxu1  ;;  %12155 = vmatprep.subr.bf16.mxu0 %v13067_v41 }
 0x445   : > { %v15690_v17 = vsel %vm959_vm6, %v7643_v22, %v7647_v19  ;;  %v6625_v31 = vadd.f32 %v6517_v13, %v15419_v48  ;;  %v7678_v55 = vrot.slane %v7676_v10, 1  ;;  %v7361_v14 = vshrl.u32 %v15640_v25, 16  ;;  %v13069_v25 = vld [vmem:[%s16693_s5 + $0x238] sm:$0xff]  }
 0x446   : > { %v6909_v42 = vsel %vm13372_vm5, %v6907_v29, %v6908_v36  ;;  %v6910_v33 = vrot.slane %v6908_v36, 4  ;;  %8245 = vmatprep.mubr.bf16.mxu0 %v15690_v17  ;;  %v6759_v56 = vmax.f32 %v6727_v61, 0.0  ;;  %v7354_v1 = vrot.slane %v7352_v3, 1  ;;  %v11823_v54 = vpop.f32.mrf.mxu1  ;;  %12675 = vmatprep.subr.bf16.mxu1 %v13069_v25  ;;  %v15737_v25 = vld [vmem:[#allocation2 + $0x48] sm:$0xff]  }
 0x447   : > { %7021 = vst [vmem:[#allocation2 + $0x64] sm:$0xf] %v6909_v42  ;;  %8246 = vmatmul.mubr.bf16.gmra.mxu0 %v15668_v21  ;;  %v6728_v19 = vadd.f32 %v15468_v4, %v6625_v31  ;;  %v11819_v48 = vadd.f32 %v11818_v39, %v11817_v15  ;;  %v7679_v11 = vor.u32 %v7678_v55, %v7674_v35  ;;  %v7532_v29 = vrot.slane %v15683_v28, 1 }
 0x448   : > { %7022 = vst [vmem:[#allocation2 + $0x68] sm:$0x1] %v6910_v33  ;;  %v10829_v43 = vpack.c.bf16 %v6759_v56, %v6759_v56  ;;  %v7533_v57 = vrot.slane %v15687_v59, 1  ;;  %v7355_v58 = vor.u32 %v7354_v1, %v7350_v26  ;;  %v7669_v8 = vshll.u32 %v7361_v14, 16  ;;  %v11824_v7 = vpop.f32.mrf.mxu1 }
 0x449   : > { %v6760_v34 = vmax.f32 %v6728_v19, 0.0  ;;  %v6522_v22 = vadd.f32 %v15627_v51, %v11819_v48  ;;  %v15710_v39 = vsel %vm959_vm6, %v7679_v11, %v7683_v18  ;;  %v11822_v48 = vadd.f32 %v11821_v52, %v11820_v63  ;;  %v15739_v63 = vld [vmem:[#allocation2 + $0x50] ss:$0 sps:$4 sm:$0x33]  }
 0x44a   : > { %v6911_v15 = vrot.slane %v10829_v43, 7  ;;  %v7534_v47 = vsel %vm1184_vm7, %v7532_v29, %v7533_v57  ;;  %v7705_v13 = vshll.u32 %v7533_v57, 16  ;;  %12603 = vmatprep.mubr.bf16.mxu1 %v15710_v39  ;;  %v15716_v51 = vsel %vm959_vm6, %v7355_v58, %v15676_v12  ;;  %v15718_v35 = vpop.f32.mrf.mxu1  ;;  %v15726_v12 = vpop.f32.mrf.mxu0 }
 0x44b   : > { %v10830_v26 = vpack.c.bf16 %v6760_v34, %v6760_v34  ;;  %v10920_v36 = vpack.c.bf16 %v6760_v34, %v6759_v56  ;;  %v7671_v61 = vrot.slane %v7669_v8, 1  ;;  %v7662_v18 = vshrl.u32 %v15716_v51, 16 }
 0x44c   : > { %v6912_v10 = vrot.slane %v6911_v15, 4  ;;  %7023 = vst [vmem:[#allocation2 + $0x6c] sm:$0xe] %v6911_v15  ;;  %v7664_v31 = vshll.u32 %v15716_v51, 16  ;;  %v6626_v3 = vadd.f32 %v6522_v22, %v15406_v45  ;;  %v7698_v33 = vshrl.u32 %v7534_v47, 16  ;;  %v15724_v19 = vpop.f32.mrf.mxu1 }
 0x44d   : > { %v6913_v42 = vrot.slane %v10830_v26, 7  ;;  %11044 = vst [vmem:[%s15486_s12 + $0x40] sm:$0xff] %v10920_v36   ;;  %v7700_v56 = vshll.u32 %v7534_v47, 16  ;;  %v7707_v55 = vrot.slane %v7705_v13, 1  ;;  %v7364_v43 = vshrl.u32 %v15683_v28, 16  ;;  %v6529_v26 = vpop.f32.mrf.mxu0 }
 0x44e   : > { %v7666_v1 = vrot.slane %v7664_v31, 1  ;;  %v6729_v14 = vadd.f32 %v15468_v4, %v6626_v3  ;;  %v7366_v57 = vshll.u32 %v15683_v28, 16  ;;  %v15733_v41 = vpop.f32.mrf.mxu1  ;;  %v6525_v8 = vadd.f32 %v15664_v32, %v11822_v48 }
 0x44f   : > { %v6914_v11 = vsel %vm13372_vm5, %v6912_v10, %v6913_v42  ;;  %v6915_v29 = vrot.slane %v6913_v42, 4  ;;  %v7702_v45 = vrot.slane %v7700_v56, 1  ;;  %v7371_v22 = vshll.u32 %v15687_v59, 16 }
 0x450   : > { %7024 = vst [vmem:[#allocation2 + $0x70] sm:$0xf] %v6914_v11  ;;  %v7667_v34 = vor.u32 %v7666_v1, %v7662_v18  ;;  %v6761_v58 = vmax.f32 %v6729_v14, 0.0  ;;  %v7368_v15 = vrot.slane %v7366_v57, 1  ;;  %v7375_v47 = vshrl.u32 %v15687_v59, 16  ;;  %v15742_v28 = vpop.f32.mrf.mxu1 }
 0x451   : > { %7025 = vst [vmem:[#allocation2 + $0x74] sm:$0x1] %v6915_v29  ;;  %v7703_v52 = vor.u32 %v7702_v45, %v7698_v33  ;;  %v11825_v13 = vadd.f32 %v11824_v7, %v11823_v54  ;;  %v6627_v32 = vadd.f32 %v6525_v8, %v15417_v27  ;;  %v7373_v18 = vrot.slane %v7371_v22, 1 }
 0x452   : > { %v15745_v36 = vsel %vm959_vm6, %v7667_v34, %v7671_v61  ;;  %v10831_v10 = vpack.c.bf16 %v6761_v58, %v6761_v58  ;;  %v7369_v3 = vor.u32 %v7368_v15, %v7364_v43  ;;  %v7693_v42 = vshll.u32 %v7375_v47, 16  ;;  %v15752_v59 = vpop.f32.mrf.mxu1  ;;  %v15766_v43 = vpop.f32.mrf.mxu0 }
 0x453   : > { %8253 = vmatprep.mubr.bf16.mxu0 %v15745_v36  ;;  %v15750_v31 = vsel %vm959_vm6, %v7703_v52, %v7707_v55  ;;  %v6530_v33 = vadd.f32 %v11825_v13, %v6529_v26  ;;  %v6730_v7 = vadd.f32 %v15468_v4, %v6627_v32  ;;  %v7385_v27 = vshll.u32 %v15739_v63, 16 }
 0x454   : > { %8254 = vmatmul.mubr.bf16.gmra.mxu0 %v15716_v51  ;;  %v6916_v54 = vrot.slane %v10831_v10, 7  ;;  %12604 = vmatmul.mubr.bf16.gmra.mxu1 %v15750_v31  ;;  %v7535_v61 = vrot.slane %v15737_v25, 1  ;;  %v15760_v56 = vsel %vm959_vm6, %v7369_v3, %v7373_v18  ;;  %v7695_v55 = vrot.slane %v7693_v42, 1  ;;  %v15764_v48 = vpop.f32.mrf.mxu1  ;;  %v15778_v42 = vld [vmem:[#allocation2 + $0x54] sm:$0xff]  }
 0x455   : > { %16834 = vst [vmem:[#allocation15_spill] sm:$0xff] %v15760_v56  ;;  %v6628_v1 = vadd.f32 %v6530_v33, %v15425_v62  ;;  %v7536_v14 = vrot.slane %v15739_v63, 1  ;;  %v6762_v29 = vmax.f32 %v6730_v7, 0.0  ;;  %v7686_v45 = vshrl.u32 %v15760_v56, 16  ;;  %v6532_v33 = vpop.f32.mrf.mxu0 }
 0x456   : > { %v6917_v11 = vrot.slane %v6916_v54, 4  ;;  %7026 = vst [vmem:[#allocation2 + $0x78] sm:$0xe] %v6916_v54  ;;  %v7688_v57 = vshll.u32 %v15760_v56, 16  ;;  %v7387_v8 = vrot.slane %v7385_v27, 1  ;;  %v15772_v52 = vpop.f32.mrf.mxu1  ;;  %v11828_v3 = vadd.f32 %v15724_v19, %v15718_v35 }
 0x457   : > { %v6731_v34 = vadd.f32 %v15468_v4, %v6628_v1  ;;  %v7537_v22 = vsel %vm1184_vm7, %v7535_v61, %v7536_v14  ;;  %v7729_v62 = vshll.u32 %v7536_v14, 16  ;;  %v10832_v15 = vpack.c.bf16 %v6762_v29, %v6762_v29  ;;  %v15785_v61 = vld [vmem:[#allocation2 + $0x5c] ss:$0 sps:$4 sm:$0x33]  }
 0x458   : > { %v10925_v47 = vpack.c.bf16 %v6762_v29, %v6761_v58  ;;  %v7690_v13 = vrot.slane %v7688_v57, 1  ;;  %v7722_v26 = vshrl.u32 %v7537_v22, 16  ;;  %v7724_v32 = vshll.u32 %v7537_v22, 16  ;;  %v15780_v4 = vpop.f32.mrf.mxu1 }
 0x459   : > { %v15774_v10 = vmax.f32 %v6731_v34, 0.0  ;;  %v7731_v18 = vrot.slane %v7729_v62, 1  ;;  %v6918_v54 = vrot.slane %v10832_v15, 7  ;;  %v7378_v27 = vshrl.u32 %v15737_v25, 16 }
 0x45a   : > { %11045 = vst [vmem:[%s15486_s12 + $0x48] sm:$0xff] %v10925_v47   ;;  %v7691_v7 = vor.u32 %v7690_v13, %v7686_v45  ;;  %v7380_v58 = vshll.u32 %v15737_v25, 16  ;;  %v7726_v14 = vrot.slane %v7724_v32, 1  ;;  %v6533_v29 = vadd.f32 %v11828_v3, %v6532_v33  ;;  %v15790_v19 = vpop.f32.mrf.mxu1 }
 0x45b   : > { %v10833_v1 = vpack.c.bf16 %v15774_v10, %v15774_v10  ;;  %v7389_v35 = vshrl.u32 %v15739_v63, 16  ;;  %v6919_v57 = vsel %vm13372_vm5, %v6917_v11, %v6918_v54  ;;  %v6920_v34 = vrot.slane %v6918_v54, 4 }
 0x45c   : > { %v15795_v45 = vsel %vm959_vm6, %v7691_v7, %v7695_v55  ;;  %v7382_v22 = vrot.slane %v7380_v58, 1  ;;  %7027 = vst [vmem:[#allocation2 + $0x7c] sm:$0xf] %v6919_v57  ;;  %v7727_v62 = vor.u32 %v7726_v14, %v7722_v26  ;;  %v6629_v15 = vadd.f32 %v6533_v29, %v15432_v30  ;;  %v15799_v13 = vpop.f32.mrf.mxu1  ;;  %v15812_v30 = vld [vmem:[%s16692_s4] ss:$0 sm:$0xff] }
 0x45d   : > { %8261 = vmatprep.mubr.bf16.mxu0 %v15795_v45  ;;  %v6921_v25 = vrot.slane %v10833_v1, 7  ;;  %v7717_v47 = vshll.u32 %v7389_v35, 16  ;;  %7028 = vst [vmem:[#allocation2 + $0x80] sm:$0x1] %v6920_v34  ;;  %v11831_v11 = vadd.f32 %v15742_v28, %v15733_v41  ;;  %v7538_v55 = vrot.slane %v15778_v42, 1 }
 0x45e   : > { %8262 = vmatmul.mubr.bf16.gmra.mxu0 %v15760_v56  ;;  %v7383_v63 = vor.u32 %v7382_v22, %v7378_v27  ;;  %v7539_v32 = vrot.slane %v15785_v61, 1  ;;  %v15807_v26 = vsel %vm959_vm6, %v7727_v62, %v7731_v18  ;;  %v6732_v33 = vadd.f32 %v15812_v30, %v6629_v15  ;;  %v15815_v7 = vpop.f32.mrf.mxu1 }
 0x45f   : > { %v6922_v3 = vrot.slane %v6921_v25, 4  ;;  %7029 = vst [vmem:[#allocation2 + $0x84] sm:$0xe] %v6921_v25  ;;  %v7719_v54 = vrot.slane %v7717_v47, 1  ;;  %12607 = vmatprep.mubr.bf16.mxu1 %v15807_v26  ;;  %v6538_v28 = vadd.f32 %v15726_v12, %v11831_v11  ;;  %v15830_v12 = vpop.f32.mrf.mxu0  ;;  %v7392_v47 = vshrl.u32 %v15778_v42, 16 }
 0x460   : > { %v15819_v41 = vsel %vm959_vm6, %v7383_v63, %v7387_v8  ;;  %v7540_v18 = vsel %vm1184_vm7, %v7538_v55, %v7539_v32  ;;  %v7753_v27 = vshll.u32 %v7539_v32, 16  ;;  %v6764_v58 = vmax.f32 %v6732_v33, 0.0  ;;  %v15825_v35 = vpop.f32.mrf.mxu1  ;;  %v15834_v63 = vld [vmem:[#allocation2 + $0x68] ss:$0 sps:$4 sm:$0x33]  }
 0x461   : > { %v7710_v1 = vshrl.u32 %v15819_v41, 16  ;;  %v7712_v14 = vshll.u32 %v15819_v41, 16  ;;  %v7746_v29 = vshrl.u32 %v7540_v18, 16  ;;  %v6630_v57 = vadd.f32 %v6538_v28, %v15422_v44 }
 0x462   : > { %v7748_v34 = vshll.u32 %v7540_v18, 16  ;;  %v7755_v22 = vrot.slane %v7753_v27, 1  ;;  %v11834_v8 = vadd.f32 %v15764_v48, %v15752_v59  ;;  %v10834_v25 = vpack.c.bf16 %v6764_v58, %v6764_v58  ;;  %v15836_v11 = vpop.f32.mrf.mxu1  ;;  %v15844_v18 = vld [vmem:[#allocation2 + $0x60] sm:$0xff]  }
 0x463   : > { %v10930_v62 = vpack.c.bf16 %v6764_v58, %v15774_v10  ;;  %v7714_v15 = vrot.slane %v7712_v14, 1  ;;  %v6733_v44 = vadd.f32 %v15812_v30, %v6630_v57  ;;  %v7394_v33 = vshll.u32 %v15778_v42, 16  ;;  %v6545_v57 = vpop.f32.mrf.mxu0 }
 0x464   : > { %v7750_v55 = vrot.slane %v7748_v34, 1  ;;  %v6541_v32 = vadd.f32 %v15766_v43, %v11834_v8  ;;  %v6923_v59 = vrot.slane %v10834_v25, 7  ;;  %v7399_v28 = vshll.u32 %v15785_v61, 16  ;;  %v15852_v8 = vpop.f32.mrf.mxu1 }
 0x465   : > { %11046 = vst [vmem:[%s15486_s12 + $0x50] sm:$0xff] %v10930_v62   ;;  %v7715_v48 = vor.u32 %v7714_v15, %v7710_v1  ;;  %v7403_v10 = vshrl.u32 %v15785_v61, 16  ;;  %v6765_v27 = vmax.f32 %v6733_v44, 0.0  ;;  %v7396_v56 = vrot.slane %v7394_v33, 1 }
 0x466   : > { %v7751_v58 = vor.u32 %v7750_v55, %v7746_v29  ;;  %v6631_v14 = vadd.f32 %v6541_v32, %v15430_v23  ;;  %v6924_v43 = vsel %vm13372_vm5, %v6922_v3, %v6923_v59  ;;  %v6925_v34 = vrot.slane %v6923_v59, 4 }
 0x467   : > { %v15850_v42 = vsel %vm959_vm6, %v7715_v48, %v7719_v54  ;;  %v7401_v1 = vrot.slane %v7399_v28, 1  ;;  %7030 = vst [vmem:[#allocation2 + $0x88] sm:$0xf] %v6924_v43  ;;  %v10835_v61 = vpack.c.bf16 %v6765_v27, %v6765_v27  ;;  %v7397_v25 = vor.u32 %v7396_v56, %v7392_v47  ;;  %v15869_v47 = vpop.f32.mrf.mxu0 }
 0x468   : > { %8269 = vmatprep.mubr.bf16.mxu0 %v15850_v42  ;;  %v15856_v29 = vsel %vm959_vm6, %v7751_v58, %v7755_v22  ;;  %v6734_v23 = vadd.f32 %v15812_v30, %v6631_v14  ;;  %7031 = vst [vmem:[#allocation2 + $0x8c] sm:$0x1] %v6925_v34  ;;  %v7741_v3 = vshll.u32 %v7403_v10, 16  ;;  %v11837_v54 = vadd.f32 %v15780_v4, %v15772_v52  ;;  %v15873_v4 = vpop.f32.mrf.mxu1 }
 0x469   : > { %8270 = vmatmul.mubr.bf16.gmra.mxu0 %v15819_v41  ;;  %12608 = vmatmul.mubr.bf16.gmra.mxu1 %v15856_v29  ;;  %v7413_v62 = vshll.u32 %v15834_v63, 16  ;;  %v7541_v15 = vrot.slane %v15844_v18, 1  ;;  %v6926_v44 = vrot.slane %v10835_v61, 7  ;;  %v15866_v22 = vsel %vm959_vm6, %v7397_v25, %v7401_v1  ;;  %v15877_v61 = vld [vmem:[#allocation2 + $0x6c] sm:$0xff]  }
 0x46a   : > { %v6766_v55 = vmax.f32 %v6734_v23, 0.0  ;;  %v7542_v56 = vrot.slane %v15834_v63, 1  ;;  %v7734_v32 = vshrl.u32 %v15866_v22, 16  ;;  %v7736_v33 = vshll.u32 %v15866_v22, 16 }
 0x46b   : > { %v7743_v59 = vrot.slane %v7741_v3, 1  ;;  %v6546_v52 = vadd.f32 %v11837_v54, %v6545_v57  ;;  %v6927_v48 = vrot.slane %v6926_v44, 4  ;;  %7032 = vst [vmem:[#allocation2 + $0x90] sm:$0xe] %v6926_v44  ;;  %v7415_v58 = vrot.slane %v7413_v62, 1  ;;  %v6548_v44 = vpop.f32.mrf.mxu0 }
 0x46c   : > { %v10836_v28 = vpack.c.bf16 %v6766_v55, %v6766_v55  ;;  %v10935_v10 = vpack.c.bf16 %v6766_v55, %v6765_v27  ;;  %v7738_v14 = vrot.slane %v7736_v33, 1  ;;  %v7543_v34 = vsel %vm1184_vm7, %v7541_v15, %v7542_v56  ;;  %v15882_v54 = vld [vmem:[#allocation2 + $0x74] ss:$0 sps:$4 sm:$0x33]   ;;  %v15886_v15 = vpop.f32.mrf.mxu1 }
 0x46d   : > { %v6632_v43 = vadd.f32 %v6546_v52, %v15443_v0  ;;  %v7777_v1 = vshll.u32 %v7542_v56, 16  ;;  %v7770_v25 = vshrl.u32 %v7543_v34, 16  ;;  %v7772_v3 = vshll.u32 %v7543_v34, 16 }
 0x46e   : > { %v6928_v23 = vrot.slane %v10836_v28, 7  ;;  %11047 = vst [vmem:[%s15486_s12 + $0x58] sm:$0xff] %v10935_v10   ;;  %v11840_v57 = vadd.f32 %v15799_v13, %v15790_v19  ;;  %v7739_v27 = vor.u32 %v7738_v14, %v7734_v32  ;;  %v7406_v0 = vshrl.u32 %v15844_v18, 16 }
 0x46f   : > { %v6735_v62 = vadd.f32 %v15812_v30, %v6632_v43  ;;  %v7779_v55 = vrot.slane %v7777_v1, 1  ;;  %v7774_v52 = vrot.slane %v7772_v3, 1  ;;  %v7408_v32 = vshll.u32 %v15844_v18, 16  ;;  %v15902_v3 = vpop.f32.mrf.mxu1 }
 0x470   : > { %v6929_v56 = vsel %vm13372_vm5, %v6927_v48, %v6928_v23  ;;  %v6930_v33 = vrot.slane %v6928_v23, 4  ;;  %v6549_v28 = vadd.f32 %v11840_v57, %v6548_v44  ;;  %v15891_v19 = vsel %vm959_vm6, %v7739_v27, %v7743_v59 }
 0x471   : > { %7033 = vst [vmem:[#allocation2 + $0x94] sm:$0xf] %v6929_v56  ;;  %v6767_v13 = vmax.f32 %v6735_v62, 0.0  ;;  %v7417_v10 = vshrl.u32 %v15834_v63, 16  ;;  %8277 = vmatprep.mubr.bf16.mxu0 %v15891_v19  ;;  %v7775_v14 = vor.u32 %v7774_v52, %v7770_v25  ;;  %v11843_v48 = vadd.f32 %v15825_v35, %v15815_v7 }
 0x472   : > { %7034 = vst [vmem:[#allocation2 + $0x98] sm:$0x1] %v6930_v33  ;;  %v6633_v43 = vadd.f32 %v6549_v28, %v15449_v37  ;;  %v7544_v34 = vrot.slane %v15877_v61, 1  ;;  %8278 = vmatmul.mubr.bf16.gmra.mxu0 %v15866_v22  ;;  %v7410_v1 = vrot.slane %v7408_v32, 1  ;;  %v7545_v18 = vrot.slane %v15882_v54, 1 }
 0x473   : > { %v10837_v59 = vpack.c.bf16 %v6767_v13, %v6767_v13  ;;  %v7765_v23 = vshll.u32 %v7417_v10, 16  ;;  %v15905_v63 = vsel %vm959_vm6, %v7775_v14, %v7779_v55  ;;  %v6554_v37 = vadd.f32 %v15830_v12, %v11843_v48 }
 0x474   : > { %v6736_v25 = vadd.f32 %v15812_v30, %v6633_v43  ;;  %v11846_v7 = vadd.f32 %v15852_v8, %v15836_v11  ;;  %12611 = vmatprep.mubr.bf16.mxu1 %v15905_v63  ;;  %v7411_v57 = vor.u32 %v7410_v1, %v7406_v0  ;;  %v7546_v27 = vsel %vm1184_vm7, %v7544_v34, %v7545_v18  ;;  %v15918_v8 = vpop.f32.mrf.mxu1 }
 0x475   : > { %v6931_v35 = vrot.slane %v10837_v59, 7  ;;  %v7767_v44 = vrot.slane %v7765_v23, 1  ;;  %v6634_v56 = vadd.f32 %v6554_v37, %v15440_v40  ;;  %v7794_v33 = vshrl.u32 %v7546_v27, 16  ;;  %v15922_v40 = vpop.f32.mrf.mxu0 }
 0x476   : > { %v6768_v62 = vmax.f32 %v6736_v25, 0.0  ;;  %v7796_v55 = vshll.u32 %v7546_v27, 16  ;;  %v15915_v12 = vsel %vm959_vm6, %v7411_v57, %v7415_v58  ;;  %v7801_v28 = vshll.u32 %v7545_v18, 16 }
 0x477   : > { %v6932_v52 = vrot.slane %v6931_v35, 4  ;;  %7035 = vst [vmem:[#allocation2 + $0x9c] sm:$0xe] %v6931_v35  ;;  %v6557_v11 = vadd.f32 %v15869_v47, %v11846_v7  ;;  %v7758_v10 = vshrl.u32 %v15915_v12, 16  ;;  %v7760_v14 = vshll.u32 %v15915_v12, 16  ;;  %v15933_v35 = vpop.f32.mrf.mxu1 }
 0x478   : > { %v10838_v0 = vpack.c.bf16 %v6768_v62, %v6768_v62  ;;  %v10940_v32 = vpack.c.bf16 %v6768_v62, %v6767_v13  ;;  %v6737_v43 = vadd.f32 %v15812_v30, %v6634_v56  ;;  %v7798_v48 = vrot.slane %v7796_v55, 1  ;;  %v15931_v7 = vld [vmem:[#allocation2 + $0x80] ss:$0 sps:$4 sm:$0x33]   ;;  %v6561_v56 = vpop.f32.mrf.mxu0  ;;  %v15937_v55 = vld [vmem:[#allocation2 + $0x78] sm:$0xff]  }
 0x479   : > { %v7803_v34 = vrot.slane %v7801_v28, 1  ;;  %v6635_v58 = vadd.f32 %v6557_v11, %v15447_v9  ;;  %v7762_v1 = vrot.slane %v7760_v14, 1  ;;  %v7420_v47 = vshrl.u32 %v15877_v61, 16 }
 0x47a   : > { %v6933_v59 = vrot.slane %v10838_v0, 7  ;;  %11048 = vst [vmem:[%s15486_s12 + $0x60] sm:$0xff] %v10940_v32   ;;  %v7422_v23 = vshll.u32 %v15877_v61, 16  ;;  %v6769_v13 = vmax.f32 %v6737_v43, 0.0  ;;  %v7799_v18 = vor.u32 %v7798_v48, %v7794_v33 }
 0x47b   : > { %v6738_v25 = vadd.f32 %v15812_v30, %v6635_v58  ;;  %v7427_v37 = vshll.u32 %v15882_v54, 16  ;;  %v7763_v27 = vor.u32 %v7762_v1, %v7758_v10  ;;  %v7431_v32 = vshrl.u32 %v15882_v54, 16  ;;  %v11854_v58 = vpop.f32.mrf.mxu1  ;;  %v15955_v54 = vpop.f32.mrf.mxu0 }
 0x47c   : > { %v6934_v9 = vsel %vm13372_vm5, %v6932_v52, %v6933_v59  ;;  %v6935_v57 = vrot.slane %v6933_v59, 4  ;;  %v7424_v62 = vrot.slane %v7422_v23, 1  ;;  %v10839_v61 = vpack.c.bf16 %v6769_v13, %v6769_v13 }
 0x47d   : > { %7036 = vst [vmem:[#allocation2 + $0xa0] sm:$0xf] %v6934_v9  ;;  %v15940_v33 = vsel %vm959_vm6, %v7799_v18, %v7803_v34  ;;  %v6770_v28 = vmax.f32 %v6738_v25, 0.0  ;;  %v7429_v11 = vrot.slane %v7427_v37, 1  ;;  %v15943_v0 = vsel %vm959_vm6, %v7763_v27, %v7767_v44 }
 0x47e   : > { %7037 = vst [vmem:[#allocation2 + $0xa4] sm:$0x1] %v6935_v57  ;;  %12612 = vmatmul.mubr.bf16.gmra.mxu1 %v15940_v33  ;;  %v7425_v52 = vor.u32 %v7424_v62, %v7420_v47  ;;  %v11849_v10 = vadd.f32 %v15886_v15, %v15873_v4  ;;  %8285 = vmatprep.mubr.bf16.mxu0 %v15943_v0  ;;  %v6936_v14 = vrot.slane %v10839_v61, 7  ;;  %v7441_v34 = vshll.u32 %v15931_v7, 16 }
 0x47f   : > { %v10840_v43 = vpack.c.bf16 %v6770_v28, %v6770_v28  ;;  %v10945_v48 = vpack.c.bf16 %v6770_v28, %v6769_v13  ;;  %8286 = vmatmul.mubr.bf16.gmra.mxu0 %v15915_v12  ;;  %v7789_v59 = vshll.u32 %v7431_v32, 16  ;;  %v7547_v4 = vrot.slane %v15937_v55, 1  ;;  %v15967_v61 = vld [vmem:[#allocation2 + $0x8c] ss:$0 sps:$4 sm:$0x33]   ;;  %v11856_v28 = vpop.f32.mrf.mxu1  ;;  %v6564_v32 = vpop.f32.mrf.mxu0 }
 0x480   : > { %v15953_v44 = vsel %vm959_vm6, %v7425_v52, %v7429_v11  ;;  %v6562_v1 = vadd.f32 %v11849_v10, %v6561_v56  ;;  %v6937_v15 = vrot.slane %v6936_v14, 4  ;;  %7038 = vst [vmem:[#allocation2 + $0xa8] sm:$0xe] %v6936_v14  ;;  %v7443_v37 = vrot.slane %v7441_v34, 1  ;;  %v15972_v14 = vld [vmem:[#allocation2 + $0x84] sm:$0xff]  }
 0x481   : > { %v6938_v47 = vrot.slane %v10840_v43, 7  ;;  %11049 = vst [vmem:[%s15486_s12 + $0x68] sm:$0xff] %v10945_v48   ;;  %v7782_v23 = vshrl.u32 %v15953_v44, 16  ;;  %v7784_v13 = vshll.u32 %v15953_v44, 16  ;;  %v7791_v18 = vrot.slane %v7789_v59, 1 }
 0x482   : > { %v6636_v25 = vadd.f32 %v6562_v1, %v15454_v6  ;;  %v7548_v9 = vrot.slane %v15931_v7, 1  ;;  %v11852_v56 = vadd.f32 %v15918_v8, %v15902_v3  ;;  %v7434_v10 = vshrl.u32 %v15937_v55, 16 }
 0x483   : > { %v6939_v57 = vsel %vm13372_vm5, %v6937_v15, %v6938_v47  ;;  %v6940_v27 = vrot.slane %v6938_v47, 4  ;;  %v7786_v62 = vrot.slane %v7784_v13, 1  ;;  %v7436_v1 = vshll.u32 %v15937_v55, 16 }
 0x484   : > { %7039 = vst [vmem:[#allocation2 + $0xac] sm:$0xf] %v6939_v57  ;;  %v6739_v11 = vadd.f32 %v15812_v30, %v6636_v25  ;;  %v7549_v52 = vsel %vm1184_vm7, %v7547_v4, %v7548_v9  ;;  %v7825_v6 = vshll.u32 %v7548_v9, 16  ;;  %v6565_v59 = vadd.f32 %v11852_v56, %v6564_v32  ;;  %v11857_v9 = vpop.f32.mrf.mxu1 }
 0x485   : > { %7040 = vst [vmem:[#allocation2 + $0xb0] sm:$0x1] %v6940_v27  ;;  %v7787_v43 = vor.u32 %v7786_v62, %v7782_v23  ;;  %v7818_v48 = vshrl.u32 %v7549_v52, 16  ;;  %v7820_v34 = vshll.u32 %v7549_v52, 16  ;;  %v7445_v15 = vshrl.u32 %v15931_v7, 16 }
 0x486   : > { %v6771_v3 = vmax.f32 %v6739_v11, 0.0  ;;  %v7827_v8 = vrot.slane %v7825_v6, 1  ;;  %v6637_v13 = vadd.f32 %v6565_v59, %v15457_v49  ;;  %v11855_v25 = vadd.f32 %v11854_v58, %v15933_v35 }
 0x487   : > { %v15977_v47 = vsel %vm959_vm6, %v7787_v43, %v7791_v18  ;;  %v7822_v4 = vrot.slane %v7820_v34, 1  ;;  %v7438_v57 = vrot.slane %v7436_v1, 1  ;;  %v7813_v27 = vshll.u32 %v7445_v15, 16 }
 0x488   : > { %8293 = vmatprep.mubr.bf16.mxu0 %v15977_v47  ;;  %v10841_v23 = vpack.c.bf16 %v6771_v3, %v6771_v3  ;;  %v7550_v62 = vrot.slane %v15972_v14, 1  ;;  %v6740_v7 = vadd.f32 %v15812_v30, %v6637_v13  ;;  %v6570_v18 = vadd.f32 %v15922_v40, %v11855_v25  ;;  %v16000_v25 = vld [vmem:[#allocation2 + $0x98] ss:$0 sps:$4 sm:$0x33]  }
 0x489   : > { %8294 = vmatmul.mubr.bf16.gmra.mxu0 %v15953_v44  ;;  %v7823_v55 = vor.u32 %v7822_v4, %v7818_v48  ;;  %v7551_v56 = vrot.slane %v15967_v61, 1  ;;  %v7439_v11 = vor.u32 %v7438_v57, %v7434_v10  ;;  %v7815_v35 = vrot.slane %v7813_v27, 1 }
 0x48a   : > { %v6941_v49 = vrot.slane %v10841_v23, 7  ;;  %v11858_v58 = vadd.f32 %v11857_v9, %v11856_v28  ;;  %v6772_v6 = vmax.f32 %v6740_v7, 0.0  ;;  %v6638_v32 = vadd.f32 %v6570_v18, %v15460_v53  ;;  %v13047_v7 = vld [vmem:[#allocation2 + $0x90] sm:$0xff]  }
 0x48b   : > { %v15988_v52 = vsel %vm959_vm6, %v7823_v55, %v7827_v8  ;;  %v7552_v43 = vsel %vm1184_vm7, %v7550_v62, %v7551_v56  ;;  %v15994_v40 = vsel %vm959_vm6, %v7439_v11, %v7443_v37  ;;  %v7849_v4 = vshll.u32 %v7551_v56, 16 }
 0x48c   : > { %v6942_v34 = vrot.slane %v6941_v49, 4  ;;  %7041 = vst [vmem:[#allocation2 + $0xb4] sm:$0xe] %v6941_v49  ;;  %12615 = vmatprep.mubr.bf16.mxu1 %v15988_v52  ;;  %v7842_v48 = vshrl.u32 %v7552_v43, 16  ;;  %v7844_v10 = vshll.u32 %v7552_v43, 16  ;;  %v10842_v59 = vpack.c.bf16 %v6772_v6, %v6772_v6 }
 0x48d   : > { %v10950_v28 = vpack.c.bf16 %v6772_v6, %v6771_v3  ;;  %v7806_v8 = vshrl.u32 %v15994_v40, 16  ;;  %v7808_v1 = vshll.u32 %v15994_v40, 16  ;;  %v6741_v53 = vadd.f32 %v15812_v30, %v6638_v32 }
 0x48e   : > { %v7846_v15 = vrot.slane %v7844_v10, 1  ;;  %v6573_v13 = vadd.f32 %v15955_v54, %v11858_v58  ;;  %v6943_v9 = vrot.slane %v10842_v59, 7  ;;  %v7448_v23 = vshrl.u32 %v15972_v14, 16 }
 0x48f   : > { %11050 = vst [vmem:[%s15486_s12 + $0x70] sm:$0xff] %v10950_v28   ;;  %v7810_v37 = vrot.slane %v7808_v1, 1  ;;  %v7450_v57 = vshll.u32 %v15972_v14, 16  ;;  %v6773_v3 = vmax.f32 %v6741_v53, 0.0  ;;  %v7851_v62 = vrot.slane %v7849_v4, 1  ;;  %v13052_v1 = vld [vmem:[#allocation2 + $0x9c] sm:$0xff]  }
 0x490   : > { %v7847_v27 = vor.u32 %v7846_v15, %v7842_v48  ;;  %v6639_v55 = vadd.f32 %v6573_v13, %v15463_v38  ;;  %v6944_v18 = vsel %vm13372_vm5, %v6942_v34, %v6943_v9  ;;  %v6945_v56 = vrot.slane %v6943_v9, 4 }
 0x491   : > { %v7811_v54 = vor.u32 %v7810_v37, %v7806_v8  ;;  %v7452_v49 = vrot.slane %v7450_v57, 1  ;;  %7042 = vst [vmem:[#allocation2 + $0xb8] sm:$0xf] %v6944_v18  ;;  %v10843_v11 = vpack.c.bf16 %v6773_v3, %v6773_v3  ;;  %v7455_v14 = vshll.u32 %v15967_v61, 16 }
 0x492   : > { %v16009_v58 = vsel %vm959_vm6, %v7847_v27, %v7851_v62  ;;  %v6742_v6 = vadd.f32 %v15812_v30, %v6639_v55  ;;  %7043 = vst [vmem:[#allocation2 + $0xbc] sm:$0x1] %v6945_v56  ;;  %v7459_v43 = vshrl.u32 %v15967_v61, 16  ;;  %v7469_v34 = vshll.u32 %v16000_v25, 16 }
 0x493   : > { %v16014_v32 = vsel %vm959_vm6, %v7811_v54, %v7815_v35  ;;  %12616 = vmatmul.mubr.bf16.gmra.mxu1 %v16009_v58  ;;  %v7453_v38 = vor.u32 %v7452_v49, %v7448_v23  ;;  %v6946_v48 = vrot.slane %v10843_v11, 7  ;;  %v7457_v59 = vrot.slane %v7455_v14, 1  ;;  %v13053_v57 = vld [vmem:[#allocation2 + $0xa4] ss:$0 sps:$4 sm:$0x33]  }
 0x494   : > { %8301 = vmatprep.mubr.bf16.mxu0 %v16014_v32  ;;  %v6774_v10 = vmax.f32 %v6742_v6, 0.0  ;;  %v7553_v28 = vrot.slane %v13047_v7, 1  ;;  %v7837_v30 = vshll.u32 %v7459_v43, 16  ;;  %v7471_v8 = vrot.slane %v7469_v34, 1 }
 0x495   : > { %8302 = vmatmul.mubr.bf16.gmra.mxu0 %v15994_v40  ;;  %v7554_v35 = vrot.slane %v16000_v25, 1  ;;  %7044 = vst [vmem:[#allocation2 + $0xc0] sm:$0xe] %v6946_v48  ;;  %v16023_v61 = vsel %vm959_vm6, %v7453_v38, %v7457_v59  ;;  %v7462_v4 = vshrl.u32 %v13047_v7, 16  ;;  %v6947_v13 = vrot.slane %v6946_v48, 4 }
 0x496   : > { %v10844_v53 = vpack.c.bf16 %v6774_v10, %v6774_v10  ;;  %v10955_v15 = vpack.c.bf16 %v6774_v10, %v6773_v3  ;;  %v7830_v9 = vshrl.u32 %v16023_v61, 16  ;;  %v7832_v37 = vshll.u32 %v16023_v61, 16 }
 0x497   : > { %v7555_v23 = vsel %vm1184_vm7, %v7553_v28, %v7554_v35  ;;  %v7839_v62 = vrot.slane %v7837_v30, 1  ;;  %v7873_v18 = vshll.u32 %v7554_v35, 16  ;;  %v7464_v54 = vshll.u32 %v13047_v7, 16 }
 0x498   : > { %v6948_v27 = vrot.slane %v10844_v53, 7  ;;  %11051 = vst [vmem:[%s15486_s12 + $0x78] sm:$0xff] %v10955_v15   ;;  %v7868_v55 = vshll.u32 %v7555_v23, 16  ;;  %v7834_v56 = vrot.slane %v7832_v37, 1  ;;  %v7473_v3 = vshrl.u32 %v16000_v25, 16  ;;  %v13056_v53 = vld [vmem:[#allocation2 + $0xa8] sm:$0xff]  }
 0x499   : > { %v7556_v49 = vrot.slane %v13052_v1, 1  ;;  %v7866_v14 = vshrl.u32 %v7555_v23, 16  ;;  %v7875_v34 = vrot.slane %v7873_v18, 1  ;;  %v7466_v48 = vrot.slane %v7464_v54, 1 }
 0x49a   : > { %v6949_v11 = vsel %vm13372_vm5, %v6947_v13, %v6948_v27  ;;  %v6950_v6 = vrot.slane %v6948_v27, 4  ;;  %v7870_v38 = vrot.slane %v7868_v55, 1  ;;  %v7835_v43 = vor.u32 %v7834_v56, %v7830_v9  ;;  %v13057_v15 = vld [vmem:[#allocation2 + $0xb0] ss:$0 sps:$4 sm:$0x33]  }
 0x49b   : > { %7045 = vst [vmem:[#allocation2 + $0xc4] sm:$0xf] %v6949_v11  ;;  %v7557_v10 = vrot.slane %v13053_v57, 1  ;;  %v7861_v28 = vshll.u32 %v7473_v3, 16  ;;  %v7478_v30 = vshll.u32 %v13052_v1, 16  ;;  %v7483_v35 = vshll.u32 %v13053_v57, 16 }
 0x49c   : > { %7046 = vst [vmem:[#allocation2 + $0xc8] sm:$0x1] %v6950_v6  ;;  %v7871_v59 = vor.u32 %v7870_v38, %v7866_v14  ;;  %v16033_v7 = vsel %vm959_vm6, %v7835_v43, %v7839_v62  ;;  %v7467_v25 = vor.u32 %v7466_v48, %v7462_v4  ;;  %v7476_v23 = vshrl.u32 %v13052_v1, 16 }
 0x49d   : > { %v7558_v20 = vsel %vm1184_vm7, %v7556_v49, %v7557_v10  ;;  %8309 = vmatprep.mubr.bf16.mxu0 %v16033_v7  ;;  %v7897_v37 = vshll.u32 %v7557_v10, 16  ;;  %v7480_v4 = vrot.slane %v7478_v30, 1  ;;  %v7485_v62 = vrot.slane %v7483_v35, 1 }
 0x49e   : > { %v16038_v13 = vsel %vm959_vm6, %v7871_v59, %v7875_v34  ;;  %v7892_v9 = vshll.u32 %v7558_v20, 16  ;;  %8310 = vmatmul.mubr.bf16.gmra.mxu0 %v16023_v61  ;;  %v16043_v27 = vsel %vm959_vm6, %v7467_v25, %v7471_v8  ;;  %v7487_v55 = vshrl.u32 %v13053_v57, 16  ;;  %v13061_v59 = vld [vmem:[#allocation2 + $0xb4] sm:$0xff]  }
 0x49f   : > { %12619 = vmatprep.mubr.bf16.mxu1 %v16038_v13  ;;  %v7856_v18 = vshll.u32 %v16043_v27, 16  ;;  %v7863_v56 = vrot.slane %v7861_v28, 1  ;;  %v7890_v54 = vshrl.u32 %v7558_v20, 16  ;;  %v7854_v49 = vshrl.u32 %v16043_v27, 16 }
 0x4a0   : > { %v7894_v3 = vrot.slane %v7892_v9, 1  ;;  %v7481_v11 = vor.u32 %v7480_v4, %v7476_v23  ;;  %v7497_v6 = vshll.u32 %v13057_v15, 16  ;;  %v7559_v1 = vrot.slane %v13056_v53, 1  ;;  %v13062_v20 = vld [vmem:[#allocation2 + $0xbc] ss:$0 sps:$4 sm:$0x33]  }
 0x4a1   : > { %v7858_v14 = vrot.slane %v7856_v18, 1  ;;  %v7899_v43 = vrot.slane %v7897_v37, 1  ;;  %v7560_v34 = vrot.slane %v13057_v15, 1  ;;  %v7885_v48 = vshll.u32 %v7487_v55, 16 }
 0x4a2   : > { %v7895_v38 = vor.u32 %v7894_v3, %v7890_v54  ;;  %v16048_v8 = vsel %vm959_vm6, %v7481_v11, %v7485_v62  ;;  %v7490_v10 = vshrl.u32 %v13056_v53, 16  ;;  %v7492_v57 = vshll.u32 %v13056_v53, 16 }
 0x4a3   : > { %v7859_v30 = vor.u32 %v7858_v14, %v7854_v49  ;;  %v7880_v35 = vshll.u32 %v16048_v8, 16  ;;  %v7499_v25 = vrot.slane %v7497_v6, 1  ;;  %v7561_v9 = vsel %vm1184_vm7, %v7559_v1, %v7560_v34 }
 0x4a4   : > { %v16051_v28 = vsel %vm959_vm6, %v7895_v38, %v7899_v43  ;;  %v7921_v37 = vshll.u32 %v7560_v34, 16  ;;  %v7494_v23 = vrot.slane %v7492_v57, 1  ;;  %v7501_v4 = vshrl.u32 %v13057_v15, 16  ;;  %v11899_v57 = vpop.f32.mrf.mxu0 }
 0x4a5   : > { %12620 = vmatmul.mubr.bf16.gmra.mxu1 %v16051_v28  ;;  %v16057_v62 = vsel %vm959_vm6, %v7859_v30, %v7863_v56  ;;  %v7878_v53 = vshrl.u32 %v16048_v8, 16  ;;  %v7882_v55 = vrot.slane %v7880_v35, 1  ;;  %v7916_v18 = vshll.u32 %v7561_v9, 16 }
 0x4a6   : > { %8317 = vmatprep.mubr.bf16.mxu0 %v16057_v62  ;;  %v7887_v54 = vrot.slane %v7885_v48, 1  ;;  %v7914_v3 = vshrl.u32 %v7561_v9, 16  ;;  %v7495_v49 = vor.u32 %v7494_v23, %v7490_v10  ;;  %v7562_v11 = vrot.slane %v13061_v59, 1 }
 0x4a7   : > { %8318 = vmatmul.mubr.bf16.gmra.mxu0 %v16043_v27  ;;  %v7883_v6 = vor.u32 %v7882_v55, %v7878_v53  ;;  %v7918_v1 = vrot.slane %v7916_v18, 1  ;;  %v7923_v14 = vrot.slane %v7921_v37, 1  ;;  %v7563_v38 = vrot.slane %v13062_v20, 1 }
 0x4a8   : > { %v16063_v15 = vsel %vm959_vm6, %v7495_v49, %v7499_v25  ;;  %v7909_v56 = vshll.u32 %v7501_v4, 16  ;;  %v7506_v43 = vshll.u32 %v13061_v59, 16  ;;  %v7511_v34 = vshll.u32 %v13062_v20, 16 }
 0x4a9   : > { %v16066_v30 = vsel %vm959_vm6, %v7883_v6, %v7887_v54  ;;  %v7919_v48 = vor.u32 %v7918_v1, %v7914_v3  ;;  %v7904_v10 = vshll.u32 %v16063_v15, 16  ;;  %v7504_v35 = vshrl.u32 %v13061_v59, 16  ;;  %v11900_v59 = vpop.f32.mrf.mxu0 }
 0x4aa   : > { %16835 = vst [vmem:[#allocation13_spill] sm:$0xff] %v16066_v30  ;;  %8325 = vmatprep.mubr.bf16.mxu0 %v16066_v30  ;;  %v7564_v9 = vsel %vm1184_vm7, %v7562_v11, %v7563_v38  ;;  %v7945_v37 = vshll.u32 %v7563_v38, 16  ;;  %v7508_v23 = vrot.slane %v7506_v43, 1  ;;  %v7513_v53 = vrot.slane %v7511_v34, 1 }
 0x4ab   : > { %v16072_v25 = vsel %vm959_vm6, %v7919_v48, %v7923_v14  ;;  %v7902_v4 = vshrl.u32 %v16063_v15, 16  ;;  %v7906_v55 = vrot.slane %v7904_v10, 1  ;;  %v7940_v18 = vshll.u32 %v7564_v9, 16 }
 0x4ac   : > { %12623 = vmatprep.mubr.bf16.mxu1 %v16072_v25  ;;  %v7911_v54 = vrot.slane %v7909_v56, 1  ;;  %v7509_v3 = vor.u32 %v7508_v23, %v7504_v35  ;;  %v7515_v49 = vshrl.u32 %v13062_v20, 16  ;;  %v7938_v1 = vshrl.u32 %v7564_v9, 16  ;;  %v13079_v23 = vld [vmem:[%s16693_s5 + $0x228] sm:$0xff]  }
 0x4ad   : > { %v7907_v6 = vor.u32 %v7906_v55, %v7902_v4  ;;  %v7942_v30 = vrot.slane %v7940_v18, 1  ;;  %v16076_v11 = vadd.f32 %v11900_v59, %v11899_v57  ;;  %v7947_v38 = vrot.slane %v7945_v37, 1  ;;  %v13070_v4 = vld [vmem:[%s16693_s5 + $0x1f0] sm:$0xff]   ;;  %v13091_v59 = vld [vmem:[%s16693_s5 + $0x208] sm:$0xff]  }
 0x4ae   : > { %v16079_v43 = vsel %vm959_vm6, %v7509_v3, %v7513_v53  ;;  %v7933_v48 = vshll.u32 %v7515_v49, 16  ;;  %v13068_v53 = vld [vmem:[%s16693_s5 + $0x1b8] sm:$0xff]   ;;  %v13071_v55 = vld [vmem:[%s16693_s5 + $0x1b0] sm:$0xff]   ;;  %v13073_v3 = vld [vmem:[%s16693_s5 + $0x1a8] sm:$0xff]  }
 0x4af   : > { %8326 = vmatmul.mubr.bf16.gmra.mxu0 %v16048_v8  ;;  %v16083_v14 = vsel %vm959_vm6, %v7907_v6, %v7911_v54  ;;  %v7943_v34 = vor.u32 %v7942_v30, %v7938_v1  ;;  %v7928_v56 = vshll.u32 %v16079_v43, 16  ;;  %v7926_v57 = vshrl.u32 %v16079_v43, 16  ;;  %v13074_v30 = vld [vmem:[%s16693_s5 + $0x230] sm:$0xff]   ;;  %v13072_v54 = vld [vmem:[%s16693_s5 + $0x1e8] sm:$0xff]   ;;  %v13075_v49 = vld [vmem:[%s16693_s5 + $0x1e0] sm:$0xff]  }
 0x4b0   : > { %8333 = vmatprep.mubr.bf16.mxu0 %v16083_v14  ;;  %v7935_v9 = vrot.slane %v7933_v48, 1  ;;  %v13090_v18 = vld [vmem:[%s16693_s5 + $0x210] sm:$0xff]   ;;  %v13076_v6 = vld [vmem:[%s16693_s5 + $0x1a0] sm:$0xff]  }
 0x4b1   : > { %v16088_v20 = vsel %vm959_vm6, %v7943_v34, %v7947_v38  ;;  %v7930_v10 = vrot.slane %v7928_v56, 1  ;;  %v13092_v1 = vld [vmem:[%s16693_s5 + $0x200] sm:$0xff]   ;;  %v13077_v38 = vld [vmem:[%s16693_s5 + $0x1d8] sm:$0xff]   ;;  %v13080_v56 = vld [vmem:[%s16693_s5 + $0x1d0] sm:$0xff]  }
 0x4b2   : > { %12624 = vmatmul.mubr.bf16.gmra.mxu1 %v16088_v20  ;;  %v13078_v34 = vld [vmem:[%s16693_s5 + $0x198] sm:$0xff]   ;;  %v13081_v48 = vld [vmem:[%s16693_s5 + $0x190] sm:$0xff]  }
 0x4b3   : > { %8820 = vmatprep.mubr.bf16.mxu1 %v15572_v2  ;;  %v7931_v35 = vor.u32 %v7930_v10, %v7926_v57  ;;  %v13105_v2 = vld [vmem:[%s16693_s5 + $0x238] sm:$0xff]   ;;  %v13082_v57 = vld [vmem:[%s16693_s5 + $0x1c8] sm:$0xff]  }
 0x4b4   : > { %v16836_v10 = vld [vmem:[#allocation15_spill] sm:$0xff] }
 0x4b5   : > { %v16094_v37 = vsel %vm959_vm6, %v7931_v35, %v7935_v9  ;;  %v13083_v35 = vld [vmem:[%s16693_s5 + $0x188] sm:$0xff]   ;;  %v13087_v9 = vld [vmem:[%s16693_s5 + $0x1c0] sm:$0xff]  }
 0x4b7   : > { %8334 = vmatmul.mubr.bf16.gmra.mxu0 %v16063_v15 }
 0x4b8   : > { %8341 = vmatprep.mubr.bf16.mxu0 %v16094_v37 }
 0x4ba   : > { %8821 = vmatmul.mubr.bf16.vlgmr.msra.gmra.mxu1 %v15531_v60  ;;  %v13084_v60 = vld [vmem:[%s16693_s5 + $0x220] sm:$0xff]  }
 0x4bb   : > { %8828 = vmatprep.mubr.bf16.mxu1 %v15647_v5  ;;  %12676 = vmatpush3.bf16.msra.mxu1 %v13105_v2 }
 0x4bc   : > { %12677 = vmatprep.subr.bf16.mxu1 %v13074_v30 }
 0x4bf   : > { %8342 = vmatmul.mubr.bf16.gmra.mxu0 %v16079_v43  ;;  %12678 = vmatpush3.bf16.msra.mxu1 %v13074_v30  ;;  %v13088_v30 = vld [vmem:[%s16693_s5 + $0x180] sm:$0xff]  }
 0x4c0   : > { %12643 = vmatprep.mubr.bf16.mxu0 %v15528_v46  ;;  %12679 = vmatprep.subr.bf16.mxu1 %v13079_v23  ;;  %v13089_v46 = vld [vmem:[%s16693_s5 + $0x218] sm:$0xff]  }
 0x4c2   : > { %8829 = vmatmul.mubr.bf16.gmra.mxu1 %v15613_v24 }
 0x4c3   : > { %8836 = vmatprep.mubr.bf16.mxu1 %v15690_v17  ;;  %12680 = vmatpush3.bf16.msra.mxu1 %v13079_v23 }
 0x4c4   : > { %12681 = vmatprep.subr.bf16.mxu1 %v13084_v60 }
 0x4c7   : > { %12644 = vmatmul.mubr.bf16.vlgmr.msra.gmra.mxu0 %v15597_v16  ;;  %12682 = vmatpush3.bf16.msra.mxu1 %v13084_v60  ;;  %v16189_v60 = vpop.f32.mrf.mxu0 }
 0x4c8   : > { %12647 = vmatprep.mubr.bf16.mxu0 %v15655_v50  ;;  %12156 = vmatpush3.bf16.msra.mxu0 %v13068_v53 }
 0x4c9   : > { %12157 = vmatprep.subr.bf16.mxu0 %v13070_v4  ;;  %12683 = vmatprep.subr.bf16.mxu1 %v13089_v46  ;;  %v16195_v4 = vld [vmem:[#allocation2 + $0xc0] sm:$0xff]  }
 0x4ca   : > { %8837 = vmatmul.mubr.bf16.gmra.mxu1 %v15668_v21 }
 0x4cb   : > { %8844 = vmatprep.mubr.bf16.mxu1 %v15745_v36  ;;  %12684 = vmatpush3.bf16.msra.mxu1 %v13089_v46  ;;  %v16197_v46 = vld [vmem:[#allocation2 + $0xc8] ss:$0 sps:$4 sm:$0x33]  }
 0x4cc   : > { %12158 = vmatpush3.bf16.msra.mxu0 %v13071_v55  ;;  %12685 = vmatprep.subr.bf16.mxu1 %v13090_v18  ;;  %v16201_v55 = vpop.f32.mrf.mxu0 }
 0x4cd   : > { %12159 = vmatprep.subr.bf16.mxu0 %v13072_v54  ;;  %v8566_v54 = vrot.slane %v16197_v46, 1 }
 0x4cf   : > { %12648 = vmatmul.mubr.bf16.gmra.mxu0 %v15710_v39  ;;  %12686 = vmatpush3.bf16.msra.mxu1 %v13090_v18  ;;  %v8565_v18 = vrot.slane %v16195_v4, 1 }
 0x4d0   : > { %12651 = vmatprep.mubr.bf16.mxu0 %v15750_v31  ;;  %12160 = vmatpush3.bf16.msra.mxu0 %v13073_v3 }
 0x4d1   : > { %12161 = vmatprep.subr.bf16.mxu0 %v13075_v49  ;;  %12687 = vmatprep.subr.bf16.mxu1 %v13091_v59  ;;  %v8567_v49 = vsel %vm1184_vm7, %v8565_v18, %v8566_v54 }
 0x4d2   : > { %8845 = vmatmul.mubr.bf16.gmra.mxu1 %v15716_v51 }
 0x4d3   : > { %8852 = vmatprep.mubr.bf16.mxu1 %v15795_v45  ;;  %12688 = vmatpush3.bf16.msra.mxu1 %v13091_v59 }
 0x4d4   : > { %12162 = vmatpush3.bf16.msra.mxu0 %v13076_v6  ;;  %12689 = vmatprep.subr.bf16.mxu1 %v13092_v1 }
 0x4d5   : > { %12163 = vmatprep.subr.bf16.mxu0 %v13077_v38  ;;  %v8583_v38 = vshll.u32 %v8567_v49, 16 }
 0x4d7   : > { %12652 = vmatmul.mubr.bf16.gmra.mxu0 %v15807_v26  ;;  %12690 = vmatpush3.bf16.msra.mxu1 %v13092_v1 }
 0x4d8   : > { %12655 = vmatprep.mubr.bf16.mxu0 %v15856_v29  ;;  %12164 = vmatpush3.bf16.msra.mxu0 %v13078_v34 }
 0x4d9   : > { %12165 = vmatprep.subr.bf16.mxu0 %v13080_v56 }
 0x4da   : > { %8853 = vmatmul.mubr.bf16.gmra.mxu1 %v16836_v10 }
 0x4db   : > { %8860 = vmatprep.mubr.bf16.mxu1 %v15850_v42 }
 0x4dc   : > { %12166 = vmatpush3.bf16.msra.mxu0 %v13081_v48 }
 0x4dd   : > { %12167 = vmatprep.subr.bf16.mxu0 %v13082_v57 }
 0x4df   : > { %12656 = vmatmul.mubr.bf16.gmra.mxu0 %v15905_v63 }
 0x4e0   : > { %12659 = vmatprep.mubr.bf16.mxu0 %v15940_v33  ;;  %12168 = vmatpush3.bf16.msra.mxu0 %v13083_v35  ;;  %v8585_v35 = vrot.slane %v8583_v38, 1 }
 0x4e1   : > { %12169 = vmatprep.subr.bf16.mxu0 %v13087_v9  ;;  %v8581_v9 = vshrl.u32 %v8567_v49, 16 }
 0x4e2   : > { %8861 = vmatmul.mubr.bf16.gmra.mxu1 %v15819_v41 }
 0x4e3   : > { %8868 = vmatprep.mubr.bf16.mxu1 %v15891_v19 }
 0x4e4   : > { %v12597_v2 = vpop.f32.mrf.mxu1  ;;  %12170 = vmatpush3.bf16.msra.mxu0 %v13088_v30  ;;  %v8588_v30 = vshll.u32 %v8566_v54, 16 }
 0x4e6   : > { %v8384_v23 = vpop.f32.mrf.mxu1  ;;  %v8590_v18 = vrot.slane %v8588_v30, 1 }
 0x4e7   : > { %v16192_v53 = vadd.f32 %v16076_v11, %v8384_v23  ;;  %12660 = vmatmul.mubr.bf16.gmra.mxu0 %v15988_v52  ;;  %v8586_v23 = vor.u32 %v8585_v35, %v8581_v9 }
 0x4e8   : > { %12663 = vmatprep.mubr.bf16.mxu0 %v16009_v58  ;;  %v12598_v48 = vpop.f32.mrf.mxu1 }
 0x4ea   : > { %8869 = vmatmul.mubr.bf16.gmra.mxu1 %v15866_v22 }
 0x4eb   : > { %8876 = vmatprep.mubr.bf16.mxu1 %v15943_v0 }
 0x4ed   : > { %v11905_v11 = vpop.f32.mrf.mxu0 }
 0x4ef   : > { %v11906_v3 = vpop.f32.mrf.mxu0  ;;  %12664 = vmatmul.mubr.bf16.gmra.mxu0 %v16038_v13 }
 0x4f0   : > { %v11907_v59 = vadd.f32 %v11906_v3, %v11905_v11  ;;  %12667 = vmatprep.mubr.bf16.mxu0 %v16051_v28 }
 0x4f1   : > { %v11908_v6 = vpop.f32.mrf.mxu0 }
 0x4f2   : > { %v16209_v1 = vadd.f32 %v12597_v2, %v11907_v59  ;;  %8877 = vmatmul.mubr.bf16.gmra.mxu1 %v15915_v12  ;;  %v16218_v2 = vpop.f32.mrf.mxu1  ;;  %v16222_v59 = vsel %vm959_vm6, %v8586_v23, %v8590_v18 }
 0x4f3   : > { %v11909_v34 = vpop.f32.mrf.mxu0  ;;  %8884 = vmatprep.mubr.bf16.mxu1 %v15977_v47 }
 0x4f4   : > { %v11910_v56 = vadd.f32 %v11909_v34, %v11908_v6 }
 0x4f6   : > { %v16213_v57 = vadd.f32 %v12598_v48, %v11910_v56 }
 0x4f7   : > { %12668 = vmatmul.mubr.bf16.gmra.mxu0 %v16072_v25 }
 0x4f8   : > { %12671 = vmatprep.mubr.bf16.mxu0 %v16088_v20 }
 0x4fa   : > { %8885 = vmatmul.mubr.bf16.gmra.mxu1 %v15953_v44 }
 0x4fb   : > { %8892 = vmatprep.mubr.bf16.mxu1 %v16014_v32 }
 0x4fd   : > { %v11911_v11 = vpop.f32.mrf.mxu0  ;;  %v12601_v3 = vpop.f32.mrf.mxu1 }
 0x4ff   : > { %v11912_v6 = vpop.f32.mrf.mxu0  ;;  %v8400_v38 = vpop.f32.mrf.mxu1  ;;  %12672 = vmatmul.mubr.bf16.gmra.mxu0 %v16222_v59 }
 0x500   : > { %v11913_v34 = vadd.f32 %v11912_v6, %v11911_v11  ;;  %9483 = vmatprep.mubr.bf16.mxu0 %v15647_v5 }
 0x501   : > { %v11914_v54 = vpop.f32.mrf.mxu0  ;;  %v12602_v11 = vpop.f32.mrf.mxu1 }
 0x502   : > { %v16226_v49 = vadd.f32 %v11913_v34, %v8400_v38  ;;  %8893 = vmatmul.mubr.bf16.gmra.mxu1 %v15994_v40  ;;  %v16839_v34 = vld [vmem:[#allocation13_spill] sm:$0xff] }
 0x503   : > { %v11915_v56 = vpop.f32.mrf.mxu0  ;;  %8900 = vmatprep.mubr.bf16.mxu1 %v16033_v7 }
 0x504   : > { %v16230_v48 = vadd.f32 %v11915_v56, %v11914_v54 }
 0x507   : > { %v11917_v35 = vpop.f32.mrf.mxu0  ;;  %9484 = vmatmul.mubr.bf16.vlgmr.msra.gmra.mxu0 %v15613_v24  ;;  %v8554_v24 = vshll.u32 %v16195_v4, 16 }
 0x508   : > { %9491 = vmatprep.mubr.bf16.mxu0 %v15690_v17  ;;  %v16243_v17 = vpop.f32.mrf.mxu1 }
 0x509   : > { %v11918_v9 = vpop.f32.mrf.mxu0  ;;  %v8556_v56 = vrot.slane %v8554_v24, 1 }
 0x50a   : > { %v11919_v30 = vadd.f32 %v11918_v9, %v11917_v35  ;;  %8901 = vmatmul.mubr.bf16.gmra.mxu1 %v16023_v61  ;;  %v8559_v35 = vshll.u32 %v16197_v46, 16 }
 0x50b   : > { %v11920_v5 = vpop.f32.mrf.mxu0  ;;  %8908 = vmatprep.mubr.bf16.mxu1 %v16057_v62 }
 0x50c   : > { %v16236_v23 = vadd.f32 %v12601_v3, %v11919_v30 }
 0x50d   : > { %v11921_v18 = vpop.f32.mrf.mxu0 }
 0x50e   : > { %16837 = vst [vmem:[#allocation10_spill] sm:$0xff] %v16236_v23  ;;  %v11922_v6 = vadd.f32 %v11921_v18, %v11920_v5 }
 0x50f   : > { %9492 = vmatmul.mubr.bf16.gmra.mxu0 %v15668_v21  ;;  %v8552_v21 = vshrl.u32 %v16195_v4, 16 }
 0x510   : > { %v16239_v38 = vadd.f32 %v12602_v11, %v11922_v6  ;;  %9499 = vmatprep.mubr.bf16.mxu0 %v15745_v36  ;;  %v8561_v11 = vrot.slane %v8559_v35, 1 }
 0x511   : > { %v8557_v36 = vor.u32 %v8556_v56, %v8552_v21  ;;  %v8563_v56 = vshrl.u32 %v16197_v46, 16 }
 0x512   : > { %16838 = vst [vmem:[#allocation18_spill] sm:$0xff] %v16239_v38  ;;  %8909 = vmatmul.mubr.bf16.gmra.mxu1 %v16043_v27 }
 0x513   : > { %8916 = vmatprep.mubr.bf16.mxu1 %v16839_v34  ;;  %v16258_v23 = vsel %vm959_vm6, %v8557_v36, %v8561_v11 }
 0x514   : > { %v11923_v54 = vpop.f32.mrf.mxu0  ;;  %v12605_v3 = vpop.f32.mrf.mxu1 }
 0x516   : > { %v11924_v9 = vpop.f32.mrf.mxu0  ;;  %v8416_v30 = vpop.f32.mrf.mxu1 }
 0x517   : > { %v11925_v5 = vadd.f32 %v11924_v9, %v11923_v54  ;;  %9500 = vmatmul.mubr.bf16.gmra.mxu0 %v15716_v51  ;;  %v8571_v51 = vshll.u32 %v16258_v23, 16 }
 0x518   : > { %v11926_v18 = vpop.f32.mrf.mxu0  ;;  %9507 = vmatprep.mubr.bf16.mxu0 %v15795_v45 }
 0x519   : > { %v16251_v6 = vadd.f32 %v11925_v5, %v8416_v30  ;;  %v8573_v30 = vrot.slane %v8571_v51, 1  ;;  %v8569_v5 = vshrl.u32 %v16258_v23, 16 }
 0x51a   : > { %v11927_v38 = vpop.f32.mrf.mxu0  ;;  %8917 = vmatmul.mubr.bf16.gmra.mxu1 %v16048_v8 }
 0x51b   : > { %v16254_v24 = vadd.f32 %v11927_v38, %v11926_v18  ;;  %8924 = vmatprep.mubr.bf16.mxu1 %v16083_v14  ;;  %v12606_v38 = vpop.f32.mrf.mxu1  ;;  %v8576_v18 = vshll.u32 %v8563_v56, 16 }
 0x51d   : > { %v16269_v36 = vpop.f32.mrf.mxu1  ;;  %v8578_v46 = vrot.slane %v8576_v18, 1 }
 0x51e   : > { %v11929_v4 = vpop.f32.mrf.mxu0 }
 0x51f   : > { %9508 = vmatmul.mubr.bf16.gmra.mxu0 %v16836_v10 }
 0x520   : > { %v11930_v54 = vpop.f32.mrf.mxu0  ;;  %9515 = vmatprep.mubr.bf16.mxu0 %v15850_v42  ;;  %v8574_v42 = vor.u32 %v8573_v30, %v8569_v5 }
 0x521   : > { %v11931_v45 = vadd.f32 %v11930_v54, %v11929_v4 }
 0x522   : > { %v11932_v35 = vpop.f32.mrf.mxu0  ;;  %8925 = vmatmul.mubr.bf16.gmra.mxu1 %v16063_v15  ;;  %v16277_v51 = vsel %vm959_vm6, %v8574_v42, %v8578_v46 }
 0x523   : > { %v16265_v9 = vadd.f32 %v12605_v3, %v11931_v45  ;;  %8932 = vmatprep.mubr.bf16.mxu1 %v16094_v37 }
 0x524   : > { %v11933_v21 = vpop.f32.mrf.mxu0 }
 0x525   : > { %v11934_v10 = vadd.f32 %v11933_v21, %v11932_v35 }
 0x527   : > { %v16271_v11 = vadd.f32 %v12606_v38, %v11934_v10  ;;  %9516 = vmatmul.mubr.bf16.gmra.mxu0 %v15819_v41 }
 0x528   : > { %9523 = vmatprep.mubr.bf16.mxu0 %v15891_v19 }
 0x529   : > { %v11935_v3 = vpop.f32.mrf.mxu0  ;;  %v12609_v4 = vpop.f32.mrf.mxu1 }
 0x52a   : > { %8933 = vmatmul.mubr.bf16.gmra.mxu1 %v16079_v43 }
 0x52b   : > { %v11936_v54 = vpop.f32.mrf.mxu0  ;;  %v8432_v45 = vpop.f32.mrf.mxu1  ;;  %8940 = vmatprep.mubr.bf16.mxu1 %v16277_v51 }
 0x52c   : > { %v11937_v56 = vadd.f32 %v11936_v54, %v11935_v3 }
 0x52d   : > { %v11938_v35 = vpop.f32.mrf.mxu0  ;;  %v12610_v10 = vpop.f32.mrf.mxu1 }
 0x52e   : > { %v16280_v38 = vadd.f32 %v11937_v56, %v8432_v45 }
 0x52f   : > { %v11939_v30 = vpop.f32.mrf.mxu0  ;;  %9524 = vmatmul.mubr.bf16.gmra.mxu0 %v15866_v22 }
 0x530   : > { %v16283_v41 = vadd.f32 %v11939_v30, %v11938_v35  ;;  %9531 = vmatprep.mubr.bf16.mxu0 %v15943_v0  ;;  %v16293_v0 = vpop.f32.mrf.mxu1 }
 0x532   : > { %8941 = vmatmul.mubr.bf16.gmra.mxu1 %v16258_v23  ;;  %v11941_v19 = vpop.f32.mrf.mxu0 }
 0x533   : > { %12691 = vmatprep.mubr.bf16.mxu1 %v15597_v16 }
 0x534   : > { %v11942_v21 = vpop.f32.mrf.mxu0 }
 0x535   : > { %v11943_v5 = vadd.f32 %v11942_v21, %v11941_v19 }
 0x536   : > { %v11944_v18 = vpop.f32.mrf.mxu0 }
 0x537   : > { %9532 = vmatmul.mubr.bf16.gmra.mxu0 %v15915_v12  ;;  %v16289_v42 = vadd.f32 %v12609_v4, %v11943_v5 }
 0x538   : > { %9539 = vmatprep.mubr.bf16.mxu0 %v15977_v47  ;;  %v11945_v22 = vpop.f32.mrf.mxu0 }
 0x539   : > { %v11946_v46 = vadd.f32 %v11945_v22, %v11944_v18 }
 0x53a   : > { %12692 = vmatmul.mubr.bf16.vlgmr.msra.gmra.mxu1 %v15655_v50 }
 0x53b   : > { %12695 = vmatprep.mubr.bf16.mxu1 %v15710_v39  ;;  %v16296_v3 = vadd.f32 %v12610_v10, %v11946_v46  ;;  %v13093_v46 = vld [vmem:[#allocation2 + $0xcc] sm:$0xff]  }
 0x53e   : > { %v12613_v16 = vpop.f32.mrf.mxu1 }
 0x53f   : > { %9540 = vmatmul.mubr.bf16.gmra.mxu0 %v15953_v44  ;;  %v11947_v54 = vpop.f32.mrf.mxu0 }
 0x540   : > { %v8448_v12 = vpop.f32.mrf.mxu1  ;;  %9547 = vmatprep.mubr.bf16.mxu0 %v16014_v32 }
 0x541   : > { %v11948_v4 = vpop.f32.mrf.mxu0 }
 0x542   : > { %v12614_v45 = vpop.f32.mrf.mxu1  ;;  %v11949_v47 = vadd.f32 %v11948_v4, %v11947_v54  ;;  %12696 = vmatmul.mubr.bf16.gmra.mxu1 %v15750_v31  ;;  %v13094_v54 = vld [vmem:[#allocation2 + $0xd4] ss:$0 sps:$4 sm:$0x33]  }
 0x543   : > { %12699 = vmatprep.mubr.bf16.mxu1 %v15807_v26  ;;  %v11950_v50 = vpop.f32.mrf.mxu0 }
 0x544   : > { %v16302_v56 = vadd.f32 %v11949_v47, %v8448_v12  ;;  %v8451_v35 = vpop.f32.mrf.mxu1  ;;  %v9229_v47 = vrot.slane %v13094_v54, 1 }
 0x545   : > { %v11951_v39 = vpop.f32.mrf.mxu0 }
 0x546   : > { %v11952_v30 = vadd.f32 %v11951_v39, %v11950_v50  ;;  %v9215_v39 = vshrl.u32 %v13093_v46, 16 }
 0x547   : > { %9548 = vmatmul.mubr.bf16.gmra.mxu0 %v15994_v40 }
 0x548   : > { %9555 = vmatprep.mubr.bf16.mxu0 %v16033_v7  ;;  %v16306_v19 = vadd.f32 %v11952_v30, %v8451_v35 }
 0x549   : > { %v11953_v44 = vpop.f32.mrf.mxu0 }
 0x54a   : > { %12700 = vmatmul.mubr.bf16.gmra.mxu1 %v15856_v29 }
 0x54b   : > { %v11954_v32 = vpop.f32.mrf.mxu0  ;;  %12703 = vmatprep.mubr.bf16.mxu1 %v15905_v63 }
 0x54c   : > { %v11955_v21 = vadd.f32 %v11954_v32, %v11953_v44 }
 0x54d   : > { %v11956_v31 = vpop.f32.mrf.mxu0 }
 0x54e   : > { %v16310_v26 = vadd.f32 %v12613_v16, %v11955_v21 }
 0x54f   : > { %v11957_v5 = vpop.f32.mrf.mxu0  ;;  %9556 = vmatmul.mubr.bf16.gmra.mxu0 %v16023_v61 }
 0x550   : > { %v11958_v18 = vadd.f32 %v11957_v5, %v11956_v31  ;;  %9563 = vmatprep.mubr.bf16.mxu0 %v16057_v62 }
 0x552   : > { %v16314_v40 = vadd.f32 %v12614_v45, %v11958_v18  ;;  %12704 = vmatmul.mubr.bf16.gmra.mxu1 %v15940_v33  ;;  %v9217_v33 = vshll.u32 %v13093_v46, 16  ;;  %v9228_v45 = vrot.slane %v13093_v46, 1 }
 0x553   : > { %v12617_v7 = vpop.f32.mrf.mxu1  ;;  %12707 = vmatprep.mubr.bf16.mxu1 %v15988_v52 }
 0x554   : > { %v9219_v35 = vrot.slane %v9217_v33, 1  ;;  %v9230_v44 = vsel %vm1184_vm7, %v9228_v45, %v9229_v47 }
 0x555   : > { %v11959_v29 = vpop.f32.mrf.mxu0  ;;  %v8464_v10 = vpop.f32.mrf.mxu1  ;;  %v9246_v5 = vshll.u32 %v9230_v44, 16 }
 0x557   : > { %v11960_v22 = vpop.f32.mrf.mxu0  ;;  %v12618_v63 = vpop.f32.mrf.mxu1  ;;  %9564 = vmatmul.mubr.bf16.gmra.mxu0 %v16043_v27 }
 0x558   : > { %v11961_v16 = vadd.f32 %v11960_v22, %v11959_v29  ;;  %9571 = vmatprep.mubr.bf16.mxu0 %v16839_v34  ;;  %v9222_v34 = vshll.u32 %v13094_v54, 16 }
 0x559   : > { %v11962_v61 = vpop.f32.mrf.mxu0  ;;  %v8467_v4 = vpop.f32.mrf.mxu1 }
 0x55a   : > { %v16320_v62 = vadd.f32 %v11961_v16, %v8464_v10  ;;  %12708 = vmatmul.mubr.bf16.gmra.mxu1 %v16009_v58  ;;  %v9224_v21 = vrot.slane %v9222_v34, 1  ;;  %v9244_v16 = vshrl.u32 %v9230_v44, 16 }
 0x55b   : > { %v11963_v12 = vpop.f32.mrf.mxu0  ;;  %12711 = vmatprep.mubr.bf16.mxu1 %v16038_v13  ;;  %v9220_v13 = vor.u32 %v9219_v35, %v9215_v39 }
 0x55c   : > { %v11964_v52 = vadd.f32 %v11963_v12, %v11962_v61  ;;  %v9251_v61 = vshll.u32 %v9229_v47, 16 }
 0x55e   : > { %v16324_v50 = vadd.f32 %v11964_v52, %v8467_v4  ;;  %v11965_v27 = vpop.f32.mrf.mxu0  ;;  %v9253_v45 = vrot.slane %v9251_v61, 1 }
 0x55f   : > { %9572 = vmatmul.mubr.bf16.gmra.mxu0 %v16048_v8 }
 0x560   : > { %9579 = vmatprep.mubr.bf16.mxu0 %v16083_v14  ;;  %v11966_v30 = vpop.f32.mrf.mxu0  ;;  %v9225_v14 = vsel %vm959_vm6, %v9220_v13, %v9224_v21 }
 0x561   : > { %v11967_v58 = vadd.f32 %v11966_v30, %v11965_v27  ;;  %v9234_v4 = vshll.u32 %v9225_v14, 16  ;;  %v9232_v35 = vshrl.u32 %v9225_v14, 16 }
 0x562   : > { %v11968_v32 = vpop.f32.mrf.mxu0  ;;  %12712 = vmatmul.mubr.bf16.gmra.mxu1 %v16051_v28  ;;  %v9248_v28 = vrot.slane %v9246_v5, 1 }
 0x563   : > { %v16330_v31 = vadd.f32 %v12617_v7, %v11967_v58  ;;  %12715 = vmatprep.mubr.bf16.mxu1 %v16072_v25  ;;  %v9226_v25 = vshrl.u32 %v13094_v54, 16  ;;  %v9236_v47 = vrot.slane %v9234_v4, 1 }
 0x564   : > { %v11969_v18 = vpop.f32.mrf.mxu0 }
 0x565   : > { %v12621_v29 = vpop.f32.mrf.mxu1  ;;  %v11970_v10 = vadd.f32 %v11969_v18, %v11968_v32  ;;  %v9239_v34 = vshll.u32 %v9226_v25, 16 }
 0x567   : > { %v8480_v8 = vpop.f32.mrf.mxu1  ;;  %v16334_v22 = vadd.f32 %v12618_v63, %v11970_v10  ;;  %v11971_v46 = vpop.f32.mrf.mxu0  ;;  %9580 = vmatmul.mubr.bf16.gmra.mxu0 %v16063_v15  ;;  %v9249_v63 = vor.u32 %v9248_v28, %v9244_v16  ;;  %v9241_v58 = vrot.slane %v9239_v34, 1 }
 0x568   : > { %9587 = vmatprep.mubr.bf16.mxu0 %v16094_v37 }
 0x569   : > { %v11972_v7 = vpop.f32.mrf.mxu0  ;;  %v12622_v12 = vpop.f32.mrf.mxu1  ;;  %v9254_v54 = vsel %vm959_vm6, %v9249_v63, %v9253_v45 }
 0x56a   : > { %v11973_v33 = vadd.f32 %v11972_v7, %v11971_v46  ;;  %12716 = vmatmul.mubr.bf16.gmra.mxu1 %v16088_v20 }
 0x56b   : > { %v11974_v52 = vpop.f32.mrf.mxu0  ;;  %12719 = vmatprep.mubr.bf16.mxu1 %v16222_v59  ;;  %v8483_v39 = vpop.f32.mrf.mxu1  ;;  %v9237_v59 = vor.u32 %v9236_v47, %v9232_v35 }
 0x56c   : > { %v16340_v27 = vadd.f32 %v11973_v33, %v8480_v8 }
 0x56d   : > { %v11975_v15 = vpop.f32.mrf.mxu0  ;;  %v9242_v8 = vsel %vm959_vm6, %v9237_v59, %v9241_v58 }
 0x56e   : > { %v11976_v37 = vadd.f32 %v11975_v15, %v11974_v52 }
 0x56f   : > { %v11977_v30 = vpop.f32.mrf.mxu0  ;;  %9588 = vmatmul.mubr.bf16.gmra.mxu0 %v16079_v43 }
 0x570   : > { %v16344_v44 = vadd.f32 %v11976_v37, %v8483_v39  ;;  %9595 = vmatprep.mubr.bf16.mxu0 %v16277_v51 }
 0x571   : > { %v11978_v20 = vpop.f32.mrf.mxu0 }
 0x572   : > { %v11979_v32 = vadd.f32 %v11978_v20, %v11977_v30  ;;  %v12625_v13 = vpop.f32.mrf.mxu1  ;;  %12720 = vmatmul.mubr.bf16.gmra.mxu1 %v9254_v54 }
 0x573   : > { %v11980_v21 = vpop.f32.mrf.mxu0 }
 0x574   : > { %v16347_v5 = vadd.f32 %v12621_v29, %v11979_v32  ;;  %v8496_v18 = vpop.f32.mrf.mxu1 }
 0x575   : > { %v11981_v10 = vpop.f32.mrf.mxu0 }
 0x576   : > { %v11982_v43 = vadd.f32 %v11981_v10, %v11980_v21  ;;  %v12626_v46 = vpop.f32.mrf.mxu1 }
 0x577   : > { %v11983_v16 = vpop.f32.mrf.mxu0  ;;  %9596 = vmatmul.mubr.bf16.gmra.mxu0 %v16258_v23 }
 0x578   : > { %v16351_v28 = vadd.f32 %v12622_v12, %v11982_v43  ;;  %9603 = vmatprep.mubr.bf16.mxu0 %v9242_v8  ;;  %v8499_v51 = vpop.f32.mrf.mxu1 }
 0x579   : > { %v11984_v61 = vpop.f32.mrf.mxu0 }
 0x57a   : > { %v11985_v7 = vadd.f32 %v11984_v61, %v11983_v16  ;;  %v12035_v25 = vpop.f32.mrf.mxu1 }
 0x57b   : > { %v11986_v4 = vpop.f32.mrf.mxu0 }
 0x57c   : > { %v16353_v33 = vadd.f32 %v11985_v7, %v8496_v18  ;;  %v12036_v29 = vpop.f32.mrf.mxu1 }
 0x57d   : > { %v11987_v52 = vpop.f32.mrf.mxu0  ;;  %v12037_v63 = vadd.f32 %v12036_v29, %v12035_v25 }
 0x57e   : > { %v11988_v45 = vadd.f32 %v11987_v52, %v11986_v4  ;;  %v12038_v15 = vpop.f32.mrf.mxu1 }
 0x57f   : > { %v11989_v39 = vpop.f32.mrf.mxu0  ;;  %9604 = vmatmul.mubr.bf16.gmra.mxu0 %v9225_v14 }
 0x580   : > { %v16355_v35 = vadd.f32 %v11988_v45, %v8499_v51  ;;  %v12039_v23 = vpop.f32.mrf.mxu1 }
 0x581   : > { %v11990_v12 = vpop.f32.mrf.mxu0  ;;  %v12040_v47 = vadd.f32 %v12039_v23, %v12038_v15 }
 0x582   : > { %v11991_v34 = vadd.f32 %v11990_v12, %v11989_v39  ;;  %v12041_v37 = vpop.f32.mrf.mxu1 }
 0x583   : > { %v11992_v30 = vpop.f32.mrf.mxu0 }
 0x584   : > { %v16357_v54 = vadd.f32 %v12625_v13, %v11991_v34  ;;  %v12042_v20 = vpop.f32.mrf.mxu1  ;;  %v11904_v13 = vadd.f32 %v16201_v55, %v16189_v60 }
 0x585   : > { %v11993_v59 = vpop.f32.mrf.mxu0  ;;  %v12043_v58 = vadd.f32 %v12042_v20, %v12041_v37 }
 0x586   : > { %v11994_v32 = vadd.f32 %v11993_v59, %v11992_v30  ;;  %v12044_v21 = vpop.f32.mrf.mxu1  ;;  %v8388_v15 = vadd.f32 %v11904_v13, %v16218_v2 }
 0x587   : > { %v12645_v18 = vpop.f32.mrf.mxu0 }
 0x588   : > { %v16359_v10 = vadd.f32 %v12626_v46, %v11994_v32  ;;  %v8992_v8 = vadd.f32 %v12645_v18, %v12043_v58  ;;  %v12045_v14 = vpop.f32.mrf.mxu1 }
 0x589   : > { %v8983_v43 = vpop.f32.mrf.mxu0  ;;  %v12046_v16 = vadd.f32 %v12045_v14, %v12044_v21 }
 0x58a   : > { %v8984_v51 = vadd.f32 %v12037_v63, %v8983_v43  ;;  %v12047_v61 = vpop.f32.mrf.mxu1  ;;  %v16362_v7 = vadd.f32 %v8992_v8, %v16209_v1 }
 0x58b   : > { %v12646_v25 = vpop.f32.mrf.mxu0 }
 0x58c   : > { %v16367_v4 = vadd.f32 %v8984_v51, %v16192_v53  ;;  %v8995_v29 = vadd.f32 %v12646_v25, %v12046_v16  ;;  %v12048_v52 = vpop.f32.mrf.mxu1  ;;  %v16840_v51 = vld [vmem:[#allocation10_spill] sm:$0xff] }
 0x58d   : > { %v8986_v46 = vpop.f32.mrf.mxu0  ;;  %v12049_v45 = vadd.f32 %v12048_v52, %v12047_v61 }
 0x58e   : > { %v8987_v39 = vadd.f32 %v12040_v47, %v8986_v46  ;;  %v12050_v23 = vpop.f32.mrf.mxu1  ;;  %v16371_v63 = vadd.f32 %v8995_v29, %v16213_v57  ;;  %v8404_v47 = vadd.f32 %v16230_v48, %v16243_v17 }
 0x58f   : > { %v12649_v1 = vpop.f32.mrf.mxu0 }
 0x590   : > { %v16373_v12 = vadd.f32 %v8987_v39, %v8388_v15  ;;  %v12051_v34 = vpop.f32.mrf.mxu1 }
 0x591   : > { %v8999_v37 = vpop.f32.mrf.mxu0  ;;  %v12052_v60 = vadd.f32 %v12051_v34, %v12050_v23 }
 0x592   : > { %v9000_v55 = vadd.f32 %v12049_v45, %v8999_v37  ;;  %v12053_v53 = vpop.f32.mrf.mxu1  ;;  %v16841_v45 = vld [vmem:[#allocation18_spill] sm:$0xff] }
 0x593   : > { %v12650_v30 = vpop.f32.mrf.mxu0 }
 0x594   : > { %v12054_v20 = vpop.f32.mrf.mxu1  ;;  %v16376_v59 = vadd.f32 %v9000_v55, %v16226_v49  ;;  %v8420_v55 = vadd.f32 %v16254_v24, %v16269_v36 }
 0x595   : > { %v9002_v58 = vpop.f32.mrf.mxu0  ;;  %v12055_v2 = vadd.f32 %v12054_v20, %v12053_v53 }
 0x596   : > { %v9003_v57 = vadd.f32 %v12052_v60, %v9002_v58  ;;  %v12056_v32 = vpop.f32.mrf.mxu1 }
 0x597   : > { %v12653_v21 = vpop.f32.mrf.mxu0  ;;  %v9008_v18 = vadd.f32 %v12649_v1, %v12055_v2 }
 0x598   : > { %v12057_v8 = vpop.f32.mrf.mxu1  ;;  %v16380_v14 = vadd.f32 %v9003_v57, %v8404_v47 }
 0x599   : > { %v9015_v43 = vpop.f32.mrf.mxu0  ;;  %v12058_v16 = vadd.f32 %v12057_v8, %v12056_v32  ;;  %v16383_v61 = vadd.f32 %v9008_v18, %v16840_v51 }
 0x59a   : > { %v12059_v25 = vpop.f32.mrf.mxu1 }
 0x59b   : > { %v12654_v49 = vpop.f32.mrf.mxu0  ;;  %v9011_v13 = vadd.f32 %v12650_v30, %v12058_v16 }
 0x59c   : > { %v12060_v29 = vpop.f32.mrf.mxu1 }
 0x59d   : > { %v9018_v52 = vpop.f32.mrf.mxu0  ;;  %v12061_v46 = vadd.f32 %v12060_v29, %v12059_v25  ;;  %v16386_v48 = vadd.f32 %v9011_v13, %v16841_v45 }
 0x59e   : > { %v12062_v17 = vpop.f32.mrf.mxu1 }
 0x59f   : > { %v12657_v15 = vpop.f32.mrf.mxu0  ;;  %v9016_v39 = vadd.f32 %v12061_v46, %v9015_v43 }
 0x5a0   : > { %v12063_v23 = vpop.f32.mrf.mxu1 }
 0x5a1   : > { %v9031_v1 = vpop.f32.mrf.mxu0  ;;  %v12064_v34 = vadd.f32 %v12063_v23, %v12062_v17  ;;  %v16389_v37 = vadd.f32 %v9016_v39, %v16251_v6 }
 0x5a2   : > { %v12065_v60 = vpop.f32.mrf.mxu1 }
 0x5a3   : > { %v12658_v53 = vpop.f32.mrf.mxu0  ;;  %v9019_v30 = vadd.f32 %v12064_v34, %v9018_v52 }
 0x5a4   : > { %v12066_v20 = vpop.f32.mrf.mxu1 }
 0x5a5   : > { %v9034_v58 = vpop.f32.mrf.mxu0  ;;  %v12067_v2 = vadd.f32 %v12066_v20, %v12065_v60  ;;  %v16393_v47 = vadd.f32 %v9019_v30, %v8420_v55 }
 0x5a6   : > { %v12068_v57 = vpop.f32.mrf.mxu1 }
 0x5a7   : > { %v12661_v32 = vpop.f32.mrf.mxu0  ;;  %v9024_v18 = vadd.f32 %v12653_v21, %v12067_v2 }
 0x5a8   : > { %v12069_v8 = vpop.f32.mrf.mxu1 }
 0x5a9   : > { %v9047_v43 = vpop.f32.mrf.mxu0  ;;  %v12070_v16 = vadd.f32 %v12069_v8, %v12068_v57  ;;  %v16396_v6 = vadd.f32 %v9024_v18, %v16265_v9 }
 0x5aa   : > { %v12071_v51 = vpop.f32.mrf.mxu1 }
 0x5ab   : > { %v12662_v25 = vpop.f32.mrf.mxu0  ;;  %v9027_v13 = vadd.f32 %v12654_v49, %v12070_v16  ;;  %v8436_v49 = vadd.f32 %v16283_v41, %v16293_v0 }
 0x5ac   : > { %v12072_v24 = vpop.f32.mrf.mxu1 }
 0x5ad   : > { %v9050_v36 = vpop.f32.mrf.mxu0  ;;  %v12073_v29 = vadd.f32 %v12072_v24, %v12071_v51  ;;  %v16399_v52 = vadd.f32 %v9027_v13, %v16271_v11 }
 0x5ae   : > { %v12074_v46 = vpop.f32.mrf.mxu1 }
 0x5af   : > { %v16401_v45 = vpop.f32.mrf.mxu0  ;;  %v9032_v17 = vadd.f32 %v12073_v29, %v9031_v1 }
 0x5b0   : > { %v12075_v21 = vpop.f32.mrf.mxu1 }
 0x5b1   : > { %v9063_v39 = vpop.f32.mrf.mxu0  ;;  %v12076_v23 = vadd.f32 %v12075_v21, %v12074_v46  ;;  %v16404_v34 = vadd.f32 %v9032_v17, %v16280_v38 }
 0x5b2   : > { %v12077_v9 = vpop.f32.mrf.mxu1 }
 0x5b3   : > { %v16408_v60 = vpop.f32.mrf.mxu0  ;;  %v9035_v55 = vadd.f32 %v12076_v23, %v9034_v58 }
 0x5b4   : > { %v12078_v30 = vpop.f32.mrf.mxu1 }
 0x5b5   : > { %v9066_v11 = vpop.f32.mrf.mxu0  ;;  %v12079_v20 = vadd.f32 %v12078_v30, %v12077_v9  ;;  %v16410_v2 = vadd.f32 %v9035_v55, %v8436_v49 }
 0x5b6   : > { %v12080_v57 = vpop.f32.mrf.mxu1 }
 0x5b7   : > { %v16412_v1 = vpop.f32.mrf.mxu0  ;;  %v9040_v18 = vadd.f32 %v12657_v15, %v12079_v20 }
 0x5b8   : > { %v12081_v8 = vpop.f32.mrf.mxu1 }
 0x5b9   : > { %v16414_v16 = vpop.f32.mrf.mxu0  ;;  %v12082_v38 = vadd.f32 %v12081_v8, %v12080_v57  ;;  %v16417_v51 = vadd.f32 %v9040_v18, %v16289_v42 }
 0x5ba   : > { %v12083_v41 = vpop.f32.mrf.mxu1 }
 0x5bb   : > { %v16419_v0 = vpop.f32.mrf.mxu0  ;;  %v9043_v58 = vadd.f32 %v12658_v53, %v12082_v38 }
 0x5bc   : > { %v12084_v13 = vpop.f32.mrf.mxu1 }
 0x5bd   : > { %v16421_v24 = vpop.f32.mrf.mxu0  ;;  %v12085_v29 = vadd.f32 %v12084_v13, %v12083_v41  ;;  %v16424_v46 = vadd.f32 %v9043_v58, %v16296_v3 }
 0x5be   : > { %v12086_v17 = vpop.f32.mrf.mxu1 }
 0x5bf   : > { %v16426_v15 = vpop.f32.mrf.mxu0  ;;  %v9048_v21 = vadd.f32 %v12085_v29, %v9047_v43 }
 0x5c0   : > { %v12087_v23 = vpop.f32.mrf.mxu1 }
 0x5c1   : > { %v16428_v9 = vpop.f32.mrf.mxu0  ;;  %v12088_v42 = vadd.f32 %v12087_v23, %v12086_v17  ;;  %v16431_v49 = vadd.f32 %v9048_v21, %v16302_v56 }
 0x5c2   : > { %v12089_v55 = vpop.f32.mrf.mxu1 }
 0x5c3   : > { %v16433_v53 = vpop.f32.mrf.mxu0  ;;  %v9051_v30 = vadd.f32 %v12088_v42, %v9050_v36 }
 0x5c4   : > { %v12090_v20 = vpop.f32.mrf.mxu1 }
 0x5c5   : > { %v16435_v57 = vpop.f32.mrf.mxu0  ;;  %v12091_v3 = vadd.f32 %v12090_v20, %v12089_v55  ;;  %v16438_v18 = vadd.f32 %v9051_v30, %v16306_v19 }
 0x5c6   : > { %v12092_v8 = vpop.f32.mrf.mxu1 }
 0x5c7   : > { %v16440_v43 = vpop.f32.mrf.mxu0  ;;  %v9056_v38 = vadd.f32 %v12661_v32, %v12091_v3 }
 0x5c8   : > { %v12093_v41 = vpop.f32.mrf.mxu1 }
 0x5c9   : > { %v16442_v58 = vpop.f32.mrf.mxu0  ;;  %v12094_v56 = vadd.f32 %v12093_v41, %v12092_v8  ;;  %v16445_v13 = vadd.f32 %v9056_v38, %v16310_v26 }
 0x5ca   : > { %v12095_v29 = vpop.f32.mrf.mxu1 }
 0x5cb   : > { %v16447_v36 = vpop.f32.mrf.mxu0  ;;  %v9059_v17 = vadd.f32 %v12662_v25, %v12094_v56 }
 0x5cc   : > { %v12096_v21 = vpop.f32.mrf.mxu1 }
 0x5cd   : > { %v16449_v23 = vpop.f32.mrf.mxu0  ;;  %v12097_v19 = vadd.f32 %v12096_v21, %v12095_v29  ;;  %v16452_v42 = vadd.f32 %v9059_v17, %v16314_v40 }
 0x5ce   : > { %v12098_v55 = vpop.f32.mrf.mxu1 }
 0x5cf   : > { %v16454_v32 = vpop.f32.mrf.mxu0  ;;  %v9064_v30 = vadd.f32 %v12097_v19, %v9063_v39 }
 0x5d0   : > { %v12099_v20 = vpop.f32.mrf.mxu1 }
 0x5d1   : > { %v16456_v3 = vpop.f32.mrf.mxu0  ;;  %v12100_v26 = vadd.f32 %v12099_v20, %v12098_v55  ;;  %v16459_v8 = vadd.f32 %v9064_v30, %v16320_v62 }
 0x5d2   : > { %v12101_v38 = vpop.f32.mrf.mxu1 }
 0x5d3   : > { %16842 = vst [vmem:[#allocation21_spill] sm:$0xff] %v16459_v8  ;;  %v16461_v25 = vpop.f32.mrf.mxu0  ;;  %v9067_v41 = vadd.f32 %v12100_v26, %v9066_v11 }
 0x5d4   : > { %v12102_v56 = vpop.f32.mrf.mxu1 }
 0x5d5   : > { %v16463_v29 = vpop.f32.mrf.mxu0  ;;  %v12103_v40 = vadd.f32 %v12102_v56, %v12101_v38  ;;  %v16466_v17 = vadd.f32 %v9067_v41, %v16324_v50 }
 0x5d6   : > { %v12104_v21 = vpop.f32.mrf.mxu1 }
 0x5d7   : > { %16843 = vst [vmem:[#allocation14_spill] sm:$0xff] %v16466_v17  ;;  %v16468_v39 = vpop.f32.mrf.mxu0  ;;  %v9072_v19 = vadd.f32 %v16401_v45, %v12103_v40 }
 0x5d8   : > { %v12105_v55 = vpop.f32.mrf.mxu1 }
 0x5d9   : > { %v16471_v20 = vpop.f32.mrf.mxu0  ;;  %v12106_v62 = vadd.f32 %v12105_v55, %v12104_v21  ;;  %v16474_v30 = vadd.f32 %v9072_v19, %v16330_v31 }
 0x5da   : > { %v12107_v11 = vpop.f32.mrf.mxu1 }
 0x5db   : > { %v16476_v26 = vpop.f32.mrf.mxu0  ;;  %v9075_v38 = vadd.f32 %v16408_v60, %v12106_v62 }
 0x5dc   : > { %v12108_v56 = vpop.f32.mrf.mxu1 }
 0x5dd   : > { %v16479_v50 = vpop.f32.mrf.mxu0  ;;  %v12109_v41 = vadd.f32 %v12108_v56, %v12107_v11  ;;  %v16482_v17 = vadd.f32 %v9075_v38, %v16334_v22 }
 0x5de   : > { %v12110_v45 = vpop.f32.mrf.mxu1 }
 0x5df   : > { %16844 = vst [vmem:[#allocation22_spill] sm:$0xff] %v16482_v17  ;;  %v16484_v40 = vpop.f32.mrf.mxu0  ;;  %v9080_v21 = vadd.f32 %v12109_v41, %v16414_v16 }
 0x5e0   : > { %v12111_v55 = vpop.f32.mrf.mxu1 }
 0x5e1   : > { %v16487_v31 = vpop.f32.mrf.mxu0  ;;  %v12112_v19 = vadd.f32 %v12111_v55, %v12110_v45  ;;  %v16490_v8 = vadd.f32 %v9080_v21, %v16340_v27 }
 0x5e2   : > { %v12113_v60 = vpop.f32.mrf.mxu1 }
 0x5e3   : > { %16845 = vst [vmem:[#allocation23_spill] sm:$0xff] %v16490_v8  ;;  %v16492_v62 = vpop.f32.mrf.mxu0  ;;  %v9083_v11 = vadd.f32 %v12112_v19, %v16421_v24 }
 0x5e4   : > { %v12114_v56 = vpop.f32.mrf.mxu1 }
 0x5e5   : > { %v16495_v22 = vpop.f32.mrf.mxu0  ;;  %v12115_v38 = vadd.f32 %v12114_v56, %v12113_v60  ;;  %v16498_v17 = vadd.f32 %v9083_v11, %v16344_v44 }
 0x5e6   : > { %v12116_v16 = vpop.f32.mrf.mxu1 }
 0x5e7   : > { %16846 = vst [vmem:[#allocation26_spill] sm:$0xff] %v16498_v17  ;;  %v16500_v41 = vpop.f32.mrf.mxu0  ;;  %v9088_v45 = vadd.f32 %v16412_v1, %v12115_v38 }
 0x5e8   : > { %v12117_v55 = vpop.f32.mrf.mxu1 }
 0x5e9   : > { %v16503_v27 = vpop.f32.mrf.mxu0  ;;  %v12118_v21 = vadd.f32 %v12117_v55, %v12116_v16  ;;  %v16506_v8 = vadd.f32 %v9088_v45, %v16347_v5 }
 0x5ea   : > { %v12119_v24 = vpop.f32.mrf.mxu1 }
 0x5eb   : > { %16847 = vst [vmem:[#allocation25_spill] sm:$0xff] %v16506_v8  ;;  %v16508_v19 = vpop.f32.mrf.mxu0  ;;  %v9091_v60 = vadd.f32 %v16419_v0, %v12118_v21 }
 0x5ec   : > { %v12120_v56 = vpop.f32.mrf.mxu1 }
 0x5ed   : > { %v16511_v44 = vpop.f32.mrf.mxu0  ;;  %v12121_v11 = vadd.f32 %v12120_v56, %v12119_v24  ;;  %v16514_v17 = vadd.f32 %v9091_v60, %v16351_v28 }
 0x5ee   : > { %v12122_v1 = vpop.f32.mrf.mxu1 }
 0x5ef   : > { %16848 = vst [vmem:[#allocation19_spill] sm:$0xff] %v16514_v17  ;;  %v16516_v38 = vpop.f32.mrf.mxu0  ;;  %v9096_v16 = vadd.f32 %v12121_v11, %v16428_v9 }
 0x5f0   : > { %v12123_v55 = vpop.f32.mrf.mxu1 }
 0x5f1   : > { %v16519_v5 = vpop.f32.mrf.mxu0  ;;  %v12124_v45 = vadd.f32 %v12123_v55, %v12122_v1  ;;  %v16522_v8 = vadd.f32 %v9096_v16, %v16353_v33  ;;  %v12179_v33 = vadd.f32 %v16456_v3, %v16454_v32 }
 0x5f2   : > { %v12125_v0 = vpop.f32.mrf.mxu1 }
 0x5f3   : > { %16849 = vst [vmem:[#allocation24_spill] sm:$0xff] %v16522_v8  ;;  %v16524_v21 = vpop.f32.mrf.mxu0  ;;  %v9099_v24 = vadd.f32 %v12124_v45, %v16435_v57 }
 0x5f4   : > { %v12126_v56 = vpop.f32.mrf.mxu1 }
 0x5f5   : > { %v16527_v28 = vpop.f32.mrf.mxu0  ;;  %v12127_v60 = vadd.f32 %v12126_v56, %v12125_v0  ;;  %v16530_v17 = vadd.f32 %v9099_v24, %v16355_v35  ;;  %v12173_v35 = vadd.f32 %v16442_v58, %v16440_v43  ;;  %v16558_v43 = vld [vmem:[%s16694_s6] ss:$0 sm:$0xff] }
 0x5f6   : > { %v12128_v9 = vpop.f32.mrf.mxu1 }
 0x5f7   : > { %v16532_v11 = vpop.f32.mrf.mxu0  ;;  %v9104_v1 = vadd.f32 %v16426_v15, %v12127_v60  ;;  %v12182_v60 = vadd.f32 %v16463_v29, %v16461_v25 }
 0x5f8   : > { %v12129_v55 = vpop.f32.mrf.mxu1 }
 0x5f9   : > { %v16537_v16 = vpop.f32.mrf.mxu0  ;;  %v16540_v57 = vadd.f32 %v9104_v1, %v16357_v54  ;;  %v12130_v45 = vadd.f32 %v12129_v55, %v12128_v9 }
 0x5fa   : > { %v12693_v8 = vpop.f32.mrf.mxu1 }
 0x5fb   : > { %v16544_v0 = vpop.f32.mrf.mxu0  ;;  %v9107_v24 = vadd.f32 %v16433_v53, %v12130_v45  ;;  %v9655_v56 = vadd.f32 %v12693_v8, %v12179_v33  ;;  %v12176_v53 = vadd.f32 %v16449_v23, %v16447_v36 }
 0x5fc   : > { %v9646_v15 = vpop.f32.mrf.mxu1 }
 0x5fd   : > { %v16549_v32 = vpop.f32.mrf.mxu0  ;;  %v16552_v3 = vadd.f32 %v9107_v24, %v16359_v10  ;;  %v9807_v54 = vadd.f32 %v9655_v56, %v16362_v7  ;;  %v9647_v9 = vadd.f32 %v12173_v35, %v9646_v15  ;;  %v12191_v10 = vadd.f32 %v16487_v31, %v16484_v40 }
 0x5fe   : > { %v12694_v58 = vpop.f32.mrf.mxu1  ;;  %v12185_v35 = vadd.f32 %v16471_v20, %v16468_v39  ;;  %v12188_v39 = vadd.f32 %v16479_v50, %v16476_v26  ;;  %v12194_v20 = vadd.f32 %v16495_v22, %v16492_v62  ;;  %v12203_v62 = vadd.f32 %v16519_v5, %v16516_v38 }
 0x5ff   : > { %v16562_v8 = vpop.f32.mrf.mxu0  ;;  %v9805_v25 = vadd.f32 %v9647_v9, %v16367_v4  ;;  %v9658_v29 = vadd.f32 %v12694_v58, %v12182_v60  ;;  %v9910_v55 = vadd.f32 %v16558_v43, %v9807_v54 }
 0x600   : > { %v9649_v1 = vpop.f32.mrf.mxu1 }
 0x601   : > { %v12214_v7 = vpop.f32.mrf.mxu0  ;;  %v9808_v33 = vadd.f32 %v9658_v29, %v16371_v63  ;;  %v9650_v45 = vadd.f32 %v12176_v53, %v9649_v1  ;;  %v9908_v4 = vadd.f32 %v16558_v43, %v9805_v25  ;;  %v9942_v15 = vmax.f32 %v9910_v55, 0.0 }
 0x602   : > { %v12697_v36 = vpop.f32.mrf.mxu1 }
 0x603   : > { %v16571_v23 = vpop.f32.mrf.mxu0  ;;  %v9911_v24 = vadd.f32 %v16558_v43, %v9808_v33  ;;  %v9806_v56 = vadd.f32 %v9650_v45, %v16373_v12  ;;  %v9671_v40 = vadd.f32 %v12697_v36, %v12191_v10  ;;  %v9940_v53 = vmax.f32 %v9908_v4, 0.0 }
 0x604   : > { %v9662_v31 = vpop.f32.mrf.mxu1  ;;  %v12197_v36 = vadd.f32 %v16503_v27, %v16500_v41 }
 0x605   : > { %v12217_v60 = vpop.f32.mrf.mxu0  ;;  %v9943_v54 = vmax.f32 %v9911_v24, 0.0  ;;  %v9909_v63 = vadd.f32 %v16558_v43, %v9806_v56  ;;  %v9663_v9 = vadd.f32 %v12185_v35, %v9662_v31  ;;  %v9811_v12 = vadd.f32 %v9671_v40, %v16383_v61 }
 0x606   : > { %v12698_v58 = vpop.f32.mrf.mxu1  ;;  %v12206_v40 = vadd.f32 %v16527_v28, %v16524_v21 }
 0x607   : > { %v10965_v25 = vpack.c.bf16 %v9943_v54, %v9942_v15  ;;  %v16588_v29 = vpop.f32.mrf.mxu0  ;;  %v9941_v1 = vmax.f32 %v9909_v63, 0.0  ;;  %v9809_v26 = vadd.f32 %v9663_v9, %v16376_v59  ;;  %v9674_v50 = vadd.f32 %v12698_v58, %v12194_v20 }
 0x608   : > { %v9665_v10 = vpop.f32.mrf.mxu1  ;;  %v9914_v61 = vadd.f32 %v16558_v43, %v9811_v12  ;;  %v12200_v12 = vadd.f32 %v16511_v44, %v16508_v19 }
 0x609   : > { %11052 = vst [vmem:[%s16585_s28 + $0x8] sm:$0xff] %v10965_v25   ;;  %v10960_v22 = vpack.c.bf16 %v9941_v1, %v9940_v53  ;;  %v16594_v55 = vpop.f32.mrf.mxu0  ;;  %v9666_v33 = vadd.f32 %v12188_v39, %v9665_v10  ;;  %v9812_v45 = vadd.f32 %v9674_v50, %v16386_v48  ;;  %v9912_v4 = vadd.f32 %v16558_v43, %v9809_v26 }
 0x60a   : > { %v12701_v35 = vpop.f32.mrf.mxu1  ;;  %v9946_v15 = vmax.f32 %v9914_v61, 0.0  ;;  %v12215_v53 = vadd.f32 %v12214_v7, %v16562_v8 }
 0x60b   : > { %10961 = vst [vmem:[%s16585_s28] sm:$0xff] %v10960_v22   ;;  %v16601_v59 = vpop.f32.mrf.mxu0  ;;  %v9810_v38 = vadd.f32 %v9666_v33, %v16380_v14  ;;  %v9687_v5 = vadd.f32 %v12701_v35, %v12203_v62  ;;  %v9915_v24 = vadd.f32 %v16558_v43, %v9812_v45  ;;  %v9944_v9 = vmax.f32 %v9912_v4, 0.0 }
 0x60c   : > { %v9678_v56 = vpop.f32.mrf.mxu1  ;;  %v12209_v62 = vadd.f32 %v16537_v16, %v16532_v11  ;;  %v12218_v22 = vadd.f32 %v12217_v60, %v16571_v23  ;;  %v12212_v4 = vadd.f32 %v16549_v32, %v16544_v0  ;;  %v12221_v0 = vadd.f32 %v16594_v55, %v16588_v29 }
 0x60d   : > { %v16608_v31 = vpop.f32.mrf.mxu0  ;;  %v9913_v48 = vadd.f32 %v16558_v43, %v9810_v38  ;;  %v9815_v41 = vadd.f32 %v9687_v5, %v16396_v6  ;;  %v9679_v27 = vadd.f32 %v12197_v36, %v9678_v56  ;;  %v9947_v54 = vmax.f32 %v9915_v24, 0.0 }
 0x60e   : > { %v12702_v63 = vpop.f32.mrf.mxu1  ;;  %v12224_v29 = vadd.f32 %v16608_v31, %v16601_v59 }
 0x60f   : > { %v12225_v14 = vpop.f32.mrf.mxu0  ;;  %v9945_v39 = vmax.f32 %v9913_v48, 0.0  ;;  %v9690_v20 = vadd.f32 %v12702_v63, %v12206_v40  ;;  %v10975_v21 = vpack.c.bf16 %v9947_v54, %v9946_v15  ;;  %v9813_v28 = vadd.f32 %v9679_v27, %v16389_v37 }
 0x610   : > { %v9681_v58 = vpop.f32.mrf.mxu1  ;;  %v9918_v1 = vadd.f32 %v16558_v43, %v9815_v41 }
 0x611   : > { %v10970_v6 = vpack.c.bf16 %v9945_v39, %v9944_v9  ;;  %v12226_v25 = vpop.f32.mrf.mxu0  ;;  %v9816_v26 = vadd.f32 %v9690_v20, %v16399_v52  ;;  %11054 = vst [vmem:[%s16585_s28 + $0x18] sm:$0xff] %v10975_v21   ;;  %v9682_v50 = vadd.f32 %v12200_v12, %v9681_v58  ;;  %v9916_v8 = vadd.f32 %v16558_v43, %v9813_v28 }
 0x612   : > { %v12705_v10 = vpop.f32.mrf.mxu1  ;;  %v9950_v61 = vmax.f32 %v9918_v1, 0.0  ;;  %v12227_v40 = vadd.f32 %v12226_v25, %v12225_v14 }
 0x613   : > { %11053 = vst [vmem:[%s16585_s28 + $0x10] sm:$0xff] %v10970_v6   ;;  %v12228_v19 = vpop.f32.mrf.mxu0  ;;  %v9919_v44 = vadd.f32 %v16558_v43, %v9816_v26  ;;  %v9703_v37 = vadd.f32 %v12705_v10, %v12215_v53  ;;  %v9814_v7 = vadd.f32 %v9682_v50, %v16393_v47  ;;  %v9948_v47 = vmax.f32 %v9916_v8, 0.0 }
 0x614   : > { %v9694_v33 = vpop.f32.mrf.mxu1 }
 0x615   : > { %v12229_v52 = vpop.f32.mrf.mxu0  ;;  %v9951_v45 = vmax.f32 %v9919_v44, 0.0  ;;  %v9819_v35 = vadd.f32 %v9703_v37, %v16417_v51  ;;  %v9695_v36 = vadd.f32 %v12209_v62, %v9694_v33  ;;  %v9917_v11 = vadd.f32 %v16558_v43, %v9814_v7 }
 0x616   : > { %v12706_v16 = vpop.f32.mrf.mxu1  ;;  %v12230_v55 = vadd.f32 %v12229_v52, %v12228_v19 }
 0x617   : > { %v10985_v38 = vpack.c.bf16 %v9951_v45, %v9950_v61  ;;  %v12231_v23 = vpop.f32.mrf.mxu0  ;;  %v9817_v60 = vadd.f32 %v9695_v36, %v16404_v34  ;;  %v9706_v5 = vadd.f32 %v12706_v16, %v12218_v22  ;;  %v9949_v24 = vmax.f32 %v9917_v11, 0.0 }
 0x618   : > { %v9697_v56 = vpop.f32.mrf.mxu1  ;;  %v9922_v51 = vadd.f32 %v16558_v43, %v9819_v35 }
 0x619   : > { %11056 = vst [vmem:[%s16585_s28 + $0x28] sm:$0xff] %v10985_v38   ;;  %v12232_v48 = vpop.f32.mrf.mxu0  ;;  %v9820_v41 = vadd.f32 %v9706_v5, %v16424_v46  ;;  %v9698_v27 = vadd.f32 %v12212_v4, %v9697_v56  ;;  %v10980_v32 = vpack.c.bf16 %v9949_v24, %v9948_v47  ;;  %v9920_v34 = vadd.f32 %v16558_v43, %v9817_v60  ;;  %v16850_v47 = vld [vmem:[#allocation21_spill] sm:$0xff] }
 0x61a   : > { %v12709_v15 = vpop.f32.mrf.mxu1  ;;  %v9954_v20 = vmax.f32 %v9922_v51, 0.0  ;;  %v12233_v19 = vadd.f32 %v12232_v48, %v12231_v23 }
 0x61b   : > { %v12234_v54 = vpop.f32.mrf.mxu0  ;;  %v9923_v63 = vadd.f32 %v16558_v43, %v9820_v41  ;;  %v9818_v9 = vadd.f32 %v9698_v27, %v16410_v2  ;;  %v9719_v14 = vadd.f32 %v12709_v15, %v12227_v40  ;;  %11055 = vst [vmem:[%s16585_s28 + $0x20] sm:$0xff] %v10980_v32   ;;  %v9952_v6 = vmax.f32 %v9920_v34, 0.0  ;;  %v16851_v32 = vld [vmem:[#allocation22_spill] sm:$0xff] }
 0x61c   : > { %v9710_v39 = vpop.f32.mrf.mxu1 }
 0x61d   : > { %v12235_v12 = vpop.f32.mrf.mxu0  ;;  %v9955_v46 = vmax.f32 %v9923_v63, 0.0  ;;  %v9921_v21 = vadd.f32 %v16558_v43, %v9818_v9  ;;  %v9711_v28 = vadd.f32 %v12221_v0, %v9710_v39  ;;  %v9823_v58 = vadd.f32 %v9719_v14, %v16445_v13  ;;  %v16852_v9 = vld [vmem:[#allocation14_spill] sm:$0xff] }
 0x61e   : > { %v12710_v53 = vpop.f32.mrf.mxu1  ;;  %v12236_v23 = vadd.f32 %v12235_v12, %v12234_v54 }
 0x61f   : > { %v10995_v2 = vpack.c.bf16 %v9955_v46, %v9954_v20  ;;  %v12237_v25 = vpop.f32.mrf.mxu0  ;;  %v9953_v1 = vmax.f32 %v9921_v21, 0.0  ;;  %v9821_v26 = vadd.f32 %v9711_v28, %v16431_v49  ;;  %v9722_v50 = vadd.f32 %v12710_v53, %v12230_v55 }
 0x620   : > { %v9713_v10 = vpop.f32.mrf.mxu1  ;;  %v9926_v59 = vadd.f32 %v16558_v43, %v9823_v58 }
 0x621   : > { %11058 = vst [vmem:[%s16585_s28 + $0x38] sm:$0xff] %v10995_v2   ;;  %v10990_v62 = vpack.c.bf16 %v9953_v1, %v9952_v6  ;;  %v12238_v44 = vpop.f32.mrf.mxu0  ;;  %v9714_v37 = vadd.f32 %v12224_v29, %v9713_v10  ;;  %v9824_v31 = vadd.f32 %v9722_v50, %v16452_v42  ;;  %v9924_v7 = vadd.f32 %v16558_v43, %v9821_v26 }
 0x622   : > { %v12239_v22 = vadd.f32 %v12238_v44, %v12237_v25  ;;  %v12713_v13 = vpop.f32.mrf.mxu1  ;;  %v9958_v11 = vmax.f32 %v9926_v59, 0.0  ;;  %v16853_v25 = vld [vmem:[#allocation23_spill] sm:$0xff] }
 0x623   : > { %11057 = vst [vmem:[%s16585_s28 + $0x30] sm:$0xff] %v10990_v62   ;;  %v12240_v8 = vpop.f32.mrf.mxu0  ;;  %v9822_v33 = vadd.f32 %v9714_v37, %v16438_v18  ;;  %v9927_v49 = vadd.f32 %v16558_v43, %v9824_v31  ;;  %v9956_v60 = vmax.f32 %v9924_v7, 0.0 }
 0x624   : > { %v9735_v61 = vadd.f32 %v12713_v13, %v12239_v22  ;;  %v9726_v52 = vpop.f32.mrf.mxu1  ;;  %v16854_v13 = vld [vmem:[#allocation26_spill] sm:$0xff] }
 0x625   : > { %v12241_v45 = vpop.f32.mrf.mxu0  ;;  %v9925_v35 = vadd.f32 %v16558_v43, %v9822_v33  ;;  %v9727_v36 = vadd.f32 %v12233_v19, %v9726_v52  ;;  %v9959_v42 = vmax.f32 %v9927_v49, 0.0 }
 0x626   : > { %v12242_v16 = vadd.f32 %v12241_v45, %v12240_v8  ;;  %v9827_v4 = vadd.f32 %v9735_v61, %v16474_v30  ;;  %v12714_v38 = vpop.f32.mrf.mxu1  ;;  %v16855_v61 = vld [vmem:[#allocation25_spill] sm:$0xff] }
 0x627   : > { %v12243_v5 = vpop.f32.mrf.mxu0  ;;  %v9957_v18 = vmax.f32 %v9925_v35, 0.0  ;;  %v9825_v24 = vadd.f32 %v9727_v36, %v16850_v47  ;;  %v11005_v56 = vpack.c.bf16 %v9959_v42, %v9958_v11 }
 0x628   : > { %v9738_v40 = vadd.f32 %v12714_v38, %v12242_v16  ;;  %v9729_v48 = vpop.f32.mrf.mxu1  ;;  %v9930_v0 = vadd.f32 %v16558_v43, %v9827_v4 }
 0x629   : > { %v11000_v51 = vpack.c.bf16 %v9957_v18, %v9956_v60  ;;  %v12244_v41 = vpop.f32.mrf.mxu0  ;;  %v9730_v27 = vadd.f32 %v12236_v23, %v9729_v48  ;;  %11060 = vst [vmem:[%s16585_s28 + $0x48] sm:$0xff] %v11005_v56   ;;  %v9928_v63 = vadd.f32 %v16558_v43, %v9825_v24  ;;  %v16856_v60 = vld [vmem:[#allocation19_spill] sm:$0xff] }
 0x62a   : > { %v9828_v15 = vadd.f32 %v9738_v40, %v16851_v32  ;;  %v12717_v30 = vpop.f32.mrf.mxu1  ;;  %v12245_v34 = vadd.f32 %v12244_v41, %v12243_v5  ;;  %v9962_v28 = vmax.f32 %v9930_v0, 0.0 }
 0x62b   : > { %11059 = vst [vmem:[%s16585_s28 + $0x40] sm:$0xff] %v11000_v51   ;;  %v12246_v54 = vpop.f32.mrf.mxu0  ;;  %v9826_v14 = vadd.f32 %v9730_v27, %v16852_v9  ;;  %v9960_v58 = vmax.f32 %v9928_v63, 0.0  ;;  %v16857_v27 = vld [vmem:[#allocation24_spill] sm:$0xff] }
 0x62c   : > { %v9931_v39 = vadd.f32 %v16558_v43, %v9828_v15  ;;  %v9742_v20 = vpop.f32.mrf.mxu1 }
 0x62d   : > { %v12247_v12 = vpop.f32.mrf.mxu0  ;;  %v9929_v46 = vadd.f32 %v16558_v43, %v9826_v14  ;;  %v9743_v21 = vadd.f32 %v12245_v34, %v9742_v20 }
 0x62e   : > { %v9963_v29 = vmax.f32 %v9931_v39, 0.0  ;;  %v12718_v55 = vpop.f32.mrf.mxu1  ;;  %v12248_v53 = vadd.f32 %v12247_v12, %v12246_v54 }
 0x62f   : > { %v12249_v6 = vpop.f32.mrf.mxu0  ;;  %v9961_v2 = vmax.f32 %v9929_v46, 0.0  ;;  %v9829_v1 = vadd.f32 %v9743_v21, %v16853_v25 }
 0x630   : > { %v11015_v26 = vpack.c.bf16 %v9963_v29, %v9962_v28  ;;  %v9745_v50 = vpop.f32.mrf.mxu1 }
 0x631   : > { %v11010_v10 = vpack.c.bf16 %v9961_v2, %v9960_v58  ;;  %v12250_v62 = vpop.f32.mrf.mxu0  ;;  %v9746_v44 = vadd.f32 %v12248_v53, %v9745_v50  ;;  %v9932_v31 = vadd.f32 %v16558_v43, %v9829_v1 }
 0x632   : > { %11062 = vst [vmem:[%s16585_s28 + $0x58] sm:$0xff] %v11015_v26   ;;  %v12251_v37 = vadd.f32 %v12250_v62, %v12249_v6  ;;  %v12721_v22 = vpop.f32.mrf.mxu1 }
 0x633   : > { %11061 = vst [vmem:[%s16585_s28 + $0x50] sm:$0xff] %v11010_v10   ;;  %v12252_v59 = vpop.f32.mrf.mxu0  ;;  %v9830_v19 = vadd.f32 %v9746_v44, %v16854_v13  ;;  %v9964_v35 = vmax.f32 %v9932_v31, 0.0 }
 0x634   : > { %v9751_v8 = vadd.f32 %v12717_v30, %v12251_v37  ;;  %v9758_v49 = vpop.f32.mrf.mxu1 }
 0x635   : > { %v12253_v7 = vpop.f32.mrf.mxu0  ;;  %v9933_v33 = vadd.f32 %v16558_v43, %v9830_v19 }
 0x636   : > { %v9831_v52 = vadd.f32 %v9751_v8, %v16855_v61  ;;  %v12254_v45 = vadd.f32 %v12253_v7, %v12252_v59  ;;  %v12722_v38 = vpop.f32.mrf.mxu1 }
 0x637   : > { %v12255_v36 = vpop.f32.mrf.mxu0  ;;  %v9965_v11 = vmax.f32 %v9933_v33, 0.0 }
 0x638   : > { %v9754_v16 = vadd.f32 %v12718_v55, %v12254_v45  ;;  %v9934_v23 = vadd.f32 %v16558_v43, %v9831_v52  ;;  %v9761_v48 = vpop.f32.mrf.mxu1 }
 0x639   : > { %v11020_v42 = vpack.c.bf16 %v9965_v11, %v9964_v35  ;;  %v12256_v4 = vpop.f32.mrf.mxu0 }
 0x63a   : > { %v9832_v5 = vadd.f32 %v9754_v16, %v16856_v60  ;;  %v12257_v18 = vadd.f32 %v12256_v4, %v12255_v36  ;;  %v9966_v51 = vmax.f32 %v9934_v23, 0.0 }
 0x63b   : > { %11063 = vst [vmem:[%s16585_s28 + $0x60] sm:$0xff] %v11020_v42   ;;  %v12258_v47 = vpop.f32.mrf.mxu0 }
 0x63c   : > { %v9935_v24 = vadd.f32 %v16558_v43, %v9832_v5  ;;  %v9759_v56 = vadd.f32 %v12257_v18, %v9758_v49 }
 0x63d   : > { %v12259_v40 = vpop.f32.mrf.mxu0 }
 0x63e   : > { %v9967_v41 = vmax.f32 %v9935_v24, 0.0  ;;  %v9833_v0 = vadd.f32 %v9759_v56, %v16857_v27  ;;  %v12260_v32 = vadd.f32 %v12259_v40, %v12258_v47 }
 0x63f   : > { %v12261_v15 = vpop.f32.mrf.mxu0 }
 0x640   : > { %v11025_v30 = vpack.c.bf16 %v9967_v41, %v9966_v51  ;;  %v9762_v34 = vadd.f32 %v12260_v32, %v9761_v48  ;;  %v9936_v63 = vadd.f32 %v16558_v43, %v9833_v0 }
 0x641   : > { %v12262_v54 = vpop.f32.mrf.mxu0 }
 0x642   : > { %11064 = vst [vmem:[%s16585_s28 + $0x68] sm:$0xff] %v11025_v30   ;;  %v9834_v9 = vadd.f32 %v9762_v34, %v16530_v17  ;;  %v12263_v14 = vadd.f32 %v12262_v54, %v12261_v15  ;;  %v9968_v21 = vmax.f32 %v9936_v63, 0.0 }
 0x643   : > { %v12264_v39 = vpop.f32.mrf.mxu0 }
 0x644   : > { %v9937_v20 = vadd.f32 %v16558_v43, %v9834_v9  ;;  %v9767_v12 = vadd.f32 %v12721_v22, %v12263_v14 }
 0x645   : > { %v12265_v46 = vpop.f32.mrf.mxu0 }
 0x646   : > { %v9969_v28 = vmax.f32 %v9937_v20, 0.0  ;;  %v9835_v29 = vadd.f32 %v9767_v12, %v16540_v57  ;;  %v12266_v55 = vadd.f32 %v12265_v46, %v12264_v39 }
 0x648   : > { %v11030_v58 = vpack.c.bf16 %v9969_v28, %v9968_v21  ;;  %v9770_v53 = vadd.f32 %v12722_v38, %v12266_v55  ;;  %v9938_v6 = vadd.f32 %v16558_v43, %v9835_v29 }
 0x64a   : > { %11065 = vst [vmem:[%s16585_s28 + $0x70] sm:$0xff] %v11030_v58   ;;  %v9836_v2 = vadd.f32 %v9770_v53, %v16552_v3  ;;  %v9970_v25 = vmax.f32 %v9938_v6, 0.0 }
 0x64c   : > { %v9939_v17 = vadd.f32 %v16558_v43, %v9836_v2 }
 0x64e   : > { %v9971_v1 = vmax.f32 %v9939_v17, 0.0 }
 0x650   : > { %v11035_v26 = vpack.c.bf16 %v9971_v1, %v9970_v25 }
 0x652   : > { %11066 = vst [vmem:[%s16585_s28 + $0x78] sm:$0xff] %v11035_v26  }
 0x653 PF: > { %s21_s27 = sadd.s32 1, %s13172_s27  }
 0x654   : > { %p18_p3 = scmp.ge.s32.totalorder %s21_s27, 4  }
 0x656   :  { %20 = sbr.rel (!%p18_p3) target bundleno = 2 (0x2), region = 108 }
 0x65b   :  { %10169 = vsyncpa [#allocation5], 1 }
 0x65c   :  { %10171 = vsyncpa [#allocation5 + $0x1], 1 }
 0x65d   :  { %10172 = vsyncpa [#allocation7], 1 }

</bundles_post_ra>
